<compile_context>
chip_gen: v5e
topology: v5e:2x2
jax: 0.10.0
libtpu: 0.0.40
codegen_flags: <defaults>
</compile_context>

<pallas_src>
import numpy as np
import jax
import jax.numpy as jnp
from jax.experimental import pallas as pl
from jax.experimental.pallas import tpu as pltpu


# ----------------------------------------------------------------------------
# Fused Pallas kernel: chained  h <- sin(W_l @ h + b_l)  for all layers
#   x_ref : (F_in, TN)            activation tile, N on the lane axis
#   per layer: w_ref (F_out, F_in), b_ref (F_out, 1)   (omega_0 pre-folded)
#   o_ref : (out_features, TN)
# ----------------------------------------------------------------------------
def _fused_convsiren_kernel(*refs):
    x_ref, o_ref = refs[0], refs[-1]
    p = refs[1:-1]
    n_layers = len(p) // 2
    h = x_ref[...]                                            # (F_in, TN) f32
    for l in range(n_layers):                                 # static unroll
        w_ref, b_ref = p[2 * l], p[2 * l + 1]
        f_out, f_in = w_ref.shape
        b = b_ref[...]                                        # (f_out, 1)
        if f_in <= 8:
            # Tiny-K layer (the first SIREN layer, K = in_features): avoid an MXU
            # push/drain for a K<=8 matmul; do K broadcast-FMAs on the VPU instead.
            w = w_ref[...]                                    # (f_out, f_in)
            acc = b
            for k in range(f_in):
                acc = acc + w[:, k:k + 1] * h[k:k + 1, :]     # (f_out,1)*(1,TN)
            h = jnp.sin(acc)
        else:
            # MXU path: conv-as-dense layers and the final head.
            h = jnp.sin(jnp.dot(w_ref[...], h,
                                preferred_element_type=jnp.float32) + b)
    o_ref[...] = h


# ----------------------------------------------------------------------------
# Exact lowering of a 3x3 / padding=1 conv over an HxW grid to a dense matrix
# (host-side numpy, run once at parameter-build time on concrete arrays).
# ----------------------------------------------------------------------------
def conv3x3_to_dense(w_oihw, H, W):
    """w_oihw: (Cout, Cin, 3, 3) -> dense M: (Cin*H*W, Cout*H*W), row-major (c,h,w)."""
    w = np.asarray(w_oihw)
    Cout, Cin, KH, KW = w.shape
    M = np.zeros((Cin * H * W, Cout * H * W), dtype=np.float32)
    for co in range(Cout):
        for ci in range(Cin):
            for oh in range(H):
                for ow in range(W):
                    for kh in range(KH):
                        for kw in range(KW):
                            ih = oh + kh - (KH - 1) // 2
                            iw = ow + kw - (KW - 1) // 2
                            if 0 <= ih < H and 0 <= iw < W:
                                M[ci * H * W + ih * W + iw,
                                  co * H * W + oh * W + ow] = w[co, ci, kh, kw]
    return jnp.asarray(M)


# ----------------------------------------------------------------------------
# Deterministic parameter init (same ranges as the PyTorch module's init_weights)
# ----------------------------------------------------------------------------
def init_params(key, in_features, num_ch, out_features, nhood,
                first_omega_0, hidden_omega_0):
    params = {}
    out0 = num_ch[0] * nhood * nhood
    key, k1, k2 = jax.random.split(key, 3)
    params["first"] = (
        jax.random.uniform(k1, (out0, in_features), jnp.float32,
                           -1.0 / in_features, 1.0 / in_features),
        jax.random.uniform(k2, (out0,), jnp.float32,
                           -1.0 / np.sqrt(in_features), 1.0 / np.sqrt(in_features)),
    )
    convs = []
    for i in range(len(num_ch) - 1):
        cin, cout = num_ch[i], num_ch[i + 1]
        fan_in = 9 * cin
        bound_w = np.sqrt(6.0 / fan_in) / hidden_omega_0
        key, k1, k2 = jax.random.split(key, 3)
        convs.append((
            jax.random.uniform(k1, (cout, cin, 3, 3), jnp.float32, -bound_w, bound_w),
            jax.random.uniform(k2, (cout,), jnp.float32,
                               -1.0 / np.sqrt(fan_in), 1.0 / np.sqrt(fan_in)),
        ))
    params["convs"] = convs
    fin = num_ch[-1] * nhood * nhood
    bound_w = np.sqrt(6.0 / fin) / hidden_omega_0
    key, k1, k2 = jax.random.split(key, 3)
    params["last"] = (
        jax.random.uniform(k1, (out_features, fin), jnp.float32, -bound_w, bound_w),
        jax.random.uniform(k2, (out_features,), jnp.float32,
                           -1.0 / np.sqrt(fin), 1.0 / np.sqrt(fin)),
    )
    return params


# ----------------------------------------------------------------------------
# One-time parameter preparation for the fused kernel:
#   - lower convs to dense matrices, transpose everything to (F_out, F_in),
#   - fold omega_0 into weights & biases, biases reshaped to (F_out, 1) columns.
#   Kept in f32: bf16 casting would corrupt the tens-of-radians pre-activations.
# ----------------------------------------------------------------------------
def build_fused_params(params, nhood, first_omega_0, hidden_omega_0):
    fused = []
    W0, b0 = params["first"]                                   # (out0, in), (out0,)
    fused.append((jnp.asarray(first_omega_0 * W0, jnp.float32),
                  jnp.asarray(first_omega_0 * b0, jnp.float32)[:, None]))
    for Wc, bc in params["convs"]:
        Md = conv3x3_to_dense(Wc, nhood, nhood)                # (Cin*9, Cout*9)
        bvec = jnp.repeat(bc, nhood * nhood)                   # per (c,h,w) bias
        fused.append((jnp.asarray(hidden_omega_0 * Md.T, jnp.float32),
                      jnp.asarray(hidden_omega_0 * bvec, jnp.float32)[:, None]))
    Wf, bf = params["last"]                                    # (out, fin), (out,)
    fused.append((jnp.asarray(hidden_omega_0 * Wf, jnp.float32),
                  jnp.asarray(hidden_omega_0 * bf, jnp.float32)[:, None]))
    return fused


def _round_up(n, m):
    return ((n + m - 1) // m) * m


def _choose_tile(N, max_block_n):
    """Pick the N-tile (lane) size TN and the padded batch size N_pad."""
    n_lane = _round_up(N, 128)                 # lane-dense minimum
    # >= 2 tiles whenever possible so v7x's two TensorCores both get work; never
    # below one 128-lane slab; capped so per-tile VMEM stays small everywhere.
    half = _round_up(n_lane // 2, 128) if n_lane >= 256 else 128
    tn = min(max_block_n, max(128, half))
    n_pad = _round_up(N, tn)
    return tn, n_pad


# ----------------------------------------------------------------------------
# ConvSiren forward: ONE fused pallas_call, tiled over N (lane axis)
# ----------------------------------------------------------------------------
def conv_siren_forward(coords, fused_params, out_features, *, max_block_n=8192):
    # TODO(synk): clone/detach/requires_grad(True) on coords is autograd bookkeeping
    # with no inference-time effect; we simply return coords unchanged.
    N, F_in = coords.shape
    TN, N_pad = _choose_tile(N, max_block_n)
    num_tiles = N_pad // TN

    # TODO(synk): callers that can produce/consume the transposed (F, N) layout
    # directly would save these two wrapper-side HBM copies (transpose in/out).
    x_pad = jnp.pad(coords, ((0, N_pad - N), (0, 0))).T        # (F_in, N_pad)

    flat_params = []
    in_specs = [pl.BlockSpec((F_in, TN), lambda i: (0, i))]    # streamed over N
    for W, b in fused_params:
        flat_params += [W, b]
        in_specs += [pl.BlockSpec(W.shape, lambda i: (0, 0)),  # VMEM-resident
                     pl.BlockSpec(b.shape, lambda i: (0, 0))]
    out_spec = pl.BlockSpec((out_features, TN), lambda i: (0, i))

    # Advisory cost estimate.  jnp.sin is a VPU range-reduction + polynomial on
    # TPU (not an EUP transcendental) -> count it as flops, not transcendentals.
    SIN_FLOPS = 12
    flops = 0
    param_bytes = 0
    for W, b in fused_params:
        fo, fi = W.shape
        flops += 2 * N_pad * fo * fi + SIN_FLOPS * N_pad * fo
        param_bytes += 4 * (W.size + b.size)
    bytes_accessed = 4 * N_pad * (F_in + out_features) + param_bytes

    # VMEM budget: double-buffered coord/out tiles + ~3 live (widest, TN) f32
    # intermediates + double-buffered params.  ~8 MiB at TN=8192; request at least
    # 32 MiB (raises v5e's 16 MiB scoped default, == v6e/v7x scoped default,
    # << v7x's 64 MiB physical VMEM), capped at 48 MiB.
    widest = max([F_in, out_features] + [W.shape[0] for W, _ in fused_params])
    tile_bytes = 4 * TN * (2 * F_in + 2 * out_features + 3 * widest) + 2 * param_bytes
    vmem_limit = int(min(max(32 * 1024 * 1024, 2 * tile_bytes), 48 * 1024 * 1024))

    outT = pl.pallas_call(
        _fused_convsiren_kernel,
        out_shape=jax.ShapeDtypeStruct((out_features, N_pad), jnp.float32),
        grid=(num_tiles,),
        in_specs=in_specs,
        out_specs=out_spec,
        compiler_params=pltpu.CompilerParams(
            dimension_semantics=("parallel",),
            vmem_limit_bytes=vmem_limit),
        cost_estimate=pl.CostEstimate(
            flops=flops, transcendentals=0, bytes_accessed=bytes_accessed),
    )(x_pad, *flat_params)

    out = outT[:, :N].T                                        # (N, out_features)
    return out, coords


# ----------------------------------------------------------------------------
# Pure-JAX reference (NCHW conv) for correctness check
# ----------------------------------------------------------------------------
def reference_forward(coords, params, num_ch, nhood, first_omega_0, hidden_omega_0):
    hp = jax.lax.Precision.HIGHEST
    W0, b0 = params["first"]
    h = jnp.sin(first_omega_0 * (jnp.dot(coords, W0.T, precision=hp) + b0))
    h = h.reshape(-1, num_ch[0], nhood, nhood)
    for Wc, bc in params["convs"]:
        y = jax.lax.conv_general_dilated(
            h, Wc, window_strides=(1, 1), padding="SAME",
            dimension_numbers=("NCHW", "OIHW", "NCHW"), precision=hp)
        h = jnp.sin(hidden_omega_0 * (y + bc[None, :, None, None]))
    h = h.reshape(-1, num_ch[-1] * nhood * nhood)
    Wf, bf = params["last"]
    return jnp.sin(hidden_omega_0 * (jnp.dot(h, Wf.T, precision=hp) + bf))


if __name__ == "__main__":
    in_features = 2
    num_ch = [4, 8, 4]          # hidden_layers = 2
    out_features = 3
    nhood = 3
    first_omega_0 = 30.0
    hidden_omega_0 = 30.0
    N = 300                     # -> TN=256, 2 row tiles: exercises multi-tile + tail pad

    key = jax.random.PRNGKey(0)
    kc, kp = jax.random.split(key)
    coords = jax.random.uniform(kc, (N, in_features), jnp.float32, -1.0, 1.0)
    params = init_params(kp, in_features, num_ch, out_features, nhood,
                         first_omega_0, hidden_omega_0)

    # One-time parameter build (conv -> dense matrices, omega folded).
    fused_params = build_fused_params(params, nhood, first_omega_0, hidden_omega_0)

    out, coords_out = conv_siren_forward(coords, fused_params, out_features)
    out = jax.block_until_ready(out)

    ref = reference_forward(coords, params, num_ch, nhood, first_omega_0, hidden_omega_0)
    np.testing.assert_allclose(np.asarray(out), np.asarray(ref), rtol=1e-4, atol=5e-5)
    assert out.shape == (N, out_features) and coords_out.shape == coords.shape

    print("KERNEL_OK")
</pallas_src>

<mosaic_0001>
module attributes {stable_mosaic.version = 11 : i64} {
  func.func @_fused_convsiren_kernel(%arg0: i32, %arg1: memref<2x256xf32, #tpu.memory_space<vmem>>, %arg2: memref<36x2xf32, #tpu.memory_space<vmem>>, %arg3: memref<36x1xf32, #tpu.memory_space<vmem>>, %arg4: memref<72x36xf32, #tpu.memory_space<vmem>>, %arg5: memref<72x1xf32, #tpu.memory_space<vmem>>, %arg6: memref<36x72xf32, #tpu.memory_space<vmem>>, %arg7: memref<36x1xf32, #tpu.memory_space<vmem>>, %arg8: memref<3x36xf32, #tpu.memory_space<vmem>>, %arg9: memref<3x1xf32, #tpu.memory_space<vmem>>, %arg10: memref<3x256xf32, #tpu.memory_space<vmem>>) attributes {dimension_semantics = [#tpu.dimension_semantics<parallel>], iteration_bounds = array<i64: 2>, scalar_prefetch = 0 : i64, scratch_operands = 0 : i64, tpu.core_type = #tpu.core_type<tc>, window_params = [{transform_indices = @transform_0, window_bounds = array<i64: 2, 256>}, {pipeline_mode = #tpu.pipeline_mode<synchronous>, transform_indices = @transform_1, window_bounds = array<i64: 36, 2>}, {pipeline_mode = #tpu.pipeline_mode<synchronous>, transform_indices = @transform_2, window_bounds = array<i64: 36, 1>}, {pipeline_mode = #tpu.pipeline_mode<synchronous>, transform_indices = @transform_3, window_bounds = array<i64: 72, 36>}, {pipeline_mode = #tpu.pipeline_mode<synchronous>, transform_indices = @transform_4, window_bounds = array<i64: 72, 1>}, {pipeline_mode = #tpu.pipeline_mode<synchronous>, transform_indices = @transform_5, window_bounds = array<i64: 36, 72>}, {pipeline_mode = #tpu.pipeline_mode<synchronous>, transform_indices = @transform_6, window_bounds = array<i64: 36, 1>}, {pipeline_mode = #tpu.pipeline_mode<synchronous>, transform_indices = @transform_7, window_bounds = array<i64: 3, 36>}, {pipeline_mode = #tpu.pipeline_mode<synchronous>, transform_indices = @transform_8, window_bounds = array<i64: 3, 1>}, {transform_indices = @transform_9, window_bounds = array<i64: 3, 256>}]} {
    %c0 = arith.constant 0 : index
    %c0_0 = arith.constant 0 : index
    %0 = vector.load %arg1[%c0, %c0_0] : memref<2x256xf32, #tpu.memory_space<vmem>>, vector<2x256xf32>
    %c0_1 = arith.constant 0 : index
    %c0_2 = arith.constant 0 : index
    %1 = vector.load %arg3[%c0_1, %c0_2] : memref<36x1xf32, #tpu.memory_space<vmem>>, vector<36x1xf32>
    %c0_3 = arith.constant 0 : index
    %c0_4 = arith.constant 0 : index
    %2 = vector.load %arg2[%c0_3, %c0_4] : memref<36x2xf32, #tpu.memory_space<vmem>>, vector<36x2xf32>
    %3 = vector.extract_strided_slice %2 {offsets = [0, 0], sizes = [36, 1], strides = [1, 1]} : vector<36x2xf32> to vector<36x1xf32>
    %4 = vector.extract_strided_slice %0 {offsets = [0, 0], sizes = [1, 256], strides = [1, 1]} : vector<2x256xf32> to vector<1x256xf32>
    %5 = vector.broadcast %3 : vector<36x1xf32> to vector<36x256xf32>
    %6 = vector.broadcast %4 : vector<1x256xf32> to vector<36x256xf32>
    %7 = arith.mulf %5, %6 : vector<36x256xf32>
    %8 = vector.broadcast %1 : vector<36x1xf32> to vector<36x256xf32>
    %9 = arith.addf %8, %7 : vector<36x256xf32>
    %10 = vector.extract_strided_slice %2 {offsets = [0, 1], sizes = [36, 1], strides = [1, 1]} : vector<36x2xf32> to vector<36x1xf32>
    %11 = vector.extract_strided_slice %0 {offsets = [1, 0], sizes = [1, 256], strides = [1, 1]} : vector<2x256xf32> to vector<1x256xf32>
    %12 = vector.broadcast %10 : vector<36x1xf32> to vector<36x256xf32>
    %13 = vector.broadcast %11 : vector<1x256xf32> to vector<36x256xf32>
    %14 = arith.mulf %12, %13 : vector<36x256xf32>
    %15 = arith.addf %9, %14 : vector<36x256xf32>
    %16 = math.sin %15 : vector<36x256xf32>
    %c0_5 = arith.constant 0 : index
    %c0_6 = arith.constant 0 : index
    %17 = vector.load %arg5[%c0_5, %c0_6] : memref<72x1xf32, #tpu.memory_space<vmem>>, vector<72x1xf32>
    %c0_7 = arith.constant 0 : index
    %c0_8 = arith.constant 0 : index
    %18 = vector.load %arg4[%c0_7, %c0_8] : memref<72x36xf32, #tpu.memory_space<vmem>>, vector<72x36xf32>
    %cst = arith.constant dense<0.000000e+00> : vector<72x256xf32>
    %19 = tpu.matmul %18, %16, %cst {dimension_numbers = #tpu.dot_dimension_numbers<[1], [0], [0], [1], [0, 0, 1, 1], [], []>} : vector<72x36xf32>, vector<36x256xf32>, vector<72x256xf32> -> vector<72x256xf32>
    %20 = vector.broadcast %17 : vector<72x1xf32> to vector<72x256xf32>
    %21 = arith.addf %19, %20 : vector<72x256xf32>
    %22 = math.sin %21 : vector<72x256xf32>
    %c0_9 = arith.constant 0 : index
    %c0_10 = arith.constant 0 : index
    %23 = vector.load %arg7[%c0_9, %c0_10] : memref<36x1xf32, #tpu.memory_space<vmem>>, vector<36x1xf32>
    %c0_11 = arith.constant 0 : index
    %c0_12 = arith.constant 0 : index
    %24 = vector.load %arg6[%c0_11, %c0_12] : memref<36x72xf32, #tpu.memory_space<vmem>>, vector<36x72xf32>
    %cst_13 = arith.constant dense<0.000000e+00> : vector<36x256xf32>
    %25 = tpu.matmul %24, %22, %cst_13 {dimension_numbers = #tpu.dot_dimension_numbers<[1], [0], [0], [1], [0, 0, 1, 1], [], []>} : vector<36x72xf32>, vector<72x256xf32>, vector<36x256xf32> -> vector<36x256xf32>
    %26 = vector.broadcast %23 : vector<36x1xf32> to vector<36x256xf32>
    %27 = arith.addf %25, %26 : vector<36x256xf32>
    %28 = math.sin %27 : vector<36x256xf32>
    %c0_14 = arith.constant 0 : index
    %c0_15 = arith.constant 0 : index
    %29 = vector.load %arg9[%c0_14, %c0_15] : memref<3x1xf32, #tpu.memory_space<vmem>>, vector<3x1xf32>
    %c0_16 = arith.constant 0 : index
    %c0_17 = arith.constant 0 : index
    %30 = vector.load %arg8[%c0_16, %c0_17] : memref<3x36xf32, #tpu.memory_space<vmem>>, vector<3x36xf32>
    %cst_18 = arith.constant dense<0.000000e+00> : vector<3x256xf32>
    %31 = tpu.matmul %30, %28, %cst_18 {dimension_numbers = #tpu.dot_dimension_numbers<[1], [0], [0], [1], [0, 0, 1, 1], [], []>} : vector<3x36xf32>, vector<36x256xf32>, vector<3x256xf32> -> vector<3x256xf32>
    %32 = vector.broadcast %29 : vector<3x1xf32> to vector<3x256xf32>
    %33 = arith.addf %31, %32 : vector<3x256xf32>
    %34 = math.sin %33 : vector<3x256xf32>
    %c0_19 = arith.constant 0 : index
    %c0_20 = arith.constant 0 : index
    %35 = vector.load %arg10[%c0_19, %c0_20] : memref<3x256xf32, #tpu.memory_space<vmem>>, vector<3x256xf32>
    tpu.vector_store %arg10[%c0_19, %c0_20], %34 {strides = array<i32>} : memref<3x256xf32, #tpu.memory_space<vmem>>, vector<3x256xf32>,
    return
  }
  func.func @transform_0(%arg0: i32) -> (i32, i32) {
    %c0_i32 = arith.constant 0 : i32
    %c0_i32_0 = arith.constant 0 : i32
    return %c0_i32, %arg0 : i32, i32
  }
  func.func @transform_1(%arg0: i32) -> (i32, i32) {
    %c0_i32 = arith.constant 0 : i32
    %c0_i32_0 = arith.constant 0 : i32
    %c0_i32_1 = arith.constant 0 : i32
    return %c0_i32, %c0_i32_0 : i32, i32
  }
  func.func @transform_2(%arg0: i32) -> (i32, i32) {
    %c0_i32 = arith.constant 0 : i32
    %c0_i32_0 = arith.constant 0 : i32
    %c0_i32_1 = arith.constant 0 : i32
    return %c0_i32, %c0_i32_0 : i32, i32
  }
  func.func @transform_3(%arg0: i32) -> (i32, i32) {
    %c0_i32 = arith.constant 0 : i32
    %c0_i32_0 = arith.constant 0 : i32
    %c0_i32_1 = arith.constant 0 : i32
    return %c0_i32, %c0_i32_0 : i32, i32
  }
  func.func @transform_4(%arg0: i32) -> (i32, i32) {
    %c0_i32 = arith.constant 0 : i32
    %c0_i32_0 = arith.constant 0 : i32
    %c0_i32_1 = arith.constant 0 : i32
    return %c0_i32, %c0_i32_0 : i32, i32
  }
  func.func @transform_5(%arg0: i32) -> (i32, i32) {
    %c0_i32 = arith.constant 0 : i32
    %c0_i32_0 = arith.constant 0 : i32
    %c0_i32_1 = arith.constant 0 : i32
    return %c0_i32, %c0_i32_0 : i32, i32
  }
  func.func @transform_6(%arg0: i32) -> (i32, i32) {
    %c0_i32 = arith.constant 0 : i32
    %c0_i32_0 = arith.constant 0 : i32
    %c0_i32_1 = arith.constant 0 : i32
    return %c0_i32, %c0_i32_0 : i32, i32
  }
  func.func @transform_7(%arg0: i32) -> (i32, i32) {
    %c0_i32 = arith.constant 0 : i32
    %c0_i32_0 = arith.constant 0 : i32
    %c0_i32_1 = arith.constant 0 : i32
    return %c0_i32, %c0_i32_0 : i32, i32
  }
  func.func @transform_8(%arg0: i32) -> (i32, i32) {
    %c0_i32 = arith.constant 0 : i32
    %c0_i32_0 = arith.constant 0 : i32
    %c0_i32_1 = arith.constant 0 : i32
    return %c0_i32, %c0_i32_0 : i32, i32
  }
  func.func @transform_9(%arg0: i32) -> (i32, i32) {
    %c0_i32 = arith.constant 0 : i32
    %c0_i32_0 = arith.constant 0 : i32
    return %c0_i32, %arg0 : i32, i32
  }
}

</mosaic_0001>

<bundles_post_ra>
// kernel: tpu_custom_call.1
= control target key start
LH: loop header
LB: loop body
LE: loop exit
PB: predicated region body
PF: predicated region fallthrough
CT: control target
= control target key end

     0   :  { %14 = vsyncpa [#allocation3], 0  ;;  %s13463_s0 = inlined_call_operand.vmem [shape: f32[2,512], index: 0, kind: input, shape index: {}]   ;;  %s13464_s1 = inlined_call_operand.vmem [shape: f32[36,2], index: 1, kind: input, shape index: {}]   ;;  %s13465_s2 = inlined_call_operand.vmem [shape: f32[36,1], index: 2, kind: input, shape index: {}]   ;;  %s13466_s3 = inlined_call_operand.vmem [shape: f32[72,36], index: 3, kind: input, shape index: {}]   ;;  %s13467_s4 = inlined_call_operand.vmem [shape: f32[72,1], index: 4, kind: input, shape index: {}]   ;;  %s13468_s5 = inlined_call_operand.vmem [shape: f32[36,72], index: 5, kind: input, shape index: {}]   ;;  %s13469_s6 = inlined_call_operand.vmem [shape: f32[36,1], index: 6, kind: input, shape index: {}]   ;;  %s13470_s7 = inlined_call_operand.vmem [shape: f32[3,36], index: 7, kind: input, shape index: {}]   ;;  %s13471_s8 = inlined_call_operand.vmem [shape: f32[3,1], index: 8, kind: input, shape index: {}]   ;;  %s13472_s9 = inlined_call_operand.hbm [shape: f32[3,512], index: 9, kind: output, shape index: {}]  }
   0x1   :  { %16 = vsyncpa [#allocation3 + $0x1], 0  ;;  %s7451_s30 = smov 0   ;;  %s7453_s10 = smov 0  }
   0x2   :  { %s7455_s11 = smov 0   ;;  %s7457_s12 = smov 0  }
   0x3 LB: > { %s7472_s13 = sadd.s32 4294967295, %s7391_s12   ;;  %s7107_s14 = sadd.s32 4294967294, %s7391_s12   ;;  %s7391_s12 = sphi %s7457_s12, %s13966_s12   ;;  %s7387_s11 = sphi %s7455_s11, %s13965_s11   ;;  %s7383_s10 = sphi %s7453_s10, %s13964_s10   ;;  %s7379_s30 = sphi %s7451_s30, %s13963_s30  }
   0x4   : > { %s7476_s15 = sadd.s32 1, %s7391_s12   ;;  %s223_s16 = sadd.s32 1, %s7387_s11 }
   0x5   : > { %s220_s17 = ssub.s32 %s7391_s12, %s7476_s15  ;;  %p233_p0 = scmp.ne.s32.totalorder %s7387_s11, %s7383_s10 }
   0x6   : > { %p221_p1 = scmp.eq.s32.totalorder %s220_s17, 0  ;;  %p234_p2 = scmp.eq.s32.totalorder %s7472_s13, 1 }
   0x7   : > { %p239_p3 = scmp.ne.s32.totalorder %s7383_s10, %s7379_s30  ;;  %p240_p4 = scmp.eq.s32.totalorder %s7107_s14, 1 }
   0x8   : > { %s7487_s18 = scalar_select %p221_p1, %s7387_s11, %s223_s16  }
   0x9   : > { %p7489_p5 = por %p234_p2, %p233_p0  ;;  %p7493_p6 = por %p240_p4, %p239_p3 }
   0xa   : > { %p7110_p7 = scmp.ge.s32.totalorder %s7391_s12, 1  ;;  %p291_p8 = scmp.lt.s32.totalorder %s7391_s12, 3 }
   0xc   : > { %p292_p9 = pnand %p7110_p7, %p291_p8 }
   0xe   : > { %295 = sbr.rel (%p292_p9) target bundleno = 2202 (0x89a), region = 56 }
  0x13   : > { %v343_v0 = vld [vmem:[%s13464_s1 + $0x18] sm:$0xff]  ;;  %v342_v1 = vld [vmem:[%s13464_s1 + $0x10] sm:$0xff]  ;;  %v339_v2 = vld [vmem:[%s13465_s2 + $0x20] sm:$0xf]  ;;  %v7393_v3 = vmov 1   ;;  %v13480_v4 = vmov 0  }
  0x14   : > { %7324 = vset.pattern.permute.xlu0 %v7393_v3  ;;  %7323 = vset.pattern.permute.xlu2 %v13480_v4  ;;  %v338_v5 = vld [vmem:[%s13465_s2 + $0x18] sm:$0xff]  ;;  %v344_v6 = vld [vmem:[%s13464_s1 + $0x20] sm:$0xf]  ;;  %v337_v7 = vld [vmem:[%s13465_s2 + $0x10] sm:$0xff]  ;;  %s7112_s23 = sshll.u32 %s7472_s13, 1  ;;  %s324_s22 = sand.u32 1, %s7383_s10  }
  0x15   : > { %7321 = vset.pattern.permute.xlu1 %v13480_v4  ;;  %435 = vperm.xlu0 %7324, %v343_v0   ;;  %v341_v8 = vld [vmem:[%s13464_s1 + $0x8] sm:$0xff]  ;;  %v340_v9 = vld [vmem:[%s13464_s1] sm:$0xff]  ;;  %v2025_v12 = vld [vmem:[%s13467_s4 + $0x38] sm:$0xff]  ;;  %p328_p10 = scmp.lt.s32.totalorder %s7112_s23, 3  ;;  %s7273_s24 = sshll.u32 %s7472_s13, 3 }
  0x16   : > { %357 = vperm.xlu2 %7323, %v342_v1   ;;  %409 = vperm.xlu1 %7321, %v339_v2   ;;  %v336_v10 = vld [vmem:[%s13465_s2 + $0x8] sm:$0xff]  ;;  %v335_v11 = vld [vmem:[%s13465_s2] sm:$0xff]  ;;  %v2020_v17 = vld [vmem:[%s13467_s4 + $0x10] sm:$0xff]  ;;  %s7043_s27 = scalar_lea.hbm %s13472_s9, %s7273_s24  ;;  %s7032_s14 = scalar_lea.sflag [#allocation3], %s324_s22 }
  0x17   : > { %v2026_v13 = vld [vmem:[%s13467_s4 + $0x40] sm:$0xff]  ;;  %v2023_v15 = vld [vmem:[%s13467_s4 + $0x28] sm:$0xff]  ;;  %v4997_v18 = vld [vmem:[%s13469_s6 + $0x18] sm:$0xff]  ;;  %s13968_s23 = smov (!%p328_p10, %s7112_s23), 3  ;;  %s7349_s24 = scalar_lea.hbm %s13472_s9, 16 }
  0x18   : > { %v2022_v14 = vld [vmem:[%s13467_s4 + $0x20] sm:$0xff]  ;;  %v2019_v16 = vld [vmem:[%s13467_s4 + $0x8] sm:$0xff]  ;;  %s7113_s26 = sshll.u32 %s13968_s23, 1  ;;  %s13424_s23 = sshll.u32 %s324_s22, 3 }
  0x19   : > { %v4998_v19 = vld [vmem:[%s13469_s6 + $0x20] sm:$0xf]  ;;  %v4995_v21 = vld [vmem:[%s13469_s6 + $0x8] sm:$0xff]  ;;  %s331_s29 = scalar_lea.vmem %s13463_s0, %s7113_s26  ;;  %s326_s13 = scalar_lea.vmem [#allocation2], %s13424_s23 }
  0x1a   : > { %v4994_v20 = vld [vmem:[%s13469_s6] sm:$0xff]  ;;  %s7045_s28 = sshll.u32 %s326_s13, 4  ;;  %s7046_s28 = int_to_ptr.vmem [resolvable:$true] %s7045_s28 }
  0x1b   : > { %v334_v22 = vld [vmem:[%s331_s29] sm:$0xf]  ;;  %s7047_s29 = sshll.u32 %s7043_s27, 4  ;;  %s7048_s29 = int_to_ptr.hbm [resolvable:$true] %s7047_s29 }
  0x1c   : > { %v371_v23 = vperm.slane %v334_v22, 0  ;;  %v372_v24 = vperm.slane %v334_v22, 2  ;;  %v443_v30 = vperm.slane %v334_v22, 3  ;;  %v442_v35 = vperm.slane %v334_v22, 1  ;;  %s7343_s16 = sshra.s32 %s7048_s29, 4  ;;  %s7344_s16 = int_to_ptr.hbm [resolvable:$true] %s7343_s16 }
  0x1d   : > { %7325 = vset.pattern.permute.xlu0 %v13480_v4  ;;  %s7345_s17 = scalar_lea.hbm %s7344_s16, 8  ;;  %p7350_p0 = scmp.lt.s32.totalorder %s7344_s16, %s13472_s9 }
  0x1e   : > { %7322 = vset.pattern.permute.xlu1 %v7393_v3  ;;  %404 = vperm.xlu2 %7323, %v338_v5   ;;  %v375_v25 = vperm.slane %v371_v23, 0  ;;  %v376_v26 = vperm.slane %v372_v24, 0  ;;  %v7568_v31 = vperm.slane %v443_v30, 1  ;;  %v7571_v37 = vperm.slane %v442_v35, 1  ;;  %p7346_p11 = scmp.ne.s32.totalorder %s7344_s16, %s7345_s17  ;;  %p7351_p1 = scmp.lt.s32.totalorder %s7349_s24, %s7345_s17 }
  0x1f   : > { %367 = vperm.xlu0 %7325, %v344_v6   ;;  %439 = vperm.xlu1 %7322, %v344_v6  }
  0x20   : > { %p7347_p12 = pnand %p7346_p11, %p7489_p5  ;;  %p7352_p2 = por %p7351_p1, %p7350_p0 }
  0x22   : > { %p7348_p13 = pneg %p7347_p12 }
  0x24   : > { %p7353_p3 = pnand %p7352_p2, %p7348_p13 }
  0x26   : > { %399 = vperm.xlu2 %7323, %v337_v7  }
  0x27   : > { %362 = vperm.xlu0 %7325, %v343_v0   ;;  %7326 = vset.pattern.permute.xlu1 %v13480_v4 }
  0x28   : > { %352 = vperm.xlu1 %7326, %v341_v8  }
  0x2e   : > { %347 = vperm.xlu2 %7323, %v340_v9  }
  0x2f   : > { %394 = vperm.xlu0 %7325, %v336_v10  }
  0x30   : > { %7327 = vset.pattern.permute.xlu1 %v7393_v3 }
  0x31   : > { %431 = vperm.xlu1 %7327, %v342_v1  }
  0x36   : > { %389 = vperm.xlu2 %7323, %v335_v11  }
  0x37   : > { %2073 = vperm.xlu0 %7325, %v2025_v12  }
  0x39   : > { %427 = vperm.xlu1 %7327, %v341_v8  }
  0x3e   : > { %2078 = vperm.xlu2 %7323, %v2026_v13  }
  0x3f   : > { %2058 = vperm.xlu0 %7325, %v2022_v14  }
  0x41   : > { %423 = vperm.xlu1 %7327, %v340_v9  }
  0x46   : > { %2063 = vperm.xlu2 %7323, %v2023_v15  }
  0x47   : > { %2043 = vperm.xlu0 %7325, %v2019_v16  }
  0x49   : > { %7328 = vset.pattern.permute.xlu1 %v13480_v4 }
  0x4e   : > { %2048 = vperm.xlu2 %7323, %v2020_v17  }
  0x4f   : > { %5021 = vperm.xlu0 %7325, %v4997_v18  }
  0x56   : > { %5026 = vperm.xlu2 %7323, %v4998_v19  }
  0x57   : > { %5006 = vperm.xlu0 %7325, %v4994_v20  }
  0x5e   : > { %5011 = vperm.xlu2 %7323, %v4995_v21  }
  0x70   : > { %v358_v27 = vpop.permute.xlu2 %357 }
  0x71   : > { %v381_v28 = vmul.f32 %v375_v25, %v358_v27  ;;  %v382_v29 = vmul.f32 %v376_v26, %v358_v27 }
  0x78   : > { %v405_v36 = vpop.permute.xlu2 %404 }
  0x80   : > { %v400_v45 = vpop.permute.xlu2 %399 }
  0x81   : > { %v416_v1 = vadd.f32 %v400_v45, %v381_v28  ;;  %v417_v5 = vadd.f32 %v400_v45, %v382_v29 }
  0x87   : > { %v436_v32 = vpop.permute.xlu0 %435 }
  0x88   : > { %v410_v33 = vpop.permute.xlu1 %409  ;;  %v455_v34 = vmul.f32 %v7568_v31, %v436_v32  ;;  %v454_v61 = vmul.f32 %v7571_v37, %v436_v32  ;;  %v348_v0 = vpop.permute.xlu2 %347 }
  0x89   : > { %v377_v16 = vmul.f32 %v375_v25, %v348_v0  ;;  %v378_v20 = vmul.f32 %v376_v26, %v348_v0 }
  0x90   : > { %v390_v27 = vpop.permute.xlu2 %389 }
  0x91   : > { %v368_v38 = vpop.permute.xlu0 %367  ;;  %v440_v39 = vpop.permute.xlu1 %439  ;;  %v413_v35 = vadd.f32 %v390_v27, %v378_v20 }
  0x92   : > { %v385_v40 = vmul.f32 %v375_v25, %v368_v38  ;;  %v456_v42 = vmul.f32 %v7571_v37, %v440_v39  ;;  %v386_v44 = vmul.f32 %v376_v26, %v368_v38  ;;  %v457_v57 = vmul.f32 %v7568_v31, %v440_v39 }
  0x93   : > { %v13474_v39 = vmov 2475754826  }
  0x94   : > { %v420_v41 = vadd.f32 %v410_v33, %v385_v40  ;;  %v421_v52 = vadd.f32 %v410_v33, %v386_v44  ;;  %v412_v33 = vadd.f32 %v390_v27, %v377_v16  ;;  %v13489_v44 = vmov 920167782  }
  0x96   : > { %v7574_v43 = vadd.f32 %v456_v42, %v420_v41  ;;  %v7581_v62 = vadd.f32 %v457_v57, %v421_v52  ;;  %v13482_v41 = vmov 2131351028  }
  0x98   : > { %v1711_v46 = vand.u32 2139095040, %v7574_v43  ;;  %v1866_v2 = vand.u32 2139095040, %v7581_v62  ;;  %v1708_v13 = vand.u32 2147483647, %v7574_v43 }
  0x99   : > { %v363_v47 = vpop.permute.xlu0 %362 }
  0x9a   : > { %v1712_v48 = vshrl.u32 %v1711_v46, 23  ;;  %v383_v49 = vmul.f32 %v375_v25, %v363_v47  ;;  %v384_v50 = vmul.f32 %v376_v26, %v363_v47  ;;  %v353_v51 = vpop.permute.xlu1 %352  ;;  %v1867_v15 = vshrl.u32 %v1866_v2, 23 }
  0x9b   : > { %v379_v53 = vmul.f32 %v375_v25, %v353_v51  ;;  %v380_v54 = vmul.f32 %v376_v26, %v353_v51  ;;  %v1715_v21 = vand.u32 8388607, %v1708_v13  ;;  %v1863_v46 = vand.u32 2147483647, %v7581_v62 }
  0x9c   : > { %v7138_v55 = vadd.s32 4294967169, %v1712_v48  ;;  %v419_v56 = vadd.f32 %v405_v36, %v384_v50  ;;  %v418_v58 = vadd.f32 %v405_v36, %v383_v49  ;;  %v7141_v23 = vadd.s32 4294967169, %v1867_v15 }
  0x9d   : > { %v1716_v38 = vor.u32 8388608, %v1715_v21  ;;  %v13476_v48 = vmov 683565275   ;;  %v13486_v51 = vmov 2102212464  }
  0x9e   : > { %v1718_v59 = vadd.s32 1, %v7138_v55  ;;  %v7578_v60 = vadd.f32 %v455_v34, %v419_v56  ;;  %v7583_v63 = vadd.f32 %v454_v61, %v418_v58  ;;  %v1873_v47 = vadd.s32 1, %v7141_v23 }
  0x9f   : > { %v13478_v56 = vmov 1326507024   ;;  %v7623_v0 = vshll.u32 %v1716_v38, 8 }
  0xa0   : > { %vm1719_vm0 = vcmp.gt.s32.totalorder %v1718_v59, 0  ;;  %v1401_v9 = vand.u32 2139095040, %v7583_v63  ;;  %v1556_v10 = vand.u32 2139095040, %v7578_v60  ;;  %vm1874_vm1 = vcmp.gt.s32.totalorder %v1873_v47, 0 }
  0xa1   : > { %v1720_v6 = vsel %vm1719_vm0, %v1718_v59, 0  ;;  %v395_v19 = vpop.permute.xlu0 %394 }
  0xa2   : > { %v1722_v14 = vand.u32 31, %v1720_v6  ;;  %v1402_v17 = vshrl.u32 %v1401_v9, 23  ;;  %v1557_v18 = vshrl.u32 %v1556_v10, 23  ;;  %v414_v28 = vadd.f32 %v395_v19, %v379_v53 }
  0xa3   : > { %v432_v3 = vpop.permute.xlu1 %431  ;;  %v415_v29 = vadd.f32 %v395_v19, %v380_v54  ;;  %v7619_v58 = vshrl.u32 %v1720_v6, 5  ;;  %v1875_v19 = vsel %vm1874_vm1, %v1873_v47, 0 }
  0xa4   : > { %v452_v7 = vmul.f32 %v7571_v37, %v432_v3  ;;  %v453_v8 = vmul.f32 %v7568_v31, %v432_v3  ;;  %v7597_v22 = vsub.s32 32, %v1722_v14  ;;  %v7132_v25 = vadd.s32 4294967169, %v1402_v17 }
  0xa5   : > { %v7135_v34 = vadd.s32 4294967169, %v1557_v18  ;;  %v1725_v49 = vshll.u32 %v13476_v48, %v1722_v14  ;;  %v1728_v50 = vshll.u32 %v13474_v39, %v1722_v14  ;;  %v1734_v55 = vshll.u32 %v13486_v51, %v1722_v14 }
  0xa6   : > { %v7590_v11 = vadd.f32 %v452_v7, %v416_v1  ;;  %v7592_v12 = vadd.f32 %v453_v8, %v417_v5  ;;  %v1726_v40 = vshrl.u32 %v13474_v39, %v7597_v22  ;;  %v1729_v42 = vshrl.u32 %v13482_v41, %v7597_v22 }
  0xa7   : > { %v1735_v45 = vshrl.u32 %v13489_v44, %v7597_v22  ;;  %v1732_v52 = vshrl.u32 %v13486_v51, %v7597_v22  ;;  %v1408_v53 = vadd.s32 1, %v7132_v25  ;;  %v1563_v54 = vadd.s32 1, %v7135_v34 }
  0xa8   : > { %v1738_v57 = vshrl.u32 %v13478_v56, %v7597_v22  ;;  %v1091_v59 = vand.u32 2139095040, %v7590_v11  ;;  %v1731_v61 = vshll.u32 %v13482_v41, %v1722_v14  ;;  %v1727_v2 = vor.u32 %v1726_v40, %v1725_v49 }
  0xa9   : > { %v1730_v3 = vor.u32 %v1729_v42, %v1728_v50  ;;  %v1736_v5 = vor.u32 %v1735_v45, %v1734_v55  ;;  %v1737_v7 = vshll.u32 %v13489_v44, %v1722_v14  ;;  %vm1409_vm2 = vcmp.gt.s32.totalorder %v1408_v53, 0 }
  0xaa   : > { %v1733_v10 = vor.u32 %v1732_v52, %v1731_v61  ;;  %vm1564_vm3 = vcmp.gt.s32.totalorder %v1563_v54, 0  ;;  %v1246_v6 = vand.u32 2139095040, %v7592_v12  ;;  %vm1740_vm4 = vcmp.lt.s32.totalorder %v7619_v58, 1 }
  0xab   : > { %v428_v24 = vpop.permute.xlu1 %427  ;;  %v1739_v15 = vor.u32 %v1738_v57, %v1737_v7  ;;  %vm1743_vm5 = vcmp.lt.s32.totalorder %v7619_v58, 4  ;;  %v1092_v14 = vshrl.u32 %v1091_v59, 23  ;;  %vm1742_vm6 = vcmp.lt.s32.totalorder %v7619_v58, 3 }
  0xac   : > { %v450_v30 = vmul.f32 %v7571_v37, %v428_v24  ;;  %v451_v32 = vmul.f32 %v7568_v31, %v428_v24  ;;  %v1410_v20 = vsel %vm1409_vm2, %v1408_v53, 0  ;;  %vm1741_vm7 = vcmp.lt.s32.totalorder %v7619_v58, 2 }
  0xad   : > { %v1753_v21 = vsel %vm1743_vm5, %v1739_v15, 1326507024  ;;  %v1565_v23 = vsel %vm1564_vm3, %v1563_v54, 0  ;;  %v1247_v24 = vshrl.u32 %v1246_v6, 23  ;;  %v7658_v25 = vand.u32 31, %v1410_v20 }
  0xae   : > { %v7601_v36 = vadd.f32 %v450_v30, %v414_v28  ;;  %v7603_v26 = vadd.f32 %v451_v32, %v415_v29  ;;  %v1752_v28 = vsel %vm1740_vm4, %v1730_v3, %v1733_v10  ;;  %v7126_v29 = vadd.s32 4294967169, %v1092_v14 }
  0xaf   : > { %v1757_v30 = vand.u32 65535, %v7623_v0  ;;  %v7654_v32 = vand.u32 8388607, %v1863_v46  ;;  %v1724_v34 = vshrl.u32 %v13476_v48, %v7597_v22  ;;  %v7664_v38 = vand.u32 31, %v1565_v23 }
  0xb0   : > { %v1745_v40 = vsel %vm1743_vm5, %v1733_v10, 2102212464  ;;  %v7129_v47 = vadd.s32 4294967169, %v1247_v24  ;;  %v7670_v53 = vshrl.u32 %v1875_v19, 5  ;;  %v7672_v54 = vadd.s32 1, %v7126_v29 }
  0xb1   : > { %v1758_v22 = vshrl.u32 %v7623_v0, 16  ;;  %v1871_v55 = vor.u32 8388608, %v7654_v32  ;;  %v1744_v57 = vsel %vm1740_vm4, %v1724_v34, %v1727_v2  ;;  %v1746_v59 = vsel %vm1742_vm6, %v1730_v3, %v1745_v40 }
  0xb2   : > { %v7683_v7 = vshrl.u32 %v1410_v20, 5  ;;  %v7691_v6 = vsub.s32 32, %v7664_v38  ;;  %vm1099_vm8 = vcmp.gt.s32.totalorder %v7672_v54, 0  ;;  %vm1895_vm15 = vcmp.lt.s32.totalorder %v7670_v53, 1 }
  0xb3   : > { %v424_v1 = vpop.permute.xlu1 %423  ;;  %vm1898_vm0 = vcmp.lt.s32.totalorder %v7670_v53, 4  ;;  %vm1897_vm1 = vcmp.lt.s32.totalorder %v7670_v53, 3  ;;  %vm1896_vm2 = vcmp.lt.s32.totalorder %v7670_v53, 2 }
  0xb4   : > { %v448_v8 = vmul.f32 %v7571_v37, %v424_v1  ;;  %v449_v9 = vmul.f32 %v7568_v31, %v424_v1  ;;  %v1748_v31 = vsel %vm1740_vm4, %v1727_v2, %v1730_v3  ;;  %v1749_v37 = vsel %vm1743_vm5, %v1736_v5, 920167782 }
  0xb5   : > { %v1750_v18 = vsel %vm1742_vm6, %v1733_v10, %v1749_v37  ;;  %v7688_v10 = vsub.s32 32, %v7658_v25  ;;  %v7693_v2 = vadd.s32 1, %v7129_v47  ;;  %v7697_v3 = vsel %vm1741_vm7, %v1744_v57, %v1746_v59 }
  0xb6   : > { %v7629_v16 = vadd.f32 %v448_v8, %v412_v33  ;;  %v7631_v17 = vadd.f32 %v449_v9, %v413_v35  ;;  %v1751_v27 = vsel %vm1741_vm7, %v1748_v31, %v1750_v18  ;;  %v7656_v33 = vand.u32 31, %v1875_v19 }
  0xb7   : > { %v1754_v35 = vsel %vm1742_vm6, %v1736_v5, %v1753_v21  ;;  %v1782_v45 = vshrl.u32 %v1751_v27, 16  ;;  %v1781_v52 = vand.u32 65535, %v1751_v27  ;;  %v7685_v8 = vshrl.u32 %v1565_v23, 5 }
  0xb8   : > { %v1755_v42 = vsel %vm1741_vm7, %v1752_v28, %v1754_v35  ;;  %v7681_v5 = vsub.s32 32, %v7656_v33  ;;  %vm1254_vm13 = vcmp.gt.s32.totalorder %v7693_v2, 0  ;;  %v1883_v59 = vshll.u32 %v13474_v39, %v7656_v33 }
  0xb9   : > { %v1759_v49 = vand.u32 65535, %v1755_v42  ;;  %v1760_v50 = vshrl.u32 %v1755_v42, 16  ;;  %v1784_v1 = vmul.u32 %v1782_v45, %v1757_v30  ;;  %v1785_v15 = vmul.u32 %v1781_v52, %v1758_v22 }
  0xba   : > { %v1783_v37 = vmul.u32 %v1781_v52, %v1757_v30  ;;  %v1786_v20 = vmul.u32 %v1782_v45, %v1758_v22  ;;  %v1881_v52 = vshrl.u32 %v13474_v39, %v7681_v5 }
  0xbb   : > { %v1762_v61 = vmul.u32 %v1760_v50, %v1757_v30  ;;  %v1763_v9 = vmul.u32 %v1759_v49, %v1758_v22  ;;  %v1761_v14 = vmul.u32 %v1759_v49, %v1757_v30  ;;  %v1764_v18 = vmul.u32 %v1760_v50, %v1758_v22 }
  0xbc   : > { %v1787_v21 = vshll.u32 %v1784_v1, 16  ;;  %v1789_v29 = vshll.u32 %v1785_v15, 16  ;;  %v1788_v35 = vshrl.u32 %v1784_v1, 16  ;;  %v1790_v42 = vshrl.u32 %v1785_v15, 16 }
  0xbd   : > { %v1765_v31 = vshll.u32 %v1762_v61, 16  ;;  %v1766_v19 = vshrl.u32 %v1762_v61, 16  ;;  %v1767_v23 = vshll.u32 %v1763_v9, 16  ;;  %v1768_v24 = vshrl.u32 %v1763_v9, 16 }
  0xbe   : > { %vm1791_vm10 = vc.u32 %v1783_v37, %v1787_v21  ;;  %v1793_v58 = vadd.s32 %v1787_v21, %v1783_v37  ;;  %v1880_v50 = vshll.u32 %v13476_v48, %v7656_v33  ;;  %v1884_v61 = vshrl.u32 %v13482_v41, %v7681_v5 }
  0xbf   : > { %vm1769_vm9 = vc.u32 %v1761_v14, %v1765_v31  ;;  %v1771_v27 = vadd.s32 %v1765_v31, %v1761_v14  ;;  %v1792_v30 = vsel %vm1791_vm10, 1, %v13480_v4  ;;  %v1886_v15 = vshll.u32 %v13482_v41, %v7656_v33 }
  0xc0   : > { %v1770_v28 = vsel %vm1769_vm9, 1, %v13480_v4  ;;  %v1794_v47 = vadd.s32 %v1792_v30, %v1786_v20  ;;  %vm1795_vm12 = vc.u32 %v1793_v58, %v1789_v29  ;;  %v7709_v22 = vadd.s32 %v1793_v58, %v1789_v29 }
  0xc1   : > { %v1772_v34 = vadd.s32 %v1770_v28, %v1764_v18  ;;  %vm1773_vm11 = vc.u32 %v1771_v27, %v1767_v23  ;;  %v1796_v49 = vsel %vm1795_vm12, 1, %v13480_v4  ;;  %v1882_v9 = vor.u32 %v1881_v52, %v1880_v50 }
  0xc2   : > { %v1774_v40 = vsel %vm1773_vm11, 1, %v13480_v4  ;;  %v1798_v57 = vadd.s32 %v1796_v49, %v1794_v47  ;;  %v1887_v14 = vshrl.u32 %v13486_v51, %v7681_v5  ;;  %v1885_v37 = vor.u32 %v1884_v61, %v1883_v59 }
  0xc3   : > { %v1776_v45 = vadd.s32 %v1774_v40, %v1772_v34  ;;  %v1889_v18 = vshll.u32 %v13486_v51, %v7656_v33  ;;  %v1890_v20 = vshrl.u32 %v13489_v44, %v7681_v5  ;;  %v1893_v27 = vshrl.u32 %v13478_v56, %v7681_v5 }
  0xc4   : > { %v1799_v31 = vadd.s32 %v1798_v57, %v1788_v35  ;;  %v1888_v23 = vor.u32 %v1887_v14, %v1886_v15  ;;  %v781_v28 = vand.u32 2139095040, %v7601_v36  ;;  %v936_v29 = vand.u32 2139095040, %v7603_v26 }
  0xc5   : > { %v1777_v1 = vadd.s32 %v1776_v45, %v1766_v19  ;;  %v1892_v19 = vshll.u32 %v13489_v44, %v7656_v33  ;;  %v1891_v34 = vor.u32 %v1890_v20, %v1889_v18  ;;  %v1100_v35 = vsel %vm1099_vm8, %v7672_v54, 0 }
  0xc6   : > { %v1800_v58 = vadd.s32 %v1799_v31, %v1790_v42  ;;  %v1801_v33 = vmul.u32 %v7623_v0, %v7697_v3  ;;  %v1903_v40 = vsel %vm1895_vm15, %v1882_v9, %v1885_v37  ;;  %v1907_v42 = vsel %vm1895_vm15, %v1885_v37, %v1888_v23 }
  0xc7   : > { %v7723_v21 = vadd.s32 %v1777_v1, %v1768_v24  ;;  %v1894_v24 = vor.u32 %v1893_v27, %v1892_v19  ;;  %v1904_v54 = vsel %vm1898_vm0, %v1891_v34, 920167782  ;;  %v7760_v57 = vshll.u32 %v1871_v55, 8 }
  0xc8   : > { %v1804_v30 = vadd.s32 1, %v1800_v58  ;;  %v1905_v0 = vsel %vm1897_vm1, %v1888_v23, %v1904_v54  ;;  %v1255_v59 = vsel %vm1254_vm13, %v7693_v2, 0  ;;  %v7765_v14 = vshrl.u32 %v1100_v35, 5 }
  0xc9   : > { %vm1803_vm14 = vc.u32 %v7723_v21, %v7709_v22  ;;  %v1908_v47 = vsel %vm1898_vm0, %v1894_v24, 1326507024  ;;  %v1906_v50 = vsel %vm1896_vm2, %v1903_v40, %v1905_v0  ;;  %v7767_v31 = vand.u32 31, %v1100_v35 }
  0xca   : > { %v1805_v45 = vsel %vm1803_vm14, %v1804_v30, %v1800_v58  ;;  %v1909_v3 = vsel %vm1897_vm1, %v1891_v34, %v1908_v47  ;;  %v1937_v15 = vshrl.u32 %v1906_v50, 16  ;;  %v1912_v20 = vand.u32 65535, %v7760_v57 }
  0xcb   : > { %v1806_v49 = vadd.s32 %v1805_v45, %v1801_v33  ;;  %v1910_v52 = vsel %vm1896_vm2, %v1907_v42, %v1909_v3  ;;  %v1879_v19 = vshrl.u32 %v13476_v48, %v7681_v5  ;;  %v1900_v32 = vsel %vm1898_vm0, %v1888_v23, 2102212464 }
  0xcc   : > { %v1914_v61 = vand.u32 65535, %v1910_v52  ;;  %v1915_v1 = vshrl.u32 %v1910_v52, 16  ;;  %v1913_v55 = vshrl.u32 %v7760_v57, 16  ;;  %v1936_v27 = vand.u32 65535, %v1906_v50 }
  0xcd   : > { %v1807_v18 = vadd.s32 536870912, %v1806_v49  ;;  %v7775_v2 = vshrl.u32 %v1255_v59, 5  ;;  %v7777_v58 = vand.u32 31, %v1255_v59  ;;  %v782_v24 = vshrl.u32 %v781_v28, 23 }
  0xce   : > { %v1917_v35 = vmul.u32 %v1915_v1, %v1912_v20  ;;  %v1899_v33 = vsel %vm1895_vm15, %v1879_v19, %v1882_v9  ;;  %v1918_v30 = vmul.u32 %v1914_v61, %v1913_v55  ;;  %v1939_v40 = vmul.u32 %v1937_v15, %v1912_v20 }
  0xcf   : > { %v7779_v34 = vshrl.u32 %v1807_v18, 30  ;;  %v1901_v23 = vsel %vm1897_vm1, %v1885_v37, %v1900_v32  ;;  %v1916_v54 = vmul.u32 %v1914_v61, %v1912_v20  ;;  %v7787_v47 = vsub.s32 32, %v7767_v31 }
  0xd0   : > { %v1920_v42 = vshll.u32 %v1917_v35, 16  ;;  %v7789_v45 = vshrl.u32 %v936_v29, 23  ;;  %v1940_v0 = vmul.u32 %v1936_v27, %v1913_v55  ;;  %v1942_v3 = vshll.u32 %v1939_v40, 16 }
  0xd1   : > { %v1809_v5 = vshll.u32 %v7779_v34, 30  ;;  %v1919_v50 = vmul.u32 %v1915_v1, %v1913_v55  ;;  %v7795_v52 = vsel %vm1896_vm2, %v1899_v33, %v1901_v23  ;;  %v1922_v59 = vshll.u32 %v1918_v30, 16 }
  0xd2   : > { %vm1924_vm3 = vc.u32 %v1916_v54, %v1920_v42  ;;  %v1926_v9 = vadd.s32 %v1920_v42, %v1916_v54  ;;  %v1938_v61 = vmul.u32 %v1936_v27, %v1912_v20  ;;  %v1941_v19 = vmul.u32 %v1937_v15, %v1913_v55 }
  0xd3   : > { %v7791_v28 = vsub.s32 %v1806_v49, %v1809_v5  ;;  %v1925_v37 = vsel %vm1924_vm3, 1, %v13480_v4  ;;  %v1944_v49 = vshll.u32 %v1940_v0, 16  ;;  %v1921_v5 = vshrl.u32 %v1917_v35, 16 }
  0xd4   : > { %v1927_v18 = vadd.s32 %v1925_v37, %v1919_v50  ;;  %vm1928_vm5 = vc.u32 %v1926_v9, %v1922_v59  ;;  %vm1946_vm6 = vc.u32 %v1938_v61, %v1942_v3  ;;  %v1948_v1 = vadd.s32 %v1942_v3, %v1938_v61 }
  0xd5   : > { %vm1811_vm4 = vcmp.lt.s32.totalorder %v7791_v28, 0  ;;  %v1812_v29 = vsub.s32 0, %v7791_v28  ;;  %v1929_v53 = vsel %vm1928_vm5, 1, %v13480_v4  ;;  %v1947_v33 = vsel %vm1946_vm6, 1, %v13480_v4 }
  0xd6   : > { %v1931_v54 = vadd.s32 %v1929_v53, %v1927_v18  ;;  %v1949_v20 = vadd.s32 %v1947_v33, %v1941_v19  ;;  %vm1950_vm7 = vc.u32 %v1948_v1, %v1944_v49  ;;  %v7804_v27 = vsub.s32 32, %v7777_v58 }
  0xd7   : > { %v1813_v32 = vsel %vm1811_vm4, %v1812_v29, %v7791_v28  ;;  %v1923_v42 = vshrl.u32 %v1918_v30, 16  ;;  %v1951_v15 = vsel %vm1950_vm7, 1, %v13480_v4  ;;  %v13473_v55 = vand.u32 2147483647, %v7583_v63 }
  0xd8   : > { %v1814_v23 = vclz %v1813_v32  ;;  %v1932_v50 = vadd.s32 %v1931_v54, %v1921_v5  ;;  %v1943_v9 = vshrl.u32 %v1939_v40, 16  ;;  %v1953_v35 = vadd.s32 %v1951_v15, %v1949_v20 }
  0xd9   : > { %v7120_v59 = vadd.s32 4294967169, %v782_v24  ;;  %vm1710_vm8 = vcmp.lt.s32.totalorder %v7574_v43, 0  ;;  %v1802_v37 = vadd.s32 %v7709_v22, %v7723_v21  ;;  %v1832_v61 = vsub.s32 4, %v7779_v34 }
  0xda   : > { %v7139_v3 = vadd.s32 4294967294, %v1814_v23  ;;  %v1956_v29 = vmul.u32 %v7760_v57, %v7795_v52  ;;  %v7814_v30 = vadd.s32 %v1932_v50, %v1923_v42  ;;  %v1945_v18 = vshrl.u32 %v1940_v0, 16 }
  0xdb   : > { %v1954_v19 = vadd.s32 %v1953_v35, %v1943_v9  ;;  %v7816_v5 = vadd.s32 %v1948_v1, %v1944_v49  ;;  %v1405_v24 = vand.u32 8388607, %v13473_v55  ;;  %v1415_v40 = vshll.u32 %v13476_v48, %v7658_v25 }
  0xdc   : > { %vm7140_vm9 = vcmp.lt.s32.totalorder %v7139_v3, 0  ;;  %vm7824_vm10 = vcmp.le.f32.partialorder %v1708_v13, 0.7853982  ;;  %v1416_v0 = vshrl.u32 %v13474_v39, %v7688_v10  ;;  %v1418_v1 = vshll.u32 %v13474_v39, %v7658_v25 }
  0xdd   : > { %v1817_v32 = vsel %vm7140_vm9, 0, %v7139_v3  ;;  %v1955_v52 = vadd.s32 %v1954_v19, %v1945_v18  ;;  %vm1958_vm11 = vc.u32 %v7814_v30, %v7816_v5  ;;  %v1419_v13 = vshrl.u32 %v13482_v41, %v7688_v10 }
  0xde   : > { %v1818_v21 = vsub.s32 32, %v1817_v32  ;;  %v1822_v57 = vsub.s32 4294967266, %v1817_v32  ;;  %v1819_v49 = vshll.u32 %v7791_v28, %v1817_v32  ;;  %v1422_v54 = vshrl.u32 %v13486_v51, %v7688_v10 }
  0xdf   : > { %v1959_v23 = vadd.s32 1, %v1955_v52  ;;  %v1421_v20 = vshll.u32 %v13482_v41, %v7658_v25  ;;  %v1424_v28 = vshll.u32 %v13486_v51, %v7658_v25  ;;  %v1425_v42 = vshrl.u32 %v13489_v44, %v7688_v10 }
  0xe0   : > { %v1820_v53 = vshrl.u32 %v1802_v37, %v1818_v21  ;;  %v1823_v33 = vadd.s32 127, %v1822_v57  ;;  %v1428_v15 = vshrl.u32 %v13478_v56, %v7688_v10  ;;  %v1427_v35 = vshll.u32 %v13489_v44, %v7658_v25 }
  0xe1   : > { %v1960_v9 = vsel %vm1958_vm11, %v1959_v23, %v1955_v52  ;;  %v7849_v18 = vor.u32 %v1419_v13, %v1418_v1  ;;  %v1423_v19 = vor.u32 %v1422_v54, %v1421_v20  ;;  %v1426_v32 = vor.u32 %v1425_v42, %v1424_v28 }
  0xe2   : > { %v1821_v3 = vor.u32 %v1820_v53, %v1819_v49  ;;  %v1824_v50 = vshll.u32 %v1823_v33, 23  ;;  %v1961_v37 = vadd.s32 %v1960_v9, %v1956_v29  ;;  %v1833_v57 = vsel %vm1710_vm8, %v1832_v61, %v7779_v34 }
  0xe3   : > { %v7854_v55 = vor.u32 %v1416_v0, %v1415_v40  ;;  %v1429_v39 = vor.u32 %v1428_v15, %v1427_v35  ;;  %v7123_v49 = vadd.s32 4294967169, %v7789_v45  ;;  %v1406_v52 = vor.u32 8388608, %v1405_v24 }
  0xe4   : > { %v1825_v21 = vor.u32 4788187, %v1824_v50  ;;  %v1962_v53 = vadd.s32 536870912, %v1961_v37  ;;  %vm1433_vm12 = vcmp.lt.s32.totalorder %v7683_v7, 4  ;;  %v1828_v29 = vcvt.s32.f32 %v1821_v3 }
  0xe5   : > { %vm1430_vm13 = vcmp.lt.s32.totalorder %v7683_v7, 1  ;;  %v1439_v1 = vsel %vm1433_vm12, %v1426_v32, 920167782  ;;  %v1835_v13 = vsel %vm7824_vm10, 0, %v1833_v57  ;;  %vm1432_vm14 = vcmp.lt.s32.totalorder %v7683_v7, 3 }
  0xe6   : > { %v1826_v25 = vand.u32 2147483647, %v1825_v21  ;;  %v7863_v34 = vshrl.u32 %v1962_v53, 30  ;;  %v1442_v45 = vsel %vm1430_vm13, %v7849_v18, %v1423_v19  ;;  %v1438_v24 = vsel %vm1430_vm13, %v7854_v55, %v7849_v18 }
  0xe7   : > { %v1440_v40 = vsel %vm1432_vm14, %v1423_v19, %v1439_v1  ;;  %v1443_v0 = vsel %vm1433_vm12, %v1429_v39, 1326507024  ;;  %vm1431_vm15 = vcmp.lt.s32.totalorder %v7683_v7, 2  ;;  %v7881_v54 = vshll.u32 %v1406_v52, 8 }
  0xe8   : > { %v1829_v61 = vmul.f32 %v1828_v29, %v1826_v25  ;;  %v1964_v33 = vshll.u32 %v7863_v34, 30  ;;  %v1444_v23 = vsel %vm1432_vm14, %v1426_v32, %v1443_v0  ;;  %v7883_v20 = vadd.s32 1, %v7120_v59 }
  0xe9   : > { %v7885_v28 = vadd.s32 1, %v7123_v49  ;;  %v1445_v15 = vsel %vm1431_vm15, %v1442_v45, %v1444_v23  ;;  %v1852_v39 = vadd.s32 3, %v1835_v13  ;;  %v7894_v9 = vsel %vm1431_vm15, %v1438_v24, %v1440_v40 }
  0xea   : > { %v1830_v42 = vxor.u32 2147483648, %v1829_v61  ;;  %v7890_v50 = vsub.s32 %v1961_v37, %v1964_v33  ;;  %v1447_v59 = vand.u32 65535, %v7881_v54  ;;  %v1449_v32 = vand.u32 65535, %v1445_v15 }
  0xeb   : > { %v1450_v21 = vshrl.u32 %v1445_v15, 16  ;;  %v7907_v49 = vshrl.u32 %v7881_v54, 16  ;;  %v1414_v25 = vshrl.u32 %v13476_v48, %v7688_v10  ;;  %v7916_v22 = vand.u32 3, %v1852_v39 }
  0xec   : > { %v1831_v35 = vsel %vm1710_vm8, %v1830_v42, %v1829_v61  ;;  %vm1966_vm0 = vcmp.lt.s32.totalorder %v7890_v50, 0  ;;  %v1967_v37 = vsub.s32 0, %v7890_v50  ;;  %v1472_v45 = vshrl.u32 %v7894_v9, 16 }
  0xed   : > { %v7902_v57 = vsel %vm7824_vm10, %v7574_v43, %v1831_v35  ;;  %v7914_v29 = vmul.u32 %v1450_v21, %v1447_v59  ;;  %v7920_v13 = vmul.u32 %v1449_v32, %v7907_v49  ;;  %v1957_v33 = vadd.s32 %v7816_v5, %v7814_v30 }
  0xee   : > { %v1836_v52 = vmul.f32 %v7902_v57, %v7902_v57  ;;  %v1968_v1 = vsel %vm1966_vm0, %v1967_v37, %v7890_v50  ;;  %v1435_v10 = vsel %vm1433_vm12, %v1423_v19, 2102212464  ;;  %v1451_v23 = vmul.u32 %v1449_v32, %v1447_v59 }
  0xef   : > { %v1969_v40 = vclz %v1968_v1  ;;  %v1455_v0 = vshll.u32 %v7914_v29, 16  ;;  %v1471_v42 = vand.u32 65535, %v7894_v9  ;;  %v1454_v37 = vmul.u32 %v1450_v21, %v7907_v49 }
  0xf0   : > { %v1837_v61 = vmul.f32 -0.001358992, %v1836_v52  ;;  %v1844_v24 = vmul.f32 -0.00019511016, %v1836_v52  ;;  %v1457_v53 = vshll.u32 %v7920_v13, 16  ;;  %v7931_v3 = vmul.u32 %v1472_v45, %v1447_v59 }
  0xf1   : > { %v7142_v35 = vadd.s32 4294967294, %v1969_v40  ;;  %vm1459_vm1 = vc.u32 %v1451_v23, %v1455_v0  ;;  %v1461_v1 = vadd.s32 %v1455_v0, %v1451_v23  ;;  %v1434_v19 = vsel %vm1430_vm13, %v1414_v25, %v7854_v55 }
  0xf2   : > { %v1838_v15 = vadd.f32 0.041655596, %v1837_v61  ;;  %v1845_v39 = vadd.f32 0.008332121, %v1844_v24  ;;  %v1460_v30 = vsel %vm1459_vm1, 1, %v13480_v4  ;;  %vm1865_vm4 = vcmp.lt.s32.totalorder %v7581_v62, 0 }
  0xf3   : > { %vm7143_vm2 = vcmp.lt.s32.totalorder %v7142_v35, 0  ;;  %v1462_v9 = vadd.s32 %v1460_v30, %v1454_v37  ;;  %vm1463_vm3 = vc.u32 %v1461_v1, %v1457_v53  ;;  %v1475_v24 = vmul.u32 %v1471_v42, %v7907_v49 }
  0xf4   : > { %v1839_v48 = vmul.f32 %v1838_v15, %v1836_v52  ;;  %v1846_v56 = vmul.f32 %v1845_v39, %v1836_v52  ;;  %v1972_v5 = vsel %vm7143_vm2, 0, %v7142_v35  ;;  %vm789_vm5 = vcmp.gt.s32.totalorder %v7883_v20, 0 }
  0xf5   : > { %v1973_v61 = vsub.s32 32, %v1972_v5  ;;  %vm1855_vm6 = vcmp.eq.s32.totalorder %v7916_v22, 0  ;;  %vm1858_vm7 = vcmp.eq.s32.totalorder %v7916_v22, 2  ;;  %v1977_v40 = vsub.s32 4294967266, %v1972_v5 }
  0xf6   : > { %v1840_v32 = vadd.f32 -0.4999988, %v1839_v48  ;;  %v1847_v21 = vadd.f32 -0.16666654, %v1846_v56  ;;  %v1436_v55 = vsel %vm1432_vm14, %v7849_v18, %v1435_v10  ;;  %v1464_v53 = vsel %vm1463_vm3, 1, %v13480_v4 }
  0xf7   : > { %v1477_v48 = vshll.u32 %v7931_v3, 16  ;;  %vm944_vm8 = vcmp.gt.s32.totalorder %v7885_v28, 0  ;;  %vm1854_vm9 = vcmp.lt.s32.totalorder %v7916_v22, 2  ;;  %v1975_v0 = vshrl.u32 %v1957_v33, %v1973_v61 }
  0xf8   : > { %v1841_v56 = vmul.f32 %v1840_v32, %v1836_v52  ;;  %v1848_v25 = vmul.f32 %v1847_v21, %v1836_v52  ;;  %v1987_v23 = vsub.s32 4, %v7863_v34  ;;  %vm1851_vm10 = vweird.f32 %v7574_v43 }
  0xf9   : > { %v1974_v15 = vshll.u32 %v7890_v50, %v1972_v5  ;;  %v1978_v39 = vadd.s32 127, %v1977_v40  ;;  %v1466_v35 = vadd.s32 %v1464_v53, %v1462_v9  ;;  %v1473_v18 = vmul.u32 %v1471_v42, %v1447_v59 }
  0xfa   : > { %v1842_v10 = vadd.f32 1.0, %v1841_v56  ;;  %v1849_v37 = vadd.f32 1.0, %v1848_v25  ;;  %vm7954_vm11 = vcmp.le.f32.partialorder %v1863_v46, 0.7853982  ;;  %v1456_v52 = vshrl.u32 %v7914_v29, 16 }
  0xfb   : > { %v1479_v33 = vshll.u32 %v1475_v24, 16  ;;  %v1976_v30 = vor.u32 %v1975_v0, %v1974_v15  ;;  %v1979_v32 = vshll.u32 %v1978_v39, 23  ;;  %vm1481_vm12 = vc.u32 %v1473_v18, %v1477_v48 }
  0xfc   : > { %v1483_v21 = vadd.s32 %v1477_v48, %v1473_v18  ;;  %v1850_v50 = vmul.f32 %v1849_v37, %v7902_v57  ;;  %v1859_v5 = vxor.u32 2147483648, %v1842_v10  ;;  %vm13584_vm13 = vcmask 1043456  }
  0xfd   : > { %v1476_v59 = vmul.u32 %v1472_v45, %v7907_v49  ;;  %v1980_v42 = vor.u32 4788187, %v1979_v32  ;;  %v1467_v9 = vadd.s32 %v1466_v35, %v1456_v52  ;;  %v1482_v46 = vsel %vm1481_vm12, 1, %v13480_v4 }
  0xfe   : > { %vm1485_vm14 = vc.u32 %v1483_v21, %v1479_v33  ;;  %v1856_v61 = vxor.u32 2147483648, %v1850_v50  ;;  %v1437_v29 = vsel %vm1431_vm15, %v1434_v19, %v1436_v55  ;;  %v1983_v48 = vcvt.s32.f32 %v1976_v30 }
  0xff   : > { %v1484_v40 = vadd.s32 %v1482_v46, %v1476_v59  ;;  %v1486_v53 = vsel %vm1485_vm14, 1, %v13480_v4  ;;  %v1981_v56 = vand.u32 2147483647, %v1980_v42  ;;  %v1988_v57 = vsel %vm1865_vm4, %v1987_v23, %v7863_v34 }
 0x100   : > { %v1458_v49 = vshrl.u32 %v7920_v13, 16  ;;  %v1857_v45 = vsel %vm1855_vm6, %v1842_v10, %v1856_v61  ;;  %v1860_v25 = vsel %vm1858_vm7, %v1859_v5, %v1850_v50  ;;  %v1478_v7 = vshrl.u32 %v7931_v3, 16 }
 0x101   : > { %v1488_v19 = vadd.s32 %v1486_v53, %v1484_v40  ;;  %v1861_v55 = vsel %vm1854_vm9, %v1857_v45, %v1860_v25  ;;  %v1984_v0 = vmul.f32 %v1983_v48, %v1981_v56  ;;  %v1553_v39 = vand.u32 2147483647, %v7578_v60 }
 0x102   : > { %v7976_v15 = vadd.s32 %v1467_v9, %v1458_v49  ;;  %v7982_v34 = vsel %vm789_vm5, %v7883_v20, 0  ;;  %v1862_v13 = vsel %vm1851_vm10, nan, %v1861_v55  ;;  %v1480_v23 = vshrl.u32 %v1475_v24, 16 }
 0x103   : > { %v1489_v35 = vadd.s32 %v1488_v19, %v1478_v7  ;;  %v7989_v3 = vsel %vm944_vm8, %v7885_v28, 0  ;;  %7144 = vmatpush.msk.msra.mxu0 %vm13584_vm13, %v1862_v13  ;;  %v1985_v22 = vxor.u32 2147483648, %v1984_v0  ;;  %v1990_v18 = vsel %vm7954_vm11, 0, %v1988_v57 }
 0x104   : > { %v7994_v10 = vadd.s32 %v1483_v21, %v1479_v33  ;;  %v1491_v37 = vmul.u32 %v7881_v54, %v1437_v29  ;;  %v1574_v43 = vshrl.u32 %v13482_v41, %v7691_v6  ;;  %v1577_v24 = vshrl.u32 %v13486_v51, %v7691_v6 }
 0x105   : > { %v1490_v20 = vadd.s32 %v1489_v35, %v1480_v23  ;;  %v1986_v28 = vsel %vm1865_vm4, %v1985_v22, %v1984_v0  ;;  %v1560_v52 = vand.u32 8388607, %v1553_v39  ;;  %v13641_v33 = vmov 2475754826  }
 0x106   : > { %vm1493_vm15 = vc.u32 %v7976_v15, %v7994_v10  ;;  %v1573_v30 = vshll.u32 %v13641_v33, %v7664_v38  ;;  %v1989_v54 = vsel %vm7954_vm11, %v7581_v62, %v1986_v28  ;;  %v1576_v21 = vshll.u32 %v13482_v41, %v7664_v38 }
 0x107   : > { %v1494_v32 = vadd.s32 1, %v1490_v20  ;;  %v1580_v50 = vshrl.u32 %v13489_v44, %v7691_v6  ;;  %v1991_v5 = vmul.f32 %v1989_v54, %v1989_v54  ;;  %v1571_v59 = vshrl.u32 %v13641_v33, %v7691_v6 }
 0x108   : > { %v1582_v42 = vshll.u32 %v13489_v44, %v7664_v38  ;;  %v13642_v9 = vmov 1326507024   ;;  %v8022_v1 = vor.u32 %v1574_v43, %v1573_v30  ;;  %v8024_v29 = vor.u32 %v1577_v24, %v1576_v21 }
 0x109   : > { %v1583_v46 = vshrl.u32 %v13642_v9, %v7691_v6  ;;  %v1495_v61 = vsel %vm1493_vm15, %v1494_v32, %v1490_v20  ;;  %v1579_v40 = vshll.u32 %v13486_v51, %v7664_v38  ;;  %v1992_v53 = vmul.f32 -0.001358992, %v1991_v5 }
 0x10a   : > { %v1999_v56 = vmul.f32 -0.00019511016, %v1991_v5  ;;  %v1496_v48 = vadd.s32 %v1495_v61, %v1491_v37  ;;  %v2007_v49 = vadd.s32 3, %v1990_v18  ;;  %v1561_v45 = vor.u32 8388608, %v1560_v52 }
 0x10b   : > { %v1584_v57 = vor.u32 %v1583_v46, %v1582_v42  ;;  %v13643_v25 = vmov 683565275   ;;  %v1581_v19 = vor.u32 %v1580_v50, %v1579_v40  ;;  %v1993_v55 = vadd.f32 0.041655596, %v1992_v53 }
 0x10c   : > { %v1570_v7 = vshll.u32 %v13643_v25, %v7664_v38  ;;  %v2000_v0 = vadd.f32 0.008332121, %v1999_v56  ;;  %v1497_v13 = vadd.s32 536870912, %v1496_v48  ;;  %vm1588_vm0 = vcmp.lt.s32.totalorder %v7685_v8, 4 }
 0x10d   : > { %vm1585_vm1 = vcmp.lt.s32.totalorder %v7685_v8, 1  ;;  %vm1587_vm2 = vcmp.lt.s32.totalorder %v7685_v8, 3  ;;  %v1598_v35 = vsel %vm1588_vm0, %v1584_v57, 1326507024  ;;  %v1994_v22 = vmul.f32 %v1993_v55, %v1991_v5 }
 0x10e   : > { %v8031_v23 = vor.u32 %v1571_v59, %v1570_v7  ;;  %v2001_v18 = vmul.f32 %v2000_v0, %v1991_v5  ;;  %v8037_v20 = vshrl.u32 %v1497_v13, 30  ;;  %v1597_v38 = vsel %vm1585_vm1, %v8022_v1, %v8024_v29 }
 0x10f   : > { %v13644_v37 = vand.u32 2139095040, %v7629_v16  ;;  %v1594_v24 = vsel %vm1588_vm0, %v1581_v19, 920167782  ;;  %v1599_v28 = vsel %vm1587_vm2, %v1581_v19, %v1598_v35  ;;  %v8051_v52 = vshll.u32 %v1561_v45, 8 }
 0x110   : > { %v1995_v30 = vadd.f32 -0.4999988, %v1994_v22  ;;  %v2002_v32 = vadd.f32 -0.16666654, %v2001_v18  ;;  %v1499_v21 = vshll.u32 %v8037_v20, 30  ;;  %vm1586_vm3 = vcmp.lt.s32.totalorder %v7685_v8, 2 }
 0x111   : > { %v8045_v43 = vshrl.u32 %v13644_v37, 23  ;;  %v13645_v50 = vand.u32 2139095040, %v7631_v17  ;;  %v2008_v42 = vand.u32 3, %v2007_v49  ;;  %v1593_v46 = vsel %vm1585_vm1, %v8031_v23, %v8022_v1 }
 0x112   : > { %v1600_v61 = vsel %vm1586_vm3, %v1597_v38, %v1599_v28  ;;  %v1996_v40 = vmul.f32 %v1995_v30, %v1991_v5  ;;  %v2003_v53 = vmul.f32 %v2002_v32, %v1991_v5  ;;  %v8065_v56 = vsub.s32 %v1496_v48, %v1499_v21 }
 0x113   : > { %v8057_v59 = vshrl.u32 %v13645_v50, 23  ;;  %v1595_v57 = vsel %vm1587_vm2, %v8024_v29, %v1594_v24  ;;  %vm2006_vm4 = vweird.f32 %v7581_v62  ;;  %v1602_v49 = vand.u32 65535, %v8051_v52 }
 0x114   : > { %v1603_v45 = vshrl.u32 %v8051_v52, 16  ;;  %v1604_v7 = vand.u32 65535, %v1600_v61  ;;  %v1605_v19 = vshrl.u32 %v1600_v61, 16  ;;  %v1997_v55 = vadd.f32 1.0, %v1996_v40 }
 0x115   : > { %v2004_v0 = vadd.f32 1.0, %v2003_v53  ;;  %vm1501_vm5 = vcmp.lt.s32.totalorder %v8065_v56, 0  ;;  %v1502_v5 = vsub.s32 0, %v8065_v56  ;;  %vm2009_vm6 = vcmp.lt.s32.totalorder %v2008_v42, 2 }
 0x116   : > { %v1596_v48 = vsel %vm1586_vm3, %v1593_v46, %v1595_v57  ;;  %v1607_v13 = vmul.u32 %v1605_v19, %v1602_v49  ;;  %v8077_v35 = vmul.u32 %v1604_v7, %v1603_v45  ;;  %vm2010_vm7 = vcmp.eq.s32.totalorder %v2008_v42, 0 }
 0x117   : > { %v2005_v22 = vmul.f32 %v2004_v0, %v1989_v54  ;;  %v2014_v18 = vxor.u32 2147483648, %v1997_v55  ;;  %v1503_v38 = vsel %vm1501_vm5, %v1502_v5, %v8065_v56  ;;  %vm2013_vm8 = vcmp.eq.s32.totalorder %v2008_v42, 2 }
 0x118   : > { %v1492_v37 = vadd.s32 %v7994_v10, %v7976_v15  ;;  %v1504_v24 = vclz %v1503_v38  ;;  %v1610_v28 = vshll.u32 %v1607_v13, 16  ;;  %vm1400_vm9 = vcmp.lt.s32.totalorder %v7583_v63, 0 }
 0x119   : > { %v2011_v30 = vxor.u32 2147483648, %v2005_v22  ;;  %v1569_v32 = vshrl.u32 %v13643_v25, %v7691_v6  ;;  %v1606_v21 = vmul.u32 %v1604_v7, %v1602_v49  ;;  %v1626_v50 = vand.u32 65535, %v1596_v48 }
 0x11a   : > { %v2015_v46 = vsel %vm2013_vm8, %v2014_v18, %v2005_v22  ;;  %v7133_v54 = vadd.s32 4294967294, %v1504_v24  ;;  %v1609_v61 = vmul.u32 %v1605_v19, %v1603_v45  ;;  %v1612_v40 = vshll.u32 %v8077_v35, 16 }
 0x11b   : > { %v2012_v53 = vsel %vm2010_vm7, %v1997_v55, %v2011_v30  ;;  %vm1614_vm10 = vc.u32 %v1606_v21, %v1610_v28  ;;  %v1616_v57 = vadd.s32 %v1610_v28, %v1606_v21  ;;  %v1627_v15 = vshrl.u32 %v1596_v48, 16 }
 0x11c   : > { %v2016_v10 = vsel %vm2009_vm6, %v2012_v53, %v2015_v46  ;;  %vm7134_vm11 = vcmp.lt.s32.totalorder %v7133_v54, 0  ;;  %v1590_v0 = vsel %vm1588_vm0, %v8024_v29, 2102212464  ;;  %v1615_v6 = vsel %vm1614_vm10, 1, %v13480_v4 }
 0x11d   : > { %v2017_v7 = vsel %vm2006_vm4, nan, %v2016_v10  ;;  %v13646_v19 = vand.u32 2147483647, %v7583_v63  ;;  %v1507_v55 = vsel %vm7134_vm11, 0, %v7133_v54  ;;  %v1617_v48 = vadd.s32 %v1615_v6, %v1609_v61 }
 0x11e   : > { %vm1618_vm14 = vc.u32 %v1616_v57, %v1612_v40  ;;  %7154 = vmatpush.msk.msra.mxu1 %vm13584_vm13, %v2017_v7  ;;  %v1508_v42 = vsub.s32 32, %v1507_v55  ;;  %v1512_v22 = vsub.s32 4294967266, %v1507_v55  ;;  %v1522_v29 = vsub.s32 4, %v8037_v20 }
 0x11f   : > { %vm8096_vm12 = vcmp.le.f32.partialorder %v13646_v19, 0.7853982  ;;  %v1619_v18 = vsel %vm1618_vm14, 1, %v13480_v4  ;;  %v1589_v62 = vsel %vm1585_vm1, %v1569_v32, %v8031_v23  ;;  %v1629_v24 = vmul.u32 %v1627_v15, %v1602_v49 }
 0x120   : > { %v1621_v38 = vadd.s32 %v1619_v18, %v1617_v48  ;;  %v1630_v28 = vmul.u32 %v1626_v50, %v1603_v45  ;;  %v1509_v30 = vshll.u32 %v8065_v56, %v1507_v55  ;;  %v1510_v21 = vshrl.u32 %v1492_v37, %v1508_v42 }
 0x121   : > { %v1513_v46 = vadd.s32 127, %v1512_v22  ;;  %v1088_v54 = vand.u32 2147483647, %v7590_v11  ;;  %v1591_v61 = vsel %vm1587_vm2, %v8022_v1, %v1590_v0  ;;  %v1611_v40 = vshrl.u32 %v1607_v13, 16 }
 0x122   : > { %v1628_v53 = vmul.u32 %v1626_v50, %v1602_v49  ;;  %v1632_v57 = vshll.u32 %v1629_v24, 16  ;;  %v1511_v10 = vor.u32 %v1510_v21, %v1509_v30  ;;  %v1523_v23 = vsel %vm1400_vm9, %v1522_v29, %v8037_v20 }
 0x123   : > { %v1514_v6 = vshll.u32 %v1513_v46, 23  ;;  %v1631_v32 = vmul.u32 %v1627_v15, %v1603_v45  ;;  %v1622_v7 = vadd.s32 %v1621_v38, %v1611_v40  ;;  %v1634_v56 = vshll.u32 %v1630_v28, 16 }
 0x124   : > { %vm1636_vm15 = vc.u32 %v1628_v53, %v1632_v57  ;;  %v1638_v37 = vadd.s32 %v1632_v57, %v1628_v53  ;;  %v8115_v19 = vshrl.u32 %v7982_v34, 5  ;;  %v1095_v49 = vand.u32 8388607, %v1088_v54 }
 0x125   : > { %v1515_v55 = vor.u32 4788187, %v1514_v6  ;;  %v1637_v1 = vsel %vm1636_vm15, 1, %v13480_v4  ;;  %v1592_v13 = vsel %vm1586_vm3, %v1589_v62, %v1591_v61  ;;  %v1613_v50 = vshrl.u32 %v8077_v35, 16 }
 0x126   : > { %v1639_v20 = vadd.s32 %v1637_v1, %v1631_v32  ;;  %vm1640_vm0 = vc.u32 %v1638_v37, %v1634_v56  ;;  %v1518_v15 = vcvt.s32.f32 %v1511_v10  ;;  %v1525_v0 = vsel %vm8096_vm12, 0, %v1523_v23 }
 0x127   : > { %v1516_v45 = vand.u32 2147483647, %v1515_v55  ;;  %v1641_v48 = vsel %vm1640_vm0, 1, %v13480_v4  ;;  %v8126_v42 = vadd.s32 %v1622_v7, %v1613_v50  ;;  %v1633_v22 = vshrl.u32 %v1629_v24, 16 }
 0x128   : > { %v1635_v29 = vshrl.u32 %v1630_v28, 16  ;;  %v1643_v18 = vadd.s32 %v1641_v48, %v1639_v20  ;;  %v8128_v30 = vadd.s32 %v1638_v37, %v1634_v56  ;;  %v1096_v8 = vor.u32 8388608, %v1095_v49 }
 0x129   : > { %v1519_v38 = vmul.f32 %v1518_v15, %v1516_v45  ;;  %v1109_v35 = vshrl.u32 %v13482_v41, %v7787_v47  ;;  %v1112_v21 = vshrl.u32 %v13486_v51, %v7787_v47  ;;  %v1114_v46 = vshll.u32 %v13486_v51, %v7767_v31 }
 0x12a   : > { %v1644_v62 = vadd.s32 %v1643_v18, %v1633_v22  ;;  %v1115_v61 = vshrl.u32 %v13489_v44, %v7787_v47  ;;  %v1108_v28 = vshll.u32 %v13641_v33, %v7767_v31  ;;  %v1111_v40 = vshll.u32 %v13482_v41, %v7767_v31 }
 0x12b   : > { %v1520_v24 = vxor.u32 2147483648, %v1519_v38  ;;  %v1118_v53 = vshrl.u32 %v13642_v9, %v7787_v47  ;;  %v1106_v10 = vshrl.u32 %v13641_v33, %v7787_v47  ;;  %v1117_v23 = vshll.u32 %v13489_v44, %v7767_v31 }
 0x12c   : > { %v1645_v57 = vadd.s32 %v1644_v62, %v1635_v29  ;;  %v1116_v6 = vor.u32 %v1115_v61, %v1114_v46  ;;  %vm1648_vm1 = vc.u32 %v8126_v42, %v8128_v30  ;;  %v8152_v7 = vor.u32 %v1109_v35, %v1108_v28 }
 0x12d   : > { %v1521_v32 = vsel %vm1400_vm9, %v1520_v24, %v1519_v38  ;;  %v1113_v56 = vor.u32 %v1112_v21, %v1111_v40  ;;  %v1105_v1 = vshll.u32 %v13643_v25, %v7767_v31  ;;  %v1119_v49 = vor.u32 %v1118_v53, %v1117_v23 }
 0x12e   : > { %v8157_v37 = vsel %vm8096_vm12, %v7583_v63, %v1521_v32  ;;  %v1649_v55 = vadd.s32 1, %v1645_v57  ;;  %v1542_v20 = vadd.s32 3, %v1525_v0  ;;  %v1646_v45 = vmul.u32 %v8051_v52, %v1592_v13 }
 0x12f   : > { %v1526_v50 = vmul.f32 %v8157_v37, %v8157_v37  ;;  %vm1123_vm2 = vcmp.lt.s32.totalorder %v7765_v14, 4  ;;  %v8165_v48 = vor.u32 %v1106_v10, %v1105_v1  ;;  %vm1120_vm3 = vcmp.lt.s32.totalorder %v7765_v14, 1 }
 0x130   : > { %v1650_v15 = vsel %vm1648_vm1, %v1649_v55, %v1645_v57  ;;  %v1129_v5 = vsel %vm1123_vm2, %v1116_v6, 920167782  ;;  %v1132_v18 = vsel %vm1120_vm3, %v8152_v7, %v1113_v56  ;;  %vm1121_vm4 = vcmp.lt.s32.totalorder %v7765_v14, 2 }
 0x131   : > { %v1527_v22 = vmul.f32 -0.001358992, %v1526_v50  ;;  %v1534_v29 = vmul.f32 -0.00019511016, %v1526_v50  ;;  %v1651_v31 = vadd.s32 %v1650_v15, %v1646_v45  ;;  %vm1122_vm5 = vcmp.lt.s32.totalorder %v7765_v14, 3 }
 0x132   : > { %v1133_v52 = vsel %vm1123_vm2, %v1119_v49, 1326507024  ;;  %v8177_v13 = vshll.u32 %v1096_v8, 8  ;;  %v1543_v21 = vand.u32 3, %v1542_v20  ;;  %v1128_v46 = vsel %vm1120_vm3, %v8165_v48, %v8152_v7 }
 0x133   : > { %v1528_v0 = vadd.f32 0.041655596, %v1527_v22  ;;  %v1535_v38 = vadd.f32 0.008332121, %v1534_v29  ;;  %v1652_v35 = vadd.s32 536870912, %v1651_v31  ;;  %v1134_v62 = vsel %vm1122_vm5, %v1116_v6, %v1133_v52 }
 0x134   : > { %v1130_v61 = vsel %vm1122_vm5, %v1113_v56, %v1129_v5  ;;  %v1135_v24 = vsel %vm1121_vm4, %v1132_v18, %v1134_v62  ;;  %v8192_v57 = vand.u32 31, %v7982_v34  ;;  %v1137_v10 = vand.u32 65535, %v8177_v13 }
 0x135   : > { %v1529_v8 = vmul.f32 %v1528_v0, %v1526_v50  ;;  %v1536_v28 = vmul.f32 %v1535_v38, %v1526_v50  ;;  %v8189_v40 = vshrl.u32 %v1652_v35, 30  ;;  %v1139_v53 = vand.u32 65535, %v1135_v24 }
 0x136   : > { %v1138_v6 = vshrl.u32 %v8177_v13, 16  ;;  %v1140_v23 = vshrl.u32 %v1135_v24, 16  ;;  %v1131_v49 = vsel %vm1121_vm4, %v1128_v46, %v1130_v61  ;;  %vm1545_vm6 = vcmp.eq.s32.totalorder %v1543_v21, 0 }
 0x137   : > { %v1530_v32 = vadd.f32 -0.4999988, %v1529_v8  ;;  %v1537_v55 = vadd.f32 -0.16666654, %v1536_v28  ;;  %v1654_v1 = vshll.u32 %v8189_v40, 30  ;;  %vm1548_vm7 = vcmp.eq.s32.totalorder %v1543_v21, 2 }
 0x138   : > { %v1104_v20 = vshrl.u32 %v13643_v25, %v7787_v47  ;;  %v1142_v45 = vmul.u32 %v1140_v23, %v1137_v10  ;;  %v1143_v34 = vmul.u32 %v1139_v53, %v1138_v6  ;;  %vm1544_vm8 = vcmp.lt.s32.totalorder %v1543_v21, 2 }
 0x139   : > { %v1531_v15 = vmul.f32 %v1530_v32, %v1526_v50  ;;  %v1538_v5 = vmul.f32 %v1537_v55, %v1526_v50  ;;  %v1655_v22 = vsub.s32 %v1651_v31, %v1654_v1  ;;  %v1125_v29 = vsel %vm1123_vm2, %v1113_v56, 2102212464 }
 0x13a   : > { %vm1541_vm9 = vweird.f32 %v7583_v63  ;;  %v1141_v18 = vmul.u32 %v1139_v53, %v1137_v10  ;;  %v1145_v52 = vshll.u32 %v1142_v45, 16  ;;  %v1161_v0 = vand.u32 65535, %v1131_v49 }
 0x13b   : > { %v1162_v38 = vshrl.u32 %v1131_v49, 16  ;;  %v1532_v35 = vadd.f32 1.0, %v1531_v15  ;;  %v1539_v62 = vadd.f32 1.0, %v1538_v5  ;;  %vm1656_vm10 = vcmp.lt.s32.totalorder %v1655_v22, 0 }
 0x13c   : > { %v1657_v46 = vsub.s32 0, %v1655_v22  ;;  %v1144_v47 = vmul.u32 %v1140_v23, %v1138_v6  ;;  %v1147_v61 = vshll.u32 %v1143_v34, 16  ;;  %vm1149_vm11 = vc.u32 %v1141_v18, %v1145_v52 }
 0x13d   : > { %v1151_v24 = vadd.s32 %v1145_v52, %v1141_v18  ;;  %v1540_v50 = vmul.f32 %v1539_v62, %v8157_v37  ;;  %v1549_v31 = vxor.u32 2147483648, %v1532_v35  ;;  %v1150_v56 = vsel %vm1149_vm11, 1, %v13480_v4 }
 0x13e   : > { %v1658_v8 = vsel %vm1656_vm10, %v1657_v46, %v1655_v22  ;;  %v1647_v28 = vadd.s32 %v8128_v30, %v8126_v42  ;;  %v1152_v32 = vadd.s32 %v1150_v56, %v1144_v47  ;;  %v1124_v23 = vsel %vm1120_vm3, %v1104_v20, %v8165_v48 }
 0x13f   : > { %v1659_v53 = vclz %v1658_v8  ;;  %vm1153_vm12 = vc.u32 %v1151_v24, %v1147_v61  ;;  %v1546_v55 = vxor.u32 2147483648, %v1540_v50  ;;  %v1164_v49 = vmul.u32 %v1162_v38, %v1137_v10 }
 0x140   : > { %v1154_v1 = vsel %vm1153_vm12, 1, %v13480_v4  ;;  %v1126_v37 = vsel %vm1122_vm5, %v8152_v7, %v1125_v29  ;;  %v1146_v5 = vshrl.u32 %v1142_v45, 16  ;;  %v1165_v18 = vmul.u32 %v1161_v0, %v1138_v6 }
 0x141   : > { %v7136_v15 = vadd.s32 4294967294, %v1659_v53  ;;  %v1547_v42 = vsel %vm1545_vm6, %v1532_v35, %v1546_v55  ;;  %v1550_v30 = vsel %vm1548_vm7, %v1549_v31, %v1540_v50  ;;  %v1156_v52 = vadd.s32 %v1154_v1, %v1152_v32 }
 0x142   : > { %v1167_v62 = vshll.u32 %v1164_v49, 16  ;;  %v1551_v46 = vsel %vm1544_vm8, %v1547_v42, %v1550_v30  ;;  %v1677_v48 = vsub.s32 4, %v8189_v40  ;;  %v1163_v20 = vmul.u32 %v1161_v0, %v1137_v10 }
 0x143   : > { %vm7137_vm14 = vcmp.lt.s32.totalorder %v7136_v15, 0  ;;  %v1552_v47 = vsel %vm1541_vm9, nan, %v1551_v46  ;;  %v1148_v24 = vshrl.u32 %v1143_v34, 16  ;;  %v1157_v7 = vadd.s32 %v1156_v52, %v1146_v5 }
 0x144   : > { %v1662_v61 = vsel %vm7137_vm14, 0, %v7136_v15  ;;  %2128 = vmatpush.msra.mxu0 %v1552_v47  ;;  %v1166_v35 = vmul.u32 %v1162_v38, %v1138_v6  ;;  %vm1171_vm15 = vc.u32 %v1163_v20, %v1167_v62  ;;  %v1169_v31 = vshll.u32 %v1165_v18, 16 }
 0x145   : > { %v1663_v45 = vsub.s32 32, %v1662_v61  ;;  %v1667_v29 = vsub.s32 4294967266, %v1662_v61  ;;  %v1664_v50 = vshll.u32 %v1655_v22, %v1662_v61  ;;  %v1172_v21 = vsel %vm1171_vm15, 1, %v13480_v4 }
 0x146   : > { %v1173_v8 = vadd.s32 %v1167_v62, %v1163_v20  ;;  %v8222_v32 = vadd.s32 %v1157_v7, %v1148_v24  ;;  %v1174_v10 = vadd.s32 %v1172_v21, %v1166_v35  ;;  %v8225_v63 = vshrl.u32 %v7989_v3, 5 }
 0x147   : > { %v1665_v56 = vshrl.u32 %v1647_v28, %v1663_v45  ;;  %v1668_v53 = vadd.s32 127, %v1667_v29  ;;  %vm1555_vm0 = vcmp.lt.s32.totalorder %v7578_v60, 0  ;;  %v1243_v34 = vand.u32 2147483647, %v7592_v12 }
 0x148   : > { %vm1175_vm1 = vc.u32 %v1173_v8, %v1169_v31  ;;  %v8230_v38 = vadd.s32 %v1173_v8, %v1169_v31  ;;  %vm8234_vm2 = vcmp.le.f32.partialorder %v1553_v39, 0.7853982  ;;  %v1127_v55 = vsel %vm1121_vm4, %v1124_v23, %v1126_v37 }
 0x149   : > { %v1666_v6 = vor.u32 %v1665_v56, %v1664_v50  ;;  %v1669_v0 = vshll.u32 %v1668_v53, 23  ;;  %v1176_v22 = vsel %vm1175_vm1, 1, %v13480_v4  ;;  %v1168_v1 = vshrl.u32 %v1164_v49, 16 }
 0x14a   : > { %v1178_v15 = vadd.s32 %v1176_v22, %v1174_v10  ;;  %v1678_v42 = vsel %vm1555_vm0, %v1677_v48, %v8189_v40  ;;  %v1170_v30 = vshrl.u32 %v1165_v18, 16  ;;  %vm1183_vm3 = vc.u32 %v8222_v32, %v8230_v38 }
 0x14b   : > { %v1670_v5 = vor.u32 4788187, %v1669_v0  ;;  %v1673_v52 = vcvt.s32.f32 %v1666_v6  ;;  %v1250_v39 = vand.u32 8388607, %v1243_v34  ;;  %v1264_v14 = vshrl.u32 %v13482_v41, %v7804_v27 }
 0x14c   : > { %v1179_v62 = vadd.s32 %v1178_v15, %v1168_v1  ;;  %v1261_v49 = vshrl.u32 %v13641_v33, %v7804_v27  ;;  %v1263_v37 = vshll.u32 %v13641_v33, %v7777_v58  ;;  %v1267_v40 = vshrl.u32 %v13486_v51, %v7804_v27 }
 0x14d   : > { %v1671_v23 = vand.u32 2147483647, %v1670_v5  ;;  %v1266_v46 = vshll.u32 %v13482_v41, %v7777_v58  ;;  %v1269_v48 = vshll.u32 %v13486_v51, %v7777_v58  ;;  %v1270_v20 = vshrl.u32 %v13489_v44, %v7804_v27 }
 0x14e   : > { %v1180_v18 = vadd.s32 %v1179_v62, %v1170_v30  ;;  %v1260_v61 = vshll.u32 %v13643_v25, %v7777_v58  ;;  %v1272_v24 = vshll.u32 %v13489_v44, %v7777_v58  ;;  %v1273_v7 = vshrl.u32 %v13642_v9, %v7804_v27 }
 0x14f   : > { %v1674_v47 = vmul.f32 %v1673_v52, %v1671_v23  ;;  %v8267_v29 = vor.u32 %v1264_v14, %v1263_v37  ;;  %v8269_v35 = vor.u32 %v1267_v40, %v1266_v46  ;;  %v1271_v50 = vor.u32 %v1270_v20, %v1269_v48 }
 0x150   : > { %v1184_v45 = vadd.s32 1, %v1180_v18  ;;  %v1680_v21 = vsel %vm8234_vm2, 0, %v1678_v42  ;;  %v1181_v8 = vmul.u32 %v8177_v13, %v1127_v55  ;;  %v1274_v56 = vor.u32 %v1273_v7, %v1272_v24 }
 0x151   : > { %v1675_v31 = vxor.u32 2147483648, %v1674_v47  ;;  %v1251_v53 = vor.u32 8388608, %v1250_v39  ;;  %v8277_v10 = vor.u32 %v1261_v49, %v1260_v61  ;;  %vm1278_vm4 = vcmp.lt.s32.totalorder %v7775_v2, 4 }
 0x152   : > { %v1185_v58 = vsel %vm1183_vm3, %v1184_v45, %v1180_v18  ;;  %vm1275_vm5 = vcmp.lt.s32.totalorder %v7775_v2, 1  ;;  %v1284_v22 = vsel %vm1278_vm4, %v1271_v50, 920167782  ;;  %v1697_v55 = vadd.s32 3, %v1680_v21 }
 0x153   : > { %v1676_v6 = vsel %vm1555_vm0, %v1675_v31, %v1674_v47  ;;  %v1186_v0 = vadd.s32 %v1185_v58, %v1181_v8  ;;  %vm1276_vm6 = vcmp.lt.s32.totalorder %v7775_v2, 2  ;;  %v1287_v1 = vsel %vm1275_vm5, %v8267_v29, %v8269_v35 }
 0x154   : > { %v8288_v13 = vsel %vm8234_vm2, %v7578_v60, %v1676_v6  ;;  %vm1277_vm7 = vcmp.lt.s32.totalorder %v7775_v2, 3  ;;  %v1288_v42 = vsel %vm1278_vm4, %v1274_v56, 1326507024  ;;  %v1283_v28 = vsel %vm1275_vm5, %v8277_v10, %v8267_v29 }
 0x155   : > { %v1681_v15 = vmul.f32 %v8288_v13, %v8288_v13  ;;  %v1187_v5 = vadd.s32 536870912, %v1186_v0  ;;  %v1285_v30 = vsel %vm1277_vm7, %v8269_v35, %v1284_v22  ;;  %v1289_v52 = vsel %vm1277_vm7, %v1271_v50, %v1288_v42 }
 0x156   : > { %v8309_v62 = vshll.u32 %v1251_v53, 8  ;;  %v1290_v49 = vsel %vm1276_vm6, %v1287_v1, %v1289_v52  ;;  %v1286_v61 = vsel %vm1276_vm6, %v1283_v28, %v1285_v30  ;;  %v8320_v24 = vsub.s32 32, %v8192_v57 }
 0x157   : > { %v1682_v39 = vmul.f32 -0.001358992, %v1681_v15  ;;  %v1689_v14 = vmul.f32 -0.00019511016, %v1681_v15  ;;  %v1188_v23 = vshrl.u32 %v1187_v5, 30  ;;  %v1294_v18 = vand.u32 65535, %v1290_v49 }
 0x158   : > { %v1292_v37 = vand.u32 65535, %v8309_v62  ;;  %v8315_v40 = vshrl.u32 %v8309_v62, 16  ;;  %v1295_v46 = vshrl.u32 %v1290_v49, 16  ;;  %v1698_v7 = vand.u32 3, %v1697_v55 }
 0x159   : > { %v1683_v48 = vadd.f32 0.041655596, %v1682_v39  ;;  %v1690_v20 = vadd.f32 0.008332121, %v1689_v14  ;;  %v1189_v47 = vshll.u32 %v1188_v23, 30  ;;  %vm1090_vm8 = vcmp.lt.s32.totalorder %v7590_v11, 0 }
 0x15a   : > { %v1297_v45 = vmul.u32 %v1295_v46, %v1292_v37  ;;  %v8323_v50 = vmul.u32 %v1294_v18, %v8315_v40  ;;  %v1259_v56 = vshrl.u32 %v13643_v25, %v7804_v27  ;;  %v1296_v58 = vmul.u32 %v1294_v18, %v1292_v37 }
 0x15b   : > { %v1684_v31 = vmul.f32 %v1683_v48, %v1681_v15  ;;  %v1691_v21 = vmul.f32 %v1690_v20, %v1681_v15  ;;  %v8326_v8 = vsub.s32 %v1186_v0, %v1189_v47  ;;  %v1317_v6 = vshrl.u32 %v1286_v61, 16 }
 0x15c   : > { %v1300_v53 = vshll.u32 %v1297_v45, 16  ;;  %vm1700_vm10 = vcmp.eq.s32.totalorder %v1698_v7, 0  ;;  %v1299_v5 = vmul.u32 %v1295_v46, %v8315_v40  ;;  %v1302_v42 = vshll.u32 %v8323_v50, 16 }
 0x15d   : > { %v1685_v22 = vadd.f32 -0.4999988, %v1684_v31  ;;  %v1692_v1 = vadd.f32 -0.16666654, %v1691_v21  ;;  %vm1191_vm9 = vcmp.lt.s32.totalorder %v8326_v8, 0  ;;  %v1192_v55 = vsub.s32 0, %v8326_v8 }
 0x15e   : > { %vm1304_vm11 = vc.u32 %v1296_v58, %v1300_v53  ;;  %v1306_v0 = vadd.s32 %v1300_v53, %v1296_v58  ;;  %vm1699_vm12 = vcmp.lt.s32.totalorder %v1698_v7, 2  ;;  %vm1696_vm14 = vweird.f32 %v7578_v60 }
 0x15f   : > { %v1686_v28 = vmul.f32 %v1685_v22, %v1681_v15  ;;  %v1693_v30 = vmul.f32 %v1692_v1, %v1681_v15  ;;  %v1193_v27 = vsel %vm1191_vm9, %v1192_v55, %v8326_v8  ;;  %v1305_v52 = vsel %vm1304_vm11, 1, %v13480_v4 }
 0x160   : > { %v1194_v39 = vclz %v1193_v27  ;;  %v1212_v14 = vsub.s32 4, %v1188_v23  ;;  %v1307_v49 = vadd.s32 %v1305_v52, %v1299_v5  ;;  %vm1308_vm15 = vc.u32 %v1306_v0, %v1302_v42 }
 0x161   : > { %v1687_v18 = vadd.f32 1.0, %v1686_v28  ;;  %v1694_v48 = vadd.f32 1.0, %v1693_v30  ;;  %v1309_v46 = vsel %vm1308_vm15, 1, %v13480_v4  ;;  %v1316_v20 = vand.u32 65535, %v1286_v61 }
 0x162   : > { %vm1703_vm0 = vcmp.eq.s32.totalorder %v1698_v7, 2  ;;  %vm8340_vm1 = vcmp.le.f32.partialorder %v1088_v54, 0.7853982  ;;  %v1182_v47 = vadd.s32 %v8230_v38, %v8222_v32  ;;  %v7127_v31 = vadd.s32 4294967294, %v1194_v39 }
 0x163   : > { %v1279_v21 = vsel %vm1275_vm5, %v1259_v56, %v8277_v10  ;;  %v1695_v58 = vmul.f32 %v1694_v48, %v8288_v13  ;;  %v1704_v53 = vxor.u32 2147483648, %v1687_v18  ;;  %v1311_v22 = vadd.s32 %v1309_v46, %v1307_v49 }
 0x164   : > { %v1319_v61 = vmul.u32 %v1317_v6, %v1292_v37  ;;  %vm7128_vm2 = vcmp.lt.s32.totalorder %v7127_v31, 0  ;;  %v1213_v54 = vsel %vm1090_vm8, %v1212_v14, %v1188_v23  ;;  %v1280_v1 = vsel %vm1278_vm4, %v8269_v35, 2102212464 }
 0x165   : > { %v1301_v55 = vshrl.u32 %v1297_v45, 16  ;;  %v1701_v32 = vxor.u32 2147483648, %v1695_v58  ;;  %v1197_v38 = vsel %vm7128_vm2, 0, %v7127_v31  ;;  %v1303_v5 = vshrl.u32 %v8323_v50, 16 }
 0x166   : > { %v1320_v10 = vmul.u32 %v1316_v20, %v8315_v40  ;;  %v1198_v56 = vsub.s32 32, %v1197_v38  ;;  %v1202_v13 = vsub.s32 4294967266, %v1197_v38  ;;  %v1318_v42 = vmul.u32 %v1316_v20, %v1292_v37 }
 0x167   : > { %v1322_v0 = vshll.u32 %v1319_v61, 16  ;;  %v1702_v28 = vsel %vm1700_vm10, %v1687_v18, %v1701_v32  ;;  %v1705_v30 = vsel %vm1703_vm0, %v1704_v53, %v1695_v58  ;;  %v1312_v23 = vadd.s32 %v1311_v22, %v1301_v55 }
 0x168   : > { %v1321_v27 = vmul.u32 %v1317_v6, %v8315_v40  ;;  %v1706_v35 = vsel %vm1699_vm12, %v1702_v28, %v1705_v30  ;;  %v1199_v45 = vshll.u32 %v8326_v8, %v1197_v38  ;;  %v1200_v52 = vshrl.u32 %v1182_v47, %v1198_v56 }
 0x169   : > { %v1203_v39 = vadd.s32 127, %v1202_v13  ;;  %v1707_v50 = vsel %vm1696_vm14, nan, %v1706_v35  ;;  %v1324_v14 = vshll.u32 %v1320_v10, 16  ;;  %vm1326_vm3 = vc.u32 %v1318_v42, %v1322_v0 }
 0x16a   : > { %v1328_v37 = vadd.s32 %v1322_v0, %v1318_v42  ;;  %2172 = vmatpush.msra.mxu1 %v1707_v50  ;;  %v1201_v49 = vor.u32 %v1200_v52, %v1199_v45  ;;  %v1281_v48 = vsel %vm1277_vm7, %v8267_v29, %v1280_v1  ;;  %v1327_v40 = vsel %vm1326_vm3, 1, %v13480_v4 }
 0x16b   : > { %v1204_v18 = vshll.u32 %v1203_v39, 23  ;;  %v1215_v7 = vsel %vm8340_vm1, 0, %v1213_v54  ;;  %v8370_v8 = vadd.s32 %v1312_v23, %v1303_v5  ;;  %v1329_v6 = vadd.s32 %v1327_v40, %v1321_v27 }
 0x16c   : > { %vm1330_vm4 = vc.u32 %v1328_v37, %v1324_v14  ;;  %v8373_v60 = vand.u32 31, %v7989_v3  ;;  %v778_v47 = vand.u32 2147483647, %v7601_v36  ;;  %v8378_v31 = vadd.s32 4294967169, %v8045_v43 }
 0x16d   : > { %v1205_v46 = vor.u32 4788187, %v1204_v18  ;;  %v1331_v20 = vsel %vm1330_vm4, 1, %v13480_v4  ;;  %v1323_v29 = vshrl.u32 %v1319_v61, 16  ;;  %v8380_v58 = vadd.s32 %v1328_v37, %v1324_v14 }
 0x16e   : > { %v1333_v53 = vadd.s32 %v1331_v20, %v1329_v6  ;;  %v1208_v54 = vcvt.s32.f32 %v1201_v49  ;;  %v1232_v1 = vadd.s32 3, %v1215_v7  ;;  %v1282_v55 = vsel %vm1276_vm6, %v1279_v21, %v1281_v48 }
 0x16f   : > { %v1206_v22 = vand.u32 2147483647, %v1205_v46  ;;  %v1325_v3 = vshrl.u32 %v1320_v10, 16  ;;  %vm1338_vm5 = vc.u32 %v8370_v8, %v8380_v58  ;;  %v799_v38 = vshrl.u32 %v13482_v41, %v8320_v24 }
 0x170   : > { %v1334_v32 = vadd.s32 %v1333_v53, %v1323_v29  ;;  %v785_v61 = vand.u32 8388607, %v778_v47  ;;  %v796_v5 = vshrl.u32 %v13641_v33, %v8320_v24  ;;  %v802_v56 = vshrl.u32 %v13486_v51, %v8320_v24 }
 0x171   : > { %v1209_v43 = vmul.f32 %v1208_v54, %v1206_v22  ;;  %v798_v21 = vshll.u32 %v13641_v33, %v8192_v57  ;;  %v801_v10 = vshll.u32 %v13482_v41, %v8192_v57  ;;  %v805_v13 = vshrl.u32 %v13489_v44, %v8320_v24 }
 0x172   : > { %v1335_v2 = vadd.s32 %v1334_v32, %v1325_v3  ;;  %v795_v0 = vshll.u32 %v13643_v25, %v8192_v57  ;;  %v807_v28 = vshll.u32 %v13489_v44, %v8192_v57  ;;  %v808_v30 = vshrl.u32 %v13642_v9, %v8320_v24 }
 0x173   : > { %v1210_v42 = vxor.u32 2147483648, %v1209_v43  ;;  %v8406_v27 = vor.u32 %v799_v38, %v798_v21  ;;  %v8408_v35 = vor.u32 %v802_v56, %v801_v10  ;;  %v804_v45 = vshll.u32 %v13486_v51, %v8192_v57 }
 0x174   : > { %v1339_v23 = vadd.s32 1, %v1335_v2  ;;  %v1336_v39 = vmul.u32 %v8309_v62, %v1282_v55  ;;  %v786_v50 = vor.u32 8388608, %v785_v61  ;;  %v809_v14 = vor.u32 %v808_v30, %v807_v28 }
 0x175   : > { %v1211_v52 = vsel %vm1090_vm8, %v1210_v42, %v1209_v43  ;;  %v8423_v18 = vor.u32 %v796_v5, %v795_v0  ;;  %v806_v48 = vor.u32 %v805_v13, %v804_v45  ;;  %vm810_vm6 = vcmp.lt.s32.totalorder %v8115_v19, 1 }
 0x176   : > { %v8418_v37 = vsel %vm8340_vm1, %v7590_v11, %v1211_v52  ;;  %v1340_v49 = vsel %vm1338_vm5, %v1339_v23, %v1335_v2  ;;  %vm813_vm7 = vcmp.lt.s32.totalorder %v8115_v19, 4  ;;  %v8429_v62 = vand.u32 3, %v1232_v1 }
 0x177   : > { %v1216_v57 = vmul.f32 %v8418_v37, %v8418_v37  ;;  %v1341_v40 = vadd.s32 %v1340_v49, %v1336_v39  ;;  %vm811_vm8 = vcmp.lt.s32.totalorder %v8115_v19, 2  ;;  %v822_v15 = vsel %vm810_vm6, %v8406_v27, %v8408_v35 }
 0x178   : > { %v823_v7 = vsel %vm813_vm7, %v809_v14, 1326507024  ;;  %vm812_vm9 = vcmp.lt.s32.totalorder %v8115_v19, 3  ;;  %v818_v29 = vsel %vm810_vm6, %v8423_v18, %v8406_v27  ;;  %v819_v53 = vsel %vm813_vm7, %v806_v48, 920167782 }
 0x179   : > { %v1217_v6 = vmul.f32 -0.001358992, %v1216_v57  ;;  %v1224_v46 = vmul.f32 -0.00019511016, %v1216_v57  ;;  %v1342_v20 = vadd.s32 536870912, %v1341_v40  ;;  %v824_v22 = vsel %vm812_vm9, %v806_v48, %v823_v7 }
 0x17a   : > { %v8447_v54 = vshll.u32 %v786_v50, 8  ;;  %v825_v32 = vsel %vm811_vm8, %v822_v15, %v824_v22  ;;  %v820_v10 = vsel %vm812_vm9, %v8408_v35, %v819_v53  ;;  %v8464_v13 = vsub.s32 32, %v8373_v60 }
 0x17b   : > { %v1218_v1 = vadd.f32 0.041655596, %v1217_v6  ;;  %v1225_v55 = vadd.f32 0.008332121, %v1224_v46  ;;  %v8449_v3 = vshrl.u32 %v1342_v20, 30  ;;  %v829_v61 = vand.u32 65535, %v825_v32 }
 0x17c   : > { %v8454_v38 = vand.u32 65535, %v8447_v54  ;;  %v8457_v43 = vshrl.u32 %v8447_v54, 16  ;;  %v830_v5 = vshrl.u32 %v825_v32, 16  ;;  %v8467_v42 = vadd.s32 4294967169, %v8057_v59 }
 0x17d   : > { %v1219_v56 = vmul.f32 %v1218_v1, %v1216_v57  ;;  %v1226_v2 = vmul.f32 %v1225_v55, %v1216_v57  ;;  %v1344_v21 = vshll.u32 %v8449_v3, 30  ;;  %v8474_v30 = vadd.s32 1, %v8378_v31 }
 0x17e   : > { %v832_v0 = vmul.u32 %v830_v5, %v8454_v38  ;;  %v8471_v28 = vmul.u32 %v829_v61, %v8457_v43  ;;  %vm1235_vm10 = vcmp.eq.s32.totalorder %v8429_v62, 0  ;;  %v794_v39 = vshrl.u32 %v13643_v25, %v8320_v24 }
 0x17f   : > { %v1220_v23 = vadd.f32 -0.4999988, %v1219_v56  ;;  %v1227_v45 = vadd.f32 -0.16666654, %v1226_v2  ;;  %v8476_v52 = vsub.s32 %v1341_v40, %v1344_v21  ;;  %v821_v59 = vsel %vm811_vm8, %v818_v29, %v820_v10 }
 0x180   : > { %v831_v50 = vmul.u32 %v829_v61, %v8454_v38  ;;  %v835_v14 = vshll.u32 %v832_v0, 16  ;;  %vm1234_vm11 = vcmp.lt.s32.totalorder %v8429_v62, 2  ;;  %vm1245_vm12 = vcmp.lt.s32.totalorder %v7592_v12, 0 }
 0x181   : > { %v1221_v49 = vmul.f32 %v1220_v23, %v1216_v57  ;;  %v1228_v48 = vmul.f32 %v1227_v45, %v1216_v57  ;;  %vm1346_vm14 = vcmp.lt.s32.totalorder %v8476_v52, 0  ;;  %v1347_v31 = vsub.s32 0, %v8476_v52 }
 0x182   : > { %vm1231_vm15 = vweird.f32 %v7590_v11  ;;  %v834_v24 = vmul.u32 %v830_v5, %v8457_v43  ;;  %v837_v40 = vshll.u32 %v8471_v28, 16  ;;  %vm839_vm0 = vc.u32 %v831_v50, %v835_v14 }
 0x183   : > { %v841_v15 = vadd.s32 %v835_v14, %v831_v50  ;;  %v1222_v7 = vadd.f32 1.0, %v1221_v49  ;;  %v1229_v6 = vadd.f32 1.0, %v1228_v48  ;;  %v1348_v57 = vsel %vm1346_vm14, %v1347_v31, %v8476_v52 }
 0x184   : > { %v840_v46 = vsel %vm839_vm0, 1, %v13480_v4  ;;  %v1349_v20 = vclz %v1348_v57  ;;  %v815_v29 = vsel %vm813_vm7, %v8408_v35, 2102212464  ;;  %vm479_vm2 = vcmp.gt.s32.totalorder %v8474_v30, 0 }
 0x185   : > { %v842_v53 = vadd.s32 %v840_v46, %v834_v24  ;;  %vm843_vm1 = vc.u32 %v841_v15, %v837_v40  ;;  %v1230_v22 = vmul.f32 %v1229_v6, %v8418_v37  ;;  %v1239_v1 = vxor.u32 2147483648, %v1222_v7 }
 0x186   : > { %vm8500_vm3 = vcmp.le.f32.partialorder %v1243_v34, 0.7853982  ;;  %v844_v32 = vsel %vm843_vm1, 1, %v13480_v4  ;;  %v851_v61 = vand.u32 65535, %v821_v59  ;;  %vm1238_vm4 = vcmp.eq.s32.totalorder %v8429_v62, 2 }
 0x187   : > { %v1337_v35 = vadd.s32 %v8380_v58, %v8370_v8  ;;  %v7130_v5 = vadd.s32 4294967294, %v1349_v20  ;;  %v1367_v56 = vsub.s32 4, %v8449_v3  ;;  %v1236_v2 = vxor.u32 2147483648, %v1230_v22 }
 0x188   : > { %v814_v37 = vsel %vm810_vm6, %v794_v39, %v8423_v18  ;;  %v846_v34 = vadd.s32 %v844_v32, %v842_v53  ;;  %v852_v21 = vshrl.u32 %v821_v59, 16  ;;  %v1240_v10 = vsel %vm1238_vm4, %v1239_v1, %v1230_v22 }
 0x189   : > { %vm7131_vm5 = vcmp.lt.s32.totalorder %v7130_v5, 0  ;;  %v816_v23 = vsel %vm812_vm9, %v8406_v27, %v815_v29  ;;  %v836_v45 = vshrl.u32 %v832_v0, 16  ;;  %v1237_v8 = vsel %vm1235_vm10, %v1222_v7, %v1236_v2 }
 0x18a   : > { %v1352_v58 = vsel %vm7131_vm5, 0, %v7130_v5  ;;  %v854_v50 = vmul.u32 %v852_v21, %v8454_v38  ;;  %v855_v14 = vmul.u32 %v851_v61, %v8457_v43  ;;  %v1241_v18 = vsel %vm1234_vm11, %v1237_v8, %v1240_v10 }
 0x18b   : > { %v1353_v39 = vsub.s32 32, %v1352_v58  ;;  %v1357_v59 = vsub.s32 4294967266, %v1352_v58  ;;  %v1368_v49 = vsel %vm1245_vm12, %v1367_v56, %v8449_v3  ;;  %v1242_v27 = vsel %vm1231_vm15, nan, %v1241_v18 }
 0x18c   : > { %v847_v0 = vadd.s32 %v846_v34, %v836_v45  ;;  %v853_v48 = vmul.u32 %v851_v61, %v8454_v38  ;;  %v857_v31 = vshll.u32 %v854_v50, 16  ;;  %2129 = vmatpush.msra.mxu0 %v1242_v27  ;;  %v1354_v24 = vshll.u32 %v8476_v52, %v1352_v58 }
 0x18d   : > { %v1355_v40 = vshrl.u32 %v1337_v35, %v1353_v39  ;;  %v1358_v15 = vadd.s32 127, %v1357_v59  ;;  %v838_v62 = vshrl.u32 %v8471_v28, 16  ;;  %v856_v7 = vmul.u32 %v852_v21, %v8457_v43 }
 0x18e   : > { %v859_v6 = vshll.u32 %v855_v14, 16  ;;  %vm861_vm6 = vc.u32 %v853_v48, %v857_v31  ;;  %v863_v57 = vadd.s32 %v857_v31, %v853_v48  ;;  %v1370_v11 = vsel %vm8500_vm3, 0, %v1368_v49 }
 0x18f   : > { %v1356_v3 = vor.u32 %v1355_v40, %v1354_v24  ;;  %v1359_v46 = vshll.u32 %v1358_v15, 23  ;;  %v862_v38 = vsel %vm861_vm6, 1, %v13480_v4  ;;  %v8533_v20 = vadd.s32 %v847_v0, %v838_v62 }
 0x190   : > { %v864_v29 = vadd.s32 %v862_v38, %v856_v7  ;;  %vm865_vm7 = vc.u32 %v863_v57, %v859_v6  ;;  %v933_v52 = vand.u32 2147483647, %v7603_v26  ;;  %v8539_v43 = vsel %vm479_vm2, %v8474_v30, 0 }
 0x191   : > { %v8542_v28 = vadd.s32 1, %v8467_v42  ;;  %v1360_v53 = vor.u32 4788187, %v1359_v46  ;;  %v866_v22 = vsel %vm865_vm7, 1, %v13480_v4  ;;  %v817_v1 = vsel %vm811_vm8, %v814_v37, %v816_v23 }
 0x192   : > { %v858_v32 = vshrl.u32 %v854_v50, 16  ;;  %v8547_v61 = vadd.s32 %v863_v57, %v859_v6  ;;  %v868_v35 = vadd.s32 %v866_v22, %v864_v29  ;;  %v1363_v56 = vcvt.s32.f32 %v1356_v3 }
 0x193   : > { %v1361_v5 = vand.u32 2147483647, %v1360_v53  ;;  %v1387_v2 = vadd.s32 3, %v1370_v11  ;;  %v860_v34 = vshrl.u32 %v855_v14, 16  ;;  %v940_v42 = vand.u32 8388607, %v933_v52 }
 0x194   : > { %v869_v21 = vadd.s32 %v868_v35, %v858_v32  ;;  %vm873_vm9 = vc.u32 %v8533_v20, %v8547_v61  ;;  %v954_v30 = vshrl.u32 %v13482_v41, %v8464_v13  ;;  %v951_v37 = vshrl.u32 %v13641_v33, %v8464_v13 }
 0x195   : > { %v1364_v19 = vmul.f32 %v1363_v56, %v1361_v5  ;;  %v953_v10 = vshll.u32 %v13641_v33, %v8373_v60  ;;  %v957_v23 = vshrl.u32 %v13486_v51, %v8464_v13  ;;  %v956_v8 = vshll.u32 %v13482_v41, %v8373_v60 }
 0x196   : > { %v870_v45 = vadd.s32 %v869_v21, %v860_v34  ;;  %v959_v58 = vshll.u32 %v13486_v51, %v8373_v60  ;;  %v960_v50 = vshrl.u32 %v13489_v44, %v8464_v13  ;;  %vm634_vm8 = vcmp.gt.s32.totalorder %v8542_v28, 0 }
 0x197   : > { %v1365_v14 = vxor.u32 2147483648, %v1364_v19  ;;  %v950_v18 = vshll.u32 %v13643_v25, %v8373_v60  ;;  %v962_v39 = vshll.u32 %v13489_v44, %v8373_v60  ;;  %v963_v59 = vshrl.u32 %v13642_v9, %v8464_v13 }
 0x198   : > { %v874_v49 = vadd.s32 1, %v870_v45  ;;  %v8574_v27 = vor.u32 %v954_v30, %v953_v10  ;;  %v8576_v0 = vor.u32 %v957_v23, %v956_v8  ;;  %v961_v48 = vor.u32 %v960_v50, %v959_v58 }
 0x199   : > { %v1366_v31 = vsel %vm1245_vm12, %v1365_v14, %v1364_v19  ;;  %v871_v24 = vmul.u32 %v8447_v54, %v817_v1  ;;  %v941_v40 = vor.u32 8388608, %v940_v42  ;;  %v964_v15 = vor.u32 %v963_v59, %v962_v39 }
 0x19a   : > { %v8584_v60 = vsel %vm8500_vm3, %v7592_v12, %v1366_v31  ;;  %v875_v62 = vsel %vm873_vm9, %v874_v49, %v870_v45  ;;  %v8589_v7 = vor.u32 %v951_v37, %v950_v18  ;;  %vm968_vm10 = vcmp.lt.s32.totalorder %v8225_v63, 4 }
 0x19b   : > { %v1371_v6 = vmul.f32 %v8584_v60, %v8584_v60  ;;  %v876_v57 = vadd.s32 %v875_v62, %v871_v24  ;;  %vm965_vm11 = vcmp.lt.s32.totalorder %v8225_v63, 1  ;;  %v974_v54 = vsel %vm968_vm10, %v961_v48, 920167782 }
 0x19c   : > { %v8597_v55 = vand.u32 3, %v1387_v2  ;;  %vm966_vm12 = vcmp.lt.s32.totalorder %v8225_v63, 2  ;;  %v977_v3 = vsel %vm965_vm11, %v8574_v27, %v8576_v0  ;;  %v978_v46 = vsel %vm968_vm10, %v964_v15, 1326507024 }
 0x19d   : > { %v1372_v11 = vmul.f32 -0.001358992, %v1371_v6  ;;  %v1379_v38 = vmul.f32 -0.00019511016, %v1371_v6  ;;  %v877_v29 = vadd.s32 536870912, %v876_v57  ;;  %vm967_vm14 = vcmp.lt.s32.totalorder %v8225_v63, 3 }
 0x19e   : > { %v973_v53 = vsel %vm965_vm11, %v8589_v7, %v8574_v27  ;;  %v975_v22 = vsel %vm967_vm14, %v8576_v0, %v974_v54  ;;  %v979_v1 = vsel %vm967_vm14, %v961_v48, %v978_v46  ;;  %v8616_v32 = vshll.u32 %v941_v40, 8 }
 0x19f   : > { %v1373_v35 = vadd.f32 0.041655596, %v1372_v11  ;;  %v1380_v5 = vadd.f32 0.008332121, %v1379_v38  ;;  %v878_v56 = vshrl.u32 %v877_v29, 30  ;;  %v980_v2 = vsel %vm966_vm12, %v977_v3, %v979_v1 }
 0x1a0   : > { %v8621_v34 = vand.u32 65535, %v8616_v32  ;;  %v8624_v21 = vshrl.u32 %v8616_v32, 16  ;;  %v984_v42 = vand.u32 65535, %v980_v2  ;;  %v985_v30 = vshrl.u32 %v980_v2, 16 }
 0x1a1   : > { %v1374_v19 = vmul.f32 %v1373_v35, %v1371_v6  ;;  %v1381_v37 = vmul.f32 %v1380_v5, %v1371_v6  ;;  %v879_v10 = vshll.u32 %v878_v56, 30  ;;  %v976_v23 = vsel %vm966_vm12, %v973_v53, %v975_v22 }
 0x1a2   : > { %v8629_v45 = vand.u32 31, %v8539_v43  ;;  %v8634_v8 = vsel %vm634_vm8, %v8542_v28, 0  ;;  %v987_v58 = vmul.u32 %v985_v30, %v8621_v34  ;;  %v8638_v50 = vmul.u32 %v984_v42, %v8624_v21 }
 0x1a3   : > { %v1375_v14 = vadd.f32 -0.4999988, %v1374_v19  ;;  %v1382_v18 = vadd.f32 -0.16666654, %v1381_v37  ;;  %vm780_vm15 = vcmp.lt.s32.totalorder %v7601_v36, 0  ;;  %v8641_v39 = vsub.s32 %v876_v57, %v879_v10 }
 0x1a4   : > { %vm1390_vm0 = vcmp.eq.s32.totalorder %v8597_v55, 0  ;;  %v949_v59 = vshrl.u32 %v13643_v25, %v8464_v13  ;;  %v986_v49 = vmul.u32 %v984_v42, %v8621_v34  ;;  %v990_v28 = vshll.u32 %v987_v58, 16 }
 0x1a5   : > { %v1007_v48 = vshrl.u32 %v976_v23, 16  ;;  %v1376_v31 = vmul.f32 %v1375_v14, %v1371_v6  ;;  %v1383_v24 = vmul.f32 %v1382_v18, %v1371_v6  ;;  %vm1389_vm1 = vcmp.lt.s32.totalorder %v8597_v55, 2 }
 0x1a6   : > { %vm881_vm2 = vcmp.lt.s32.totalorder %v8641_v39, 0  ;;  %v882_v40 = vsub.s32 0, %v8641_v39  ;;  %vm1386_vm3 = vweird.f32 %v7592_v12  ;;  %v989_v15 = vmul.u32 %v985_v30, %v8624_v21 }
 0x1a7   : > { %v992_v62 = vshll.u32 %v8638_v50, 16  ;;  %vm994_vm4 = vc.u32 %v986_v49, %v990_v28  ;;  %v996_v13 = vadd.s32 %v990_v28, %v986_v49  ;;  %v1377_v57 = vadd.f32 1.0, %v1376_v31 }
 0x1a8   : > { %v1384_v54 = vadd.f32 1.0, %v1383_v24  ;;  %v883_v3 = vsel %vm881_vm2, %v882_v40, %v8641_v39  ;;  %v995_v6 = vsel %vm994_vm4, 1, %v13480_v4  ;;  %v902_v11 = vsub.s32 4, %v878_v56 }
 0x1a9   : > { %v884_v46 = vclz %v883_v3  ;;  %v997_v38 = vadd.s32 %v995_v6, %v989_v15  ;;  %vm998_vm5 = vc.u32 %v996_v13, %v992_v62  ;;  %v1394_v53 = vxor.u32 2147483648, %v1377_v57 }
 0x1aa   : > { %v1385_v29 = vmul.f32 %v1384_v54, %v8584_v60  ;;  %v999_v22 = vsel %vm998_vm5, 1, %v13480_v4  ;;  %v1006_v1 = vand.u32 65535, %v976_v23  ;;  %vm1393_vm6 = vcmp.eq.s32.totalorder %v8597_v55, 2 }
 0x1ab   : > { %vm8660_vm7 = vcmp.le.f32.partialorder %v778_v47, 0.7853982  ;;  %v872_v5 = vadd.s32 %v8547_v61, %v8533_v20  ;;  %v7121_v2 = vadd.s32 4294967294, %v884_v46  ;;  %v969_v60 = vsel %vm965_vm11, %v949_v59, %v8589_v7 }
 0x1ac   : > { %v1391_v42 = vxor.u32 2147483648, %v1385_v29  ;;  %v970_v30 = vsel %vm968_vm10, %v8576_v0, 2102212464  ;;  %v1001_v19 = vadd.s32 %v999_v22, %v997_v38  ;;  %v1009_v37 = vmul.u32 %v1007_v48, %v8621_v34 }
 0x1ad   : > { %v1395_v47 = vsel %vm1393_vm6, %v1394_v53, %v1385_v29  ;;  %vm7122_vm9 = vcmp.lt.s32.totalorder %v7121_v2, 0  ;;  %v903_v10 = vsel %vm780_vm15, %v902_v11, %v878_v56  ;;  %v991_v23 = vshrl.u32 %v987_v58, 16 }
 0x1ae   : > { %v1392_v20 = vsel %vm1390_vm0, %v1377_v57, %v1391_v42  ;;  %v887_v61 = vsel %vm7122_vm9, 0, %v7121_v2  ;;  %v1010_v7 = vmul.u32 %v1006_v1, %v8624_v21  ;;  %v1012_v14 = vshll.u32 %v1009_v37, 16 }
 0x1af   : > { %v1396_v18 = vsel %vm1389_vm1, %v1392_v20, %v1395_v47  ;;  %v888_v0 = vsub.s32 32, %v887_v61  ;;  %v892_v59 = vsub.s32 4294967266, %v887_v61  ;;  %v1008_v49 = vmul.u32 %v1006_v1, %v8621_v34 }
 0x1b0   : > { %v1397_v28 = vsel %vm1386_vm3, nan, %v1396_v18  ;;  %v993_v56 = vshrl.u32 %v8638_v50, 16  ;;  %v1002_v58 = vadd.s32 %v1001_v19, %v991_v23  ;;  %v1011_v31 = vmul.u32 %v1007_v48, %v8624_v21 }
 0x1b1   : > { %2173 = vmatpush.msra.mxu1 %v1397_v28  ;;  %v889_v24 = vshll.u32 %v8641_v39, %v887_v61  ;;  %v890_v40 = vshrl.u32 %v872_v5, %v888_v0  ;;  %v893_v15 = vadd.s32 127, %v892_v59  ;;  %vm1016_vm8 = vc.u32 %v1008_v49, %v1012_v14 }
 0x1b2   : > { %v1014_v55 = vshll.u32 %v1010_v7, 16  ;;  %v1017_v62 = vsel %vm1016_vm8, 1, %v13480_v4  ;;  %v1018_v13 = vadd.s32 %v1012_v14, %v1008_v49  ;;  %v468_v34 = vand.u32 2147483647, %v7629_v16 }
 0x1b3   : > { %v891_v57 = vor.u32 %v890_v40, %v889_v24  ;;  %v894_v12 = vshll.u32 %v893_v15, 23  ;;  %v971_v50 = vsel %vm967_vm14, %v8574_v27, %v970_v30  ;;  %v1019_v54 = vadd.s32 %v1017_v62, %v1011_v31 }
 0x1b4   : > { %v8692_v21 = vsub.s32 32, %v8629_v45  ;;  %v905_v39 = vsel %vm8660_vm7, 0, %v903_v10  ;;  %v8696_v48 = vadd.s32 %v1002_v58, %v993_v56  ;;  %vm1020_vm10 = vc.u32 %v1018_v13, %v1014_v55 }
 0x1b5   : > { %v8699_v3 = vshrl.u32 %v8539_v43, 5  ;;  %v895_v6 = vor.u32 4788187, %v894_v12  ;;  %v1021_v46 = vsel %vm1020_vm10, 1, %v13480_v4  ;;  %v475_v11 = vand.u32 8388607, %v468_v34 }
 0x1b6   : > { %v972_v27 = vsel %vm966_vm12, %v969_v60, %v971_v50  ;;  %v1013_v38 = vshrl.u32 %v1009_v37, 16  ;;  %v8706_v29 = vadd.s32 %v1018_v13, %v1014_v55  ;;  %v1023_v53 = vadd.s32 %v1021_v46, %v1019_v54 }
 0x1b7   : > { %v896_v22 = vand.u32 2147483647, %v895_v6  ;;  %v898_v1 = vcvt.s32.f32 %v891_v57  ;;  %v922_v5 = vadd.s32 3, %v905_v39  ;;  %v1015_v2 = vshrl.u32 %v1010_v7, 16 }
 0x1b8   : > { %v1024_v42 = vadd.s32 %v1023_v53, %v1013_v38  ;;  %vm1028_vm11 = vc.u32 %v8696_v48, %v8706_v29  ;;  %v489_v43 = vshrl.u32 %v13482_v41, %v8692_v21  ;;  %v492_v30 = vshrl.u32 %v13486_v51, %v8692_v21 }
 0x1b9   : > { %v899_v63 = vmul.f32 %v898_v1, %v896_v22  ;;  %v476_v60 = vor.u32 8388608, %v475_v11  ;;  %v494_v19 = vshll.u32 %v13486_v51, %v8629_v45  ;;  %v495_v37 = vshrl.u32 %v13489_v44, %v8692_v21 }
 0x1ba   : > { %v1025_v47 = vadd.s32 %v1024_v42, %v1015_v2  ;;  %v486_v10 = vshrl.u32 %v13641_v33, %v8692_v21  ;;  %v488_v23 = vshll.u32 %v13641_v33, %v8629_v45  ;;  %v491_v20 = vshll.u32 %v13482_v41, %v8629_v45 }
 0x1bb   : > { %v900_v61 = vxor.u32 2147483648, %v899_v63  ;;  %v496_v7 = vor.u32 %v495_v37, %v494_v19  ;;  %v497_v14 = vshll.u32 %v13489_v44, %v8629_v45  ;;  %v498_v18 = vshrl.u32 %v13642_v9, %v8692_v21 }
 0x1bc   : > { %v1029_v0 = vadd.s32 1, %v1025_v47  ;;  %v485_v59 = vshll.u32 %v13643_v25, %v8629_v45  ;;  %v8730_v49 = vor.u32 %v489_v43, %v488_v23  ;;  %v8732_v28 = vor.u32 %v492_v30, %v491_v20 }
 0x1bd   : > { %v8735_v56 = vand.u32 31, %v8634_v8  ;;  %v901_v58 = vsel %vm780_vm15, %v900_v61, %v899_v63  ;;  %v1026_v31 = vmul.u32 %v8616_v32, %v972_v27  ;;  %v499_v24 = vor.u32 %v498_v18, %v497_v14 }
 0x1be   : > { %v8743_v40 = vsel %vm8660_vm7, %v7601_v36, %v901_v58  ;;  %v1030_v45 = vsel %vm1028_vm11, %v1029_v0, %v1025_v47  ;;  %v8748_v15 = vor.u32 %v486_v10, %v485_v59  ;;  %vm503_vm12 = vcmp.lt.s32.totalorder %v8699_v3, 4 }
 0x1bf   : > { %v906_v55 = vmul.f32 %v8743_v40, %v8743_v40  ;;  %v1031_v62 = vadd.s32 %v1030_v45, %v1026_v31  ;;  %vm500_vm14 = vcmp.lt.s32.totalorder %v8699_v3, 1  ;;  %v509_v32 = vsel %vm503_vm12, %v496_v7, 920167782 }
 0x1c0   : > { %v8756_v35 = vand.u32 3, %v922_v5  ;;  %v512_v13 = vsel %vm500_vm14, %v8730_v49, %v8732_v28  ;;  %v513_v57 = vsel %vm503_vm12, %v499_v24, 1326507024  ;;  %v8764_v12 = vshll.u32 %v476_v60, 8 }
 0x1c1   : > { %v907_v50 = vmul.f32 -0.001358992, %v906_v55  ;;  %v914_v54 = vmul.f32 -0.00019511016, %v906_v55  ;;  %v1032_v39 = vadd.s32 536870912, %v1031_v62  ;;  %vm502_vm15 = vcmp.lt.s32.totalorder %v8699_v3, 3 }
 0x1c2   : > { %vm501_vm0 = vcmp.lt.s32.totalorder %v8699_v3, 2  ;;  %v508_v6 = vsel %vm500_vm14, %v8748_v15, %v8730_v49  ;;  %v510_v46 = vsel %vm502_vm15, %v8732_v28, %v509_v32  ;;  %v514_v11 = vsel %vm502_vm15, %v496_v7, %v513_v57 }
 0x1c3   : > { %v908_v27 = vadd.f32 0.041655596, %v907_v50  ;;  %v915_v38 = vadd.f32 0.008332121, %v914_v54  ;;  %v8777_v53 = vshrl.u32 %v1032_v39, 30  ;;  %v515_v22 = vsel %vm501_vm0, %v512_v13, %v514_v11 }
 0x1c4   : > { %v517_v1 = vand.u32 65535, %v8764_v12  ;;  %v518_v5 = vshrl.u32 %v8764_v12, 16  ;;  %v519_v2 = vand.u32 65535, %v515_v22  ;;  %v520_v42 = vshrl.u32 %v515_v22, 16 }
 0x1c5   : > { %v909_v43 = vmul.f32 %v908_v27, %v906_v55  ;;  %v916_v30 = vmul.f32 %v915_v38, %v906_v55  ;;  %v1034_v63 = vshll.u32 %v8777_v53, 30  ;;  %v511_v60 = vsel %vm501_vm0, %v508_v6, %v510_v46 }
 0x1c6   : > { %v8787_v19 = vshrl.u32 %v8634_v8, 5  ;;  %v522_v37 = vmul.u32 %v520_v42, %v517_v1  ;;  %v8789_v47 = vmul.u32 %v519_v2, %v518_v5  ;;  %v8792_v10 = vsub.s32 32, %v8735_v56 }
 0x1c7   : > { %v910_v23 = vadd.f32 -0.4999988, %v909_v43  ;;  %v917_v20 = vadd.f32 -0.16666654, %v916_v30  ;;  %v8794_v61 = vsub.s32 %v1031_v62, %v1034_v63  ;;  %vm925_vm1 = vcmp.eq.s32.totalorder %v8756_v35, 0 }
 0x1c8   : > { %vm928_vm2 = vcmp.eq.s32.totalorder %v8756_v35, 2  ;;  %v521_v7 = vmul.u32 %v519_v2, %v517_v1  ;;  %v525_v14 = vshll.u32 %v522_v37, 16  ;;  %v541_v18 = vand.u32 65535, %v511_v60 }
 0x1c9   : > { %v542_v0 = vshrl.u32 %v511_v60, 16  ;;  %v911_v8 = vmul.f32 %v910_v23, %v906_v55  ;;  %v918_v59 = vmul.f32 %v917_v20, %v906_v55  ;;  %vm924_vm3 = vcmp.lt.s32.totalorder %v8756_v35, 2 }
 0x1ca   : > { %vm1036_vm4 = vcmp.lt.s32.totalorder %v8794_v61, 0  ;;  %v1037_v58 = vsub.s32 0, %v8794_v61  ;;  %vm921_vm5 = vweird.f32 %v7601_v36  ;;  %v524_v31 = vmul.u32 %v520_v42, %v518_v5 }
 0x1cb   : > { %v527_v24 = vshll.u32 %v8789_v47, 16  ;;  %vm529_vm6 = vc.u32 %v521_v7, %v525_v14  ;;  %v531_v45 = vadd.s32 %v525_v14, %v521_v7  ;;  %v912_v62 = vadd.f32 1.0, %v911_v8 }
 0x1cc   : > { %v919_v32 = vadd.f32 1.0, %v918_v59  ;;  %v1038_v13 = vsel %vm1036_vm4, %v1037_v58, %v8794_v61  ;;  %v530_v57 = vsel %vm529_vm6, 1, %v13480_v4  ;;  %vm935_vm7 = vcmp.lt.s32.totalorder %v7603_v26, 0 }
 0x1cd   : > { %v1039_v55 = vclz %v1038_v13  ;;  %v484_v50 = vshrl.u32 %v13643_v25, %v8692_v21  ;;  %v532_v54 = vadd.s32 %v530_v57, %v524_v31  ;;  %vm533_vm9 = vc.u32 %v531_v45, %v527_v24 }
 0x1ce   : > { %v920_v39 = vmul.f32 %v919_v32, %v8743_v40  ;;  %v929_v6 = vxor.u32 2147483648, %v912_v62  ;;  %v534_v46 = vsel %vm533_vm9, 1, %v13480_v4  ;;  %v544_v11 = vmul.u32 %v542_v0, %v517_v1 }
 0x1cf   : > { %v1027_v27 = vadd.s32 %v8706_v29, %v8696_v48  ;;  %v7124_v38 = vadd.s32 4294967294, %v1039_v55  ;;  %v505_v22 = vsel %vm503_vm12, %v8732_v28, 2102212464  ;;  %v543_v2 = vmul.u32 %v541_v18, %v517_v1 }
 0x1d0   : > { %v926_v42 = vxor.u32 2147483648, %v920_v39  ;;  %v1057_v21 = vsub.s32 4, %v8777_v53  ;;  %v536_v43 = vadd.s32 %v534_v46, %v532_v54  ;;  %v545_v30 = vmul.u32 %v541_v18, %v518_v5 }
 0x1d1   : > { %vm7125_vm8 = vcmp.lt.s32.totalorder %v7124_v38, 0  ;;  %v526_v40 = vshrl.u32 %v522_v37, 16  ;;  %v528_v63 = vshrl.u32 %v8789_v47, 16  ;;  %v547_v60 = vshll.u32 %v544_v11, 16 }
 0x1d2   : > { %v927_v23 = vsel %vm925_vm1, %v912_v62, %v926_v42  ;;  %v930_v48 = vsel %vm928_vm2, %v929_v6, %v920_v39  ;;  %v1042_v29 = vsel %vm7125_vm8, 0, %v7124_v38  ;;  %v546_v20 = vmul.u32 %v542_v0, %v518_v5 }
 0x1d3   : > { %v931_v28 = vsel %vm924_vm3, %v927_v23, %v930_v48  ;;  %v1043_v1 = vsub.s32 32, %v1042_v29  ;;  %v1047_v7 = vsub.s32 4294967266, %v1042_v29  ;;  %v537_v14 = vadd.s32 %v536_v43, %v526_v40 }
 0x1d4   : > { %v932_v37 = vsel %vm921_vm5, nan, %v931_v28  ;;  %v1044_v47 = vshll.u32 %v8794_v61, %v1042_v29  ;;  %v549_v18 = vshll.u32 %v545_v30, 16  ;;  %vm551_vm10 = vc.u32 %v543_v2, %v547_v60 }
 0x1d5   : > { %2130 = vmatpush.msra.mxu0 %v932_v37  ;;  %v1045_v8 = vshrl.u32 %v1027_v27, %v1043_v1  ;;  %v1048_v59 = vadd.s32 127, %v1047_v7  ;;  %v552_v58 = vsel %vm551_vm10, 1, %v13480_v4  ;;  %v553_v31 = vadd.s32 %v547_v60, %v543_v2 }
 0x1d6   : > { %v1058_v35 = vsel %vm935_vm7, %v1057_v21, %v8777_v53  ;;  %v504_v5 = vsel %vm500_vm14, %v484_v50, %v8748_v15  ;;  %v506_v36 = vsel %vm502_vm15, %v8730_v49, %v505_v22  ;;  %v554_v61 = vadd.s32 %v552_v58, %v546_v20  ;;  %v2024_v15 = vld [vmem:[%s13467_s4 + $0x30] sm:$0xff] }
 0x1d7   : > { %v1046_v0 = vor.u32 %v1045_v8, %v1044_v47  ;;  %v1049_v24 = vshll.u32 %v1048_v59, 23  ;;  %v8836_v45 = vadd.s32 %v537_v14, %v528_v63  ;;  %vm555_vm11 = vc.u32 %v553_v31, %v549_v18  ;;  %2068 = vperm.xlu1 %7328, %v2024_v15  }
 0x1d8   : > { %vm8840_vm12 = vcmp.le.f32.partialorder %v933_v52, 0.7853982  ;;  %v556_v53 = vsel %vm555_vm11, 1, %v13480_v4  ;;  %v623_v49 = vand.u32 2147483647, %v7631_v17  ;;  %v548_v13 = vshrl.u32 %v544_v11, 16 }
 0x1d9   : > { %v1050_v32 = vor.u32 4788187, %v1049_v24  ;;  %v8849_v57 = vadd.s32 %v553_v31, %v549_v18  ;;  %v558_v55 = vadd.s32 %v556_v53, %v554_v61  ;;  %v1053_v50 = vcvt.s32.f32 %v1046_v0 }
 0x1da   : > { %v1060_v52 = vsel %vm8840_vm12, 0, %v1058_v35  ;;  %v507_v54 = vsel %vm501_vm0, %v504_v5, %v506_v36  ;;  %v550_v39 = vshrl.u32 %v545_v30, 16  ;;  %v644_v27 = vshrl.u32 %v13482_v41, %v8792_v10 }
 0x1db   : > { %v1051_v6 = vand.u32 2147483647, %v1050_v32  ;;  %v559_v46 = vadd.s32 %v558_v55, %v548_v13  ;;  %vm563_vm14 = vc.u32 %v8836_v45, %v8849_v57  ;;  %v630_v11 = vand.u32 8388607, %v623_v49 }
 0x1dc   : > { %v640_v38 = vshll.u32 %v13643_v25, %v8735_v56  ;;  %v641_v22 = vshrl.u32 %v13641_v33, %v8792_v10  ;;  %v647_v3 = vshrl.u32 %v13486_v51, %v8792_v10  ;;  %v643_v21 = vshll.u32 %v13641_v33, %v8735_v56 }
 0x1dd   : > { %v1054_v2 = vmul.f32 %v1053_v50, %v1051_v6  ;;  %v560_v42 = vadd.s32 %v559_v46, %v550_v39  ;;  %v646_v43 = vshll.u32 %v13482_v41, %v8735_v56  ;;  %v649_v30 = vshll.u32 %v13486_v51, %v8735_v56 }
 0x1de   : > { %v650_v40 = vshrl.u32 %v13489_v44, %v8792_v10  ;;  %v652_v63 = vshll.u32 %v13489_v44, %v8735_v56  ;;  %v653_v60 = vshrl.u32 %v13642_v9, %v8792_v10  ;;  %v8879_v29 = vor.u32 %v644_v27, %v643_v21 }
 0x1df   : > { %v1055_v23 = vxor.u32 2147483648, %v1054_v2  ;;  %v564_v48 = vadd.s32 1, %v560_v42  ;;  %v8881_v20 = vor.u32 %v647_v3, %v646_v43  ;;  %v561_v28 = vmul.u32 %v8764_v12, %v507_v54 }
 0x1e0   : > { %v631_v1 = vor.u32 8388608, %v630_v11  ;;  %v651_v7 = vor.u32 %v650_v40, %v649_v30  ;;  %v654_v14 = vor.u32 %v653_v60, %v652_v63  ;;  %v1077_v47 = vadd.s32 3, %v1060_v52 }
 0x1e1   : > { %v1056_v37 = vsel %vm935_vm7, %v1055_v23, %v1054_v2  ;;  %v565_v56 = vsel %vm563_vm14, %v564_v48, %v560_v42  ;;  %v8889_v18 = vor.u32 %v641_v22, %v640_v38  ;;  %vm655_vm15 = vcmp.lt.s32.totalorder %v8787_v19, 1 }
 0x1e2   : > { %v1059_v8 = vsel %vm8840_vm12, %v7603_v26, %v1056_v37  ;;  %v566_v59 = vadd.s32 %v565_v56, %v561_v28  ;;  %vm658_vm0 = vcmp.lt.s32.totalorder %v8787_v19, 4  ;;  %vm656_vm1 = vcmp.lt.s32.totalorder %v8787_v19, 2 }
 0x1e3   : > { %v1061_v12 = vmul.f32 %v1059_v8, %v1059_v8  ;;  %v664_v58 = vsel %vm658_vm0, %v651_v7, 920167782  ;;  %v667_v31 = vsel %vm655_vm15, %v8879_v29, %v8881_v20  ;;  %vm657_vm2 = vcmp.lt.s32.totalorder %v8787_v19, 3 }
 0x1e4   : > { %v567_v35 = vadd.s32 536870912, %v566_v59  ;;  %v668_v5 = vsel %vm658_vm0, %v654_v14, 1326507024  ;;  %v8906_v36 = vshll.u32 %v631_v1, 8  ;;  %v663_v24 = vsel %vm655_vm15, %v8889_v18, %v8879_v29 }
 0x1e5   : > { %v1062_v61 = vmul.f32 -0.001358992, %v1061_v12  ;;  %v1069_v0 = vmul.f32 -0.00019511016, %v1061_v12  ;;  %v669_v62 = vsel %vm657_vm2, %v651_v7, %v668_v5  ;;  %v665_v53 = vsel %vm657_vm2, %v8881_v20, %v664_v58 }
 0x1e6   : > { %v8914_v15 = vshrl.u32 %v567_v35, 30  ;;  %v670_v32 = vsel %vm656_vm1, %v667_v31, %v669_v62  ;;  %v672_v13 = vand.u32 65535, %v8906_v36  ;;  %v673_v6 = vshrl.u32 %v8906_v36, 16 }
 0x1e7   : > { %v1063_v55 = vadd.f32 0.041655596, %v1062_v61  ;;  %v1070_v50 = vadd.f32 0.008332121, %v1069_v0  ;;  %v674_v52 = vand.u32 65535, %v670_v32  ;;  %v675_v54 = vshrl.u32 %v670_v32, 16 }
 0x1e8   : > { %v569_v39 = vshll.u32 %v8914_v15, 30  ;;  %v666_v11 = vsel %vm656_vm1, %v663_v24, %v665_v53  ;;  %v1078_v21 = vand.u32 3, %v1077_v47  ;;  %vm1076_vm5 = vweird.f32 %v7603_v26 }
 0x1e9   : > { %v1064_v46 = vmul.f32 %v1063_v55, %v1061_v12  ;;  %v1071_v27 = vmul.f32 %v1070_v50, %v1061_v12  ;;  %v677_v38 = vmul.u32 %v675_v54, %v672_v13  ;;  %v8926_v3 = vmul.u32 %v674_v52, %v673_v6 }
 0x1ea   : > { %v570_v22 = vsub.s32 %v566_v59, %v569_v39  ;;  %v676_v40 = vmul.u32 %v674_v52, %v672_v13  ;;  %v696_v63 = vand.u32 65535, %v666_v11  ;;  %v679_v48 = vmul.u32 %v675_v54, %v673_v6 }
 0x1eb   : > { %v1065_v2 = vadd.f32 -0.4999988, %v1064_v46  ;;  %v1072_v42 = vadd.f32 -0.16666654, %v1071_v27  ;;  %v680_v43 = vshll.u32 %v677_v38, 16  ;;  %v697_v28 = vshrl.u32 %v666_v11, 16 }
 0x1ec   : > { %vm571_vm3 = vcmp.lt.s32.totalorder %v570_v22, 0  ;;  %v572_v30 = vsub.s32 0, %v570_v22  ;;  %v682_v7 = vshll.u32 %v8926_v3, 16  ;;  %vm1079_vm6 = vcmp.lt.s32.totalorder %v1078_v21, 2 }
 0x1ed   : > { %v1066_v60 = vmul.f32 %v1065_v2, %v1061_v12  ;;  %v1073_v23 = vmul.f32 %v1072_v42, %v1061_v12  ;;  %vm684_vm4 = vc.u32 %v676_v40, %v680_v43  ;;  %v686_v14 = vadd.s32 %v680_v43, %v676_v40 }
 0x1ee   : > { %v573_v1 = vsel %vm571_vm3, %v572_v30, %v570_v22  ;;  %v685_v58 = vsel %vm684_vm4, 1, %v13480_v4  ;;  %vm1080_vm9 = vcmp.eq.s32.totalorder %v1078_v21, 0  ;;  %vm1083_vm8 = vcmp.eq.s32.totalorder %v1078_v21, 2 }
 0x1ef   : > { %v1067_v37 = vadd.f32 1.0, %v1066_v60  ;;  %v1074_v56 = vadd.f32 1.0, %v1073_v23  ;;  %v574_v59 = vclz %v573_v1  ;;  %v687_v47 = vadd.s32 %v685_v58, %v679_v48 }
 0x1f0   : > { %vm688_vm7 = vc.u32 %v686_v14, %v682_v7  ;;  %v699_v61 = vmul.u32 %v697_v28, %v672_v13  ;;  %v562_v24 = vadd.s32 %v8849_v57, %v8836_v45  ;;  %v698_v62 = vmul.u32 %v696_v63, %v672_v13 }
 0x1f1   : > { %v1075_v31 = vmul.f32 %v1074_v56, %v1059_v8  ;;  %v1084_v35 = vxor.u32 2147483648, %v1067_v37  ;;  %v7115_v5 = vadd.s32 4294967294, %v574_v59  ;;  %v689_v12 = vsel %vm688_vm7, 1, %v13480_v4 }
 0x1f2   : > { %v700_v55 = vmul.u32 %v696_v63, %v673_v6  ;;  %v702_v50 = vshll.u32 %v699_v61, 16  ;;  %v691_v39 = vadd.s32 %v689_v12, %v687_v47  ;;  %v681_v11 = vshrl.u32 %v677_v38, 16 }
 0x1f3   : > { %v1081_v0 = vxor.u32 2147483648, %v1075_v31  ;;  %vm7116_vm10 = vcmp.lt.s32.totalorder %v7115_v5, 0  ;;  %v1085_v53 = vsel %vm1083_vm8, %v1084_v35, %v1075_v31  ;;  %v701_v2 = vmul.u32 %v697_v28, %v673_v6 }
 0x1f4   : > { %v577_v32 = vsel %vm7116_vm10, 0, %v7115_v5  ;;  %vm706_vm11 = vc.u32 %v698_v62, %v702_v50  ;;  %v704_v57 = vshll.u32 %v700_v55, 16  ;;  %v708_v30 = vadd.s32 %v702_v50, %v698_v62 }
 0x1f5   : > { %v1082_v52 = vsel %vm1080_vm9, %v1067_v37, %v1081_v0  ;;  %v578_v8 = vsub.s32 32, %v577_v32  ;;  %v582_v54 = vsub.s32 4294967266, %v577_v32  ;;  %v579_v27 = vshll.u32 %v570_v22, %v577_v32 }
 0x1f6   : > { %v1086_v46 = vsel %vm1079_vm6, %v1082_v52, %v1085_v53  ;;  %v707_v13 = vsel %vm706_vm11, 1, %v13480_v4  ;;  %v692_v60 = vadd.s32 %v691_v39, %v681_v11  ;;  %v639_v22 = vshrl.u32 %v13643_v25, %v8792_v10 }
 0x1f7   : > { %v1087_v42 = vsel %vm1076_vm5, nan, %v1086_v46  ;;  %v580_v43 = vshrl.u32 %v562_v24, %v578_v8  ;;  %v583_v45 = vadd.s32 127, %v582_v54  ;;  %v709_v23 = vadd.s32 %v707_v13, %v701_v2 }
 0x1f8   : > { %2174 = vmatpush.msra.mxu1 %v1087_v42  ;;  %v660_v26 = vsel %vm658_vm0, %v8881_v20, 2102212464  ;;  %vm710_vm12 = vc.u32 %v708_v30, %v704_v57  ;;  %v683_v38 = vshrl.u32 %v8926_v3, 16  ;;  %v659_v48 = vsel %vm655_vm15, %v639_v22, %v8889_v18 }
 0x1f9   : > { %v581_v40 = vor.u32 %v580_v43, %v579_v27  ;;  %v584_v63 = vshll.u32 %v583_v45, 23  ;;  %v711_v21 = vsel %vm710_vm12, 1, %v13480_v4  ;;  %v703_v28 = vshrl.u32 %v699_v61, 16 }
 0x1fa   : > { %v713_v1 = vadd.s32 %v711_v21, %v709_v23  ;;  %v661_v10 = vsel %vm657_vm2, %v8879_v29, %v660_v26  ;;  %v693_v37 = vadd.s32 %v692_v60, %v683_v38  ;;  %v705_v20 = vshrl.u32 %v700_v55, 16 }
 0x1fb   : > { %v585_v6 = vor.u32 4788187, %v584_v63  ;;  %v588_v14 = vcvt.s32.f32 %v581_v40  ;;  %v712_v58 = vadd.s32 %v708_v30, %v704_v57  ;;  %v662_v3 = vsel %vm656_vm1, %v659_v48, %v661_v10 }
 0x1fc   : > { %v714_v56 = vadd.s32 %v713_v1, %v703_v28  ;;  %vm470_vm15 = vcmp.lt.s32.totalorder %v7629_v16, 0  ;;  %vm8956_vm0 = vcmp.le.f32.partialorder %v468_v34, 0.7853982  ;;  %v716_v5 = vmul.u32 %v8906_v36, %v662_v3 }
 0x1fd   : > { %v586_v7 = vand.u32 2147483647, %v585_v6  ;;  %vm718_vm14 = vc.u32 %v693_v37, %v712_v58  ;;  %v592_v12 = vsub.s32 4, %v8914_v15  ;;  %vm611_vm2 = vweird.f32 %v7629_v16 }
 0x1fe   : > { %v715_v47 = vadd.s32 %v714_v56, %v705_v20  ;;  %v717_v48 = vadd.s32 %v712_v58, %v693_v37  ;;  %vm13583_vm7 = vcmask 293888   ;;  %v2021_v37 = vld [vmem:[%s13467_s4 + $0x18] sm:$0xff]  ;;  %vm625_vm9 = vcmp.lt.s32.totalorder %v7631_v17, 0 }
 0x1ff   : > { %v589_v59 = vmul.f32 %v588_v14, %v586_v7  ;;  %v593_v34 = vsel %vm470_vm15, %v592_v12, %v8914_v15  ;;  %2053 = vperm.xlu1 %7328, %v2021_v37   ;;  %vm8985_vm8 = vcmp.le.f32.partialorder %v623_v49, 0.7853982  ;;  %v2018_v12 = vld [vmem:[%s13467_s4] sm:$0xff] }
 0x200   : > { %v719_v18 = vadd.s32 1, %v715_v47  ;;  %v595_v36 = vsel %vm8956_vm0, 0, %v593_v34 }
 0x201   : > { %v590_v31 = vxor.u32 2147483648, %v589_v59  ;;  %v612_v2 = vadd.s32 3, %v595_v36 }
 0x202   : > { %v720_v61 = vsel %vm718_vm14, %v719_v18, %v715_v47  ;;  %v2028_v18 = vld [vmem:[%s13466_s3 + $0x8] sm:$0xff]  ;;  %vm766_vm14 = vweird.f32 %v7631_v17 }
 0x203   : > { %v591_v29 = vsel %vm470_vm15, %v590_v31, %v589_v59  ;;  %v721_v24 = vadd.s32 %v720_v61, %v716_v5  ;;  %v613_v30 = vand.u32 3, %v612_v2 }
 0x204   : > { %v594_v19 = vsel %vm8956_vm0, %v7629_v16, %v591_v29  ;;  %v2027_v16 = vld [vmem:[%s13466_s3] sm:$0xff] }
 0x205   : > { %v596_v0 = vmul.f32 %v594_v19, %v594_v19  ;;  %v722_v32 = vadd.s32 536870912, %v721_v24  ;;  %vm615_vm3 = vcmp.eq.s32.totalorder %v613_v30, 0  ;;  %vm618_vm4 = vcmp.eq.s32.totalorder %v613_v30, 2 }
 0x206   : > { %vm614_vm6 = vcmp.lt.s32.totalorder %v613_v30, 2 }
 0x207   : > { %v597_v62 = vmul.f32 -0.001358992, %v596_v0  ;;  %v604_v53 = vmul.f32 -0.00019511016, %v596_v0  ;;  %v8966_v52 = vshrl.u32 %v722_v32, 30  ;;  %2038 = vperm.xlu1 %7328, %v2018_v12  }
 0x209   : > { %v598_v55 = vadd.f32 0.041655596, %v597_v62  ;;  %v605_v50 = vadd.f32 0.008332121, %v604_v53  ;;  %v724_v39 = vshll.u32 %v8966_v52, 30  ;;  %v2029_v53 = vld [vmem:[%s13466_s3 + $0x10] sm:$0xff] }
 0x20b   : > { %v599_v8 = vmul.f32 %v598_v55, %v596_v0  ;;  %v606_v54 = vmul.f32 %v605_v50, %v596_v0  ;;  %v725_v11 = vsub.s32 %v721_v24, %v724_v39 }
 0x20d   : > { %v600_v46 = vadd.f32 -0.4999988, %v599_v8  ;;  %v607_v27 = vadd.f32 -0.16666654, %v606_v54  ;;  %vm726_vm1 = vcmp.lt.s32.totalorder %v725_v11, 0  ;;  %v727_v45 = vsub.s32 0, %v725_v11 }
 0x20f   : > { %v601_v42 = vmul.f32 %v600_v46, %v596_v0  ;;  %v608_v43 = vmul.f32 %v607_v27, %v596_v0  ;;  %v728_v13 = vsel %vm726_vm1, %v727_v45, %v725_v11 }
 0x210   : > { %v729_v40 = vclz %v728_v13 }
 0x211   : > { %v602_v15 = vadd.f32 1.0, %v601_v42  ;;  %v609_v57 = vadd.f32 1.0, %v608_v43 }
 0x212   : > { %v7118_v23 = vadd.s32 4294967294, %v729_v40  ;;  %v2031_v40 = vld [vmem:[%s13466_s3 + $0x20] sm:$0xff] }
 0x213   : > { %v610_v63 = vmul.f32 %v609_v57, %v594_v19  ;;  %v619_v60 = vxor.u32 2147483648, %v602_v15  ;;  %v747_v19 = vsub.s32 4, %v8966_v52 }
 0x214   : > { %vm7119_vm5 = vcmp.lt.s32.totalorder %v7118_v23, 0 }
 0x215   : > { %v616_v22 = vxor.u32 2147483648, %v610_v63  ;;  %v620_v6 = vsel %vm618_vm4, %v619_v60, %v610_v63  ;;  %v732_v38 = vsel %vm7119_vm5, 0, %v7118_v23  ;;  %v748_v62 = vsel %vm625_vm9, %v747_v19, %v8966_v52  ;;  %v2030_v52 = vld [vmem:[%s13466_s3 + $0x18] sm:$0xff]  ;;  %v2032_v60 = vld [vmem:[%s13466_s3 + $0x28] sm:$0xff] }
 0x216   : > { %v733_v28 = vsub.s32 32, %v732_v38  ;;  %v737_v1 = vsub.s32 4294967266, %v732_v38  ;;  %v734_v14 = vshll.u32 %v725_v11, %v732_v38  ;;  %v750_v55 = vsel %vm8985_vm8, 0, %v748_v62  ;;  %v2034_v23 = vld [vmem:[%s13466_s3 + $0x38] sm:$0xff] }
 0x217   : > { %v617_v26 = vsel %vm615_vm3, %v602_v15, %v616_v22  ;;  %v767_v39 = vadd.s32 3, %v750_v55  ;;  %v2035_v22 = vld [vmem:[%s13466_s3 + $0x40] sm:$0xff] }
 0x218   : > { %v621_v21 = vsel %vm614_vm6, %v617_v26, %v620_v6  ;;  %v735_v10 = vshrl.u32 %v717_v48, %v733_v28  ;;  %v738_v20 = vadd.s32 127, %v737_v1  ;;  %v4996_v26 = vld [vmem:[%s13469_s6 + $0x10] sm:$0xff]  ;;  %v6659_v6 = vld [vmem:[%s13471_s8] sm:$0x7]  ;;  %v9046_v48 = vpop.permute.xlu0 %2073 }
 0x219   : > { %v622_v7 = vsel %vm611_vm2, nan, %v621_v21  ;;  %v768_v42 = vand.u32 3, %v767_v39  ;;  %5016 = vperm.xlu1 %7328, %v4996_v26  }
 0x21a   : > { %2131 = vmatpush.msra.mxu0 %v622_v7  ;;  %v736_v56 = vor.u32 %v735_v10, %v734_v14  ;;  %v739_v59 = vshll.u32 %v738_v20, 23  ;;  %v9050_v7 = vpop.permute.xlu2 %2078 }
 0x21b   : > { %7145 = vmatmul.msk.f32.vlgmr.msra.gmra.mxu0 %vm13583_vm7, %v2027_v16  ;;  %vm770_vm10 = vcmp.eq.s32.totalorder %v768_v42, 0  ;;  %vm773_vm11 = vcmp.eq.s32.totalorder %v768_v42, 2  ;;  %vm769_vm12 = vcmp.lt.s32.totalorder %v768_v42, 2 }
 0x21c   : > { %v740_v3 = vor.u32 4788187, %v739_v59  ;;  %v743_v47 = vcvt.s32.f32 %v736_v56 }
 0x21e   : > { %v741_v58 = vand.u32 2147483647, %v740_v3 }
 0x220   : > { %v744_v31 = vmul.f32 %v743_v47, %v741_v58  ;;  %v9052_v14 = vpop.permute.xlu0 %2058 }
 0x221   : > { %6663 = vperm.xlu1 %7328, %v6659_v6  }
 0x222   : > { %v745_v35 = vxor.u32 2147483648, %v744_v31  ;;  %v9056_v59 = vpop.permute.xlu2 %2063 }
 0x223   : > { %7146 = vmatmul.msk.f32.gmra.mxu0 %vm13583_vm7, %v2028_v18 }
 0x224   : > { %v746_v5 = vsel %vm625_vm9, %v745_v35, %v744_v31 }
 0x225   : > { %v749_v61 = vsel %vm8985_vm8, %v7631_v17, %v746_v5  ;;  %v2033_v17 = vld [vmem:[%s13466_s3 + $0x30] sm:$0xff] }
 0x226   : > { %v751_v0 = vmul.f32 %v749_v61, %v749_v61 }
 0x228   : > { %v752_v24 = vmul.f32 -0.001358992, %v751_v0  ;;  %v759_v49 = vmul.f32 -0.00019511016, %v751_v0  ;;  %v2044_v3 = vpop.permute.xlu0 %2043 }
 0x22a   : > { %v753_v32 = vadd.f32 0.041655596, %v752_v24  ;;  %v760_v34 = vadd.f32 0.008332121, %v759_v49  ;;  %v2049_v29 = vpop.permute.xlu2 %2048 }
 0x22b   : > { %7147 = vmatmul.msk.f32.gmra.mxu0 %vm13583_vm7, %v2029_v53 }
 0x22c   : > { %v754_v50 = vmul.f32 %v753_v32, %v751_v0  ;;  %v761_v36 = vmul.f32 %v760_v34, %v751_v0 }
 0x22e   : > { %v755_v8 = vadd.f32 -0.4999988, %v754_v50  ;;  %v762_v54 = vadd.f32 -0.16666654, %v761_v36 }
 0x230   : > { %v756_v46 = vmul.f32 %v755_v8, %v751_v0  ;;  %v763_v27 = vmul.f32 %v762_v54, %v751_v0 }
 0x232   : > { %v757_v11 = vadd.f32 1.0, %v756_v46  ;;  %v764_v2 = vadd.f32 1.0, %v763_v27 }
 0x233   : > { %7148 = vmatmul.msk.f32.gmra.mxu0 %vm13583_vm7, %v2030_v52 }
 0x234   : > { %v765_v43 = vmul.f32 %v764_v2, %v749_v61  ;;  %v774_v45 = vxor.u32 2147483648, %v757_v11 }
 0x236   : > { %v771_v15 = vxor.u32 2147483648, %v765_v43  ;;  %v775_v13 = vsel %vm773_vm11, %v774_v45, %v765_v43 }
 0x238   : > { %v772_v57 = vsel %vm770_vm10, %v757_v11, %v771_v15 }
 0x239   : > { %v776_v30 = vsel %vm769_vm12, %v772_v57, %v775_v13 }
 0x23a   : > { %v777_v63 = vsel %vm766_vm14, nan, %v776_v30 }
 0x23b   : > { %2175 = vmatpush.msra.mxu1 %v777_v63  ;;  %7149 = vmatmul.msk.f32.gmra.mxu0 %vm13583_vm7, %v2031_v40 }
 0x23c   : > { %7155 = vmatmul.msk.f32.vlgmr.msra.gmra.mxu1 %vm13583_vm7, %v2027_v16 }
 0x243   : > { %7150 = vmatmul.msk.f32.gmra.mxu0 %vm13583_vm7, %v2032_v60 }
 0x244   : > { %7156 = vmatmul.msk.f32.gmra.mxu1 %vm13583_vm7, %v2028_v18 }
 0x249   : > { %v9044_v38 = vpop.permute.xlu1 %2068 }
 0x24b   : > { %7151 = vmatmul.msk.f32.gmra.mxu0 %vm13583_vm7, %v2033_v17 }
 0x24c   : > { %7157 = vmatmul.msk.f32.gmra.mxu1 %vm13583_vm7, %v2029_v53 }
 0x253   : > { %7152 = vmatmul.msk.f32.gmra.mxu0 %vm13583_vm7, %v2034_v23 }
 0x254   : > { %7158 = vmatmul.msk.f32.gmra.mxu1 %vm13583_vm7, %v2030_v52 }
 0x25b   : > { %7153 = vmatmul.msk.f32.gmra.mxu0 %vm13583_vm7, %v2035_v22 }
 0x25c   : > { %7159 = vmatmul.msk.f32.gmra.mxu1 %vm13583_vm7, %v2031_v40 }
 0x264   : > { %7160 = vmatmul.msk.f32.gmra.mxu1 %vm13583_vm7, %v2032_v60 }
 0x26c   : > { %7161 = vmatmul.msk.f32.gmra.mxu1 %vm13583_vm7, %v2033_v17 }
 0x271   : > { %v9048_v28 = vpop.permute.xlu1 %2053 }
 0x274   : > { %7162 = vmatmul.msk.f32.gmra.mxu1 %vm13583_vm7, %v2034_v23 }
 0x279   : > { %v2039_v10 = vpop.permute.xlu1 %2038 }
 0x27c   : > { %7163 = vmatmul.msk.f32.gmra.mxu1 %vm13583_vm7, %v2035_v22 }
 0x298   : > { %v2133_v21 = vpop.f32.mrf.mxu0 }
 0x299   : > { %v9054_v20 = vadd.f32 %v2133_v21, %v2039_v10 }
 0x29b   : > { %13663 = vst [vmem:[#allocation5_spill] sm:$0xff] %v9054_v20  ;;  %v2207_v37 = vand.u32 2139095040, %v9054_v20 }
 0x29d   : > { %v2208_v47 = vshrl.u32 %v2207_v37, 23 }
 0x29f   : > { %v7164_v5 = vadd.s32 4294967169, %v2208_v47 }
 0x2a0   : > { %v2136_v1 = vpop.f32.mrf.mxu0 }
 0x2a1   : > { %v9059_v58 = vadd.f32 %v2136_v1, %v2044_v3  ;;  %v2214_v61 = vadd.s32 1, %v7164_v5 }
 0x2a3   : > { %13664 = vst [vmem:[#allocation6_spill] sm:$0xff] %v9059_v58  ;;  %v2517_v31 = vand.u32 2139095040, %v9059_v58  ;;  %vm2215_vm15 = vcmp.gt.s32.totalorder %v2214_v61, 0 }
 0x2a4   : > { %v2216_v50 = vsel %vm2215_vm15, %v2214_v61, 0 }
 0x2a5   : > { %v2518_v12 = vshrl.u32 %v2517_v31, 23  ;;  %v9071_v54 = vand.u32 31, %v2216_v50 }
 0x2a7   : > { %v7170_v0 = vadd.s32 4294967169, %v2518_v12  ;;  %13668 = vst [vmem:[#allocation10_spill] sm:$0xff] %v9071_v54  ;;  %v9080_v45 = vsub.s32 32, %v9071_v54  ;;  %v2230_v63 = vshll.u32 %v13486_v51, %v9071_v54  ;;  %v2233_v26 = vshll.u32 %v13489_v44, %v9071_v54 }
 0x2a8   : > { %v2139_v56 = vpop.f32.mrf.mxu0 }
 0x2a9   : > { %v9062_v19 = vadd.f32 %v2139_v56, %v2049_v29  ;;  %v2524_v32 = vadd.s32 1, %v7170_v0  ;;  %13671 = vst [vmem:[#allocation13_spill] sm:$0xff] %v9080_v45  ;;  %v2231_v60 = vshrl.u32 %v13489_v44, %v9080_v45  ;;  %v2234_v6 = vshrl.u32 %v13642_v9, %v9080_v45 }
 0x2ab   : > { %13665 = vst [vmem:[#allocation7_spill] sm:$0xff] %v9062_v19  ;;  %v2827_v24 = vand.u32 2139095040, %v9062_v19  ;;  %vm2525_vm0 = vcmp.gt.s32.totalorder %v2524_v32, 0 }
 0x2ac   : > { %v2526_v27 = vsel %vm2525_vm0, %v2524_v32, 0 }
 0x2ad   : > { %v2828_v34 = vshrl.u32 %v2827_v24, 23  ;;  %v9082_v15 = vand.u32 31, %v2526_v27  ;;  %v9114_v24 = vshrl.u32 %v2526_v27, 5 }
 0x2af   : > { %v7176_v8 = vadd.s32 4294967169, %v2828_v34  ;;  %13672 = vst [vmem:[#allocation14_spill] sm:$0xff] %v9082_v15  ;;  %v9091_v17 = vsub.s32 32, %v9082_v15  ;;  %vm13586_vm5 = vcmp.lt.s32.totalorder %v9114_v24, 4 }
 0x2b0   : > { %v2142_v18 = vpop.f32.mrf.mxu0  ;;  %13680 = vst [vmem:[#allocation22_spill] sm:$0xff] %v9114_v24 }
 0x2b1   : > { %v9068_v55 = vadd.f32 %v2142_v18, %v9048_v28  ;;  %v2834_v42 = vadd.s32 1, %v7176_v8  ;;  %13673 = vst [vmem:[#allocation15_spill] sm:$0xff] %v9091_v17  ;;  %v9104_v18 = vor.u32 %v2231_v60, %v2230_v63 }
 0x2b3   : > { %13667 = vst [vmem:[#allocation9_spill] sm:$0xff] %v9068_v55  ;;  %v3137_v39 = vand.u32 2139095040, %v9068_v55  ;;  %vm2835_vm1 = vcmp.gt.s32.totalorder %v2834_v42, 0 }
 0x2b4   : > { %v2836_v56 = vsel %vm2835_vm1, %v2834_v42, 0  ;;  %13677 = vst [vmem:[#allocation19_spill] sm:$0xff] %v9104_v18 }
 0x2b5   : > { %v3138_v57 = vshrl.u32 %v3137_v39, 23  ;;  %v9112_v61 = vand.u32 31, %v2836_v56 }
 0x2b7   : > { %v7182_v23 = vadd.s32 4294967169, %v3138_v57  ;;  %13679 = vst [vmem:[#allocation21_spill] sm:$0xff] %v9112_v61 }
 0x2b8   : > { %v2145_v49 = vpop.f32.mrf.mxu0 }
 0x2b9   : > { %v2177_v16 = vpop.f32.mrf.mxu1  ;;  %v9075_v52 = vadd.f32 %v2145_v49, %v9052_v14  ;;  %v3144_v5 = vadd.s32 1, %v7182_v23  ;;  %v2544_v49 = vshrl.u32 %v13642_v9, %v9091_v17 }
 0x2ba   : > { %v9065_v53 = vadd.f32 %v2177_v16, %v2039_v10  ;;  %v9099_v16 = vshrl.u32 %v2216_v50, 5 }
 0x2bb   : > { %13669 = vst [vmem:[#allocation11_spill] sm:$0xff] %v9075_v52  ;;  %v3447_v13 = vand.u32 2139095040, %v9075_v52  ;;  %vm3145_vm4 = vcmp.gt.s32.totalorder %v3144_v5, 0 }
 0x2bc   : > { %13666 = vst [vmem:[#allocation8_spill] sm:$0xff] %v9065_v53  ;;  %v2362_v36 = vand.u32 2139095040, %v9065_v53  ;;  %vm13585_vm3 = vcmp.lt.s32.totalorder %v9099_v16, 4 }
 0x2bd   : > { %v3448_v1 = vshrl.u32 %v3447_v13, 23  ;;  %13675 = vst [vmem:[#allocation17_spill] sm:$0xff] %v9099_v16 }
 0x2be   : > { %v2363_v2 = vshrl.u32 %v2362_v36, 23  ;;  %v2543_v36 = vshll.u32 %v13489_v44, %v9082_v15 }
 0x2bf   : > { %v7188_v0 = vadd.s32 4294967169, %v3448_v1 }
 0x2c0   : > { %v2148_v11 = vpop.f32.mrf.mxu0  ;;  %v7167_v30 = vadd.s32 4294967169, %v2363_v2  ;;  %v2545_v57 = vor.u32 %v2544_v49, %v2543_v36 }
 0x2c1   : > { %v2180_v35 = vpop.f32.mrf.mxu1  ;;  %v9109_v12 = vadd.f32 %v2148_v11, %v9056_v59  ;;  %v9131_v11 = vsub.s32 32, %v9112_v61  ;;  %v3454_v2 = vadd.s32 1, %v7188_v0 }
 0x2c2   : > { %v9097_v21 = vadd.f32 %v2180_v35, %v2044_v3  ;;  %v2369_v10 = vadd.s32 1, %v7167_v30  ;;  %v2235_v3 = vor.u32 %v2234_v6, %v2233_v26  ;;  %v3146_v30 = vsel %vm3145_vm4, %v3144_v5, 0 }
 0x2c3   : > { %13678 = vst [vmem:[#allocation20_spill] sm:$0xff] %v9109_v12  ;;  %v3757_v8 = vand.u32 2139095040, %v9109_v12  ;;  %vm3455_vm6 = vcmp.gt.s32.totalorder %v3454_v2, 0  ;;  %v9161_v5 = vsel %vm13586_vm5, %v2545_v57, 1326507024 }
 0x2c4   : > { %13674 = vst [vmem:[#allocation16_spill] sm:$0xff] %v9097_v21  ;;  %v2672_v35 = vand.u32 2139095040, %v9097_v21  ;;  %vm2370_vm2 = vcmp.gt.s32.totalorder %v2369_v10, 0  ;;  %v9140_v42 = vsel %vm13585_vm3, %v2235_v3, 1326507024  ;;  %v9165_v3 = vand.u32 31, %v3146_v30 }
 0x2c5   : > { %13683 = vst [vmem:[#allocation25_spill] sm:$0xff] %v9131_v11  ;;  %v3758_v26 = vshrl.u32 %v3757_v8, 23 }
 0x2c6   : > { %v2673_v27 = vshrl.u32 %v2672_v35, 23  ;;  %13685 = vst [vmem:[#allocation27_spill] sm:$0xff] %v9140_v42  ;;  %v2853_v35 = vshll.u32 %v13489_v44, %v9112_v61  ;;  %v9179_v41 = vsub.s32 32, %v9165_v3 }
 0x2c7   : > { %13690 = vst [vmem:[#allocation32_spill] sm:$0xff] %v9161_v5 }
 0x2c8   : > { %v2151_v31 = vpop.f32.mrf.mxu0  ;;  %v7173_v1 = vadd.s32 4294967169, %v2673_v27  ;;  %13691 = vst [vmem:[#allocation33_spill] sm:$0xff] %v9165_v3  ;;  %v3164_v53 = vshrl.u32 %v13642_v9, %v9179_v41 }
 0x2c9   : > { %v2183_v62 = vpop.f32.mrf.mxu1  ;;  %v9176_v57 = vadd.f32 %v2151_v31, %v9044_v38  ;;  %13695 = vst [vmem:[#allocation37_spill] sm:$0xff] %v9179_v41 }
 0x2ca   : > { %v9077_v43 = vadd.f32 %v2183_v62, %v2049_v29  ;;  %v2541_v29 = vshrl.u32 %v13489_v44, %v9091_v17  ;;  %v2679_v8 = vadd.s32 1, %v7173_v1 }
 0x2cb   : > { %13694 = vst [vmem:[#allocation36_spill] sm:$0xff] %v9176_v57 }
 0x2cc   : > { %13670 = vst [vmem:[#allocation12_spill] sm:$0xff] %v9077_v43  ;;  %v2982_v40 = vand.u32 2139095040, %v9077_v43  ;;  %vm2680_vm10 = vcmp.gt.s32.totalorder %v2679_v8, 0 }
 0x2cd   : > { %v9224_v42 = vsel %vm2680_vm10, %v2679_v8, 0 }
 0x2ce   : > { %v2983_v37 = vshrl.u32 %v2982_v40, 23  ;;  %13704 = vst [vmem:[#allocation46_spill] sm:$0xff] %v9224_v42 }
 0x2d0   : > { %v7179_v62 = vadd.s32 4294967169, %v2983_v37  ;;  %v2154_v6 = vpop.f32.mrf.mxu0  ;;  %v2854_v37 = vshrl.u32 %v13642_v9, %v9131_v11 }
 0x2d1   : > { %v2186_v46 = vpop.f32.mrf.mxu1 }
 0x2d2   : > { %v9102_v47 = vadd.f32 %v2186_v46, %v9048_v28  ;;  %v2540_v28 = vshll.u32 %v13486_v51, %v9082_v15  ;;  %v2371_v46 = vsel %vm2370_vm2, %v2369_v10, 0  ;;  %v2989_v13 = vadd.s32 1, %v7179_v62 }
 0x2d3   : > { %v9144_v60 = vand.u32 31, %v2371_v46  ;;  %v2851_v10 = vshrl.u32 %v13489_v44, %v9131_v11  ;;  %v3456_v62 = vsel %vm3455_vm6, %v3454_v2, 0  ;;  %v2855_v27 = vor.u32 %v2854_v37, %v2853_v35 }
 0x2d4   : > { %13676 = vst [vmem:[#allocation18_spill] sm:$0xff] %v9102_v47  ;;  %v3292_v32 = vand.u32 2139095040, %v9102_v47  ;;  %v9125_v50 = vor.u32 %v2541_v29, %v2540_v28  ;;  %v9157_v29 = vshrl.u32 %v2371_v46, 5  ;;  %vm2990_vm9 = vcmp.gt.s32.totalorder %v2989_v13, 0 }
 0x2d5   : > { %13686 = vst [vmem:[#allocation28_spill] sm:$0xff] %v9144_v60  ;;  %v9170_v49 = vsub.s32 32, %v9144_v60  ;;  %v2991_v4 = vsel %vm2990_vm9, %v2989_v13, 0 }
 0x2d6   : > { %13682 = vst [vmem:[#allocation24_spill] sm:$0xff] %v9125_v50  ;;  %v3293_v40 = vshrl.u32 %v3292_v32, 23  ;;  %v9149_v23 = vsel %vm13586_vm5, %v9125_v50, 920167782  ;;  %v7194_v32 = vadd.s32 4294967169, %v3758_v26  ;;  %v9187_v26 = vand.u32 31, %v3456_v62 }
 0x2d7   : > { %13687 = vst [vmem:[#allocation29_spill] sm:$0xff] %v9149_v23  ;;  %v9226_v16 = vshrl.u32 %v2991_v4, 5 }
 0x2d8   : > { %13689 = vst [vmem:[#allocation31_spill] sm:$0xff] %v9157_v29  ;;  %v7185_v0 = vadd.s32 4294967169, %v3293_v40  ;;  %v3764_v37 = vadd.s32 1, %v7194_v32  ;;  %v2157_v32 = vpop.f32.mrf.mxu0 }
 0x2d9   : > { %v2189_v22 = vpop.f32.mrf.mxu1  ;;  %13692 = vst [vmem:[#allocation34_spill] sm:$0xff] %v9170_v49 }
 0x2da   : > { %v9123_v34 = vadd.f32 %v2189_v22, %v9052_v14  ;;  %v9136_v14 = vsel %vm13585_vm3, %v9104_v18, 920167782  ;;  %v9151_v22 = vshrl.u32 %v2836_v56, 5  ;;  %v2850_v56 = vshll.u32 %v13486_v51, %v9112_v61  ;;  %13697 = vst [vmem:[#allocation39_spill] sm:$0xff] %v9187_v26 }
 0x2db   : > { %13684 = vst [vmem:[#allocation26_spill] sm:$0xff] %v9136_v14  ;;  %v3299_v2 = vadd.s32 1, %v7185_v0  ;;  %v3160_v0 = vshll.u32 %v13486_v51, %v9165_v3  ;;  %vm3765_vm12 = vcmp.gt.s32.totalorder %v3764_v37, 0  ;;  %v9221_v18 = vadd.f32 %v2157_v32, %v9050_v7 }
 0x2dc   : > { %13681 = vst [vmem:[#allocation23_spill] sm:$0xff] %v9123_v34  ;;  %v3602_v63 = vand.u32 2139095040, %v9123_v34  ;;  %vm2859_vm8 = vcmp.lt.s32.totalorder %v9151_v22, 4  ;;  %v9173_v46 = vor.u32 %v2851_v10, %v2850_v56  ;;  %v4067_v10 = vand.u32 2139095040, %v9176_v57 }
 0x2dd   : > { %13688 = vst [vmem:[#allocation30_spill] sm:$0xff] %v9151_v22  ;;  %vm3300_vm11 = vcmp.gt.s32.totalorder %v3299_v2, 0  ;;  %v9218_v14 = vsel %vm2859_vm8, %v2855_v27, 1326507024  ;;  %v13708_v32 = vmov 920167782  }
 0x2de   : > { %v3603_v28 = vshrl.u32 %v3602_v63, 23  ;;  %13693 = vst [vmem:[#allocation35_spill] sm:$0xff] %v9173_v46  ;;  %v9185_v63 = vadd.f32 %v2154_v6, %v9046_v48  ;;  %v9200_v6 = vshrl.u32 %v3146_v30, 5  ;;  %v4068_v35 = vshrl.u32 %v4067_v10, 23 }
 0x2df   : > { %v9213_v30 = vsub.s32 32, %v9187_v26  ;;  %13703 = vst [vmem:[#allocation45_spill] sm:$0xff] %v9218_v14  ;;  %v3473_v60 = vshll.u32 %v13708_v32, %v9187_v26  ;;  %v13738_v55 = vand.u32 2147483647, %v9221_v18 }
 0x2e0   : > { %v7191_v1 = vadd.s32 4294967169, %v3603_v28  ;;  %v4377_v56 = vand.u32 2139095040, %v9185_v63  ;;  %13700 = vst [vmem:[#allocation42_spill] sm:$0xff] %v9200_v6  ;;  %vm3169_vm14 = vcmp.lt.s32.totalorder %v9200_v6, 4 }
 0x2e1   : > { %v2192_v39 = vpop.f32.mrf.mxu1  ;;  %13702 = vst [vmem:[#allocation44_spill] sm:$0xff] %v9213_v30  ;;  %v3471_v54 = vshrl.u32 %v13708_v32, %v9213_v30 }
 0x2e2   : > { %v9191_v31 = vadd.f32 %v2192_v39, %v9056_v59  ;;  %v3161_v59 = vshrl.u32 %v13489_v44, %v9179_v41  ;;  %v3163_v39 = vshll.u32 %v13489_v44, %v9165_v3  ;;  %v4378_v28 = vshrl.u32 %v4377_v56, 23  ;;  %13705 = vst [vmem:[#allocation47_spill] sm:$0xff] %v9226_v16 }
 0x2e3   : > { %v3609_v10 = vadd.s32 1, %v7191_v1  ;;  %v7200_v56 = vadd.s32 4294967169, %v4068_v35  ;;  %v3301_v35 = vsel %vm3300_vm11, %v3299_v2, 0  ;;  %v13710_v2 = vmov 2102212464  }
 0x2e4   : > { %13698 = vst [vmem:[#allocation40_spill] sm:$0xff] %v9191_v31  ;;  %v3912_v51 = vand.u32 2139095040, %v9191_v31  ;;  %v7206_v44 = vadd.s32 4294967169, %v4378_v28  ;;  %v9228_v45 = vor.u32 %v3161_v59, %v3160_v0  ;;  %v3165_v27 = vor.u32 %v3164_v53, %v3163_v39 }
 0x2e5   : > { %v3766_v28 = vsel %vm3765_vm12, %v3764_v37, 0  ;;  %vm3610_vm15 = vcmp.gt.s32.totalorder %v3609_v10, 0  ;;  %v4687_v59 = vand.u32 2139095040, %v9221_v18  ;;  %v3470_v37 = vshll.u32 %v13710_v2, %v9187_v26 }
 0x2e6   : > { %13706 = vst [vmem:[#allocation48_spill] sm:$0xff] %v9228_v45  ;;  %v3913_v8 = vshrl.u32 %v3912_v51, 23  ;;  %v4384_v49 = vadd.s32 1, %v7206_v44  ;;  %v9244_v53 = vsel %vm3169_vm14, %v9228_v45, 920167782  ;;  %v3474_v39 = vshrl.u32 %v13642_v9, %v9213_v30 }
 0x2e7   : > { %13709 = vst [vmem:[#allocation50_spill] sm:$0xff] %v9244_v53  ;;  %v9250_v51 = vand.u32 31, %v3766_v28  ;;  %v9254_v44 = vsel %vm3169_vm14, %v3165_v27, 1326507024  ;;  %v4688_v5 = vshrl.u32 %v4687_v59, 23  ;;  %v9265_v24 = vshrl.u32 %v3301_v35, 5 }
 0x2e8   : > { %13712 = vst [vmem:[#allocation52_spill] sm:$0xff] %v9254_v44  ;;  %v7197_v21 = vadd.s32 4294967169, %v3913_v8  ;;  %vm4385_vm1 = vcmp.gt.s32.totalorder %v4384_v49, 0  ;;  %v3475_v27 = vor.u32 %v3474_v39, %v3473_v60 }
 0x2e9   : > { %v2195_v36 = vpop.f32.mrf.mxu1  ;;  %13711 = vst [vmem:[#allocation51_spill] sm:$0xff] %v9250_v51  ;;  %v4386_v8 = vsel %vm4385_vm1, %v4384_v49, 0  ;;  %v7212_v15 = vadd.s32 4294967169, %v4688_v5  ;;  %v3780_v16 = vshll.u32 %v13710_v2, %v9250_v51 }
 0x2ea   : > { %v9182_v40 = vadd.f32 %v2195_v36, %v9044_v38  ;;  %v9198_v38 = vsel %vm2859_vm8, %v9173_v46, 920167782  ;;  %v9208_v36 = vand.u32 31, %v2991_v4  ;;  %v4074_v4 = vadd.s32 1, %v7200_v56  ;;  %13716 = vst [vmem:[#allocation56_spill] sm:$0xff] %v9265_v24 }
 0x2eb   : > { %13699 = vst [vmem:[#allocation41_spill] sm:$0xff] %v9198_v38  ;;  %v3611_v56 = vsel %vm3610_vm15, %v3609_v10, 0  ;;  %v4694_v38 = vadd.s32 1, %v7212_v15  ;;  %v9322_v46 = vshll.u32 %v13708_v32, %v9250_v51  ;;  %v9376_v45 = vshrl.u32 %v4386_v8, 5 }
 0x2ec   : > { %13696 = vst [vmem:[#allocation38_spill] sm:$0xff] %v9182_v40  ;;  %v4222_v13 = vand.u32 2139095040, %v9182_v40  ;;  %vm4075_vm0 = vcmp.gt.s32.totalorder %v4074_v4, 0  ;;  %v9267_v17 = vand.u32 31, %v3611_v56  ;;  %v9295_v43 = vshrl.u32 %v3611_v56, 5 }
 0x2ed   : > { %13701 = vst [vmem:[#allocation43_spill] sm:$0xff] %v9208_v36  ;;  %v4076_v60 = vsel %vm4075_vm0, %v4074_v4, 0  ;;  %vm4695_vm9 = vcmp.gt.s32.totalorder %v4694_v38, 0  ;;  %vm4409_vm12 = vcmp.lt.s32.totalorder %v9376_v45, 4 }
 0x2ee   : > { %v4223_v29 = vshrl.u32 %v4222_v13, 23  ;;  %v9232_v13 = vsub.s32 32, %v9208_v36  ;;  %13717 = vst [vmem:[#allocation57_spill] sm:$0xff] %v9267_v17  ;;  %v9304_v42 = vand.u32 31, %v4076_v60  ;;  %v9310_v5 = vshll.u32 %v13710_v2, %v9267_v17 }
 0x2ef   : > { %13725 = vst [vmem:[#allocation65_spill] sm:$0xff] %v9295_v43  ;;  %v9314_v56 = vshll.u32 %v13708_v32, %v9267_v17 }
 0x2f0   : > { %13707 = vst [vmem:[#allocation49_spill] sm:$0xff] %v9232_v13  ;;  %v7203_v20 = vadd.s32 4294967169, %v4223_v29  ;;  %v9258_v29 = vshrl.u32 %v3456_v62, 5  ;;  %v9270_v62 = vsub.s32 32, %v9250_v51  ;;  %v9336_v15 = vsub.s32 32, %v9304_v42 }
 0x2f1   : > { %v2198_v1 = vpop.f32.mrf.mxu1  ;;  %13727 = vst [vmem:[#allocation67_spill] sm:$0xff] %v9304_v42  ;;  %v4696_v13 = vsel %vm4695_vm9, %v4694_v38, 0  ;;  %v9356_v38 = vshll.u32 %v13708_v32, %v9304_v42 }
 0x2f2   : > { %v9238_v0 = vadd.f32 %v2198_v1, %v9046_v48  ;;  %v9256_v48 = vand.u32 31, %v3301_v35  ;;  %13714 = vst [vmem:[#allocation54_spill] sm:$0xff] %v9258_v29  ;;  %v9260_v1 = vor.u32 %v3471_v54, %v3470_v37  ;;  %v4229_v23 = vadd.s32 1, %v7203_v20 }
 0x2f3   : > { %13718 = vst [vmem:[#allocation58_spill] sm:$0xff] %v9270_v62  ;;  %vm3479_vm2 = vcmp.lt.s32.totalorder %v9258_v29, 4  ;;  %v9284_v35 = vshrl.u32 %v3766_v28, 5  ;;  %v3919_v37 = vadd.s32 1, %v7197_v21  ;;  %v9298_v28 = vsub.s32 32, %v9267_v17 }
 0x2f4   : > { %13713 = vst [vmem:[#allocation53_spill] sm:$0xff] %v9256_v48  ;;  %v4532_v50 = vand.u32 2139095040, %v9238_v0  ;;  %v9273_v54 = vsub.s32 32, %v9256_v48  ;;  %v9277_v10 = vshll.u32 %v13710_v2, %v9256_v48  ;;  %v9281_v20 = vshll.u32 %v13708_v32, %v9256_v48 }
 0x2f5   : > { %13715 = vst [vmem:[#allocation55_spill] sm:$0xff] %v9260_v1  ;;  %vm4230_vm4 = vcmp.gt.s32.totalorder %v4229_v23, 0  ;;  %v9289_v59 = vsel %vm3479_vm2, %v9260_v1, 920167782  ;;  %v9293_v58 = vsel %vm3479_vm2, %v3475_v27, 1326507024  ;;  %v3781_v49 = vshrl.u32 %v13708_v32, %v9270_v62 }
 0x2f6   : > { %13719 = vst [vmem:[#allocation59_spill] sm:$0xff] %v9273_v54  ;;  %v4533_v39 = vshrl.u32 %v4532_v50, 23  ;;  %v4231_v21 = vsel %vm4230_vm4, %v4229_v23, 0  ;;  %v9306_v50 = vand.u32 31, %v4386_v8  ;;  %v9318_v27 = vshrl.u32 %v13642_v9, %v9270_v62 }
 0x2f7   : > { %13720 = vst [vmem:[#allocation60_spill] sm:$0xff] %v9277_v10  ;;  %vm3920_vm6 = vcmp.gt.s32.totalorder %v3919_v37, 0  ;;  %v9329_v22 = vshrl.u32 %v13708_v32, %v9298_v28  ;;  %v9331_v11 = vor.u32 %v3781_v49, %v3780_v16  ;;  %v9333_v61 = vand.u32 31, %v4231_v21 }
 0x2f8   : > { %13721 = vst [vmem:[#allocation61_spill] sm:$0xff] %v9281_v20  ;;  %v7209_v23 = vadd.s32 4294967169, %v4533_v39  ;;  %v9339_v19 = vsub.s32 32, %v9306_v50  ;;  %v9346_v48 = vshrl.u32 %v4076_v60, 5  ;;  %v9348_v16 = vshrl.u32 %v4231_v21, 5 }
 0x2f9   : > { %13722 = vst [vmem:[#allocation62_spill] sm:$0xff] %v9284_v35  ;;  %v2201_v4 = vpop.f32.mrf.mxu1  ;;  %v9352_v49 = vshll.u32 %v13710_v2, %v9304_v42  ;;  %v4698_v24 = vand.u32 31, %v4696_v13  ;;  %v9359_v53 = vsub.s32 32, %v9333_v61  ;;  %v9363_v60 = vshll.u32 %v13710_v2, %v9333_v61 }
 0x2fa   : > { %13723 = vst [vmem:[#allocation63_spill] sm:$0xff] %v9289_v59  ;;  %v9325_v14 = vadd.f32 %v2201_v4, %v9050_v7  ;;  %v9344_v4 = vsel %vm3920_vm6, %v3919_v37, 0  ;;  %v4539_v47 = vadd.s32 1, %v7209_v23  ;;  %v9368_v21 = vshrl.u32 %v13708_v32, %v9336_v15 }
 0x2fb   : > { %13724 = vst [vmem:[#allocation64_spill] sm:$0xff] %v9293_v58  ;;  %v4401_v23 = vshrl.u32 %v13708_v32, %v9339_v19  ;;  %v9374_v20 = vshrl.u32 %v13642_v9, %v9336_v15  ;;  %v4400_v44 = vshll.u32 %v13710_v2, %v9306_v50  ;;  %v9382_v37 = vshrl.u32 %v13642_v9, %v9339_v19 }
 0x2fc   : > { %13726 = vst [vmem:[#allocation66_spill] sm:$0xff] %v9298_v28  ;;  %v4842_v39 = vand.u32 2139095040, %v9325_v14  ;;  %vm4540_vm10 = vcmp.gt.s32.totalorder %v4539_v47, 0  ;;  %v4713_v8 = vshll.u32 %v13708_v32, %v4698_v24  ;;  %v4691_v10 = vand.u32 8388607, %v13738_v55 }
 0x2fd   : > { %13728 = vst [vmem:[#allocation68_spill] sm:$0xff] %v9310_v5  ;;  %v9394_v17 = vor.u32 %v4401_v23, %v4400_v44  ;;  %v9396_v34 = vshrl.u32 %v4696_v13, 5  ;;  %v4710_v43 = vshll.u32 %v13710_v2, %v4698_v24  ;;  %v9399_v59 = vsel %vm4540_vm10, %v4539_v47, 0 }
 0x2fe   : > { %13729 = vst [vmem:[#allocation69_spill] sm:$0xff] %v9314_v56  ;;  %v4843_v36 = vshrl.u32 %v4842_v39, 23  ;;  %v4699_v39 = vsub.s32 32, %v4698_v24  ;;  %v4701_v1 = vshll.u32 %v13643_v25, %v4698_v24  ;;  %v4692_v44 = vor.u32 8388608, %v4691_v10 }
 0x2ff   : > { %13730 = vst [vmem:[#allocation70_spill] sm:$0xff] %v9318_v27  ;;  %v4704_v23 = vshll.u32 %v13641_v33, %v4698_v24  ;;  %v13739_v5 = vmov 2131351028   ;;  %v9415_v47 = vand.u32 31, %v9399_v59  ;;  %vm4719_vm15 = vcmp.lt.s32.totalorder %v9396_v34, 4 }
 0x300   : > { %13731 = vst [vmem:[#allocation71_spill] sm:$0xff] %v9322_v46  ;;  %v7215_v7 = vadd.s32 4294967169, %v4843_v36  ;;  %v4711_v6 = vshrl.u32 %v13708_v32, %v4699_v39  ;;  %v4714_v41 = vshrl.u32 %v13642_v9, %v4699_v39  ;;  %v9388_v36 = vshll.u32 %v13708_v32, %v9306_v50 }
 0x301   : > { %13732 = vst [vmem:[#allocation72_spill] sm:$0xff] %v9329_v22  ;;  %v4702_v54 = vshrl.u32 %v13641_v33, %v4699_v39  ;;  %v4705_v29 = vshrl.u32 %v13739_v5, %v4699_v39  ;;  %vm4716_vm0 = vcmp.lt.s32.totalorder %v9396_v34, 1  ;;  %vm4718_vm1 = vcmp.lt.s32.totalorder %v9396_v34, 3 }
 0x302   : > { %13733 = vst [vmem:[#allocation73_spill] sm:$0xff] %v9331_v11  ;;  %v4849_v3 = vadd.s32 1, %v7215_v7  ;;  %v4715_v7 = vor.u32 %v4714_v41, %v4713_v8  ;;  %v4712_v55 = vor.u32 %v4711_v6, %v4710_v43  ;;  %v9412_v41 = vsel %vm4409_vm12, %v9394_v17, 920167782 }
 0x303   : > { %13734 = vst [vmem:[#allocation74_spill] sm:$0xff] %v9336_v15  ;;  %v4703_v13 = vor.u32 %v4702_v54, %v4701_v1  ;;  %v4706_v6 = vor.u32 %v4705_v29, %v4704_v23  ;;  %v4707_v1 = vshll.u32 %v13739_v5, %v4698_v24  ;;  %v4708_v54 = vshrl.u32 %v13710_v2, %v4699_v39 }
 0x304   : > { %13735 = vst [vmem:[#allocation75_spill] sm:$0xff] %v9344_v4  ;;  %vm4850_vm11 = vcmp.gt.s32.totalorder %v4849_v3, 0  ;;  %v4725_v10 = vsel %vm4719_vm15, %v4712_v55, 920167782  ;;  %v9435_v24 = vshll.u32 %v4692_v44, 8  ;;  %vm4717_vm4 = vcmp.lt.s32.totalorder %v9396_v34, 2 }
 0x305   : > { %13736 = vst [vmem:[#allocation76_spill] sm:$0xff] %v9348_v16  ;;  %v4851_v56 = vsel %vm4850_vm11, %v4849_v3, 0  ;;  %v4729_v3 = vsel %vm4719_vm15, %v4715_v7, 1326507024  ;;  %v4709_v30 = vor.u32 %v4708_v54, %v4707_v1  ;;  %v4724_v29 = vsel %vm4716_vm0, %v4703_v13, %v4706_v6 }
 0x306   : > { %13737 = vst [vmem:[#allocation77_spill] sm:$0xff] %v9363_v60  ;;  %v9405_v22 = vand.u32 31, %v4851_v56  ;;  %v9437_v7 = vshrl.u32 %v4851_v56, 5  ;;  %v4730_v52 = vsel %vm4718_vm1, %v4712_v55, %v4729_v3  ;;  %v4700_v31 = vshrl.u32 %v13643_v25, %v4699_v39 }
 0x307   : > { %v4726_v1 = vsel %vm4718_vm1, %v4709_v30, %v4725_v10  ;;  %v4728_v44 = vsel %vm4716_vm0, %v4706_v6, %v4709_v30  ;;  %v4721_v55 = vsel %vm4719_vm15, %v4709_v30, 2102212464  ;;  %v4734_v10 = vshrl.u32 %v9435_v24, 16 }
 0x308   : > { %v9419_v43 = vsub.s32 32, %v9405_v22  ;;  %v4865_v23 = vshll.u32 %v13710_v2, %v9405_v22  ;;  %v4868_v26 = vshll.u32 %v13708_v32, %v9405_v22  ;;  %v4727_v51 = vsel %vm4717_vm4, %v4724_v29, %v4726_v1 }
 0x309   : > { %v4731_v3 = vsel %vm4717_vm4, %v4728_v44, %v4730_v52  ;;  %v4757_v62 = vand.u32 65535, %v4727_v51  ;;  %v4733_v12 = vand.u32 65535, %v9435_v24  ;;  %vm4874_vm6 = vcmp.lt.s32.totalorder %v9437_v7, 4 }
 0x30a   : > { %v4866_v8 = vshrl.u32 %v13708_v32, %v9419_v43  ;;  %v4869_v58 = vshrl.u32 %v13642_v9, %v9419_v43  ;;  %v4735_v56 = vand.u32 65535, %v4731_v3  ;;  %v13740_v39 = vand.u32 2147483647, %v9325_v14 }
 0x30b   : > { %v4759_v46 = vmul.u32 %v4757_v62, %v4733_v12  ;;  %v4857_v42 = vshrl.u32 %v13641_v33, %v9419_v43  ;;  %v13742_v34 = vor.u32 %v9382_v37, %v9388_v36 }
 0x30c   : > { %v9451_v54 = vor.u32 %v4866_v8, %v4865_v23  ;;  %v4870_v28 = vor.u32 %v4869_v58, %v4868_v26  ;;  %v4736_v8 = vshrl.u32 %v4731_v3, 16  ;;  %v4758_v23 = vshrl.u32 %v4727_v51, 16 }
 0x30d   : > { %v4720_v58 = vsel %vm4716_vm0, %v4700_v31, %v4703_v13  ;;  %v4761_v26 = vmul.u32 %v4757_v62, %v4734_v10  ;;  %v4846_v30 = vand.u32 8388607, %v13740_v39  ;;  %v4739_v44 = vmul.u32 %v4735_v56, %v4734_v10 }
 0x30e   : > { %v4880_v52 = vsel %vm4874_vm6, %v9451_v54, 920167782  ;;  %v4884_v29 = vsel %vm4874_vm6, %v4870_v28, 1326507024  ;;  %v4738_v1 = vmul.u32 %v4736_v8, %v4733_v12  ;;  %v4722_v51 = vsel %vm4718_vm1, %v4706_v6, %v4721_v55 }
 0x30f   : > { %v4737_v3 = vmul.u32 %v4735_v56, %v4733_v12  ;;  %v4760_v27 = vmul.u32 %v4758_v23, %v4733_v12  ;;  %v4740_v31 = vmul.u32 %v4736_v8, %v4734_v10  ;;  %v4762_v11 = vmul.u32 %v4758_v23, %v4734_v10 }
 0x310   : > { %v4741_v13 = vshll.u32 %v4738_v1, 16  ;;  %v4765_v4 = vshll.u32 %v4761_v26, 16  ;;  %v4743_v39 = vshll.u32 %v4739_v44, 16  ;;  %v4766_v40 = vshrl.u32 %v4761_v26, 16 }
 0x311   : > { %v4763_v35 = vshll.u32 %v4760_v27, 16  ;;  %v4847_v16 = vor.u32 8388608, %v4846_v30  ;;  %v4856_v28 = vshll.u32 %v13643_v25, %v9405_v22  ;;  %v13741_v6 = vmov 0  }
 0x312   : > { %vm4745_vm9 = vc.u32 %v4737_v3, %v4741_v13  ;;  %v4747_v15 = vadd.s32 %v4741_v13, %v4737_v3  ;;  %v4860_v62 = vshrl.u32 %v13739_v5, %v9419_v43  ;;  %v4859_v8 = vshll.u32 %v13641_v33, %v9405_v22 }
 0x313   : > { %v4746_v56 = vsel %vm4745_vm9, 1, %v13741_v6  ;;  %vm4767_vm10 = vc.u32 %v4759_v46, %v4763_v35  ;;  %v4769_v12 = vadd.s32 %v4763_v35, %v4759_v46  ;;  %v4858_v30 = vor.u32 %v4857_v42, %v4856_v28 }
 0x314   : > { %v4748_v55 = vadd.s32 %v4746_v56, %v4740_v31  ;;  %vm4749_vm11 = vc.u32 %v4747_v15, %v4743_v39  ;;  %v4768_v10 = vsel %vm4767_vm10, 1, %v13741_v6  ;;  %v4742_v3 = vshrl.u32 %v4738_v1, 16 }
 0x315   : > { %v4750_v23 = vsel %vm4749_vm11, 1, %v13741_v6  ;;  %v4770_v26 = vadd.s32 %v4768_v10, %v4762_v11  ;;  %vm4771_vm15 = vc.u32 %v4769_v12, %v4765_v4  ;;  %v4861_v46 = vor.u32 %v4860_v62, %v4859_v8 }
 0x316   : > { %v4752_v13 = vadd.s32 %v4750_v23, %v4748_v55  ;;  %v4772_v57 = vsel %vm4771_vm15, 1, %v13741_v6  ;;  %v4764_v35 = vshrl.u32 %v4760_v27, 16  ;;  %v4862_v15 = vshll.u32 %v13739_v5, %v9405_v22 }
 0x317   : > { %v4774_v60 = vadd.s32 %v4772_v57, %v4770_v26  ;;  %v4863_v31 = vshrl.u32 %v13710_v2, %v9419_v43  ;;  %v4744_v39 = vshrl.u32 %v4739_v44, 16  ;;  %vm4871_vm0 = vcmp.lt.s32.totalorder %v9437_v7, 1 }
 0x318   : > { %v4753_v56 = vadd.s32 %v4752_v13, %v4742_v3  ;;  %vm4873_vm1 = vcmp.lt.s32.totalorder %v9437_v7, 3  ;;  %v4879_v1 = vsel %vm4871_vm0, %v4858_v30, %v4861_v46  ;;  %v9494_v28 = vshll.u32 %v4847_v16, 8 }
 0x319   : > { %v4775_v11 = vadd.s32 %v4774_v60, %v4764_v35  ;;  %v4864_v42 = vor.u32 %v4863_v31, %v4862_v15  ;;  %v4723_v57 = vsel %vm4717_vm4, %v4720_v58, %v4722_v51  ;;  %v9500_v27 = vadd.s32 %v4769_v12, %v4765_v4 }
 0x31a   : > { %v9498_v22 = vadd.s32 %v4753_v56, %v4744_v39  ;;  %v4885_v44 = vsel %vm4873_vm1, %v9451_v54, %v4884_v29  ;;  %vm4872_vm9 = vcmp.lt.s32.totalorder %v9437_v7, 2  ;;  %v9515_v4 = vsel %vm4409_vm12, %v13742_v34, 1326507024 }
 0x31b   : > { %v4776_v62 = vadd.s32 %v4775_v11, %v4766_v40  ;;  %v4881_v60 = vsel %vm4873_vm1, %v4864_v42, %v4880_v52  ;;  %v4883_v16 = vsel %vm4871_vm0, %v4861_v46, %v4864_v42  ;;  %v9518_v58 = vshrl.u32 %v9399_v59, 5 }
 0x31c   : > { %vm4779_vm4 = vc.u32 %v9498_v22, %v9500_v27  ;;  %v4882_v40 = vsel %vm4872_vm9, %v4879_v1, %v4881_v60  ;;  %v4777_v54 = vmul.u32 %v9435_v24, %v4723_v57  ;;  %v4886_v29 = vsel %vm4872_vm9, %v4883_v16, %v4885_v44 }
 0x31d   : > { %v4780_v52 = vadd.s32 1, %v4776_v62  ;;  %v4888_v37 = vand.u32 65535, %v9494_v28  ;;  %v4889_v36 = vshrl.u32 %v9494_v28, 16  ;;  %v4890_v51 = vand.u32 65535, %v4886_v29 }
 0x31e   : > { %v4891_v12 = vshrl.u32 %v4886_v29, 16  ;;  %v4912_v59 = vand.u32 65535, %v4882_v40  ;;  %v9530_v55 = vsub.s32 32, %v9415_v47  ;;  %v4855_v8 = vshrl.u32 %v13643_v25, %v9419_v43 }
 0x31f   : > { %v4781_v10 = vsel %vm4779_vm4, %v4780_v52, %v4776_v62  ;;  %v4913_v23 = vshrl.u32 %v4882_v40, 16  ;;  %v4876_v26 = vsel %vm4874_vm6, %v4864_v42, 2102212464  ;;  %v4894_v13 = vmul.u32 %v4890_v51, %v4889_v36 }
 0x320   : > { %v4782_v24 = vadd.s32 %v4781_v10, %v4777_v54  ;;  %v4893_v3 = vmul.u32 %v4891_v12, %v4888_v37  ;;  %v9538_v35 = vshll.u32 %v13710_v2, %v9415_v47  ;;  %v9542_v15 = vshll.u32 %v13708_v32, %v9415_v47 }
 0x321   : > { %v4915_v31 = vmul.u32 %v4913_v23, %v4888_v37  ;;  %v4916_v39 = vmul.u32 %v4912_v59, %v4889_v36  ;;  %v4875_v43 = vsel %vm4871_vm0, %v4855_v8, %v4858_v30  ;;  %v4892_v11 = vmul.u32 %v4890_v51, %v4888_v37 }
 0x322   : > { %v4783_v56 = vadd.s32 536870912, %v4782_v24  ;;  %v4896_v1 = vshll.u32 %v4893_v3, 16  ;;  %v4877_v42 = vsel %vm4873_vm1, %v4861_v46, %v4876_v26  ;;  %v4895_v57 = vmul.u32 %v4891_v12, %v4889_v36 }
 0x323   : > { %v4914_v44 = vmul.u32 %v4912_v59, %v4888_v37  ;;  %v4918_v62 = vshll.u32 %v4915_v31, 16  ;;  %v4898_v16 = vshll.u32 %v4894_v13, 16  ;;  %v4920_v54 = vshll.u32 %v4916_v39, 16 }
 0x324   : > { %v4784_v60 = vshrl.u32 %v4783_v56, 30  ;;  %vm4900_vm6 = vc.u32 %v4892_v11, %v4896_v1  ;;  %v4902_v34 = vadd.s32 %v4896_v1, %v4892_v11  ;;  %v4917_v30 = vmul.u32 %v4913_v23, %v4889_v36 }
 0x325   : > { %v4901_v40 = vsel %vm4900_vm6, 1, %v13741_v6  ;;  %vm4922_vm10 = vc.u32 %v4914_v44, %v4918_v62  ;;  %v4924_v52 = vadd.s32 %v4918_v62, %v4914_v44  ;;  %v4374_v37 = vand.u32 2147483647, %v9185_v63 }
 0x326   : > { %v4785_v29 = vshll.u32 %v4784_v60, 30  ;;  %v4903_v10 = vadd.s32 %v4901_v40, %v4895_v57  ;;  %vm4904_vm11 = vc.u32 %v4902_v34, %v4898_v16  ;;  %v4923_v46 = vsel %vm4922_vm10, 1, %v13741_v6 }
 0x327   : > { %v4905_v51 = vsel %vm4904_vm11, 1, %v13741_v6  ;;  %vm4926_vm15 = vc.u32 %v4924_v52, %v4920_v54  ;;  %vm4686_vm0 = vcmp.lt.s32.totalorder %v9221_v18, 0  ;;  %v4897_v59 = vshrl.u32 %v4893_v3, 16 }
 0x328   : > { %v9553_v12 = vsub.s32 %v4782_v24, %v4785_v29  ;;  %v4907_v8 = vadd.s32 %v4905_v51, %v4903_v10  ;;  %v4925_v26 = vadd.s32 %v4923_v46, %v4917_v30  ;;  %v4556_v56 = vshrl.u32 %v13708_v32, %v9530_v55 }
 0x329   : > { %v9559_v36 = vshrl.u32 %v13642_v9, %v9530_v55  ;;  %v4878_v23 = vsel %vm4872_vm9, %v4875_v43, %v4877_v42  ;;  %v4927_v11 = vsel %vm4926_vm15, 1, %v13741_v6  ;;  %v4899_v1 = vshrl.u32 %v4894_v13, 16 }
 0x32a   : > { %vm4787_vm1 = vcmp.lt.s32.totalorder %v9553_v12, 0  ;;  %v4788_v24 = vsub.s32 0, %v9553_v12  ;;  %v4908_v3 = vadd.s32 %v4907_v8, %v4897_v59  ;;  %v4919_v57 = vshrl.u32 %v4915_v31, 16 }
 0x32b   : > { %v4921_v44 = vshrl.u32 %v4916_v39, 16  ;;  %v4929_v62 = vadd.s32 %v4927_v11, %v4925_v26  ;;  %v4392_v16 = vshrl.u32 %v13641_v33, %v9339_v19  ;;  %v4808_v40 = vsub.s32 4, %v4784_v60 }
 0x32c   : > { %v4789_v34 = vsel %vm4787_vm1, %v4788_v24, %v9553_v12  ;;  %v9569_v29 = vadd.s32 %v4908_v3, %v4899_v1  ;;  %v4381_v7 = vand.u32 8388607, %v4374_v37  ;;  %v13743_v43 = vand.u32 2147483647, %v9221_v18 }
 0x32d   : > { %v4790_v13 = vclz %v4789_v34  ;;  %v4930_v31 = vadd.s32 %v4929_v62, %v4919_v57  ;;  %v4391_v39 = vshll.u32 %v13643_v25, %v9306_v50  ;;  %v4395_v10 = vshrl.u32 %v13739_v5, %v9339_v19 }
 0x32e   : > { %vm9575_vm9 = vcmp.le.f32.partialorder %v13743_v43, 0.7853982  ;;  %v4560_v30 = vor.u32 %v9559_v36, %v9542_v15  ;;  %v4778_v51 = vadd.s32 %v9500_v27, %v9498_v22  ;;  %v9587_v46 = vadd.s32 %v4924_v52, %v4920_v54 }
 0x32f   : > { %v4394_v59 = vshll.u32 %v13641_v33, %v9306_v50  ;;  %v7213_v8 = vadd.s32 4294967294, %v4790_v13  ;;  %v4931_v26 = vadd.s32 %v4930_v31, %v4921_v44  ;;  %v4932_v11 = vmul.u32 %v9494_v28, %v4878_v23 }
 0x330   : > { %v4393_v24 = vor.u32 %v4392_v16, %v4391_v39  ;;  %vm4564_vm4 = vcmp.lt.s32.totalorder %v9518_v58, 4  ;;  %vm4934_vm6 = vc.u32 %v9569_v29, %v9587_v46  ;;  %v4397_v15 = vshll.u32 %v13739_v5, %v9306_v50 }
 0x331   : > { %v4396_v1 = vor.u32 %v4395_v10, %v4394_v59  ;;  %v4398_v22 = vshrl.u32 %v13710_v2, %v9339_v19  ;;  %vm7214_vm10 = vcmp.lt.s32.totalorder %v7213_v8, 0  ;;  %v4809_v27 = vsel %vm4686_vm0, %v4808_v40, %v4784_v60 }
 0x332   : > { %v4935_v54 = vadd.s32 1, %v4931_v26  ;;  %v4382_v52 = vor.u32 8388608, %v4381_v7  ;;  %v4793_v28 = vsel %vm7214_vm10, 0, %v7213_v8  ;;  %vm4406_vm11 = vcmp.lt.s32.totalorder %v9376_v45, 1 }
 0x333   : > { %v4399_v36 = vor.u32 %v4398_v22, %v4397_v15  ;;  %vm4408_vm15 = vcmp.lt.s32.totalorder %v9376_v45, 3  ;;  %v4794_v23 = vsub.s32 32, %v4793_v28  ;;  %v4798_v3 = vsub.s32 4294967266, %v4793_v28 }
 0x334   : > { %v4936_v57 = vsel %vm4934_vm6, %v4935_v54, %v4931_v26  ;;  %v4420_v50 = vsel %vm4408_vm15, %v9394_v17, %v9515_v4  ;;  %vm4407_vm1 = vcmp.lt.s32.totalorder %v9376_v45, 2  ;;  %v4414_v60 = vsel %vm4406_vm11, %v4393_v24, %v4396_v1 }
 0x335   : > { %v4937_v44 = vadd.s32 %v4936_v57, %v4932_v11  ;;  %v4418_v62 = vsel %vm4406_vm11, %v4396_v1, %v4399_v36  ;;  %v4795_v16 = vshll.u32 %v9553_v12, %v4793_v28  ;;  %v4796_v34 = vshrl.u32 %v4778_v51, %v4794_v23 }
 0x336   : > { %v4799_v40 = vadd.s32 127, %v4798_v3  ;;  %v4416_v7 = vsel %vm4408_vm15, %v4399_v36, %v9412_v41  ;;  %v4811_v17 = vsel %vm9575_vm9, 0, %v4809_v27  ;;  %v4421_v43 = vsel %vm4407_vm1, %v4418_v62, %v4420_v50 }
 0x337   : > { %v4938_v4 = vadd.s32 536870912, %v4937_v44  ;;  %v9620_v13 = vshll.u32 %v4382_v52, 8  ;;  %v4797_v31 = vor.u32 %v4796_v34, %v4795_v16  ;;  %v4425_v10 = vand.u32 65535, %v4421_v43 }
 0x338   : > { %v4800_v39 = vshll.u32 %v4799_v40, 23  ;;  %v4426_v59 = vshrl.u32 %v4421_v43, 16  ;;  %v9623_v12 = vor.u32 %v4556_v56, %v9538_v35  ;;  %v4417_v41 = vsel %vm4407_vm1, %v4414_v60, %v4416_v7 }
 0x339   : > { %v4939_v51 = vshrl.u32 %v4938_v4, 30  ;;  %v4423_v8 = vand.u32 65535, %v9620_v13  ;;  %v9630_v26 = vsel %vm4564_vm4, %v4560_v30, 1326507024  ;;  %v4390_v15 = vshrl.u32 %v13643_v25, %v9339_v19 }
 0x33a   : > { %v4801_v11 = vor.u32 4788187, %v4800_v39  ;;  %v4424_v22 = vshrl.u32 %v9620_v13, 16  ;;  %v4828_v27 = vadd.s32 3, %v4811_v17  ;;  %v4411_v35 = vsel %vm4409_vm12, %v4399_v36, 2102212464 }
 0x33b   : > { %v4940_v54 = vshll.u32 %v4939_v51, 30  ;;  %v4428_v56 = vmul.u32 %v4426_v59, %v4423_v8  ;;  %v4804_v28 = vcvt.s32.f32 %v4797_v31  ;;  %vm4841_vm6 = vcmp.lt.s32.totalorder %v9325_v14, 0 }
 0x33c   : > { %v4802_v52 = vand.u32 2147483647, %v4801_v11  ;;  %v9638_v23 = vmul.u32 %v4425_v10, %v4424_v22  ;;  %v4448_v30 = vshrl.u32 %v4417_v41, 16  ;;  %v4410_v19 = vsel %vm4406_vm11, %v4390_v15, %v4393_v24 }
 0x33d   : > { %v9640_v3 = vsub.s32 %v4937_v44, %v4940_v54  ;;  %v4427_v57 = vmul.u32 %v4425_v10, %v4423_v8  ;;  %v4431_v50 = vshll.u32 %v4428_v56, 16  ;;  %v4412_v62 = vsel %vm4408_vm15, %v4396_v1, %v4411_v35 }
 0x33e   : > { %v4805_v60 = vmul.f32 %v4804_v28, %v4802_v52  ;;  %v4430_v36 = vmul.u32 %v4426_v59, %v4424_v22  ;;  %v4447_v16 = vand.u32 65535, %v4417_v41  ;;  %v4433_v40 = vshll.u32 %v9638_v23, 16 }
 0x33f   : > { %vm4942_vm12 = vcmp.lt.s32.totalorder %v9640_v3, 0  ;;  %v4943_v34 = vsub.s32 0, %v9640_v3  ;;  %vm4435_vm10 = vc.u32 %v4427_v57, %v4431_v50  ;;  %v4437_v17 = vadd.s32 %v4431_v50, %v4427_v57 }
 0x340   : > { %v4806_v44 = vxor.u32 2147483648, %v4805_v60  ;;  %v4436_v7 = vsel %vm4435_vm10, 1, %v13741_v6  ;;  %v4450_v24 = vmul.u32 %v4448_v30, %v4423_v8  ;;  %v9650_v4 = vand.u32 3, %v4828_v27 }
 0x341   : > { %v4944_v43 = vsel %vm4942_vm12, %v4943_v34, %v9640_v3  ;;  %v4963_v31 = vsub.s32 4, %v4939_v51  ;;  %v4438_v1 = vadd.s32 %v4436_v7, %v4430_v36  ;;  %v4933_v10 = vadd.s32 %v9587_v46, %v9569_v29 }
 0x342   : > { %v4807_v39 = vsel %vm4686_vm0, %v4806_v44, %v4805_v60  ;;  %v4945_v59 = vclz %v4944_v43  ;;  %vm4439_vm11 = vc.u32 %v4437_v17, %v4433_v40  ;;  %v9664_v11 = vsel %vm4407_vm1, %v4410_v19, %v4412_v62 }
 0x343   : > { %v9660_v41 = vsel %vm9575_vm9, %v9221_v18, %v4807_v39  ;;  %v4449_v15 = vmul.u32 %v4447_v16, %v4423_v8  ;;  %v4451_v27 = vmul.u32 %v4447_v16, %v4424_v22  ;;  %v4440_v52 = vsel %vm4439_vm11, 1, %v13741_v6 }
 0x344   : > { %v4812_v54 = vmul.f32 %v9660_v41, %v9660_v41  ;;  %v7216_v35 = vadd.s32 4294967294, %v4945_v59  ;;  %v4453_v29 = vshll.u32 %v4450_v24, 16  ;;  %v4964_v46 = vsel %vm4841_vm6, %v4963_v31, %v4939_v51 }
 0x345   : > { %v4432_v28 = vshrl.u32 %v4428_v56, 16  ;;  %v4442_v42 = vadd.s32 %v4440_v52, %v4438_v1  ;;  %v4452_v57 = vmul.u32 %v4448_v30, %v4424_v22  ;;  %v13746_v45 = vand.u32 2147483647, %v9325_v14 }
 0x346   : > { %v4813_v50 = vmul.f32 -0.001358992, %v4812_v54  ;;  %v4820_v60 = vmul.f32 -0.00019511016, %v4812_v54  ;;  %vm7217_vm9 = vcmp.lt.s32.totalorder %v7216_v35, 0  ;;  %vm4457_vm15 = vc.u32 %v4449_v15, %v4453_v29 }
 0x347   : > { %vm9673_vm0 = vcmp.le.f32.partialorder %v13746_v45, 0.7853982  ;;  %v4948_v19 = vsel %vm7217_vm9, 0, %v7216_v35  ;;  %v4455_v62 = vshll.u32 %v4451_v27, 16  ;;  %v4458_v36 = vsel %vm4457_vm15, 1, %v13741_v6 }
 0x348   : > { %v4459_v16 = vadd.s32 %v4453_v29, %v4449_v15  ;;  %v4814_v34 = vadd.f32 0.041655596, %v4813_v50  ;;  %v4821_v51 = vadd.f32 0.008332121, %v4820_v60  ;;  %v4949_v56 = vsub.s32 32, %v4948_v19 }
 0x349   : > { %v4443_v40 = vadd.s32 %v4442_v42, %v4432_v28  ;;  %v4953_v22 = vsub.s32 4294967266, %v4948_v19  ;;  %v4434_v30 = vshrl.u32 %v9638_v23, 16  ;;  %v4460_v44 = vadd.s32 %v4458_v36, %v4452_v57 }
 0x34a   : > { %vm4461_vm1 = vc.u32 %v4459_v16, %v4455_v62  ;;  %v4815_v7 = vmul.f32 %v4814_v34, %v4812_v54  ;;  %v4822_v17 = vmul.f32 %v4821_v51, %v4812_v54  ;;  %v4951_v43 = vshrl.u32 %v4933_v10, %v4949_v56 }
 0x34b   : > { %v4462_v31 = vsel %vm4461_vm1, 1, %v13741_v6  ;;  %v4950_v1 = vshll.u32 %v9640_v3, %v4948_v19  ;;  %v4954_v39 = vadd.s32 127, %v4953_v22  ;;  %v4454_v59 = vshrl.u32 %v4450_v24, 16 }
 0x34c   : > { %v4464_v35 = vadd.s32 %v4462_v31, %v4460_v44  ;;  %v4816_v15 = vadd.f32 -0.4999988, %v4815_v7  ;;  %v4823_v52 = vadd.f32 -0.16666654, %v4822_v17  ;;  %v9681_v29 = vadd.s32 %v4443_v40, %v4434_v30 }
 0x34d   : > { %v4529_v28 = vand.u32 2147483647, %v9238_v0  ;;  %vm4831_vm12 = vcmp.eq.s32.totalorder %v9650_v4, 0  ;;  %v4952_v23 = vor.u32 %v4951_v43, %v4950_v1  ;;  %v4955_v42 = vshll.u32 %v4954_v39, 23 }
 0x34e   : > { %v4456_v57 = vshrl.u32 %v4451_v27, 16  ;;  %v4465_v50 = vadd.s32 %v4464_v35, %v4454_v59  ;;  %v4817_v10 = vmul.f32 %v4816_v15, %v4812_v54  ;;  %v4824_v60 = vmul.f32 %v4823_v52, %v4812_v54 }
 0x34f   : > { %vm4830_vm10 = vcmp.lt.s32.totalorder %v9650_v4, 2  ;;  %vm4834_vm11 = vcmp.eq.s32.totalorder %v9650_v4, 2  ;;  %v9687_v3 = vadd.s32 %v4459_v16, %v4455_v62  ;;  %vm4827_vm9 = vweird.f32 %v9221_v18 }
 0x350   : > { %v4956_v24 = vor.u32 4788187, %v4955_v42  ;;  %v4966_v45 = vsel %vm9673_vm0, 0, %v4964_v46  ;;  %v4466_v19 = vadd.s32 %v4465_v50, %v4456_v57  ;;  %v4467_v36 = vmul.u32 %v9620_v13, %v9664_v11 }
 0x351   : > { %v4818_v27 = vadd.f32 1.0, %v4817_v10  ;;  %v4825_v34 = vadd.f32 1.0, %v4824_v60  ;;  %vm4469_vm15 = vc.u32 %v9681_v29, %v9687_v3  ;;  %v4536_v54 = vand.u32 8388607, %v4529_v28 }
 0x352   : > { %v4957_v62 = vand.u32 2147483647, %v4956_v24  ;;  %v4959_v16 = vcvt.s32.f32 %v4952_v23  ;;  %v4470_v51 = vadd.s32 1, %v4466_v19  ;;  %v4547_v56 = vshrl.u32 %v13641_v33, %v9530_v55 }
 0x353   : > { %v4826_v46 = vmul.f32 %v4825_v34, %v9660_v41  ;;  %v4835_v40 = vxor.u32 2147483648, %v4818_v27  ;;  %v4546_v13 = vshll.u32 %v13643_v25, %v9415_v47  ;;  %v4550_v11 = vshrl.u32 %v13739_v5, %v9530_v55 }
 0x354   : > { %v4960_v22 = vmul.f32 %v4959_v16, %v4957_v62  ;;  %v4983_v30 = vadd.s32 3, %v4966_v45  ;;  %v4471_v44 = vsel %vm4469_vm15, %v4470_v51, %v4466_v19  ;;  %v4549_v7 = vshll.u32 %v13641_v33, %v9415_v47 }
 0x355   : > { %v4832_v17 = vxor.u32 2147483648, %v4826_v46  ;;  %v4472_v43 = vadd.s32 %v4471_v44, %v4467_v36  ;;  %v4537_v31 = vor.u32 8388608, %v4536_v54  ;;  %v9707_v1 = vor.u32 %v4547_v56, %v4546_v13  ;;  %v13749_v44 = vld [vmem:[#allocation77_spill] sm:$0xff] }
 0x356   : > { %v4961_v39 = vxor.u32 2147483648, %v4960_v22  ;;  %v9709_v41 = vor.u32 %v4550_v11, %v4549_v7  ;;  %v4552_v59 = vshll.u32 %v13739_v5, %v9415_v47  ;;  %v4553_v35 = vshrl.u32 %v13710_v2, %v9530_v55 }
 0x357   : > { %v4833_v15 = vsel %vm4831_vm12, %v4818_v27, %v4832_v17  ;;  %v4836_v52 = vsel %vm4834_vm11, %v4835_v40, %v4826_v46  ;;  %v4473_v23 = vadd.s32 536870912, %v4472_v43  ;;  %vm4561_vm1 = vcmp.lt.s32.totalorder %v9518_v58, 1 }
 0x358   : > { %vm4099_vm15 = vcmp.lt.s32.totalorder %v9346_v48, 4  ;;  %v4837_v42 = vsel %vm4830_vm10, %v4833_v15, %v4836_v52  ;;  %v4962_v47 = vsel %vm4841_vm6, %v4961_v39, %v4960_v22  ;;  %v4554_v57 = vor.u32 %v4553_v35, %v4552_v59 }
 0x359   : > { %vm4563_vm7 = vcmp.lt.s32.totalorder %v9518_v58, 3  ;;  %v4838_v50 = vsel %vm4827_vm9, nan, %v4837_v42  ;;  %v9731_v10 = vsel %vm9673_vm0, %v9325_v14, %v4962_v47  ;;  %v9733_v60 = vshrl.u32 %v4473_v23, 30 }
 0x35a   : > { %v4575_v4 = vsel %vm4563_vm7, %v9623_v12, %v9630_v26  ;;  %v4246_v24 = vshrl.u32 %v13708_v32, %v9359_v53  ;;  %v9743_v45 = vshll.u32 %v13708_v32, %v9333_v61  ;;  %5052 = vmatpush.msra.mxu2 %v4838_v50  ;;  %v4967_v18 = vmul.f32 %v9731_v10, %v9731_v10 }
 0x35b   : > { %v4573_v8 = vsel %vm4561_vm1, %v9709_v41, %v4554_v57  ;;  %v9752_v19 = vshrl.u32 %v13642_v9, %v9359_v53  ;;  %v4570_v26 = vsel %vm4564_vm4, %v9623_v12, 920167782  ;;  %v4475_v36 = vshll.u32 %v9733_v60, 30 }
 0x35c   : > { %vm4562_vm6 = vcmp.lt.s32.totalorder %v9518_v58, 2  ;;  %v4095_v27 = vor.u32 %v9374_v20, %v9356_v38  ;;  %v4968_v34 = vmul.f32 -0.001358992, %v4967_v18  ;;  %v4975_v54 = vmul.f32 -0.00019511016, %v4967_v18 }
 0x35d   : > { %v4576_v62 = vsel %vm4562_vm6, %v4573_v8, %v4575_v4  ;;  %v9763_v16 = vand.u32 3, %v4983_v30  ;;  %v9765_v51 = vsub.s32 %v4472_v43, %v4475_v36  ;;  %v4569_v12 = vsel %vm4561_vm1, %v9707_v1, %v9709_v41 }
 0x35e   : > { %v9771_v56 = vshll.u32 %v4537_v31, 8  ;;  %v4969_v46 = vadd.f32 0.041655596, %v4968_v34  ;;  %v4976_v40 = vadd.f32 0.008332121, %v4975_v54  ;;  %v4571_v20 = vsel %vm4563_vm7, %v4554_v57, %v4570_v26 }
 0x35f   : > { %v4581_v38 = vshrl.u32 %v4576_v62, 16  ;;  %vm4477_vm0 = vcmp.lt.s32.totalorder %v9765_v51, 0  ;;  %v4478_v13 = vsub.s32 0, %v9765_v51  ;;  %v4580_v22 = vand.u32 65535, %v4576_v62 }
 0x360   : > { %v4578_v11 = vand.u32 65535, %v9771_v56  ;;  %v9780_v30 = vor.u32 %v9368_v21, %v9352_v49  ;;  %v9783_v7 = vor.u32 %v4246_v24, %v13749_v44  ;;  %v4970_v17 = vmul.f32 %v4969_v46, %v4967_v18 }
 0x361   : > { %v4977_v43 = vmul.f32 %v4976_v40, %v4967_v18  ;;  %v9787_v31 = vsel %vm4099_vm15, %v4095_v27, 1326507024  ;;  %v4479_v39 = vsel %vm4477_vm0, %v4478_v13, %v9765_v51  ;;  %v4579_v59 = vshrl.u32 %v9771_v56, 16 }
 0x362   : > { %v4583_v35 = vmul.u32 %v4581_v38, %v4578_v11  ;;  %v4971_v15 = vadd.f32 -0.4999988, %v4970_v17  ;;  %v4480_v23 = vclz %v4479_v39  ;;  %v4572_v49 = vsel %vm4562_vm6, %v4569_v12, %v4571_v20 }
 0x363   : > { %v4978_v52 = vadd.f32 -0.16666654, %v4977_v43  ;;  %vm4986_vm12 = vcmp.eq.s32.totalorder %v9763_v16, 0  ;;  %vm4989_vm10 = vcmp.eq.s32.totalorder %v9763_v16, 2  ;;  %v4468_v21 = vadd.s32 %v9687_v3, %v9681_v29 }
 0x364   : > { %v4545_v42 = vshrl.u32 %v13643_v25, %v9530_v55  ;;  %v4582_v47 = vmul.u32 %v4580_v22, %v4578_v11  ;;  %v9799_v50 = vmul.u32 %v4580_v22, %v4579_v59  ;;  %v4972_v4 = vmul.f32 %v4971_v15, %v4967_v18 }
 0x365   : > { %v4979_v24 = vmul.f32 %v4978_v52, %v4967_v18  ;;  %vm4985_vm11 = vcmp.lt.s32.totalorder %v9763_v16, 2  ;;  %vm4376_vm9 = vcmp.lt.s32.totalorder %v9185_v63, 0  ;;  %v7207_v8 = vadd.s32 4294967294, %v4480_v23 }
 0x366   : > { %v4586_v26 = vshll.u32 %v4583_v35, 16  ;;  %vm4982_vm0 = vweird.f32 %v9325_v14  ;;  %v4566_v36 = vsel %vm4564_vm4, %v4554_v57, 2102212464  ;;  %v4585_v29 = vmul.u32 %v4581_v38, %v4579_v59  ;;  %v13752_v14 = vld [vmem:[#allocation36_spill] sm:$0xff] }
 0x367   : > { %v4602_v3 = vand.u32 65535, %v4572_v49  ;;  %v4603_v27 = vshrl.u32 %v4572_v49, 16  ;;  %v4973_v55 = vadd.f32 1.0, %v4972_v4  ;;  %v4980_v34 = vadd.f32 1.0, %v4979_v24 }
 0x368   : > { %vm7208_vm13 = vcmp.lt.s32.totalorder %v7207_v8, 0  ;;  %vm4590_vm3 = vc.u32 %v4582_v47, %v4586_v26  ;;  %v4588_v18 = vshll.u32 %v9799_v50, 16  ;;  %v4592_v12 = vadd.s32 %v4586_v26, %v4582_v47 }
 0x369   : > { %v4483_v54 = vsel %vm7208_vm13, 0, %v7207_v8  ;;  %v4591_v62 = vsel %vm4590_vm3, 1, %v13741_v6  ;;  %v4981_v46 = vmul.f32 %v4980_v34, %v9731_v10  ;;  %v4990_v40 = vxor.u32 2147483648, %v4973_v55 }
 0x36a   : > { %v4484_v20 = vsub.s32 32, %v4483_v54  ;;  %v4498_v13 = vsub.s32 4, %v9733_v60  ;;  %vm9812_vm4 = vcmp.le.f32.partialorder %v4374_v37, 0.7853982  ;;  %v4488_v38 = vsub.s32 4294967266, %v4483_v54 }
 0x36b   : > { %v4593_v22 = vadd.s32 %v4591_v62, %v4585_v29  ;;  %vm4594_vm13 = vc.u32 %v4592_v12, %v4588_v18  ;;  %v4605_v44 = vmul.u32 %v4603_v27, %v4578_v11  ;;  %v4987_v17 = vxor.u32 2147483648, %v4981_v46 }
 0x36c   : > { %v4486_v43 = vshrl.u32 %v4468_v21, %v4484_v20  ;;  %v4587_v39 = vshrl.u32 %v4583_v35, 16  ;;  %v4595_v15 = vsel %vm4594_vm13, 1, %v13741_v6  ;;  %v4485_v10 = vshll.u32 %v9765_v51, %v4483_v54 }
 0x36d   : > { %v4489_v52 = vadd.s32 127, %v4488_v38  ;;  %v4597_v23 = vadd.s32 %v4595_v15, %v4593_v22  ;;  %v4606_v49 = vmul.u32 %v4602_v3, %v4579_v59  ;;  %v4988_v37 = vsel %vm4986_vm12, %v4973_v55, %v4987_v17  ;;  %v13753_v22 = vld [vmem:[#allocation67_spill] sm:$0xff]  ;;  %v13754_v17 = vld [vmem:[#allocation74_spill] sm:$0xff] }
 0x36e   : > { %v4991_v47 = vsel %vm4989_vm10, %v4990_v40, %v4981_v46  ;;  %v4604_v4 = vmul.u32 %v4602_v3, %v4578_v11  ;;  %v4608_v24 = vshll.u32 %v4605_v44, 16  ;;  %v4487_v21 = vor.u32 %v4486_v43, %v4485_v10 }
 0x36f   : > { %v4992_v8 = vsel %vm4985_vm11, %v4988_v37, %v4991_v47  ;;  %v4490_v35 = vshll.u32 %v4489_v52, 23  ;;  %v4499_v51 = vsel %vm4376_vm9, %v4498_v13, %v9733_v60  ;;  %v4598_v29 = vadd.s32 %v4597_v23, %v4587_v39 }
 0x370   : > { %v4993_v26 = vsel %vm4982_vm0, nan, %v4992_v8  ;;  %v4607_v34 = vmul.u32 %v4603_v27, %v4579_v59  ;;  %vm4612_vm3 = vc.u32 %v4604_v4, %v4608_v24  ;;  %v4610_v54 = vshll.u32 %v4606_v49, 16 }
 0x371   : > { %5084 = vmatpush.msra.mxu3 %v4993_v26  ;;  %v4491_v55 = vor.u32 4788187, %v4490_v35  ;;  %v4613_v11 = vsel %vm4612_vm3, 1, %v13741_v6  ;;  %v4614_v3 = vadd.s32 %v4608_v24, %v4604_v4  ;;  %v4565_v16 = vsel %vm4561_vm1, %v4545_v42, %v9707_v1 }
 0x372   : > { %v4567_v60 = vsel %vm4563_vm7, %v9709_v41, %v4566_v36  ;;  %v4615_v18 = vadd.s32 %v4613_v11, %v4607_v34  ;;  %v4064_v62 = vand.u32 2147483647, %v13752_v14  ;;  %v4494_v59 = vcvt.s32.f32 %v4487_v21 }
 0x373   : > { %v4492_v12 = vand.u32 2147483647, %v4491_v55  ;;  %v4589_v27 = vshrl.u32 %v9799_v50, 16  ;;  %vm4616_vm12 = vc.u32 %v4614_v3, %v4610_v54  ;;  %v4501_v46 = vsel %vm9812_vm4, 0, %v4499_v51 }
 0x374   : > { %v4609_v40 = vshrl.u32 %v4605_v44, 16  ;;  %v4617_v20 = vsel %vm4616_vm12, 1, %v13741_v6  ;;  %v4071_v1 = vand.u32 8388607, %v4064_v62  ;;  %v4611_v41 = vshrl.u32 %v4606_v49, 16 }
 0x375   : > { %v4495_v42 = vmul.f32 %v4494_v59, %v4492_v12  ;;  %v9843_v13 = vadd.s32 %v4598_v29, %v4589_v27  ;;  %v4619_v36 = vadd.s32 %v4617_v20, %v4615_v18  ;;  %v9845_v38 = vadd.s32 %v4614_v3, %v4610_v54  ;;  %v13755_v20 = vld [vmem:[#allocation76_spill] sm:$0xff] }
 0x376   : > { %v4081_v50 = vshll.u32 %v13643_v25, %v13753_v22  ;;  %v4082_v43 = vshrl.u32 %v13641_v33, %v13754_v17  ;;  %v4084_v44 = vshll.u32 %v13641_v33, %v13753_v22  ;;  %v4085_v10 = vshrl.u32 %v13739_v5, %v13754_v17 }
 0x377   : > { %v4496_v39 = vxor.u32 2147483648, %v4495_v42  ;;  %v4620_v15 = vadd.s32 %v4619_v36, %v4609_v40  ;;  %v4087_v52 = vshll.u32 %v13739_v5, %v13753_v22  ;;  %v4518_v23 = vadd.s32 3, %v4501_v46 }
 0x378   : > { %v4568_v49 = vsel %vm4562_vm6, %v4565_v16, %v4567_v60  ;;  %v4072_v37 = vor.u32 8388608, %v4071_v1  ;;  %v4088_v47 = vshrl.u32 %v13710_v2, %v13754_v17  ;;  %vm4624_vm7 = vc.u32 %v9843_v13, %v9845_v38 }
 0x379   : > { %v4497_v4 = vsel %vm4376_vm9, %v4496_v39, %v4495_v42  ;;  %v4621_v24 = vadd.s32 %v4620_v15, %v4611_v41  ;;  %v9865_v8 = vor.u32 %v4085_v10, %v4084_v44  ;;  %v9872_v58 = vor.u32 %v4082_v43, %v4081_v50 }
 0x37a   : > { %v9870_v21 = vsel %vm9812_vm4, %v9185_v63, %v4497_v4  ;;  %v4089_v35 = vor.u32 %v4088_v47, %v4087_v52  ;;  %vm4098_vm1 = vcmp.lt.s32.totalorder %v9346_v48, 3  ;;  %vm4096_vm6 = vcmp.lt.s32.totalorder %v9346_v48, 1 }
 0x37b   : > { %v4502_v51 = vmul.f32 %v9870_v21, %v9870_v21  ;;  %v4625_v26 = vadd.s32 1, %v4621_v24  ;;  %v4110_v29 = vsel %vm4098_vm1, %v9780_v30, %v9787_v31  ;;  %v4105_v57 = vsel %vm4099_vm15, %v9780_v30, 920167782 }
 0x37c   : > { %v4622_v34 = vmul.u32 %v9771_v56, %v4568_v49  ;;  %v4108_v55 = vsel %vm4096_vm6, %v9865_v8, %v4089_v35  ;;  %v9889_v54 = vshll.u32 %v4072_v37, 8  ;;  %vm4097_vm10 = vcmp.lt.s32.totalorder %v9346_v48, 2 }
 0x37d   : > { %v4503_v11 = vmul.f32 -0.001358992, %v4502_v51  ;;  %v4510_v3 = vmul.f32 -0.00019511016, %v4502_v51  ;;  %v4626_v16 = vsel %vm4624_vm7, %v4625_v26, %v4621_v24  ;;  %v4250_v31 = vor.u32 %v9752_v19, %v9743_v45 }
 0x37e   : > { %v9897_v30 = vand.u32 3, %v4518_v23  ;;  %v4627_v56 = vadd.s32 %v4626_v16, %v4622_v34  ;;  %v4111_v60 = vsel %vm4097_vm10, %v4108_v55, %v4110_v29  ;;  %v4104_v59 = vsel %vm4096_vm6, %v9872_v58, %v9865_v8 }
 0x37f   : > { %v4504_v18 = vadd.f32 0.041655596, %v4503_v11  ;;  %v4511_v12 = vadd.f32 0.008332121, %v4510_v3  ;;  %v4106_v27 = vsel %vm4098_vm1, %v4089_v35, %v4105_v57  ;;  %v4113_v40 = vand.u32 65535, %v9889_v54 }
 0x380   : > { %v4628_v46 = vadd.s32 536870912, %v4627_v56  ;;  %v4115_v45 = vand.u32 65535, %v4111_v60  ;;  %v4116_v19 = vshrl.u32 %v4111_v60, 16  ;;  %vm4254_vm11 = vcmp.lt.s32.totalorder %v13755_v20, 4 }
 0x381   : > { %v4505_v1 = vmul.f32 %v4504_v18, %v4502_v51  ;;  %v4512_v42 = vmul.f32 %v4511_v12, %v4502_v51  ;;  %v4114_v41 = vshrl.u32 %v9889_v54, 16  ;;  %v9913_v36 = vsel %vm4254_vm11, %v9783_v7, 920167782 }
 0x382   : > { %v9915_v22 = vshrl.u32 %v4628_v46, 30  ;;  %v4107_v50 = vsel %vm4097_vm10, %v4104_v59, %v4106_v27  ;;  %v4118_v43 = vmul.u32 %v4116_v19, %v4113_v40  ;;  %v9921_v44 = vsel %vm4254_vm11, %v4250_v31, 1326507024 }
 0x383   : > { %v4506_v39 = vadd.f32 -0.4999988, %v4505_v1  ;;  %v4513_v15 = vadd.f32 -0.16666654, %v4512_v42  ;;  %v9923_v10 = vmul.u32 %v4115_v45, %v4114_v41  ;;  %vm4521_vm9 = vcmp.eq.s32.totalorder %v9897_v30, 0 }
 0x384   : > { %v4630_v52 = vshll.u32 %v9915_v22, 30  ;;  %v4080_v23 = vshrl.u32 %v13643_v25, %v13754_v17  ;;  %v4117_v49 = vmul.u32 %v4115_v45, %v4113_v40  ;;  %v4121_v37 = vshll.u32 %v4118_v43, 16 }
 0x385   : > { %v4507_v47 = vmul.f32 %v4506_v39, %v4502_v51  ;;  %v4514_v4 = vmul.f32 %v4513_v15, %v4502_v51  ;;  %vm4520_vm0 = vcmp.lt.s32.totalorder %v9897_v30, 2  ;;  %v4137_v24 = vand.u32 65535, %v4107_v50 }
 0x386   : > { %v4138_v26 = vshrl.u32 %v4107_v50, 16  ;;  %vm4517_vm4 = vweird.f32 %v9185_v63  ;;  %v9931_v29 = vsub.s32 %v4627_v56, %v4630_v52  ;;  %v4120_v57 = vmul.u32 %v4116_v19, %v4114_v41 }
 0x387   : > { %vm4125_vm13 = vc.u32 %v4117_v49, %v4121_v37  ;;  %v4127_v34 = vadd.s32 %v4121_v37, %v4117_v49  ;;  %v4508_v55 = vadd.f32 1.0, %v4507_v47  ;;  %v4515_v11 = vadd.f32 1.0, %v4514_v4 }
 0x388   : > { %v4123_v3 = vshll.u32 %v9923_v10, 16  ;;  %v4126_v17 = vsel %vm4125_vm13, 1, %v13741_v6  ;;  %vm4632_vm3 = vcmp.lt.s32.totalorder %v9931_v29, 0  ;;  %v4633_v51 = vsub.s32 0, %v9931_v29 }
 0x389   : > { %v4101_v16 = vsel %vm4099_vm15, %v4089_v35, 2102212464  ;;  %v4128_v31 = vadd.s32 %v4126_v17, %v4120_v57  ;;  %v4516_v56 = vmul.f32 %v4515_v11, %v9870_v21  ;;  %v4525_v60 = vxor.u32 2147483648, %v4508_v55  ;;  %v13756_v57 = vld [vmem:[#allocation38_spill] sm:$0xff] }
 0x38a   : > { %vm4531_vm12 = vcmp.lt.s32.totalorder %v9238_v0, 0  ;;  %vm4129_vm7 = vc.u32 %v4127_v34, %v4123_v3  ;;  %v4140_v18 = vmul.u32 %v4138_v26, %v4113_v40  ;;  %vm4524_vm5 = vcmp.eq.s32.totalorder %v9897_v30, 2 }
 0x38b   : > { %v4634_v12 = vsel %vm4632_vm3, %v4633_v51, %v9931_v29  ;;  %v4100_v59 = vsel %vm4096_vm6, %v4080_v23, %v9872_v58  ;;  %v4130_v27 = vsel %vm4129_vm7, 1, %v13741_v6  ;;  %v4522_v46 = vxor.u32 2147483648, %v4516_v56 }
 0x38c   : > { %v4635_v35 = vclz %v4634_v12  ;;  %v4132_v45 = vadd.s32 %v4130_v27, %v4128_v31  ;;  %v4141_v19 = vmul.u32 %v4137_v24, %v4114_v41  ;;  %v4653_v21 = vsub.s32 4, %v9915_v22 }
 0x38d   : > { %v4102_v1 = vsel %vm4098_vm1, %v9865_v8, %v4101_v16  ;;  %v4122_v42 = vshrl.u32 %v4118_v43, 16  ;;  %v4139_v50 = vmul.u32 %v4137_v24, %v4113_v40  ;;  %v4523_v39 = vsel %vm4521_vm9, %v4508_v55, %v4522_v46 }
 0x38e   : > { %v4526_v15 = vsel %vm4524_vm5, %v4525_v60, %v4516_v56  ;;  %v7210_v52 = vadd.s32 4294967294, %v4635_v35  ;;  %v4143_v58 = vshll.u32 %v4140_v18, 16  ;;  %v4124_v49 = vshrl.u32 %v9923_v10, 16  ;;  %v13759_v60 = vld [vmem:[#allocation62_spill] sm:$0xff] }
 0x38f   : > { %v4527_v23 = vsel %vm4520_vm0, %v4523_v39, %v4526_v15  ;;  %v4133_v37 = vadd.s32 %v4132_v45, %v4122_v42  ;;  %v4142_v47 = vmul.u32 %v4138_v26, %v4114_v41  ;;  %v4145_v8 = vshll.u32 %v4141_v19, 16 }
 0x390   : > { %v4528_v4 = vsel %vm4517_vm4, nan, %v4527_v23  ;;  %vm7211_vm15 = vcmp.lt.s32.totalorder %v7210_v52, 0  ;;  %vm4147_vm1 = vc.u32 %v4139_v50, %v4143_v58  ;;  %v4149_v24 = vadd.s32 %v4143_v58, %v4139_v50 }
 0x391   : > { %5053 = vmatpush.msra.mxu2 %v4528_v4  ;;  %v4638_v40 = vsel %vm7211_vm15, 0, %v7210_v52  ;;  %v4148_v43 = vsel %vm4147_vm1, 1, %v13741_v6  ;;  %v4219_v34 = vand.u32 2147483647, %v13756_v57  ;;  %v4623_v30 = vadd.s32 %v9845_v38, %v9843_v13 }
 0x392   : > { %v4639_v55 = vsub.s32 32, %v4638_v40  ;;  %v4643_v10 = vsub.s32 4294967266, %v4638_v40  ;;  %v4150_v11 = vadd.s32 %v4148_v43, %v4142_v47  ;;  %vm9964_vm5 = vcmp.le.f32.partialorder %v4529_v28, 0.7853982 }
 0x393   : > { %v4654_v41 = vsel %vm4531_vm12, %v4653_v21, %v9915_v22  ;;  %v4103_v26 = vsel %vm4097_vm10, %v4100_v59, %v4102_v1  ;;  %v9973_v3 = vadd.s32 %v4133_v37, %v4124_v49  ;;  %vm4151_vm6 = vc.u32 %v4149_v24, %v4145_v8 }
 0x394   : > { %v4640_v13 = vshll.u32 %v9931_v29, %v4638_v40  ;;  %v4641_v38 = vshrl.u32 %v4623_v30, %v4639_v55  ;;  %v4644_v17 = vadd.s32 127, %v4643_v10  ;;  %v4152_v51 = vsel %vm4151_vm6, 1, %v13741_v6  ;;  %v13761_v55 = vld [vmem:[#allocation73_spill] sm:$0xff] }
 0x395   : > { %v4144_v28 = vshrl.u32 %v4140_v18, 16  ;;  %v4146_v16 = vshrl.u32 %v4141_v19, 16  ;;  %v4154_v31 = vadd.s32 %v4152_v51, %v4150_v11  ;;  %v4226_v56 = vand.u32 8388607, %v4219_v34  ;;  %v13762_v51 = vld [vmem:[#allocation70_spill] sm:$0xff] }
 0x396   : > { %vm3789_vm9 = vcmp.lt.s32.totalorder %v13759_v60, 4  ;;  %v4642_v22 = vor.u32 %v4641_v38, %v4640_v13  ;;  %v4645_v48 = vshll.u32 %v4644_v17, 23  ;;  %v4153_v12 = vadd.s32 %v4149_v24, %v4145_v8  ;;  %v13760_v8 = vld [vmem:[#allocation75_spill] sm:$0xff] }
 0x397   : > { %v4236_v59 = vshll.u32 %v13643_v25, %v9333_v61  ;;  %v4155_v27 = vadd.s32 %v4154_v31, %v4144_v28  ;;  %v4237_v29 = vshrl.u32 %v13641_v33, %v9359_v53  ;;  %v4239_v18 = vshll.u32 %v13641_v33, %v9333_v61  ;;  %v13763_v28 = vld [vmem:[#allocation71_spill] sm:$0xff] }
 0x398   : > { %v4240_v46 = vshrl.u32 %v13739_v5, %v9359_v53  ;;  %v4646_v35 = vor.u32 4788187, %v4645_v48  ;;  %vm4159_vm10 = vc.u32 %v9973_v3, %v4153_v12  ;;  %v4242_v45 = vshll.u32 %v13739_v5, %v9333_v61 }
 0x399   : > { %v4243_v19 = vshrl.u32 %v13710_v2, %v9359_v53  ;;  %v4156_v21 = vadd.s32 %v4155_v27, %v4146_v16  ;;  %v4227_v1 = vor.u32 8388608, %v4226_v56  ;;  %v9993_v42 = vor.u32 %v4237_v29, %v4236_v59 }
 0x39a   : > { %v9995_v50 = vor.u32 %v4240_v46, %v4239_v18  ;;  %v4647_v39 = vand.u32 2147483647, %v4646_v35  ;;  %v4649_v15 = vcvt.s32.f32 %v4642_v22  ;;  %vm4253_vm0 = vcmp.lt.s32.totalorder %v13755_v20, 3 }
 0x39b   : > { %v4244_v52 = vor.u32 %v4243_v19, %v4242_v45  ;;  %v4157_v58 = vmul.u32 %v9889_v54, %v4103_v26  ;;  %v4160_v23 = vadd.s32 1, %v4156_v21  ;;  %vm4251_vm4 = vcmp.lt.s32.totalorder %v13755_v20, 1 }
 0x39c   : > { %v4265_v61 = vsel %vm4253_vm0, %v9783_v7, %v9921_v44  ;;  %v4650_v49 = vmul.f32 %v4649_v15, %v4647_v39  ;;  %v4656_v37 = vsel %vm9964_vm5, 0, %v4654_v41  ;;  %vm4252_vm13 = vcmp.lt.s32.totalorder %v13755_v20, 2 }
 0x39d   : > { %v4263_v47 = vsel %vm4251_vm4, %v9995_v50, %v4244_v52  ;;  %v4161_v54 = vsel %vm4159_vm10, %v4160_v23, %v4156_v21  ;;  %v4259_v4 = vsel %vm4251_vm4, %v9993_v42, %v9995_v50  ;;  %v4261_v7 = vsel %vm4253_vm0, %v4244_v52, %v9913_v36 }
 0x39e   : > { %v4266_v44 = vsel %vm4252_vm13, %v4263_v47, %v4265_v61  ;;  %v10022_v40 = vand.u32 31, %v13760_v8  ;;  %v4651_v43 = vxor.u32 2147483648, %v4650_v49  ;;  %v4162_v24 = vadd.s32 %v4161_v54, %v4157_v58 }
 0x39f   : > { %v10024_v30 = vshll.u32 %v4227_v1, 8  ;;  %v10029_v10 = vsel %vm3789_vm9, %v13761_v55, 920167782  ;;  %v4673_v11 = vadd.s32 3, %v4656_v37  ;;  %v4270_v41 = vand.u32 65535, %v4266_v44 }
 0x3a0   : > { %v4271_v26 = vshrl.u32 %v4266_v44, 16  ;;  %v4652_v36 = vsel %vm4531_vm12, %v4651_v43, %v4650_v49  ;;  %v4163_v13 = vadd.s32 536870912, %v4162_v24  ;;  %v10035_v38 = vsel %vm4252_vm13, %v4259_v4, %v4261_v7 }
 0x3a1   : > { %v4268_v17 = vand.u32 65535, %v10024_v30  ;;  %v13764_v16 = vor.u32 %v13762_v51, %v13763_v28  ;;  %v10046_v56 = vshrl.u32 %v13760_v8, 5  ;;  %v10051_v22 = vsel %vm9964_vm5, %v9238_v0, %v4652_v36 }
 0x3a2   : > { %v4269_v48 = vshrl.u32 %v10024_v30, 16  ;;  %v10055_v59 = vsub.s32 32, %v10022_v40  ;;  %v4657_v27 = vmul.f32 %v10051_v22, %v10051_v22  ;;  %v10059_v29 = vshrl.u32 %v4163_v13, 30 }
 0x3a3   : > { %v10043_v31 = vsel %vm3789_vm9, %v13764_v16, 1326507024  ;;  %v4273_v18 = vmul.u32 %v4271_v26, %v4268_v17  ;;  %v10063_v46 = vshll.u32 %v13710_v2, %v10022_v40  ;;  %v10065_v35 = vand.u32 3, %v4673_v11 }
 0x3a4   : > { %v10067_v63 = vmul.u32 %v4270_v41, %v4269_v48  ;;  %v4293_v45 = vshrl.u32 %v10035_v38, 16  ;;  %v4658_v19 = vmul.f32 -0.001358992, %v4657_v27  ;;  %v4665_v21 = vmul.f32 -0.00019511016, %v4657_v27 }
 0x3a5   : > { %v10071_v1 = vadd.s32 %v4153_v12, %v9973_v3  ;;  %v4165_v39 = vshll.u32 %v10059_v29, 30  ;;  %v4235_v15 = vshrl.u32 %v13643_v25, %v9359_v53  ;;  %v4272_v58 = vmul.u32 %v4270_v41, %v4268_v17 }
 0x3a6   : > { %v4276_v23 = vshll.u32 %v4273_v18, 16  ;;  %v4292_v61 = vand.u32 65535, %v10035_v38  ;;  %v4659_v49 = vadd.f32 0.041655596, %v4658_v19  ;;  %v4666_v37 = vadd.f32 0.008332121, %v4665_v21 }
 0x3a7   : > { %v10077_v47 = vsub.s32 %v4162_v24, %v4165_v39  ;;  %v4275_v54 = vmul.u32 %v4271_v26, %v4269_v48  ;;  %v4278_v4 = vshll.u32 %v10067_v63, 16  ;;  %v10080_v3 = vmul.u32 %v4293_v45, %v4268_v17 }
 0x3a8   : > { %vm4280_vm3 = vc.u32 %v4272_v58, %v4276_v23  ;;  %v4282_v7 = vadd.s32 %v4276_v23, %v4272_v58  ;;  %v4660_v12 = vmul.f32 %v4659_v49, %v4657_v27  ;;  %v4667_v44 = vmul.f32 %v4666_v37, %v4657_v27  ;;  %v13765_v58 = vld [vmem:[#allocation20_spill] sm:$0xff] }
 0x3a9   : > { %vm4167_vm12 = vcmp.lt.s32.totalorder %v10077_v47, 0  ;;  %v4168_v53 = vsub.s32 0, %v10077_v47  ;;  %v10087_v8 = vsel %vm4251_vm4, %v4235_v15, %v9993_v42  ;;  %v4256_v43 = vsel %vm4254_vm11, %v4244_v52, 2102212464 }
 0x3aa   : > { %v4281_v24 = vsel %vm4280_vm3, 1, %v13741_v6  ;;  %vm4284_vm7 = vc.u32 %v4282_v7, %v4278_v4  ;;  %v4661_v11 = vadd.f32 -0.4999988, %v4660_v12  ;;  %v4668_v41 = vadd.f32 -0.16666654, %v4667_v44 }
 0x3ab   : > { %v4169_v26 = vsel %vm4167_vm12, %v4168_v53, %v10077_v47  ;;  %v4283_v36 = vadd.s32 %v4281_v24, %v4275_v54  ;;  %vm4676_vm15 = vcmp.eq.s32.totalorder %v10065_v35, 0  ;;  %vm4679_vm1 = vcmp.eq.s32.totalorder %v10065_v35, 2 }
 0x3ac   : > { %v4170_v13 = vclz %v4169_v26  ;;  %v4277_v38 = vshrl.u32 %v4273_v18, 16  ;;  %v4285_v42 = vsel %vm4284_vm7, 1, %v13741_v6  ;;  %v4298_v51 = vshll.u32 %v10080_v3, 16 }
 0x3ad   : > { %v4662_v28 = vmul.f32 %v4661_v11, %v4657_v27  ;;  %v4669_v52 = vmul.f32 %v4668_v41, %v4657_v27  ;;  %vm4675_vm11 = vcmp.lt.s32.totalorder %v10065_v35, 2  ;;  %v4287_v16 = vadd.s32 %v4285_v42, %v4283_v36 }
 0x3ae   : > { %v4296_v19 = vmul.u32 %v4292_v61, %v4269_v48  ;;  %vm4672_vm5 = vweird.f32 %v9238_v0  ;;  %v7201_v21 = vadd.s32 4294967294, %v4170_v13  ;;  %v4257_v39 = vsel %vm4253_vm0, %v9995_v50, %v4256_v43 }
 0x3af   : > { %v4294_v15 = vmul.u32 %v4292_v61, %v4268_v17  ;;  %v3754_v18 = vand.u32 2147483647, %v13765_v58  ;;  %v4663_v23 = vadd.f32 1.0, %v4662_v28  ;;  %v4670_v49 = vadd.f32 1.0, %v4669_v52 }
 0x3b0   : > { %vm4066_vm6 = vcmp.lt.s32.totalorder %v13752_v14, 0  ;;  %v4279_v27 = vshrl.u32 %v10067_v63, 16  ;;  %v4288_v37 = vadd.s32 %v4287_v16, %v4277_v38  ;;  %vm7202_vm10 = vcmp.lt.s32.totalorder %v7201_v21, 0 }
 0x3b1   : > { %v4297_v54 = vmul.u32 %v4293_v45, %v4269_v48  ;;  %vm4302_vm4 = vc.u32 %v4294_v15, %v4298_v51  ;;  %v4304_v4 = vadd.s32 %v4298_v51, %v4294_v15  ;;  %v4671_v7 = vmul.f32 %v4670_v49, %v10051_v22 }
 0x3b2   : > { %v4680_v12 = vxor.u32 2147483648, %v4663_v23  ;;  %v4173_v44 = vsel %vm7202_vm10, 0, %v7201_v21  ;;  %v4300_v53 = vshll.u32 %v4296_v19, 16  ;;  %v4188_v61 = vsub.s32 4, %v10059_v29 }
 0x3b3   : > { %v4174_v50 = vsub.s32 32, %v4173_v44  ;;  %v4178_v17 = vsub.s32 4294967266, %v4173_v44  ;;  %v4303_v43 = vsel %vm4302_vm4, 1, %v13741_v6  ;;  %v4677_v24 = vxor.u32 2147483648, %v4671_v7 }
 0x3b4   : > { %v10108_v11 = vadd.s32 %v4288_v37, %v4279_v27  ;;  %v4305_v63 = vadd.s32 %v4303_v43, %v4297_v54  ;;  %vm4306_vm0 = vc.u32 %v4304_v4, %v4300_v53  ;;  %v4175_v48 = vshll.u32 %v10077_v47, %v4173_v44  ;;  %v13767_v27 = vld [vmem:[#allocation51_spill] sm:$0xff] }
 0x3b5   : > { %v4176_v45 = vshrl.u32 %v10071_v1, %v4174_v50  ;;  %v4179_v41 = vadd.s32 127, %v4178_v17  ;;  %v4307_v22 = vsel %vm4306_vm0, 1, %v13741_v6  ;;  %v4678_v26 = vsel %vm4676_vm15, %v4663_v23, %v4677_v24 }
 0x3b6   : > { %v4681_v36 = vsel %vm4679_vm1, %v4680_v12, %v4671_v7  ;;  %v4299_v13 = vshrl.u32 %v10080_v3, 16  ;;  %v4309_v38 = vadd.s32 %v4307_v22, %v4305_v63  ;;  %v10120_v47 = vadd.s32 %v4304_v4, %v4300_v53 }
 0x3b7   : > { %v4682_v42 = vsel %vm4675_vm11, %v4678_v26, %v4681_v36  ;;  %v4177_v51 = vor.u32 %v4176_v45, %v4175_v48  ;;  %v4180_v28 = vshll.u32 %v4179_v41, 23  ;;  %v4301_v52 = vshrl.u32 %v4296_v19, 16  ;;  %v13766_v19 = vld [vmem:[#allocation58_spill] sm:$0xff] }
 0x3b8   : > { %v4683_v1 = vsel %vm4672_vm5, nan, %v4682_v42  ;;  %v4310_v16 = vadd.s32 %v4309_v38, %v4299_v13  ;;  %v3761_v21 = vand.u32 8388607, %v3754_v18  ;;  %v4189_v3 = vsel %vm4066_vm6, %v4188_v61, %v10059_v29 }
 0x3b9   : > { %5085 = vmatpush.msra.mxu3 %v4683_v1  ;;  %v4181_v15 = vor.u32 4788187, %v4180_v28  ;;  %v4258_v35 = vsel %vm4252_vm13, %v10087_v8, %v4257_v39  ;;  %vm4314_vm3 = vc.u32 %v10108_v11, %v10120_v47  ;;  %v4184_v0 = vcvt.s32.f32 %v4177_v51 }
 0x3ba   : > { %v4311_v23 = vadd.s32 %v4310_v16, %v4301_v52  ;;  %v3772_v49 = vshrl.u32 %v13641_v33, %v13766_v19  ;;  %v3774_v37 = vshll.u32 %v13641_v33, %v13767_v27  ;;  %v3775_v4 = vshrl.u32 %v13739_v5, %v13766_v19 }
 0x3bb   : > { %v4182_v54 = vand.u32 2147483647, %v4181_v15  ;;  %v3777_v29 = vshll.u32 %v13739_v5, %v13767_v27  ;;  %v3778_v20 = vshrl.u32 %v13710_v2, %v13766_v19  ;;  %vm10146_vm13 = vcmp.le.f32.partialorder %v4064_v62, 0.7853982 }
 0x3bc   : > { %v4315_v39 = vadd.s32 1, %v4311_v23  ;;  %v3762_v7 = vor.u32 8388608, %v3761_v21  ;;  %v3771_v12 = vshll.u32 %v13643_v25, %v13767_v27  ;;  %v4312_v53 = vmul.u32 %v10024_v30, %v4258_v35 }
 0x3bd   : > { %v4185_v44 = vmul.f32 %v4184_v0, %v4182_v54  ;;  %v10153_v50 = vor.u32 %v3775_v4, %v3774_v37  ;;  %v3779_v17 = vor.u32 %v3778_v20, %v3777_v29  ;;  %v4191_v61 = vsel %vm10146_vm13, 0, %v4189_v3 }
 0x3be   : > { %v4316_v62 = vsel %vm4314_vm3, %v4315_v39, %v4311_v23  ;;  %v10160_v43 = vor.u32 %v3772_v49, %v3771_v12  ;;  %vm3788_vm12 = vcmp.lt.s32.totalorder %v13759_v60, 3  ;;  %vm3786_vm7 = vcmp.lt.s32.totalorder %v13759_v60, 1 }
 0x3bf   : > { %v4186_v24 = vxor.u32 2147483648, %v4185_v44  ;;  %v4317_v63 = vadd.s32 %v4316_v62, %v4312_v53  ;;  %v3800_v30 = vsel %vm3788_vm12, %v13761_v55, %v10043_v31  ;;  %v3936_v48 = vshrl.u32 %v13708_v32, %v10055_v59 }
 0x3c0   : > { %v10172_v45 = vshrl.u32 %v13642_v9, %v10055_v59  ;;  %v3798_v41 = vsel %vm3786_vm7, %v10153_v50, %v3779_v17  ;;  %v10177_v22 = vshll.u32 %v3762_v7, 8  ;;  %v4208_v36 = vadd.s32 3, %v4191_v61 }
 0x3c1   : > { %v4187_v26 = vsel %vm4066_vm6, %v4186_v24, %v4185_v44  ;;  %v4318_v13 = vadd.s32 536870912, %v4317_v63  ;;  %vm3787_vm15 = vcmp.lt.s32.totalorder %v13759_v60, 2  ;;  %v3794_v31 = vsel %vm3786_vm7, %v10160_v43, %v10153_v50 }
 0x3c2   : > { %v10185_v55 = vsel %vm10146_vm13, %v13752_v14, %v4187_v26  ;;  %v3796_v38 = vsel %vm3788_vm12, %v3779_v17, %v10029_v10  ;;  %v3801_v42 = vsel %vm3787_vm15, %v3798_v41, %v3800_v30  ;;  %v10201_v16 = vor.u32 %v3936_v48, %v10063_v46 }
 0x3c3   : > { %v4192_v51 = vmul.f32 %v10185_v55, %v10185_v55  ;;  %v10198_v28 = vshrl.u32 %v4318_v13, 30  ;;  %v3805_v1 = vand.u32 65535, %v3801_v42  ;;  %v3806_v52 = vshrl.u32 %v3801_v42, 16 }
 0x3c4   : > { %v10205_v21 = vshll.u32 %v13708_v32, %v10022_v40  ;;  %v3803_v15 = vand.u32 65535, %v10177_v22  ;;  %v3804_v10 = vshrl.u32 %v10177_v22, 16  ;;  %v3797_v23 = vsel %vm3787_vm15, %v3794_v31, %v3796_v38 }
 0x3c5   : > { %v4193_v3 = vmul.f32 -0.001358992, %v4192_v51  ;;  %v4200_v35 = vmul.f32 -0.00019511016, %v4192_v51  ;;  %v4320_v0 = vshll.u32 %v10198_v28, 30  ;;  %v10214_v46 = vand.u32 3, %v4208_v36 }
 0x3c6   : > { %v3940_v49 = vor.u32 %v10172_v45, %v10205_v21  ;;  %v3808_v27 = vmul.u32 %v3806_v52, %v3803_v15  ;;  %v10216_v37 = vmul.u32 %v3805_v1, %v3804_v10  ;;  %v3770_v20 = vshrl.u32 %v13643_v25, %v13766_v19 }
 0x3c7   : > { %v4194_v54 = vadd.f32 0.041655596, %v4193_v3  ;;  %v4201_v4 = vadd.f32 0.008332121, %v4200_v35  ;;  %v10218_v29 = vsub.s32 %v4317_v63, %v4320_v0  ;;  %v3807_v8 = vmul.u32 %v3805_v1, %v3803_v15 }
 0x3c8   : > { %v3811_v39 = vshll.u32 %v3808_v27, 16  ;;  %v3827_v7 = vand.u32 65535, %v3797_v23  ;;  %v3828_v12 = vshrl.u32 %v3797_v23, 16  ;;  %v3810_v62 = vmul.u32 %v3806_v52, %v3804_v10 }
 0x3c9   : > { %v4195_v44 = vmul.f32 %v4194_v54, %v4192_v51  ;;  %v4202_v53 = vmul.f32 %v4201_v4, %v4192_v51  ;;  %vm4322_vm1 = vcmp.lt.s32.totalorder %v10218_v29, 0  ;;  %v4323_v61 = vsub.s32 0, %v10218_v29 }
 0x3ca   : > { %v3813_v24 = vshll.u32 %v10216_v37, 16  ;;  %vm3815_vm11 = vc.u32 %v3807_v8, %v3811_v39  ;;  %v3817_v30 = vadd.s32 %v3811_v39, %v3807_v8  ;;  %vm4211_vm5 = vcmp.eq.s32.totalorder %v10214_v46, 0 }
 0x3cb   : > { %v4196_v63 = vadd.f32 -0.4999988, %v4195_v44  ;;  %v4203_v48 = vadd.f32 -0.16666654, %v4202_v53  ;;  %v4324_v41 = vsel %vm4322_vm1, %v4323_v61, %v10218_v29  ;;  %v3816_v19 = vsel %vm3815_vm11, 1, %v13741_v6 }
 0x3cc   : > { %vm4214_vm6 = vcmp.eq.s32.totalorder %v10214_v46, 2  ;;  %v4325_v26 = vclz %v4324_v41  ;;  %v3791_v36 = vsel %vm3789_vm9, %v3779_v17, 2102212464  ;;  %v3818_v13 = vadd.s32 %v3816_v19, %v3810_v62 }
 0x3cd   : > { %vm3819_vm10 = vc.u32 %v3817_v30, %v3813_v24  ;;  %v4197_v31 = vmul.f32 %v4196_v63, %v4192_v51  ;;  %v4204_v38 = vmul.f32 %v4203_v48, %v4192_v51  ;;  %vm4210_vm4 = vcmp.lt.s32.totalorder %v10214_v46, 2  ;;  %v13772_v48 = vld [vmem:[#allocation40_spill] sm:$0xff] }
 0x3ce   : > { %v3820_v42 = vsel %vm3819_vm10, 1, %v13741_v6  ;;  %v3830_v1 = vmul.u32 %v3828_v12, %v3803_v15  ;;  %vm4207_vm0 = vweird.f32 %v13752_v14  ;;  %v4313_v52 = vadd.s32 %v10120_v47, %v10108_v11 }
 0x3cf   : > { %v7204_v3 = vadd.s32 4294967294, %v4325_v26  ;;  %v3790_v35 = vsel %vm3786_vm7, %v3770_v20, %v10160_v43  ;;  %v3831_v17 = vmul.u32 %v3827_v7, %v3804_v10  ;;  %v4198_v0 = vadd.f32 1.0, %v4197_v31 }
 0x3d0   : > { %v4205_v23 = vadd.f32 1.0, %v4204_v38  ;;  %vm4221_vm9 = vcmp.lt.s32.totalorder %v13756_v57, 0  ;;  %v3792_v51 = vsel %vm3788_vm12, %v10153_v50, %v3791_v36  ;;  %v3822_v54 = vadd.s32 %v3820_v42, %v3818_v13 }
 0x3d1   : > { %vm7205_vm3 = vcmp.lt.s32.totalorder %v7204_v3, 0  ;;  %v4343_v4 = vsub.s32 4, %v10198_v28  ;;  %v3829_v8 = vmul.u32 %v3827_v7, %v3803_v15  ;;  %v3833_v11 = vshll.u32 %v3830_v1, 16 }
 0x3d2   : > { %v4206_v47 = vmul.f32 %v4205_v23, %v10185_v55  ;;  %v4215_v39 = vxor.u32 2147483648, %v4198_v0  ;;  %v4328_v44 = vsel %vm7205_vm3, 0, %v7204_v3  ;;  %v3812_v43 = vshrl.u32 %v3808_v27, 16 }
 0x3d3   : > { %v4329_v20 = vsub.s32 32, %v4328_v44  ;;  %v4333_v53 = vsub.s32 4294967266, %v4328_v44  ;;  %v3832_v61 = vmul.u32 %v3828_v12, %v3804_v10  ;;  %v3835_v62 = vshll.u32 %v3831_v17, 16 }
 0x3d4   : > { %v4212_v24 = vxor.u32 2147483648, %v4206_v47  ;;  %v4330_v30 = vshll.u32 %v10218_v29, %v4328_v44  ;;  %v3823_v63 = vadd.s32 %v3822_v54, %v3812_v43  ;;  %vm3837_vm13 = vc.u32 %v3829_v8, %v3833_v11 }
 0x3d5   : > { %vm3944_vm12 = vcmp.lt.s32.totalorder %v10046_v56, 4  ;;  %vm10249_vm7 = vcmp.le.f32.partialorder %v4219_v34, 0.7853982  ;;  %v4331_v55 = vshrl.u32 %v4313_v52, %v4329_v20  ;;  %v4334_v15 = vadd.s32 127, %v4333_v53 }
 0x3d6   : > { %v3838_v27 = vsel %vm3837_vm13, 1, %v13741_v6  ;;  %v3839_v7 = vadd.s32 %v3833_v11, %v3829_v8  ;;  %v4213_v10 = vsel %vm4211_vm5, %v4198_v0, %v4212_v24  ;;  %v4216_v29 = vsel %vm4214_vm6, %v4215_v39, %v4206_v47  ;;  %v13773_v24 = vld [vmem:[#allocation66_spill] sm:$0xff] }
 0x3d7   : > { %v3840_v12 = vadd.s32 %v3838_v27, %v3832_v61  ;;  %v3909_v41 = vand.u32 2147483647, %v13772_v48  ;;  %v4217_v34 = vsel %vm4210_vm4, %v4213_v10, %v4216_v29  ;;  %v4332_v19 = vor.u32 %v4331_v55, %v4330_v30 }
 0x3d8   : > { %v4335_v26 = vshll.u32 %v4334_v15, 23  ;;  %vm3841_vm1 = vc.u32 %v3839_v7, %v3835_v62  ;;  %v4218_v36 = vsel %vm4207_vm0, nan, %v4217_v34  ;;  %v3793_v13 = vsel %vm3787_vm15, %v3790_v35, %v3792_v51 }
 0x3d9   : > { %v3814_v31 = vshrl.u32 %v10216_v37, 16  ;;  %v3842_v38 = vsel %vm3841_vm1, 1, %v13741_v6  ;;  %5054 = vmatpush.msra.mxu2 %v4218_v36  ;;  %v4344_v46 = vsel %vm4221_vm9, %v4343_v4, %v10198_v28  ;;  %v3834_v52 = vshrl.u32 %v3830_v1, 16 }
 0x3da   : > { %v4336_v42 = vor.u32 4788187, %v4335_v26  ;;  %v3844_v3 = vadd.s32 %v3842_v38, %v3840_v12  ;;  %v3836_v23 = vshrl.u32 %v3831_v17, 16  ;;  %v10272_v14 = vadd.s32 %v3839_v7, %v3835_v62 }
 0x3db   : > { %v10270_v0 = vadd.s32 %v3823_v63, %v3814_v31  ;;  %v3916_v60 = vand.u32 8388607, %v3909_v41  ;;  %v4339_v37 = vcvt.s32.f32 %v4332_v19  ;;  %v3927_v54 = vshrl.u32 %v13641_v33, %v10055_v59 }
 0x3dc   : > { %v4337_v35 = vand.u32 2147483647, %v4336_v42  ;;  %v3845_v51 = vadd.s32 %v3844_v3, %v3834_v52  ;;  %v3926_v28 = vshll.u32 %v13643_v25, %v10022_v40  ;;  %v3929_v1 = vshll.u32 %v13641_v33, %v10022_v40 }
 0x3dd   : > { %v3917_v8 = vor.u32 8388608, %v3916_v60  ;;  %v3930_v17 = vshrl.u32 %v13739_v5, %v10055_v59  ;;  %v3932_v47 = vshll.u32 %v13739_v5, %v10022_v40  ;;  %v3933_v39 = vshrl.u32 %v13710_v2, %v10055_v59 }
 0x3de   : > { %v4340_v4 = vmul.f32 %v4339_v37, %v4337_v35  ;;  %v3846_v11 = vadd.s32 %v3845_v51, %v3836_v23  ;;  %v3954_v44 = vsel %vm3944_vm12, %v3940_v49, 1326507024  ;;  %v4346_v43 = vsel %vm10249_vm7, 0, %v4344_v46 }
 0x3df   : > { %vm3849_vm15 = vc.u32 %v10270_v0, %v10272_v14  ;;  %v3928_v20 = vor.u32 %v3927_v54, %v3926_v28  ;;  %v3931_v62 = vor.u32 %v3930_v17, %v3929_v1  ;;  %v3934_v40 = vor.u32 %v3933_v39, %v3932_v47 }
 0x3e0   : > { %v4341_v53 = vxor.u32 2147483648, %v4340_v4  ;;  %v3850_v61 = vadd.s32 1, %v3846_v11  ;;  %v10299_v30 = vshrl.u32 %v13642_v9, %v13773_v24  ;;  %v3847_v45 = vmul.u32 %v10177_v22, %v3793_v13 }
 0x3e1   : > { %vm3943_vm11 = vcmp.lt.s32.totalorder %v10046_v56, 3  ;;  %v10303_v21 = vshll.u32 %v3917_v8, 8  ;;  %v3950_v49 = vsel %vm3944_vm12, %v10201_v16, 920167782  ;;  %v4363_v27 = vadd.s32 3, %v4346_v43 }
 0x3e2   : > { %v4342_v63 = vsel %vm4221_vm9, %v4341_v53, %v4340_v4  ;;  %v3851_v55 = vsel %vm3849_vm15, %v3850_v61, %v3846_v11  ;;  %v3955_v15 = vsel %vm3943_vm11, %v10201_v16, %v3954_v44  ;;  %vm3941_vm5 = vcmp.lt.s32.totalorder %v10046_v56, 1 }
 0x3e3   : > { %v10316_v22 = vsel %vm10249_vm7, %v13756_v57, %v4342_v63  ;;  %v3852_v7 = vadd.s32 %v3851_v55, %v3847_v45  ;;  %vm3942_vm6 = vcmp.lt.s32.totalorder %v10046_v56, 2  ;;  %v3949_v29 = vsel %vm3941_vm5, %v3928_v20, %v3931_v62 }
 0x3e4   : > { %v4347_v10 = vmul.f32 %v10316_v22, %v10316_v22  ;;  %v3953_v16 = vsel %vm3941_vm5, %v3931_v62, %v3934_v40  ;;  %v3951_v50 = vsel %vm3943_vm11, %v3934_v40, %v3950_v49  ;;  %v3958_v19 = vand.u32 65535, %v10303_v21 }
 0x3e5   : > { %v3853_v12 = vadd.s32 536870912, %v3852_v7  ;;  %v3956_v34 = vsel %vm3942_vm6, %v3953_v16, %v3955_v15  ;;  %v3925_v42 = vshrl.u32 %v13643_v25, %v10055_v59  ;;  %v3946_v46 = vsel %vm3944_vm12, %v3934_v40, 2102212464 }
 0x3e6   : > { %v4348_v26 = vmul.f32 -0.001358992, %v4347_v10  ;;  %v4355_v36 = vmul.f32 -0.00019511016, %v4347_v10  ;;  %v3960_v13 = vand.u32 65535, %v3956_v34  ;;  %v3961_v31 = vshrl.u32 %v3956_v34, 16 }
 0x3e7   : > { %v10331_v38 = vshrl.u32 %v3853_v12, 30  ;;  %v3959_v52 = vshrl.u32 %v10303_v21, 16  ;;  %v3952_v60 = vsel %vm3942_vm6, %v3949_v29, %v3951_v50  ;;  %v4364_v37 = vand.u32 3, %v4363_v27 }
 0x3e8   : > { %v4349_v3 = vadd.f32 0.041655596, %v4348_v26  ;;  %v4356_v23 = vadd.f32 0.008332121, %v4355_v36  ;;  %v3963_v35 = vmul.u32 %v3961_v31, %v3958_v19  ;;  %v3945_v54 = vsel %vm3941_vm5, %v3925_v42, %v3928_v20 }
 0x3e9   : > { %v3855_v51 = vshll.u32 %v10331_v38, 30  ;;  %v10343_v8 = vmul.u32 %v3960_v13, %v3959_v52  ;;  %v3962_v1 = vmul.u32 %v3960_v13, %v3958_v19  ;;  %v3947_v11 = vsel %vm3943_vm11, %v3931_v62, %v3946_v46 }
 0x3ea   : > { %v4350_v59 = vmul.f32 %v4349_v3, %v4347_v10  ;;  %v4357_v28 = vmul.f32 %v4356_v23, %v4347_v10  ;;  %v3966_v17 = vshll.u32 %v3963_v35, 16  ;;  %v3982_v47 = vand.u32 65535, %v3952_v60 }
 0x3eb   : > { %v10345_v4 = vsub.s32 %v3852_v7, %v3855_v51  ;;  %v3983_v39 = vshrl.u32 %v3952_v60, 16  ;;  %v3965_v53 = vmul.u32 %v3961_v31, %v3959_v52  ;;  %v3968_v61 = vshll.u32 %v10343_v8, 16 }
 0x3ec   : > { %v4351_v44 = vadd.f32 -0.4999988, %v4350_v59  ;;  %v4358_v43 = vadd.f32 -0.16666654, %v4357_v28  ;;  %vm3970_vm10 = vc.u32 %v3962_v1, %v3966_v17  ;;  %vm4365_vm0 = vcmp.lt.s32.totalorder %v4364_v37, 2 }
 0x3ed   : > { %vm3857_vm4 = vcmp.lt.s32.totalorder %v10345_v4, 0  ;;  %v3858_v20 = vsub.s32 0, %v10345_v4  ;;  %v3971_v40 = vsel %vm3970_vm10, 1, %v13741_v6  ;;  %v3972_v63 = vadd.s32 %v3966_v17, %v3962_v1 }
 0x3ee   : > { %v4352_v45 = vmul.f32 %v4351_v44, %v4347_v10  ;;  %v4359_v49 = vmul.f32 %v4358_v43, %v4347_v10  ;;  %v3973_v55 = vadd.s32 %v3971_v40, %v3965_v53  ;;  %vm4362_vm9 = vweird.f32 %v13756_v57  ;;  %v13774_v43 = vld [vmem:[#allocation11_spill] sm:$0xff] }
 0x3ef   : > { %vm4366_vm3 = vcmp.eq.s32.totalorder %v4364_v37, 0  ;;  %v3859_v62 = vsel %vm3857_vm4, %v3858_v20, %v10345_v4  ;;  %v3985_v15 = vmul.u32 %v3983_v39, %v3958_v19  ;;  %v3986_v27 = vmul.u32 %v3982_v47, %v3959_v52 }
 0x3f0   : > { %v4353_v7 = vadd.f32 1.0, %v4352_v45  ;;  %v4360_v29 = vadd.f32 1.0, %v4359_v49  ;;  %vm3756_vm13 = vcmp.lt.s32.totalorder %v13765_v58, 0  ;;  %v3860_v16 = vclz %v3859_v62 }
 0x3f1   : > { %vm3974_vm12 = vc.u32 %v3972_v63, %v3968_v61  ;;  %vm4369_vm7 = vcmp.eq.s32.totalorder %v4364_v37, 2  ;;  %v3848_v10 = vadd.s32 %v10272_v14, %v10270_v0  ;;  %v10360_v12 = vsel %vm3942_vm6, %v3945_v54, %v3947_v11 }
 0x3f2   : > { %v3975_v50 = vsel %vm3974_vm12, 1, %v13741_v6  ;;  %v4361_v34 = vmul.f32 %v4360_v29, %v10316_v22  ;;  %v4370_v26 = vxor.u32 2147483648, %v4353_v7  ;;  %v7195_v36 = vadd.s32 4294967294, %v3860_v16  ;;  %v13776_v16 = vld [vmem:[#allocation44_spill] sm:$0xff] }
 0x3f3   : > { %v3977_v13 = vadd.s32 %v3975_v50, %v3973_v55  ;;  %v3878_v31 = vsub.s32 4, %v10331_v38  ;;  %v3967_v42 = vshrl.u32 %v3963_v35, 16  ;;  %v3984_v46 = vmul.u32 %v3982_v47, %v3958_v19 }
 0x3f4   : > { %v3988_v3 = vshll.u32 %v3985_v15, 16  ;;  %v4367_v23 = vxor.u32 2147483648, %v4361_v34  ;;  %vm7196_vm1 = vcmp.lt.s32.totalorder %v7195_v36, 0  ;;  %v3987_v60 = vmul.u32 %v3983_v39, %v3959_v52 }
 0x3f5   : > { %v3990_v0 = vshll.u32 %v3986_v27, 16  ;;  %v4371_v56 = vsel %vm4369_vm7, %v4370_v26, %v4361_v34  ;;  %v3863_v14 = vsel %vm7196_vm1, 0, %v7195_v36  ;;  %v3978_v28 = vadd.s32 %v3977_v13, %v3967_v42 }
 0x3f6   : > { %vm3992_vm15 = vc.u32 %v3984_v46, %v3988_v3  ;;  %v3994_v51 = vadd.s32 %v3988_v3, %v3984_v46  ;;  %v4368_v54 = vsel %vm4366_vm3, %v4353_v7, %v4367_v23  ;;  %v3864_v22 = vsub.s32 32, %v3863_v14 }
 0x3f7   : > { %v3868_v59 = vsub.s32 4294967266, %v3863_v14  ;;  %v4372_v1 = vsel %vm4365_vm0, %v4368_v54, %v4371_v56  ;;  %v3865_v35 = vshll.u32 %v10345_v4, %v3863_v14  ;;  %v3993_v19 = vsel %vm3992_vm15, 1, %v13741_v6  ;;  %v13781_v56 = vld [vmem:[#allocation72_spill] sm:$0xff] }
 0x3f8   : > { %vm3996_vm11 = vc.u32 %v3994_v51, %v3990_v0  ;;  %v4373_v52 = vsel %vm4362_vm9, nan, %v4372_v1  ;;  %v3866_v17 = vshrl.u32 %v3848_v10, %v3864_v22  ;;  %v3995_v47 = vadd.s32 %v3993_v19, %v3987_v60  ;;  %v13779_v60 = vld [vmem:[#allocation54_spill] sm:$0xff]  ;;  %v13782_v54 = vld [vmem:[#allocation64_spill] sm:$0xff]  ;;  %v13783_v22 = vld [vmem:[#allocation55_spill] sm:$0xff] }
 0x3f9   : > { %v3869_v11 = vadd.s32 127, %v3868_v59  ;;  %5086 = vmatpush.msra.mxu3 %v4373_v52  ;;  %v3879_v39 = vsel %vm3756_vm13, %v3878_v31, %v10331_v38  ;;  %v3969_v44 = vshrl.u32 %v10343_v8, 16  ;;  %v3997_v37 = vsel %vm3996_vm11, 1, %v13741_v6  ;;  %v13775_v8 = vld [vmem:[#allocation39_spill] sm:$0xff]  ;;  %v13784_v19 = vld [vmem:[#allocation69_spill] sm:$0xff] }
 0x3fa   : > { %v3444_v4 = vand.u32 2147483647, %v13774_v43  ;;  %v3867_v53 = vor.u32 %v3866_v17, %v3865_v35  ;;  %v3989_v61 = vshrl.u32 %v3985_v15, 16  ;;  %v3999_v40 = vadd.s32 %v3997_v37, %v3995_v47  ;;  %v13785_v37 = vld [vmem:[#allocation63_spill] sm:$0xff] }
 0x3fb   : > { %v3870_v20 = vshll.u32 %v3869_v11, 23  ;;  %v10378_v57 = vadd.s32 %v3978_v28, %v3969_v44  ;;  %v3991_v45 = vshrl.u32 %v3986_v27, 16  ;;  %v10380_v49 = vadd.s32 %v3994_v51, %v3990_v0  ;;  %v13780_v0 = vld [vmem:[#allocation68_spill] sm:$0xff] }
 0x3fc   : > { %v3451_v63 = vand.u32 8388607, %v3444_v4  ;;  %v3874_v38 = vcvt.s32.f32 %v3867_v53  ;;  %v4000_v62 = vadd.s32 %v3999_v40, %v3989_v61  ;;  %v3461_v7 = vshll.u32 %v13643_v25, %v13775_v8  ;;  %v13786_v61 = vld [vmem:[#allocation65_spill] sm:$0xff] }
 0x3fd   : > { %v3871_v55 = vor.u32 4788187, %v3870_v20  ;;  %v3462_v10 = vshrl.u32 %v13641_v33, %v13776_v16  ;;  %v3464_v15 = vshll.u32 %v13641_v33, %v13775_v8  ;;  %v3465_v27 = vshrl.u32 %v13739_v5, %v13776_v16 }
 0x3fe   : > { %v3452_v29 = vor.u32 8388608, %v3451_v63  ;;  %v4001_v34 = vadd.s32 %v4000_v62, %v3991_v45  ;;  %v3467_v26 = vshll.u32 %v13739_v5, %v13775_v8  ;;  %v3468_v36 = vshrl.u32 %v13710_v2, %v13776_v16 }
 0x3ff   : > { %v3872_v50 = vand.u32 2147483647, %v3871_v55  ;;  %vm10398_vm5 = vcmp.le.f32.partialorder %v3754_v18, 0.7853982  ;;  %vm4004_vm6 = vc.u32 %v10378_v57, %v10380_v49  ;;  %v10404_v31 = vor.u32 %v3462_v10, %v3461_v7 }
 0x400   : > { %v10406_v42 = vor.u32 %v3465_v27, %v3464_v15  ;;  %v4005_v3 = vadd.s32 1, %v4001_v34  ;;  %v3469_v23 = vor.u32 %v3468_v36, %v3467_v26  ;;  %vm3478_vm10 = vcmp.lt.s32.totalorder %v13779_v60, 3 }
 0x401   : > { %v3875_v46 = vmul.f32 %v3874_v38, %v3872_v50  ;;  %v10411_v14 = vor.u32 %v13781_v56, %v13780_v0  ;;  %v3881_v18 = vsel %vm10398_vm5, 0, %v3879_v39  ;;  %v4002_v51 = vmul.u32 %v10303_v21, %v10360_v12 }
 0x402   : > { %v3490_v59 = vsel %vm3478_vm10, %v13783_v22, %v13782_v54  ;;  %v4006_v1 = vsel %vm4004_vm6, %v4005_v3, %v4001_v34  ;;  %vm3476_vm4 = vcmp.lt.s32.totalorder %v13779_v60, 1  ;;  %v10422_v35 = vshll.u32 %v3452_v29, 8 }
 0x403   : > { %v3876_v28 = vxor.u32 2147483648, %v3875_v46  ;;  %v3630_v52 = vor.u32 %v10299_v30, %v13784_v19  ;;  %v4007_v17 = vadd.s32 %v4006_v1, %v4002_v51  ;;  %vm3477_vm0 = vcmp.lt.s32.totalorder %v13779_v60, 2 }
 0x404   : > { %v3488_v21 = vsel %vm3476_vm4, %v10406_v42, %v3469_v23  ;;  %v3898_v11 = vadd.s32 3, %v3881_v18  ;;  %v3484_v47 = vsel %vm3476_vm4, %v10404_v31, %v10406_v42  ;;  %v3486_v53 = vsel %vm3478_vm10, %v3469_v23, %v13785_v37 }
 0x405   : > { %v3877_v12 = vsel %vm3756_vm13, %v3876_v28, %v3875_v46  ;;  %v3491_v39 = vsel %vm3477_vm0, %v3488_v21, %v3490_v59  ;;  %v4008_v44 = vadd.s32 536870912, %v4007_v17  ;;  %vm3634_vm9 = vcmp.lt.s32.totalorder %v13786_v61, 4 }
 0x406   : > { %v10441_v30 = vsel %vm10398_vm5, %v13765_v58, %v3877_v12  ;;  %v3495_v20 = vand.u32 65535, %v3491_v39  ;;  %v3493_v45 = vand.u32 65535, %v10422_v35  ;;  %v3496_v63 = vshrl.u32 %v3491_v39, 16 }
 0x407   : > { %v3882_v40 = vmul.f32 %v10441_v30, %v10441_v30  ;;  %v10453_v55 = vsel %vm3634_vm9, %v10411_v14, 920167782  ;;  %v10457_v38 = vsel %vm3634_vm9, %v3630_v52, 1326507024  ;;  %v10459_v62 = vshrl.u32 %v4008_v44, 30 }
 0x408   : > { %v10462_v8 = vshrl.u32 %v10422_v35, 16  ;;  %v3487_v10 = vsel %vm3477_vm0, %v3484_v47, %v3486_v53  ;;  %v3498_v15 = vmul.u32 %v3496_v63, %v3493_v45  ;;  %v10466_v27 = vand.u32 3, %v3898_v11 }
 0x409   : > { %v3883_v7 = vmul.f32 -0.001358992, %v3882_v40  ;;  %v3890_v29 = vmul.f32 -0.00019511016, %v3882_v40  ;;  %v4010_v50 = vshll.u32 %v10459_v62, 30  ;;  %v3460_v34 = vshrl.u32 %v13643_v25, %v13776_v16 }
 0x40a   : > { %v10472_v26 = vmul.u32 %v3495_v20, %v10462_v8  ;;  %v3497_v46 = vmul.u32 %v3495_v20, %v3493_v45  ;;  %v3501_v3 = vshll.u32 %v3498_v15, 16  ;;  %v3481_v56 = vsel %vm3479_vm2, %v3469_v23, 2102212464 }
 0x40b   : > { %v3884_v36 = vadd.f32 0.041655596, %v3883_v7  ;;  %v3891_v13 = vadd.f32 0.008332121, %v3890_v29  ;;  %v10474_v0 = vsub.s32 %v4007_v17, %v4010_v50  ;;  %v3517_v18 = vand.u32 65535, %v3487_v10 }
 0x40c   : > { %v3518_v51 = vshrl.u32 %v3487_v10, 16  ;;  %v3500_v59 = vmul.u32 %v3496_v63, %v10462_v8  ;;  %vm3505_vm3 = vc.u32 %v3497_v46, %v3501_v3  ;;  %vm3904_vm13 = vcmp.eq.s32.totalorder %v10466_v27, 2 }
 0x40d   : > { %v3885_v54 = vmul.f32 %v3884_v36, %v3882_v40  ;;  %v3892_v22 = vmul.f32 %v3891_v13, %v3882_v40  ;;  %vm4012_vm12 = vcmp.lt.s32.totalorder %v10474_v0, 0  ;;  %v4013_v16 = vsub.s32 0, %v10474_v0 }
 0x40e   : > { %v3503_v28 = vshll.u32 %v10472_v26, 16  ;;  %v3506_v1 = vsel %vm3505_vm3, 1, %v13741_v6  ;;  %v3507_v23 = vadd.s32 %v3501_v3, %v3497_v46  ;;  %vm3901_vm2 = vcmp.eq.s32.totalorder %v10466_v27, 0 }
 0x40f   : > { %v3886_v19 = vadd.f32 -0.4999988, %v3885_v54  ;;  %v3893_v52 = vadd.f32 -0.16666654, %v3892_v22  ;;  %v3508_v17 = vadd.s32 %v3506_v1, %v3500_v59  ;;  %v4003_v21 = vadd.s32 %v10380_v49, %v10378_v57 }
 0x410   : > { %v4014_v12 = vsel %vm4012_vm12, %v4013_v16, %v10474_v0  ;;  %v3520_v11 = vmul.u32 %v3518_v51, %v3493_v45  ;;  %v3521_v47 = vmul.u32 %v3517_v18, %v10462_v8  ;;  %vm3900_vm7 = vcmp.lt.s32.totalorder %v10466_v27, 2 }
 0x411   : > { %v3887_v39 = vmul.f32 %v3886_v19, %v3882_v40  ;;  %v3894_v44 = vmul.f32 %v3893_v52, %v3882_v40  ;;  %v4015_v37 = vclz %v4014_v12  ;;  %vm3509_vm1 = vc.u32 %v3507_v23, %v3503_v28  ;;  %v13789_v52 = vld [vmem:[#allocation23_spill] sm:$0xff] }
 0x412   : > { %vm3897_vm15 = vweird.f32 %v13765_v58  ;;  %v4033_v53 = vsub.s32 4, %v10459_v62  ;;  %v3480_v20 = vsel %vm3476_vm4, %v3460_v34, %v10404_v31  ;;  %v3482_v57 = vsel %vm3478_vm10, %v10406_v42, %v3481_v56 }
 0x413   : > { %v3510_v49 = vsel %vm3509_vm1, 1, %v13741_v6  ;;  %v3888_v63 = vadd.f32 1.0, %v3887_v39  ;;  %v3895_v40 = vadd.f32 1.0, %v3894_v44  ;;  %v7198_v7 = vadd.s32 4294967294, %v4015_v37 }
 0x414   : > { %v3512_v29 = vadd.s32 %v3510_v49, %v3508_v17  ;;  %v3502_v10 = vshrl.u32 %v3498_v15, 16  ;;  %v3504_v50 = vshrl.u32 %v10472_v26, 16  ;;  %v3519_v36 = vmul.u32 %v3517_v18, %v3493_v45 }
 0x415   : > { %v3523_v13 = vshll.u32 %v3520_v11, 16  ;;  %v3896_v46 = vmul.f32 %v3895_v40, %v10441_v30  ;;  %v3905_v3 = vxor.u32 2147483648, %v3888_v63  ;;  %vm7199_vm11 = vcmp.lt.s32.totalorder %v7198_v7, 0 }
 0x416   : > { %v3525_v31 = vshll.u32 %v3521_v47, 16  ;;  %v4018_v34 = vsel %vm7199_vm11, 0, %v7198_v7  ;;  %v3513_v54 = vadd.s32 %v3512_v29, %v3502_v10  ;;  %v3522_v15 = vmul.u32 %v3518_v51, %v10462_v8 }
 0x417   : > { %vm3527_vm5 = vc.u32 %v3519_v36, %v3523_v13  ;;  %v3529_v42 = vadd.s32 %v3523_v13, %v3519_v36  ;;  %v3902_v56 = vxor.u32 2147483648, %v3896_v46  ;;  %v3906_v22 = vsel %vm3904_vm13, %v3905_v3, %v3896_v46 }
 0x418   : > { %v4019_v59 = vsub.s32 32, %v4018_v34  ;;  %vm10506_vm6 = vcmp.le.f32.partialorder %v3909_v41, 0.7853982  ;;  %v4020_v30 = vshll.u32 %v10474_v0, %v4018_v34  ;;  %v4023_v26 = vsub.s32 4294967266, %v4018_v34 }
 0x419   : > { %v3528_v18 = vsel %vm3527_vm5, 1, %v13741_v6  ;;  %vm3531_vm10 = vc.u32 %v3529_v42, %v3525_v31  ;;  %v3903_v16 = vsel %vm3901_vm2, %v3888_v63, %v3902_v56  ;;  %v10517_v51 = vadd.s32 %v3513_v54, %v3504_v50 }
 0x41a   : > { %v4021_v28 = vshrl.u32 %v4003_v21, %v4019_v59  ;;  %v3530_v1 = vadd.s32 %v3528_v18, %v3522_v15  ;;  %v3532_v19 = vsel %vm3531_vm10, 1, %v13741_v6  ;;  %v3907_v8 = vsel %vm3900_vm7, %v3903_v16, %v3906_v22 }
 0x41b   : > { %v4024_v41 = vadd.s32 127, %v4023_v26  ;;  %v3599_v23 = vand.u32 2147483647, %v13789_v52  ;;  %v3908_v0 = vsel %vm3897_vm15, nan, %v3907_v8  ;;  %vm3911_vm4 = vcmp.lt.s32.totalorder %v13772_v48, 0 }
 0x41c   : > { %v3524_v17 = vshrl.u32 %v3520_v11, 16  ;;  %v3534_v12 = vadd.s32 %v3532_v19, %v3530_v1  ;;  %5055 = vmatpush.msra.mxu2 %v3908_v0  ;;  %v4022_v21 = vor.u32 %v4021_v28, %v4020_v30  ;;  %v3483_v44 = vsel %vm3477_vm0, %v3480_v20, %v3482_v57  ;;  %v13790_v11 = vld [vmem:[#allocation57_spill] sm:$0xff] }
 0x41d   : > { %v4025_v39 = vshll.u32 %v4024_v41, 23  ;;  %v10525_v27 = vadd.s32 %v3529_v42, %v3525_v31  ;;  %v4034_v37 = vsel %vm3911_vm4, %v4033_v53, %v10459_v62  ;;  %v3526_v49 = vshrl.u32 %v3521_v47, 16  ;;  %v13791_v42 = vld [vmem:[#allocation59_spill] sm:$0xff] }
 0x41e   : > { %v3535_v63 = vadd.s32 %v3534_v12, %v3524_v17  ;;  %v3606_v58 = vand.u32 8388607, %v3599_v23  ;;  %v3616_v7 = vshll.u32 %v13643_v25, %v13790_v11  ;;  %v3617_v60 = vshrl.u32 %v13641_v33, %v13773_v24 }
 0x41f   : > { %v4026_v40 = vor.u32 4788187, %v4025_v39  ;;  %vm3539_vm3 = vc.u32 %v10517_v51, %v10525_v27  ;;  %v3619_v62 = vshll.u32 %v13641_v33, %v13790_v11  ;;  %v3620_v47 = vshrl.u32 %v13739_v5, %v13773_v24 }
 0x420   : > { %v3536_v20 = vadd.s32 %v3535_v63, %v3526_v49  ;;  %v3607_v57 = vor.u32 8388608, %v3606_v58  ;;  %v4029_v29 = vcvt.s32.f32 %v4022_v21  ;;  %v3622_v10 = vshll.u32 %v13739_v5, %v13790_v11 }
 0x421   : > { %v4027_v53 = vand.u32 2147483647, %v4026_v40  ;;  %v3623_v50 = vshrl.u32 %v13710_v2, %v13773_v24  ;;  %v4036_v36 = vsel %vm10506_vm6, 0, %v4034_v37  ;;  %v3618_v46 = vor.u32 %v3617_v60, %v3616_v7 }
 0x422   : > { %v3540_v13 = vadd.s32 1, %v3536_v20  ;;  %v3621_v3 = vor.u32 %v3620_v47, %v3619_v62  ;;  %v3537_v34 = vmul.u32 %v10422_v35, %v3483_v44  ;;  %vm3633_vm0 = vcmp.lt.s32.totalorder %v13786_v61, 3 }
 0x423   : > { %v4030_v31 = vmul.f32 %v4029_v29, %v4027_v53  ;;  %v3624_v54 = vor.u32 %v3623_v50, %v3622_v10  ;;  %v3316_v56 = vshrl.u32 %v13708_v32, %v13791_v42  ;;  %v3645_v59 = vsel %vm3633_vm0, %v10411_v14, %v10457_v38 }
 0x424   : > { %v3541_v22 = vsel %vm3539_vm3, %v3540_v13, %v3536_v20  ;;  %v10559_v15 = vshll.u32 %v3607_v57, 8  ;;  %v4053_v26 = vadd.s32 3, %v4036_v36  ;;  %vm3631_vm13 = vcmp.lt.s32.totalorder %v13786_v61, 1 }
 0x425   : > { %v4031_v30 = vxor.u32 2147483648, %v4030_v31  ;;  %v3542_v35 = vadd.s32 %v3541_v22, %v3537_v34  ;;  %vm3632_vm12 = vcmp.lt.s32.totalorder %v13786_v61, 2  ;;  %v3639_v18 = vsel %vm3631_vm13, %v3618_v46, %v3621_v3 }
 0x426   : > { %v3641_v16 = vsel %vm3633_vm0, %v3624_v54, %v10453_v55  ;;  %v3643_v28 = vsel %vm3631_vm13, %v3621_v3, %v3624_v54  ;;  %v10575_v19 = vand.u32 65535, %v10559_v15  ;;  %v10583_v55 = vshrl.u32 %v10559_v15, 16 }
 0x427   : > { %v4032_v14 = vsel %vm3911_vm4, %v4031_v30, %v4030_v31  ;;  %v3543_v38 = vadd.s32 536870912, %v3542_v35  ;;  %v3646_v1 = vsel %vm3632_vm12, %v3643_v28, %v3645_v59  ;;  %v10587_v17 = vshrl.u32 %v13642_v9, %v13791_v42 }
 0x428   : > { %v10580_v8 = vsel %vm10506_vm6, %v13772_v48, %v4032_v14  ;;  %v3650_v41 = vand.u32 65535, %v3646_v1  ;;  %v3651_v0 = vshrl.u32 %v3646_v1, 16  ;;  %v3642_v39 = vsel %vm3632_vm12, %v3639_v18, %v3641_v16 }
 0x429   : > { %v4037_v12 = vmul.f32 %v10580_v8, %v10580_v8  ;;  %v10591_v21 = vshrl.u32 %v3543_v38, 30  ;;  %v3615_v45 = vshrl.u32 %v13643_v25, %v13773_v24  ;;  %v3636_v44 = vsel %vm3634_vm9, %v3624_v54, 2102212464 }
 0x42a   : > { %v3653_v37 = vmul.u32 %v3651_v0, %v10575_v19  ;;  %v10601_v49 = vmul.u32 %v3650_v41, %v10583_v55  ;;  %v10603_v40 = vand.u32 3, %v4053_v26  ;;  %v3652_v60 = vmul.u32 %v3650_v41, %v10575_v19  ;;  %v13792_v26 = vld [vmem:[#allocation60_spill] sm:$0xff] }
 0x42b   : > { %v4038_v63 = vmul.f32 -0.001358992, %v4037_v12  ;;  %v4045_v58 = vmul.f32 -0.00019511016, %v4037_v12  ;;  %v3545_v11 = vshll.u32 %v10591_v21, 30  ;;  %v3635_v7 = vsel %vm3631_vm13, %v3615_v45, %v3618_v46 }
 0x42c   : > { %v3656_v24 = vshll.u32 %v3653_v37, 16  ;;  %v3673_v20 = vshrl.u32 %v3642_v39, 16  ;;  %v3637_v53 = vsel %vm3633_vm0, %v3621_v3, %v3636_v44  ;;  %v3655_v29 = vmul.u32 %v3651_v0, %v10583_v55 }
 0x42d   : > { %v4039_v57 = vadd.f32 0.041655596, %v4038_v63  ;;  %v4046_v62 = vadd.f32 0.008332121, %v4045_v58  ;;  %v10609_v47 = vsub.s32 %v3542_v35, %v3545_v11  ;;  %v3658_v10 = vshll.u32 %v10601_v49, 16 }
 0x42e   : > { %vm3660_vm9 = vc.u32 %v3652_v60, %v3656_v24  ;;  %v3662_v50 = vadd.s32 %v3656_v24, %v3652_v60  ;;  %v3672_v34 = vand.u32 65535, %v3642_v39  ;;  %v10619_v54 = vmul.u32 %v3673_v20, %v10575_v19 }
 0x42f   : > { %v4040_v36 = vmul.f32 %v4039_v57, %v4037_v12  ;;  %v4047_v13 = vmul.f32 %v4046_v62, %v4037_v12  ;;  %vm3547_vm2 = vcmp.lt.s32.totalorder %v10609_v47, 0  ;;  %v3548_v46 = vsub.s32 0, %v10609_v47 }
 0x430   : > { %v3661_v31 = vsel %vm3660_vm9, 1, %v13741_v6  ;;  %vm3664_vm7 = vc.u32 %v3662_v50, %v3658_v10  ;;  %v10623_v35 = vor.u32 %v3316_v56, %v13792_v26  ;;  %vm4056_vm1 = vcmp.eq.s32.totalorder %v10603_v40, 0  ;;  %v13795_v50 = vld [vmem:[#allocation9_spill] sm:$0xff] }
 0x431   : > { %v4041_v3 = vadd.f32 -0.4999988, %v4040_v36  ;;  %v4048_v22 = vadd.f32 -0.16666654, %v4047_v13  ;;  %v3549_v59 = vsel %vm3547_vm2, %v3548_v46, %v10609_v47  ;;  %v3663_v30 = vadd.s32 %v3661_v31, %v3655_v29 }
 0x432   : > { %v3550_v18 = vclz %v3549_v59  ;;  %v3665_v16 = vsel %vm3664_vm7, 1, %v13741_v6  ;;  %vm4055_vm15 = vcmp.lt.s32.totalorder %v10603_v40, 2  ;;  %vm4059_vm11 = vcmp.eq.s32.totalorder %v10603_v40, 2 }
 0x433   : > { %v4042_v28 = vmul.f32 %v4041_v3, %v4037_v12  ;;  %v4049_v14 = vmul.f32 %v4048_v22, %v4037_v12  ;;  %v3538_v38 = vadd.s32 %v10525_v27, %v10517_v51  ;;  %vm4052_vm5 = vweird.f32 %v13772_v48 }
 0x434   : > { %vm3446_vm6 = vcmp.lt.s32.totalorder %v13774_v43, 0  ;;  %v7189_v56 = vadd.s32 4294967294, %v3550_v18  ;;  %v3568_v1 = vsub.s32 4, %v10591_v21  ;;  %v10636_v41 = vsel %vm3632_vm12, %v3635_v7, %v3637_v53 }
 0x435   : > { %v3667_v0 = vadd.s32 %v3665_v16, %v3663_v30  ;;  %v4043_v12 = vadd.f32 1.0, %v4042_v28  ;;  %v4050_v39 = vadd.f32 1.0, %v4049_v14  ;;  %v3676_v45 = vmul.u32 %v3672_v34, %v10583_v55  ;;  %v13796_v14 = vld [vmem:[#allocation33_spill] sm:$0xff] }
 0x436   : > { %v3678_v44 = vshll.u32 %v10619_v54, 16  ;;  %vm7190_vm10 = vcmp.lt.s32.totalorder %v7189_v56, 0  ;;  %v3657_v51 = vshrl.u32 %v3653_v37, 16  ;;  %v3659_v27 = vshrl.u32 %v10601_v49, 16 }
 0x437   : > { %v3674_v63 = vmul.u32 %v3672_v34, %v10575_v19  ;;  %v4051_v58 = vmul.f32 %v4050_v39, %v10580_v8  ;;  %v4060_v11 = vxor.u32 2147483648, %v4043_v12  ;;  %v3553_v60 = vsel %vm7190_vm10, 0, %v7189_v56 }
 0x438   : > { %v3677_v61 = vmul.u32 %v3673_v20, %v10583_v55  ;;  %vm10646_vm4 = vcmp.le.f32.partialorder %v3444_v4, 0.7853982  ;;  %v3554_v24 = vsub.s32 32, %v3553_v60  ;;  %v3558_v57 = vsub.s32 4294967266, %v3553_v60 }
 0x439   : > { %v3668_v62 = vadd.s32 %v3667_v0, %v3657_v51  ;;  %vm3682_vm3 = vc.u32 %v3674_v63, %v3678_v44  ;;  %v4057_v37 = vxor.u32 2147483648, %v4051_v58  ;;  %v3680_v49 = vshll.u32 %v3676_v45, 16 }
 0x43a   : > { %v3683_v19 = vsel %vm3682_vm3, 1, %v13741_v6  ;;  %v3684_v53 = vadd.s32 %v3678_v44, %v3674_v63  ;;  %v3555_v8 = vshll.u32 %v10609_v47, %v3553_v60  ;;  %v3556_v29 = vshrl.u32 %v3538_v38, %v3554_v24 }
 0x43b   : > { %v3559_v10 = vadd.s32 127, %v3558_v57  ;;  %v3685_v55 = vadd.s32 %v3683_v19, %v3677_v61  ;;  %v4058_v4 = vsel %vm4056_vm1, %v4043_v12, %v4057_v37  ;;  %v4061_v20 = vsel %vm4059_vm11, %v4060_v11, %v4051_v58  ;;  %v13798_v61 = vld [vmem:[#allocation42_spill] sm:$0xff]  ;;  %v13800_v37 = vld [vmem:[#allocation48_spill] sm:$0xff]  ;;  %v13801_v19 = vld [vmem:[#allocation61_spill] sm:$0xff] }
 0x43c   : > { %vm3686_vm0 = vc.u32 %v3684_v53, %v3680_v49  ;;  %v3134_v36 = vand.u32 2147483647, %v13795_v50  ;;  %v4062_v13 = vsel %vm4055_vm15, %v4058_v4, %v4061_v20  ;;  %v3557_v46 = vor.u32 %v3556_v29, %v3555_v8  ;;  %v13802_v4 = vld [vmem:[#allocation50_spill] sm:$0xff] }
 0x43d   : > { %v3560_v31 = vshll.u32 %v3559_v10, 23  ;;  %v3687_v34 = vsel %vm3686_vm0, 1, %v13741_v6  ;;  %v4063_v47 = vsel %vm4052_vm5, nan, %v4062_v13  ;;  %v3569_v3 = vsel %vm3446_vm6, %v3568_v1, %v10591_v21  ;;  %v13797_v21 = vld [vmem:[#allocation37_spill] sm:$0xff] }
 0x43e   : > { %v3679_v22 = vshrl.u32 %v10619_v54, 16  ;;  %v3689_v59 = vadd.s32 %v3687_v34, %v3685_v55  ;;  %5087 = vmatpush.msra.mxu3 %v4063_v47  ;;  %v10666_v26 = vadd.s32 %v3668_v62, %v3659_v27  ;;  %v3681_v40 = vshrl.u32 %v3676_v45, 16  ;;  %v13799_v62 = vld [vmem:[#allocation52_spill] sm:$0xff] }
 0x43f   : > { %v3561_v30 = vor.u32 4788187, %v3560_v31  ;;  %v10668_v18 = vadd.s32 %v3684_v53, %v3680_v49  ;;  %v3564_v16 = vcvt.s32.f32 %v3557_v46  ;;  %v3141_v48 = vand.u32 8388607, %v3134_v36 }
 0x440   : > { %v3690_v28 = vadd.s32 %v3689_v59, %v3679_v22  ;;  %v3151_v38 = vshll.u32 %v13643_v25, %v13796_v14  ;;  %v3152_v54 = vshrl.u32 %v13641_v33, %v13797_v21  ;;  %v3154_v1 = vshll.u32 %v13641_v33, %v13796_v14  ;;  %v13803_v22 = vld [vmem:[#allocation43_spill] sm:$0xff]  ;;  %v13804_v59 = vld [vmem:[#allocation56_spill] sm:$0xff] }
 0x441   : > { %v3562_v56 = vand.u32 2147483647, %v3561_v30  ;;  %v3155_v0 = vshrl.u32 %v13739_v5, %v13797_v21  ;;  %v3571_v12 = vsel %vm10646_vm4, 0, %v3569_v3  ;;  %v3157_v45 = vshll.u32 %v13739_v5, %v13796_v14 }
 0x442   : > { %v3691_v39 = vadd.s32 %v3690_v28, %v3681_v40  ;;  %v3158_v44 = vshrl.u32 %v13710_v2, %v13797_v21  ;;  %vm3694_vm13 = vc.u32 %v10666_v26, %v10668_v18  ;;  %v10688_v27 = vor.u32 %v3152_v54, %v3151_v38 }
 0x443   : > { %v3565_v51 = vmul.f32 %v3564_v16, %v3562_v56  ;;  %v10690_v63 = vor.u32 %v3155_v0, %v3154_v1  ;;  %v3142_v11 = vor.u32 8388608, %v3141_v48  ;;  %vm3168_vm12 = vcmp.lt.s32.totalorder %v13798_v61, 3 }
 0x444   : > { %v3695_v58 = vadd.s32 1, %v3691_v39  ;;  %v3159_v60 = vor.u32 %v3158_v44, %v3157_v45  ;;  %v3692_v57 = vmul.u32 %v10559_v15, %v10636_v41  ;;  %vm3166_vm9 = vcmp.lt.s32.totalorder %v13798_v61, 1 }
 0x445   : > { %v3566_v24 = vxor.u32 2147483648, %v3565_v51  ;;  %v3180_v49 = vsel %vm3168_vm12, %v13800_v37, %v13799_v62  ;;  %v3320_v53 = vor.u32 %v10587_v17, %v13801_v19  ;;  %v3588_v8 = vadd.s32 3, %v3571_v12 }
 0x446   : > { %v3696_v29 = vsel %vm3694_vm13, %v3695_v58, %v3691_v39  ;;  %v3178_v10 = vsel %vm3166_vm9, %v10690_v63, %v3159_v60  ;;  %vm3167_vm2 = vcmp.lt.s32.totalorder %v13798_v61, 2  ;;  %v3174_v41 = vsel %vm3166_vm9, %v10688_v27, %v10690_v63 }
 0x447   : > { %v3567_v55 = vsel %vm3446_vm6, %v3566_v24, %v3565_v51  ;;  %v3697_v15 = vadd.s32 %v3696_v29, %v3692_v57  ;;  %v3176_v20 = vsel %vm3168_vm12, %v3159_v60, %v13802_v4  ;;  %v3181_v13 = vsel %vm3167_vm2, %v3178_v10, %v3180_v49 }
 0x448   : > { %v10715_v17 = vsel %vm10646_vm4, %v13774_v43, %v3567_v55  ;;  %v10722_v46 = vshll.u32 %v3142_v11, 8  ;;  %v3185_v47 = vand.u32 65535, %v3181_v13  ;;  %v3186_v3 = vshrl.u32 %v3181_v13, 16 }
 0x449   : > { %v3572_v31 = vmul.f32 %v10715_v17, %v10715_v17  ;;  %v3698_v34 = vadd.s32 536870912, %v3697_v15  ;;  %v10728_v7 = vshll.u32 %v13710_v2, %v13803_v22  ;;  %vm3324_vm7 = vcmp.lt.s32.totalorder %v13804_v59, 4 }
 0x44a   : > { %v3183_v30 = vand.u32 65535, %v10722_v46  ;;  %v3184_v40 = vshrl.u32 %v10722_v46, 16  ;;  %v3177_v14 = vsel %vm3167_vm2, %v3174_v41, %v3176_v20  ;;  %v10740_v38 = vsel %vm3324_vm7, %v10623_v35, 920167782 }
 0x44b   : > { %v3573_v16 = vmul.f32 -0.001358992, %v3572_v31  ;;  %v3580_v28 = vmul.f32 -0.00019511016, %v3572_v31  ;;  %v10733_v48 = vshrl.u32 %v3698_v34, 30  ;;  %v10748_v39 = vand.u32 3, %v3588_v8 }
 0x44c   : > { %v10744_v56 = vsel %vm3324_vm7, %v3320_v53, 1326507024  ;;  %v3188_v54 = vmul.u32 %v3186_v3, %v3183_v30  ;;  %v10746_v1 = vmul.u32 %v3185_v47, %v3184_v40  ;;  %v3150_v44 = vshrl.u32 %v13643_v25, %v13797_v21 }
 0x44d   : > { %v3574_v0 = vadd.f32 0.041655596, %v3573_v16  ;;  %v3581_v12 = vadd.f32 0.008332121, %v3580_v28  ;;  %v3700_v45 = vshll.u32 %v10733_v48, 30  ;;  %v3187_v51 = vmul.u32 %v3185_v47, %v3183_v30 }
 0x44e   : > { %v3191_v58 = vshll.u32 %v3188_v54, 16  ;;  %v3208_v11 = vshrl.u32 %v3177_v14, 16  ;;  %v3207_v37 = vand.u32 65535, %v3177_v14  ;;  %v3190_v49 = vmul.u32 %v3186_v3, %v3184_v40 }
 0x44f   : > { %v3575_v24 = vmul.f32 %v3574_v0, %v3572_v31  ;;  %v3582_v57 = vmul.f32 %v3581_v12, %v3572_v31  ;;  %v10753_v62 = vsub.s32 %v3697_v15, %v3700_v45  ;;  %v3193_v19 = vshll.u32 %v10746_v1, 16 }
 0x450   : > { %vm3195_vm1 = vc.u32 %v3187_v51, %v3191_v58  ;;  %v3197_v53 = vadd.s32 %v3191_v58, %v3187_v51  ;;  %v3171_v21 = vsel %vm3169_vm14, %v3159_v60, 2102212464  ;;  %v10761_v15 = vmul.u32 %v3208_v11, %v3183_v30 }
 0x451   : > { %v3576_v8 = vadd.f32 -0.4999988, %v3575_v24  ;;  %v3583_v29 = vadd.f32 -0.16666654, %v3582_v57  ;;  %vm3702_vm15 = vcmp.lt.s32.totalorder %v10753_v62, 0  ;;  %v3703_v10 = vsub.s32 0, %v10753_v62 }
 0x452   : > { %v3196_v55 = vsel %vm3195_vm1, 1, %v13741_v6  ;;  %vm3199_vm11 = vc.u32 %v3197_v53, %v3193_v19  ;;  %vm3590_vm5 = vcmp.lt.s32.totalorder %v10748_v39, 2  ;;  %vm3587_vm6 = vweird.f32 %v13774_v43 }
 0x453   : > { %v3577_v41 = vmul.f32 %v3576_v8, %v3572_v31  ;;  %v3584_v4 = vmul.f32 %v3583_v29, %v3572_v31  ;;  %v3704_v20 = vsel %vm3702_vm15, %v3703_v10, %v10753_v62  ;;  %v3198_v13 = vadd.s32 %v3196_v55, %v3190_v49 }
 0x454   : > { %vm3591_vm10 = vcmp.eq.s32.totalorder %v10748_v39, 0  ;;  %vm3594_vm4 = vcmp.eq.s32.totalorder %v10748_v39, 2  ;;  %v3705_v34 = vclz %v3704_v20  ;;  %v3200_v60 = vsel %vm3199_vm11, 1, %v13741_v6 }
 0x455   : > { %v3578_v47 = vadd.f32 1.0, %v3577_v41  ;;  %v3585_v3 = vadd.f32 1.0, %v3584_v4  ;;  %v3202_v16 = vadd.s32 %v3200_v60, %v3198_v13  ;;  %v3211_v28 = vmul.u32 %v3207_v37, %v3184_v40  ;;  %v13807_v41 = vld [vmem:[#allocation18_spill] sm:$0xff] }
 0x456   : > { %vm3601_vm14 = vcmp.lt.s32.totalorder %v13789_v52, 0  ;;  %v3693_v31 = vadd.s32 %v10668_v18, %v10666_v26  ;;  %v7192_v14 = vadd.s32 4294967294, %v3705_v34  ;;  %v3170_v0 = vsel %vm3166_vm9, %v3150_v44, %v10688_v27 }
 0x457   : > { %v3172_v12 = vsel %vm3168_vm12, %v10690_v63, %v3171_v21  ;;  %v3586_v45 = vmul.f32 %v3585_v3, %v10715_v17  ;;  %v3595_v51 = vxor.u32 2147483648, %v3578_v47  ;;  %v3192_v58 = vshrl.u32 %v3188_v54, 16 }
 0x458   : > { %v3213_v24 = vshll.u32 %v10761_v15, 16  ;;  %vm7193_vm3 = vcmp.lt.s32.totalorder %v7192_v14, 0  ;;  %v3723_v57 = vsub.s32 4, %v10733_v48  ;;  %v3209_v49 = vmul.u32 %v3207_v37, %v3183_v30 }
 0x459   : > { %v3212_v26 = vmul.u32 %v3208_v11, %v3184_v40  ;;  %v3592_v18 = vxor.u32 2147483648, %v3586_v45  ;;  %v3708_v19 = vsel %vm7193_vm3, 0, %v7192_v14  ;;  %v3203_v53 = vadd.s32 %v3202_v16, %v3192_v58 }
 0x45a   : > { %v3215_v8 = vshll.u32 %v3211_v28, 16  ;;  %v3596_v27 = vsel %vm3594_vm4, %v3595_v51, %v3586_v45  ;;  %v3709_v44 = vsub.s32 32, %v3708_v19  ;;  %v3713_v63 = vsub.s32 4294967266, %v3708_v19 }
 0x45b   : > { %vm3217_vm0 = vc.u32 %v3209_v49, %v3213_v24  ;;  %v3593_v17 = vsel %vm3591_vm10, %v3578_v47, %v3592_v18  ;;  %v3710_v54 = vshll.u32 %v10753_v62, %v3708_v19  ;;  %v3219_v10 = vadd.s32 %v3213_v24, %v3209_v49 }
 0x45c   : > { %v3218_v29 = vsel %vm3217_vm0, 1, %v13741_v6  ;;  %v3597_v30 = vsel %vm3590_vm5, %v3593_v17, %v3596_v27  ;;  %v3711_v40 = vshrl.u32 %v3693_v31, %v3709_v44  ;;  %v3714_v11 = vadd.s32 127, %v3713_v63 }
 0x45d   : > { %v3220_v37 = vadd.s32 %v3218_v29, %v3212_v26  ;;  %v3598_v21 = vsel %vm3587_vm6, nan, %v3597_v30  ;;  %vm10793_vm13 = vcmp.le.f32.partialorder %v3599_v23, 0.7853982  ;;  %v3173_v62 = vsel %vm3167_vm2, %v3170_v0, %v3172_v12  ;;  %v13808_v12 = vld [vmem:[#allocation53_spill] sm:$0xff] }
 0x45e   : > { %vm3221_vm12 = vc.u32 %v3219_v10, %v3215_v8  ;;  %v3289_v4 = vand.u32 2147483647, %v13807_v41  ;;  %5056 = vmatpush.msra.mxu2 %v3598_v21  ;;  %v3712_v39 = vor.u32 %v3711_v40, %v3710_v54  ;;  %v3715_v20 = vshll.u32 %v3714_v11, 23  ;;  %v13809_v30 = vld [vmem:[#allocation49_spill] sm:$0xff] }
 0x45f   : > { %v3194_v13 = vshrl.u32 %v10746_v1, 16  ;;  %v3222_v43 = vsel %vm3221_vm12, 1, %v13741_v6  ;;  %v3724_v23 = vsel %vm3601_vm14, %v3723_v57, %v10733_v48  ;;  %v3214_v34 = vshrl.u32 %v10761_v15, 16 }
 0x460   : > { %v3216_v60 = vshrl.u32 %v3211_v28, 16  ;;  %v3224_v47 = vadd.s32 %v3222_v43, %v3220_v37  ;;  %v3716_v61 = vor.u32 4788187, %v3715_v20  ;;  %v3223_v16 = vadd.s32 %v3219_v10, %v3215_v8 }
 0x461   : > { %v3204_v3 = vadd.s32 %v3203_v53, %v3194_v13  ;;  %v3296_v31 = vand.u32 8388607, %v3289_v4  ;;  %v3719_v14 = vcvt.s32.f32 %v3712_v39  ;;  %v3306_v1 = vshll.u32 %v13643_v25, %v13808_v12 }
 0x462   : > { %v3225_v0 = vadd.s32 %v3224_v47, %v3214_v34  ;;  %v3307_v45 = vshrl.u32 %v13641_v33, %v13791_v42  ;;  %v3717_v51 = vand.u32 2147483647, %v3716_v61  ;;  %v3309_v15 = vshll.u32 %v13641_v33, %v13808_v12 }
 0x463   : > { %v3297_v48 = vor.u32 8388608, %v3296_v31  ;;  %v3310_v28 = vshrl.u32 %v13739_v5, %v13791_v42  ;;  %v3312_v57 = vshll.u32 %v13739_v5, %v13808_v12  ;;  %v3313_v49 = vshrl.u32 %v13710_v2, %v13791_v42 }
 0x464   : > { %v3226_v58 = vadd.s32 %v3225_v0, %v3216_v60  ;;  %v10816_v24 = vor.u32 %v3307_v45, %v3306_v1  ;;  %v3720_v26 = vmul.f32 %v3719_v14, %v3717_v51  ;;  %v3227_v18 = vmul.u32 %v10722_v46, %v3173_v62 }
 0x465   : > { %vm3229_vm9 = vc.u32 %v3204_v3, %v3223_v16  ;;  %v10823_v19 = vor.u32 %v3310_v28, %v3309_v15  ;;  %v3314_v8 = vor.u32 %v3313_v49, %v3312_v57  ;;  %vm3321_vm2 = vcmp.lt.s32.totalorder %v13804_v59, 1 }
 0x466   : > { %v3230_v53 = vadd.s32 1, %v3226_v58  ;;  %vm3323_vm1 = vcmp.lt.s32.totalorder %v13804_v59, 3  ;;  %v3721_v27 = vxor.u32 2147483648, %v3720_v26  ;;  %v3726_v44 = vsel %vm10793_vm13, 0, %v3724_v23 }
 0x467   : > { %v3329_v63 = vsel %vm3321_vm2, %v10816_v24, %v10823_v19  ;;  %v3335_v46 = vsel %vm3323_vm1, %v10623_v35, %v10744_v56  ;;  %v3331_v54 = vsel %vm3323_vm1, %v3314_v8, %v10740_v38  ;;  %v3333_v29 = vsel %vm3321_vm2, %v10823_v19, %v3314_v8 }
 0x468   : > { %v3231_v17 = vsel %vm3229_vm9, %v3230_v53, %v3226_v58  ;;  %v10843_v10 = vshll.u32 %v3297_v48, 8  ;;  %v3006_v40 = vshrl.u32 %v13708_v32, %v13809_v30  ;;  %v3722_v11 = vsel %vm3601_vm14, %v3721_v27, %v3720_v26 }
 0x469   : > { %v3232_v37 = vadd.s32 %v3231_v17, %v3227_v18  ;;  %vm3322_vm15 = vcmp.lt.s32.totalorder %v13804_v59, 2  ;;  %v10852_v35 = vshll.u32 %v13708_v32, %v13803_v22  ;;  %v10857_v38 = vsel %vm10793_vm13, %v13789_v52, %v3722_v11 }
 0x46a   : > { %v3743_v56 = vadd.s32 3, %v3726_v44  ;;  %v3336_v21 = vsel %vm3322_vm15, %v3333_v29, %v3335_v46  ;;  %v3727_v62 = vmul.f32 %v10857_v38, %v10857_v38  ;;  %v10865_v20 = vsel %vm3322_vm15, %v3329_v63, %v3331_v54 }
 0x46b   : > { %v3233_v39 = vadd.s32 536870912, %v3232_v37  ;;  %v3340_v13 = vand.u32 65535, %v3336_v21  ;;  %v10869_v43 = vshrl.u32 %v13642_v9, %v13809_v30  ;;  %v3338_v55 = vand.u32 65535, %v10843_v10 }
 0x46c   : > { %v10873_v23 = vshrl.u32 %v10843_v10, 16  ;;  %v3341_v34 = vshrl.u32 %v3336_v21, 16  ;;  %v10876_v60 = vor.u32 %v3006_v40, %v10728_v7  ;;  %v3728_v47 = vmul.f32 -0.001358992, %v3727_v62 }
 0x46d   : > { %v3735_v61 = vmul.f32 -0.00019511016, %v3727_v62  ;;  %v3234_v31 = vshrl.u32 %v3233_v39, 30  ;;  %v10878_v14 = vand.u32 3, %v3743_v56  ;;  %v3363_v1 = vshrl.u32 %v10865_v20, 16 }
 0x46e   : > { %v3343_v0 = vmul.u32 %v3341_v34, %v3338_v55  ;;  %v10881_v12 = vmul.u32 %v3340_v13, %v10873_v23  ;;  %v3729_v45 = vadd.f32 0.041655596, %v3728_v47  ;;  %v10884_v48 = vadd.s32 %v3223_v16, %v3204_v3 }
 0x46f   : > { %v3736_v51 = vadd.f32 0.008332121, %v3735_v61  ;;  %v3235_v15 = vshll.u32 %v3234_v31, 30  ;;  %v3305_v7 = vshrl.u32 %v13643_v25, %v13791_v42  ;;  %v3342_v28 = vmul.u32 %v3340_v13, %v3338_v55 }
 0x470   : > { %v3346_v58 = vshll.u32 %v3343_v0, 16  ;;  %v3362_v57 = vand.u32 65535, %v10865_v20  ;;  %v3730_v49 = vmul.f32 %v3729_v45, %v3727_v62  ;;  %vm3136_vm11 = vcmp.lt.s32.totalorder %v13795_v50, 0 }
 0x471   : > { %v3737_v26 = vmul.f32 %v3736_v51, %v3727_v62  ;;  %v10890_v18 = vsub.s32 %v3232_v37, %v3235_v15  ;;  %v3345_v53 = vmul.u32 %v3341_v34, %v10873_v23  ;;  %vm3749_vm5 = vcmp.eq.s32.totalorder %v10878_v14, 2 }
 0x472   : > { %v3348_v3 = vshll.u32 %v10881_v12, 16  ;;  %vm3350_vm6 = vc.u32 %v3342_v28, %v3346_v58  ;;  %v3352_v16 = vadd.s32 %v3346_v58, %v3342_v28  ;;  %v10895_v27 = vmul.u32 %v3363_v1, %v3338_v55 }
 0x473   : > { %v3731_v42 = vadd.f32 -0.4999988, %v3730_v49  ;;  %v3738_v44 = vadd.f32 -0.16666654, %v3737_v26  ;;  %vm3237_vm10 = vcmp.lt.s32.totalorder %v10890_v18, 0  ;;  %v3238_v63 = vsub.s32 0, %v10890_v18 }
 0x474   : > { %vm3746_vm4 = vcmp.eq.s32.totalorder %v10878_v14, 0  ;;  %v3258_v46 = vsub.s32 4, %v3234_v31  ;;  %v3326_v17 = vsel %vm3324_vm7, %v3314_v8, 2102212464  ;;  %v3351_v54 = vsel %vm3350_vm6, 1, %v13741_v6 }
 0x475   : > { %vm3354_vm14 = vc.u32 %v3352_v16, %v3348_v3  ;;  %v3732_v29 = vmul.f32 %v3731_v42, %v3727_v62  ;;  %v3739_v40 = vmul.f32 %v3738_v44, %v3727_v62  ;;  %vm3745_vm3 = vcmp.lt.s32.totalorder %v10878_v14, 2  ;;  %v13812_v42 = vld [vmem:[#allocation7_spill] sm:$0xff] }
 0x476   : > { %v3239_v11 = vsel %vm3237_vm10, %v3238_v63, %v10890_v18  ;;  %v3353_v37 = vadd.s32 %v3351_v54, %v3345_v53  ;;  %vm3742_vm0 = vweird.f32 %v13789_v52  ;;  %v3347_v21 = vshrl.u32 %v3343_v0, 16 }
 0x477   : > { %v3240_v56 = vclz %v3239_v11  ;;  %v3355_v39 = vsel %vm3354_vm14, 1, %v13741_v6  ;;  %v3366_v20 = vmul.u32 %v3362_v57, %v10873_v23  ;;  %v3733_v13 = vadd.f32 1.0, %v3732_v29 }
 0x478   : > { %v3740_v8 = vadd.f32 1.0, %v3739_v40  ;;  %v3357_v34 = vadd.s32 %v3355_v39, %v3353_v37  ;;  %v3368_v47 = vshll.u32 %v10895_v27, 16  ;;  %vm10911_vm7 = vcmp.le.f32.partialorder %v3134_v36, 0.7853982  ;;  %v13813_v39 = vld [vmem:[#allocation21_spill] sm:$0xff] }
 0x479   : > { %v7183_v61 = vadd.s32 4294967294, %v3240_v56  ;;  %v3325_v0 = vsel %vm3321_vm2, %v3305_v7, %v10816_v24  ;;  %v3327_v45 = vsel %vm3323_vm1, %v10823_v19, %v3326_v17  ;;  %v3364_v51 = vmul.u32 %v3362_v57, %v3338_v55 }
 0x47a   : > { %v3741_v15 = vmul.f32 %v3740_v8, %v10857_v38  ;;  %v3750_v28 = vxor.u32 2147483648, %v3733_v13  ;;  %v3349_v58 = vshrl.u32 %v10881_v12, 16  ;;  %v3358_v49 = vadd.s32 %v3357_v34, %v3347_v21  ;;  %v13814_v34 = vld [vmem:[#allocation25_spill] sm:$0xff] }
 0x47b   : > { %vm7184_vm13 = vcmp.lt.s32.totalorder %v7183_v61, 0  ;;  %v3259_v36 = vsel %vm3136_vm11, %v3258_v46, %v3234_v31  ;;  %v3367_v26 = vmul.u32 %v3363_v1, %v10873_v23  ;;  %vm3372_vm12 = vc.u32 %v3364_v51, %v3368_v47 }
 0x47c   : > { %v3747_v53 = vxor.u32 2147483648, %v3741_v15  ;;  %v3751_v24 = vsel %vm3749_vm5, %v3750_v28, %v3741_v15  ;;  %v3243_v7 = vsel %vm7184_vm13, 0, %v7183_v61  ;;  %v3370_v19 = vshll.u32 %v3366_v20, 16 }
 0x47d   : > { %v3244_v55 = vsub.s32 32, %v3243_v7  ;;  %v3248_v57 = vsub.s32 4294967266, %v3243_v7  ;;  %v10928_v38 = vadd.s32 %v3358_v49, %v3349_v58  ;;  %v3373_v12 = vsel %vm3372_vm12, 1, %v13741_v6  ;;  %v13815_v49 = vld [vmem:[#allocation30_spill] sm:$0xff] }
 0x47e   : > { %v3748_v3 = vsel %vm3746_vm4, %v3733_v13, %v3747_v53  ;;  %v3374_v16 = vadd.s32 %v3368_v47, %v3364_v51  ;;  %v3375_v31 = vadd.s32 %v3373_v12, %v3367_v26  ;;  %v2824_v23 = vand.u32 2147483647, %v13812_v42 }
 0x47f   : > { %v3752_v1 = vsel %vm3745_vm3, %v3748_v3, %v3751_v24  ;;  %v3245_v44 = vshll.u32 %v10890_v18, %v3243_v7  ;;  %v3246_v63 = vshrl.u32 %v10884_v48, %v3244_v55  ;;  %v3249_v46 = vadd.s32 127, %v3248_v57  ;;  %v13816_v55 = vld [vmem:[#allocation45_spill] sm:$0xff]  ;;  %v13817_v57 = vld [vmem:[#allocation35_spill] sm:$0xff] }
 0x480   : > { %v3753_v17 = vsel %vm3742_vm0, nan, %v3752_v1  ;;  %v3328_v54 = vsel %vm3322_vm15, %v3325_v0, %v3327_v45  ;;  %vm3376_vm9 = vc.u32 %v3374_v16, %v3370_v19  ;;  %v10942_v29 = vadd.s32 %v3374_v16, %v3370_v19  ;;  %v13818_v16 = vld [vmem:[#allocation41_spill] sm:$0xff] }
 0x481   : > { %5088 = vmatpush.msra.mxu3 %v3753_v17  ;;  %v3247_v40 = vor.u32 %v3246_v63, %v3245_v44  ;;  %v3250_v11 = vshll.u32 %v3249_v46, 23  ;;  %v3377_v14 = vsel %vm3376_vm9, 1, %v13741_v6  ;;  %v2831_v18 = vand.u32 8388607, %v2824_v23 }
 0x482   : > { %v3261_v48 = vsel %vm10911_vm7, 0, %v3259_v36  ;;  %v3369_v52 = vshrl.u32 %v10895_v27, 16  ;;  %v3371_v37 = vshrl.u32 %v3366_v20, 16  ;;  %v3379_v56 = vadd.s32 %v3377_v14, %v3375_v31 }
 0x483   : > { %v3251_v59 = vor.u32 4788187, %v3250_v11  ;;  %vm3384_vm2 = vc.u32 %v10928_v38, %v10942_v29  ;;  %v2832_v21 = vor.u32 8388608, %v2831_v18  ;;  %v2841_v13 = vshll.u32 %v13643_v25, %v13813_v39 }
 0x484   : > { %v3380_v8 = vadd.s32 %v3379_v56, %v3369_v52  ;;  %v2842_v47 = vshrl.u32 %v13641_v33, %v13814_v34  ;;  %v2844_v61 = vshll.u32 %v13641_v33, %v13813_v39  ;;  %v2845_v27 = vshrl.u32 %v13739_v5, %v13814_v34 }
 0x485   : > { %v3252_v20 = vand.u32 2147483647, %v3251_v59  ;;  %v3254_v0 = vcvt.s32.f32 %v3247_v40  ;;  %v2847_v45 = vshll.u32 %v13739_v5, %v13813_v39  ;;  %v2848_v51 = vshrl.u32 %v13710_v2, %v13814_v34 }
 0x486   : > { %v3381_v15 = vadd.s32 %v3380_v8, %v3371_v37  ;;  %v10964_v28 = vor.u32 %v2842_v47, %v2841_v13  ;;  %v10966_v58 = vor.u32 %v2845_v27, %v2844_v61  ;;  %vm2856_vm1 = vcmp.lt.s32.totalorder %v13815_v49, 1  ;;  %v13820_v37 = vld [vmem:[#allocation47_spill] sm:$0xff] }
 0x487   : > { %v3255_v36 = vmul.f32 %v3254_v0, %v3252_v20  ;;  %v2849_v26 = vor.u32 %v2848_v51, %v2847_v45  ;;  %vm2858_vm15 = vcmp.lt.s32.totalorder %v13815_v49, 3  ;;  %v10970_v53 = vshll.u32 %v2832_v21, 8 }
 0x488   : > { %v3382_v24 = vmul.u32 %v10843_v10, %v3328_v54  ;;  %v3385_v7 = vadd.s32 1, %v3381_v15  ;;  %v2864_v19 = vsel %vm2856_vm1, %v10964_v28, %v10966_v58  ;;  %v2870_v12 = vsel %vm2858_vm15, %v13817_v57, %v13816_v55 }
 0x489   : > { %v3256_v3 = vxor.u32 2147483648, %v3255_v36  ;;  %vm2857_vm5 = vcmp.lt.s32.totalorder %v13815_v49, 2  ;;  %v2866_v31 = vsel %vm2858_vm15, %v2849_v26, %v13818_v16  ;;  %v2868_v10 = vsel %vm2856_vm1, %v10966_v58, %v2849_v26 }
 0x48a   : > { %v3010_v1 = vor.u32 %v10869_v43, %v10852_v35  ;;  %v3278_v44 = vadd.s32 3, %v3261_v48  ;;  %v3386_v63 = vsel %vm3384_vm2, %v3385_v7, %v3381_v15  ;;  %v2871_v46 = vsel %vm2857_vm5, %v2868_v10, %v2870_v12  ;;  %v13819_v48 = vld [vmem:[#allocation46_spill] sm:$0xff] }
 0x48b   : > { %v3257_v17 = vsel %vm3136_vm11, %v3256_v3, %v3255_v36  ;;  %v3387_v54 = vadd.s32 %v3386_v63, %v3382_v24  ;;  %v10999_v40 = vsel %vm2857_vm5, %v2864_v19, %v2866_v31  ;;  %v2873_v11 = vand.u32 65535, %v10970_v53 }
 0x48c   : > { %v11005_v35 = vsel %vm10911_vm7, %v13795_v50, %v3257_v17  ;;  %v11008_v43 = vshrl.u32 %v10970_v53, 16  ;;  %v2875_v14 = vand.u32 65535, %v2871_v46  ;;  %v2876_v18 = vshrl.u32 %v2871_v46, 16 }
 0x48d   : > { %v11011_v52 = vshrl.u32 %v13819_v48, 5  ;;  %vm3014_vm11 = vcmp.lt.s32.totalorder %v13820_v37, 4  ;;  %v3262_v56 = vmul.f32 %v11005_v35, %v11005_v35  ;;  %v3388_v59 = vadd.s32 536870912, %v3387_v54 }
 0x48e   : > { %v11019_v62 = vsel %vm3014_vm11, %v10876_v60, 920167782  ;;  %v2878_v21 = vmul.u32 %v2876_v18, %v2873_v11  ;;  %v11022_v39 = vmul.u32 %v2875_v14, %v11008_v43  ;;  %v2898_v13 = vshrl.u32 %v10999_v40, 16 }
 0x48f   : > { %v11026_v8 = vand.u32 31, %v13819_v48  ;;  %v3263_v47 = vmul.f32 -0.001358992, %v3262_v56  ;;  %v3270_v61 = vmul.f32 -0.00019511016, %v3262_v56  ;;  %v11028_v27 = vshrl.u32 %v3388_v59, 30 }
 0x490   : > { %v11032_v20 = vsel %vm3014_vm11, %v3010_v1, 1326507024  ;;  %v11034_v0 = vand.u32 3, %v3278_v44  ;;  %v2877_v45 = vmul.u32 %v2875_v14, %v2873_v11  ;;  %v2881_v51 = vshll.u32 %v2878_v21, 16 }
 0x491   : > { %v3264_v15 = vadd.f32 0.041655596, %v3263_v47  ;;  %v3271_v36 = vadd.f32 0.008332121, %v3270_v61  ;;  %v11038_v24 = vadd.s32 %v10942_v29, %v10928_v38  ;;  %v3390_v7 = vshll.u32 %v11028_v27, 30 }
 0x492   : > { %v2883_v19 = vshll.u32 %v11022_v39, 16  ;;  %vm2885_vm6 = vc.u32 %v2877_v45, %v2881_v51  ;;  %v2887_v55 = vadd.s32 %v2881_v51, %v2877_v45  ;;  %v11042_v57 = vmul.u32 %v2898_v13, %v2873_v11 }
 0x493   : > { %v3265_v12 = vmul.f32 %v3264_v15, %v3262_v56  ;;  %v3272_v3 = vmul.f32 %v3271_v36, %v3262_v56  ;;  %v11044_v16 = vsub.s32 %v3387_v54, %v3390_v7  ;;  %v2897_v31 = vand.u32 65535, %v10999_v40 }
 0x494   : > { %v2840_v10 = vshrl.u32 %v13643_v25, %v13814_v34  ;;  %v2880_v38 = vmul.u32 %v2876_v18, %v11008_v43  ;;  %v2886_v29 = vsel %vm2885_vm6, 1, %v13741_v6  ;;  %vm2889_vm10 = vc.u32 %v2887_v55, %v2883_v19 }
 0x495   : > { %v3266_v1 = vadd.f32 -0.4999988, %v3265_v12  ;;  %v3273_v44 = vadd.f32 -0.16666654, %v3272_v3  ;;  %vm3284_vm4 = vcmp.eq.s32.totalorder %v11034_v0, 2  ;;  %vm3392_vm14 = vcmp.lt.s32.totalorder %v11044_v16, 0 }
 0x496   : > { %v3393_v63 = vsub.s32 0, %v11044_v16  ;;  %vm3281_vm3 = vcmp.eq.s32.totalorder %v11034_v0, 0  ;;  %v2861_v46 = vsel %vm2859_vm8, %v2849_v26, 2102212464  ;;  %v2888_v17 = vadd.s32 %v2886_v29, %v2880_v38 }
 0x497   : > { %v2890_v34 = vsel %vm2889_vm10, 1, %v13741_v6  ;;  %v2903_v54 = vshll.u32 %v11042_v57, 16  ;;  %v3267_v40 = vmul.f32 %v3266_v1, %v3262_v56  ;;  %v3274_v14 = vmul.f32 %v3273_v44, %v3262_v56 }
 0x498   : > { %vm3280_vm0 = vcmp.lt.s32.totalorder %v11034_v0, 2  ;;  %v3394_v18 = vsel %vm3392_vm14, %v3393_v63, %v11044_v16  ;;  %v2899_v48 = vmul.u32 %v2897_v31, %v2873_v11  ;;  %vm3277_vm7 = vweird.f32 %v13795_v50 }
 0x499   : > { %v3395_v59 = vclz %v3394_v18  ;;  %v2860_v47 = vsel %vm2856_vm1, %v2840_v10, %v10964_v28  ;;  %v2892_v26 = vadd.s32 %v2890_v34, %v2888_v17  ;;  %v2901_v61 = vmul.u32 %v2897_v31, %v11008_v43 }
 0x49a   : > { %v3268_v45 = vadd.f32 1.0, %v3267_v40  ;;  %v3275_v51 = vadd.f32 1.0, %v3274_v14  ;;  %v2882_v15 = vshrl.u32 %v2878_v21, 16  ;;  %vm2907_vm8 = vc.u32 %v2899_v48, %v2903_v54  ;;  %v13823_v14 = vld [vmem:[#allocation12_spill] sm:$0xff] }
 0x49b   : > { %vm3291_vm13 = vcmp.lt.s32.totalorder %v13807_v41, 0  ;;  %v7186_v56 = vadd.s32 4294967294, %v3395_v59  ;;  %v2862_v11 = vsel %vm2858_vm15, %v10966_v58, %v2861_v46  ;;  %v2884_v36 = vshrl.u32 %v11022_v39, 16 }
 0x49c   : > { %v2902_v7 = vmul.u32 %v2898_v13, %v11008_v43  ;;  %v3276_v28 = vmul.f32 %v3275_v51, %v11005_v35  ;;  %v3285_v19 = vxor.u32 2147483648, %v3268_v45  ;;  %v2893_v55 = vadd.s32 %v2892_v26, %v2882_v15 }
 0x49d   : > { %v2908_v12 = vsel %vm2907_vm8, 1, %v13741_v6  ;;  %vm7187_vm12 = vcmp.lt.s32.totalorder %v7186_v56, 0  ;;  %v2905_v21 = vshll.u32 %v2901_v61, 16  ;;  %v2909_v3 = vadd.s32 %v2903_v54, %v2899_v48 }
 0x49e   : > { %v2910_v31 = vadd.s32 %v2908_v12, %v2902_v7  ;;  %v3282_v10 = vxor.u32 2147483648, %v3276_v28  ;;  %v3398_v38 = vsel %vm7187_vm12, 0, %v7186_v56  ;;  %v3413_v29 = vsub.s32 4, %v11028_v27 }
 0x49f   : > { %v2904_v58 = vshrl.u32 %v11042_v57, 16  ;;  %v3286_v39 = vsel %vm3284_vm4, %v3285_v19, %v3276_v28  ;;  %v3399_v43 = vsub.s32 32, %v3398_v38  ;;  %v3403_v13 = vsub.s32 4294967266, %v3398_v38 }
 0x4a0   : > { %vm2911_vm9 = vc.u32 %v2909_v3, %v2905_v21  ;;  %v3283_v35 = vsel %vm3281_vm3, %v3268_v45, %v3282_v10  ;;  %v3400_v1 = vshll.u32 %v11044_v16, %v3398_v38  ;;  %v11081_v44 = vadd.s32 %v2893_v55, %v2884_v36 }
 0x4a1   : > { %v2912_v63 = vsel %vm2911_vm9, 1, %v13741_v6  ;;  %v3287_v46 = vsel %vm3280_vm0, %v3283_v35, %v3286_v39  ;;  %v3401_v57 = vshrl.u32 %v11038_v24, %v3399_v43  ;;  %v3404_v17 = vadd.s32 127, %v3403_v13 }
 0x4a2   : > { %v2914_v34 = vadd.s32 %v2912_v63, %v2910_v31  ;;  %v3288_v54 = vsel %vm3277_vm7, nan, %v3287_v46  ;;  %vm11091_vm2 = vcmp.le.f32.partialorder %v3289_v4, 0.7853982  ;;  %v11095_v16 = vadd.s32 %v2909_v3, %v2905_v21 }
 0x4a3   : > { %v2979_v18 = vand.u32 2147483647, %v13823_v14  ;;  %5057 = vmatpush.msra.mxu2 %v3288_v54  ;;  %v3402_v0 = vor.u32 %v3401_v57, %v3400_v1  ;;  %v3405_v48 = vshll.u32 %v3404_v17, 23  ;;  %v2906_v59 = vshrl.u32 %v2901_v61, 16 }
 0x4a4   : > { %v2915_v24 = vadd.s32 %v2914_v34, %v2904_v58  ;;  %v3414_v50 = vsel %vm3291_vm13, %v3413_v29, %v11028_v27  ;;  %v2863_v26 = vsel %vm2857_vm5, %v2860_v47, %v2862_v11  ;;  %vm2919_vm1 = vc.u32 %v11081_v44, %v11095_v16 }
 0x4a5   : > { %v2986_v4 = vand.u32 8388607, %v2979_v18  ;;  %v3406_v45 = vor.u32 4788187, %v3405_v48  ;;  %v2996_v15 = vshll.u32 %v13643_v25, %v13803_v22  ;;  %v2997_v61 = vshrl.u32 %v13641_v33, %v13809_v30 }
 0x4a6   : > { %v2916_v51 = vadd.s32 %v2915_v24, %v2906_v59  ;;  %v3409_v56 = vcvt.s32.f32 %v3402_v0  ;;  %v2999_v49 = vshll.u32 %v13641_v33, %v13803_v22  ;;  %v3000_v27 = vshrl.u32 %v13739_v5, %v13809_v30 }
 0x4a7   : > { %v2987_v36 = vor.u32 8388608, %v2986_v4  ;;  %v3407_v47 = vand.u32 2147483647, %v3406_v45  ;;  %v3002_v7 = vshll.u32 %v13739_v5, %v13803_v22  ;;  %v3003_v28 = vshrl.u32 %v13710_v2, %v13809_v30 }
 0x4a8   : > { %v2920_v11 = vadd.s32 1, %v2916_v51  ;;  %v3416_v19 = vsel %vm11091_vm2, 0, %v3414_v50  ;;  %v2917_v55 = vmul.u32 %v10970_v53, %v2863_v26  ;;  %v2998_v12 = vor.u32 %v2997_v61, %v2996_v15 }
 0x4a9   : > { %v3001_v21 = vor.u32 %v3000_v27, %v2999_v49  ;;  %v3410_v3 = vmul.f32 %v3409_v56, %v3407_v47  ;;  %v3004_v10 = vor.u32 %v3003_v28, %v3002_v7  ;;  %vm3013_vm15 = vcmp.lt.s32.totalorder %v13820_v37, 3 }
 0x4aa   : > { %v2921_v31 = vsel %vm2919_vm1, %v2920_v11, %v2916_v51  ;;  %vm3011_vm5 = vcmp.lt.s32.totalorder %v13820_v37, 1  ;;  %v3025_v22 = vsel %vm3013_vm15, %v10876_v60, %v11032_v20  ;;  %v11131_v29 = vshll.u32 %v2987_v36, 8 }
 0x4ab   : > { %v2922_v38 = vadd.s32 %v2921_v31, %v2917_v55  ;;  %v11134_v53 = vsub.s32 32, %v11026_v8  ;;  %v3411_v58 = vxor.u32 2147483648, %v3410_v3  ;;  %vm3012_vm6 = vcmp.lt.s32.totalorder %v13820_v37, 2 }
 0x4ac   : > { %v3023_v39 = vsel %vm3011_vm5, %v3001_v21, %v3004_v10  ;;  %v11141_v43 = vshll.u32 %v13710_v2, %v11026_v8  ;;  %v3433_v13 = vadd.s32 3, %v3416_v19  ;;  %v3019_v1 = vsel %vm3011_vm5, %v2998_v12, %v3001_v21 }
 0x4ad   : > { %v2923_v35 = vadd.s32 536870912, %v2922_v38  ;;  %v3026_v60 = vsel %vm3012_vm6, %v3023_v39, %v3025_v22  ;;  %v3412_v20 = vsel %vm3291_vm13, %v3411_v58, %v3410_v3  ;;  %v3021_v63 = vsel %vm3013_vm15, %v3004_v10, %v11019_v62 }
 0x4ae   : > { %v11153_v46 = vand.u32 65535, %v11131_v29  ;;  %v3415_v57 = vsel %vm11091_vm2, %v13807_v41, %v3412_v20  ;;  %v3030_v34 = vand.u32 65535, %v3026_v60  ;;  %v3031_v54 = vshrl.u32 %v3026_v60, 16 }
 0x4af   : > { %v11158_v17 = vshrl.u32 %v2923_v35, 30  ;;  %v11162_v0 = vshrl.u32 %v13708_v32, %v11134_v53  ;;  %v11166_v48 = vshll.u32 %v13708_v32, %v11026_v8  ;;  %v3417_v62 = vmul.f32 %v3415_v57, %v3415_v57 }
 0x4b0   : > { %v2995_v59 = vshrl.u32 %v13643_v25, %v13809_v30  ;;  %v3016_v40 = vsel %vm3014_vm11, %v3004_v10, 2102212464  ;;  %v3029_v50 = vshrl.u32 %v11131_v29, 16  ;;  %v3033_v26 = vmul.u32 %v3031_v54, %v11153_v46 }
 0x4b1   : > { %v2925_v24 = vshll.u32 %v11158_v17, 30  ;;  %v3418_v4 = vmul.f32 -0.001358992, %v3417_v62  ;;  %v3425_v45 = vmul.f32 -0.00019511016, %v3417_v62  ;;  %v11175_v51 = vand.u32 3, %v3433_v13 }
 0x4b2   : > { %v3022_v15 = vsel %vm3012_vm6, %v3019_v1, %v3021_v63  ;;  %v3015_v30 = vsel %vm3011_vm5, %v2995_v59, %v2998_v12  ;;  %v11183_v56 = vmul.u32 %v3030_v34, %v3029_v50  ;;  %v3036_v36 = vshll.u32 %v3033_v26, 16 }
 0x4b3   : > { %v11179_v61 = vsub.s32 %v2922_v38, %v2925_v24  ;;  %v3419_v49 = vadd.f32 0.041655596, %v3418_v4  ;;  %v3426_v27 = vadd.f32 0.008332121, %v3425_v45  ;;  %v3017_v47 = vsel %vm3013_vm15, %v3001_v21, %v3016_v40 }
 0x4b4   : > { %v3032_v11 = vmul.u32 %v3030_v34, %v11153_v46  ;;  %v3035_v28 = vmul.u32 %v3031_v54, %v3029_v50  ;;  %v3052_v19 = vand.u32 65535, %v3022_v15  ;;  %v3038_v10 = vshll.u32 %v11183_v56, 16 }
 0x4b5   : > { %vm2927_vm11 = vcmp.lt.s32.totalorder %v11179_v61, 0  ;;  %v2928_v7 = vsub.s32 0, %v11179_v61  ;;  %v3420_v55 = vmul.f32 %v3419_v49, %v3417_v62  ;;  %v3427_v3 = vmul.f32 %v3426_v27, %v3417_v62 }
 0x4b6   : > { %vm3040_vm10 = vc.u32 %v3032_v11, %v3036_v36  ;;  %v3042_v12 = vadd.s32 %v3036_v36, %v3032_v11  ;;  %v3053_v22 = vshrl.u32 %v3022_v15, 16  ;;  %v11195_v35 = vshrl.u32 %v13642_v9, %v11134_v53 }
 0x4b7   : > { %v2929_v31 = vsel %vm2927_vm11, %v2928_v7, %v11179_v61  ;;  %v3041_v38 = vsel %vm3040_vm10, 1, %v13741_v6  ;;  %v3421_v21 = vadd.f32 -0.4999988, %v3420_v55  ;;  %v3428_v58 = vadd.f32 -0.16666654, %v3427_v3 }
 0x4b8   : > { %v2930_v39 = vclz %v2929_v31  ;;  %v3043_v13 = vadd.s32 %v3041_v38, %v3035_v28  ;;  %vm3436_vm4 = vcmp.eq.s32.totalorder %v11175_v51, 0  ;;  %vm3439_vm14 = vcmp.eq.s32.totalorder %v11175_v51, 2  ;;  %v13824_v31 = vld [vmem:[#allocation6_spill] sm:$0xff] }
 0x4b9   : > { %vm3044_vm3 = vc.u32 %v3042_v12, %v3038_v10  ;;  %v3422_v60 = vmul.f32 %v3421_v21, %v3417_v62  ;;  %v3429_v20 = vmul.f32 %v3428_v58, %v3417_v62  ;;  %vm3435_vm0 = vcmp.lt.s32.totalorder %v11175_v51, 2 }
 0x4ba   : > { %v7177_v1 = vadd.s32 4294967294, %v2930_v39  ;;  %v3045_v63 = vsel %vm3044_vm3, 1, %v13741_v6  ;;  %vm3432_vm7 = vweird.f32 %v13807_v41  ;;  %v2918_v34 = vadd.s32 %v11095_v16, %v11081_v44 }
 0x4bb   : > { %v11206_v54 = vsel %vm3012_vm6, %v3015_v30, %v3017_v47  ;;  %v3047_v59 = vadd.s32 %v3045_v63, %v3043_v13  ;;  %v3055_v24 = vmul.u32 %v3053_v22, %v11153_v46  ;;  %v3423_v40 = vadd.f32 1.0, %v3422_v60 }
 0x4bc   : > { %v3430_v4 = vadd.f32 1.0, %v3429_v20  ;;  %vm7178_vm8 = vcmp.lt.s32.totalorder %v7177_v1, 0  ;;  %v3056_v62 = vmul.u32 %v3052_v19, %v3029_v50  ;;  %v3037_v15 = vshrl.u32 %v3033_v26, 16 }
 0x4bd   : > { %v2933_v45 = vsel %vm7178_vm8, 0, %v7177_v1  ;;  %v3039_v36 = vshrl.u32 %v11183_v56, 16  ;;  %v3058_v49 = vshll.u32 %v3055_v24, 16  ;;  %v3440_v11 = vxor.u32 2147483648, %v3423_v40 }
 0x4be   : > { %v3431_v27 = vmul.f32 %v3430_v4, %v3415_v57  ;;  %v2934_v7 = vsub.s32 32, %v2933_v45  ;;  %v3054_v44 = vmul.u32 %v3052_v19, %v11153_v46  ;;  %v2935_v37 = vshll.u32 %v11179_v61, %v2933_v45 }
 0x4bf   : > { %v2938_v16 = vsub.s32 4294967266, %v2933_v45  ;;  %v3048_v30 = vadd.s32 %v3047_v59, %v3037_v15  ;;  %v3057_v47 = vmul.u32 %v3053_v22, %v3029_v50  ;;  %v3060_v3 = vshll.u32 %v3056_v62, 16  ;;  %v13827_v59 = vld [vmem:[#allocation14_spill] sm:$0xff] }
 0x4c0   : > { %v3437_v28 = vxor.u32 2147483648, %v3431_v27  ;;  %v2936_v55 = vshrl.u32 %v2918_v34, %v2934_v7  ;;  %vm3062_vm13 = vc.u32 %v3054_v44, %v3058_v49  ;;  %v3441_v26 = vsel %vm3439_vm14, %v3440_v11, %v3431_v27 }
 0x4c1   : > { %vm2826_vm12 = vcmp.lt.s32.totalorder %v13812_v42, 0  ;;  %v2939_v56 = vadd.s32 127, %v2938_v16  ;;  %v3063_v57 = vsel %vm3062_vm13, 1, %v13741_v6  ;;  %v3064_v12 = vadd.s32 %v3058_v49, %v3054_v44 }
 0x4c2   : > { %v3438_v46 = vsel %vm3436_vm4, %v3423_v40, %v3437_v28  ;;  %v2937_v61 = vor.u32 %v2936_v55, %v2935_v37  ;;  %v3065_v19 = vadd.s32 %v3063_v57, %v3057_v47  ;;  %v2514_v50 = vand.u32 2147483647, %v13824_v31  ;;  %v13828_v40 = vld [vmem:[#allocation15_spill] sm:$0xff]  ;;  %v13829_v28 = vld [vmem:[#allocation22_spill] sm:$0xff] }
 0x4c3   : > { %v3442_v10 = vsel %vm3435_vm0, %v3438_v46, %v3441_v26  ;;  %v2940_v38 = vshll.u32 %v2939_v56, 23  ;;  %v2948_v22 = vsub.s32 4, %v11158_v17  ;;  %vm3066_vm9 = vc.u32 %v3064_v12, %v3060_v3  ;;  %v13830_v26 = vld [vmem:[#allocation32_spill] sm:$0xff] }
 0x4c4   : > { %v3443_v21 = vsel %vm3432_vm7, nan, %v3442_v10  ;;  %vm11226_vm2 = vcmp.le.f32.partialorder %v2824_v23, 0.7853982  ;;  %v11230_v39 = vadd.s32 %v3048_v30, %v3039_v36  ;;  %v3059_v13 = vshrl.u32 %v3055_v24, 16  ;;  %v13831_v56 = vld [vmem:[#allocation24_spill] sm:$0xff] }
 0x4c5   : > { %v3067_v60 = vsel %vm3066_vm9, 1, %v13741_v6  ;;  %5089 = vmatpush.msra.mxu3 %v3443_v21  ;;  %v2941_v51 = vor.u32 4788187, %v2940_v38  ;;  %v3061_v20 = vshrl.u32 %v3056_v62, 16  ;;  %v11233_v1 = vadd.s32 %v3064_v12, %v3060_v3 }
 0x4c6   : > { %v3069_v63 = vadd.s32 %v3067_v60, %v3065_v19  ;;  %v2944_v34 = vcvt.s32.f32 %v2937_v61  ;;  %v2521_v41 = vand.u32 8388607, %v2514_v50  ;;  %v2531_v23 = vshll.u32 %v13643_v25, %v13827_v59 }
 0x4c7   : > { %v2532_v4 = vshrl.u32 %v13641_v33, %v13828_v40  ;;  %v2942_v45 = vand.u32 2147483647, %v2941_v51  ;;  %v2534_v15 = vshll.u32 %v13641_v33, %v13827_v59  ;;  %v2535_v62 = vshrl.u32 %v13739_v5, %v13828_v40 }
 0x4c8   : > { %v3070_v24 = vadd.s32 %v3069_v63, %v3059_v13  ;;  %v2522_v36 = vor.u32 8388608, %v2521_v41  ;;  %v2537_v27 = vshll.u32 %v13739_v5, %v13827_v59  ;;  %v2538_v11 = vshrl.u32 %v13710_v2, %v13828_v40 }
 0x4c9   : > { %v11245_v49 = vor.u32 %v2532_v4, %v2531_v23  ;;  %v2945_v7 = vmul.f32 %v2944_v34, %v2942_v45  ;;  %v3072_v37 = vmul.u32 %v11131_v29, %v11206_v54  ;;  %v11253_v16 = vor.u32 %v2535_v62, %v2534_v15  ;;  %v13832_v54 = vld [vmem:[#allocation29_spill] sm:$0xff] }
 0x4ca   : > { %v3071_v44 = vadd.s32 %v3070_v24, %v3061_v20  ;;  %v2949_v30 = vsel %vm2826_vm12, %v2948_v22, %v11158_v17  ;;  %vm3074_vm1 = vc.u32 %v11230_v39, %v11233_v1  ;;  %v11260_v47 = vor.u32 %v2538_v11, %v2537_v27 }
 0x4cb   : > { %vm2548_vm15 = vcmp.lt.s32.totalorder %v13829_v28, 3  ;;  %v2946_v55 = vxor.u32 2147483648, %v2945_v7  ;;  %vm2546_vm5 = vcmp.lt.s32.totalorder %v13829_v28, 1  ;;  %v11280_v46 = vshll.u32 %v2522_v36, 8 }
 0x4cc   : > { %v3075_v3 = vadd.s32 1, %v3071_v44  ;;  %v2560_v29 = vsel %vm2548_vm15, %v13831_v56, %v13830_v26  ;;  %v2554_v17 = vsel %vm2546_vm5, %v11245_v49, %v11253_v16  ;;  %v2556_v57 = vsel %vm2548_vm15, %v11260_v47, %v13832_v54 }
 0x4cd   : > { %v2558_v12 = vsel %vm2546_vm5, %v11253_v16, %v11260_v47  ;;  %v2947_v61 = vsel %vm2826_vm12, %v2946_v55, %v2945_v7  ;;  %v2951_v19 = vsel %vm11226_vm2, 0, %v2949_v30  ;;  %vm2547_vm6 = vcmp.lt.s32.totalorder %v13829_v28, 2 }
 0x4ce   : > { %v3076_v10 = vsel %vm3074_vm1, %v3075_v3, %v3071_v44  ;;  %v11289_v38 = vor.u32 %v11162_v0, %v11141_v43  ;;  %v11294_v22 = vsel %vm11226_vm2, %v13812_v42, %v2947_v61  ;;  %v2561_v13 = vsel %vm2547_vm6, %v2558_v12, %v2560_v29 }
 0x4cf   : > { %v3077_v21 = vadd.s32 %v3076_v10, %v3072_v37  ;;  %v2700_v60 = vor.u32 %v11195_v35, %v11166_v48  ;;  %v2952_v51 = vmul.f32 %v11294_v22, %v11294_v22  ;;  %v11304_v20 = vsel %vm2547_vm6, %v2554_v17, %v2556_v57 }
 0x4d0   : > { %v2565_v43 = vand.u32 65535, %v2561_v13  ;;  %v2968_v0 = vadd.s32 3, %v2951_v19  ;;  %v2563_v58 = vand.u32 65535, %v11280_v46  ;;  %v2566_v34 = vshrl.u32 %v2561_v13, 16 }
 0x4d1   : > { %v3078_v63 = vadd.s32 536870912, %v3077_v21  ;;  %vm2704_vm11 = vcmp.lt.s32.totalorder %v11011_v52, 4  ;;  %v2953_v41 = vmul.f32 -0.001358992, %v2952_v51  ;;  %v2960_v59 = vmul.f32 -0.00019511016, %v2952_v51 }
 0x4d2   : > { %v11309_v23 = vshrl.u32 %v11280_v46, 16  ;;  %v11314_v48 = vsel %vm2704_vm11, %v11289_v38, 920167782  ;;  %v2568_v4 = vmul.u32 %v2566_v34, %v2563_v58  ;;  %v2588_v45 = vshrl.u32 %v11304_v20, 16 }
 0x4d3   : > { %v11316_v35 = vshrl.u32 %v3078_v63, 30  ;;  %v11321_v24 = vsel %vm2704_vm11, %v2700_v60, 1326507024  ;;  %v2954_v15 = vadd.f32 0.041655596, %v2953_v41  ;;  %v11326_v27 = vand.u32 3, %v2968_v0 }
 0x4d4   : > { %v2961_v62 = vadd.f32 0.008332121, %v2960_v59  ;;  %v11324_v36 = vmul.u32 %v2565_v43, %v11309_v23  ;;  %v2567_v7 = vmul.u32 %v2565_v43, %v2563_v58  ;;  %v2571_v44 = vshll.u32 %v2568_v4, 16 }
 0x4d5   : > { %v3080_v11 = vshll.u32 %v11316_v35, 30  ;;  %v2955_v37 = vmul.f32 %v2954_v15, %v2952_v51  ;;  %v2570_v55 = vmul.u32 %v2566_v34, %v11309_v23  ;;  %v2587_v3 = vand.u32 65535, %v11304_v20 }
 0x4d6   : > { %v2962_v30 = vmul.f32 %v2961_v62, %v2952_v51  ;;  %vm2575_vm10 = vc.u32 %v2567_v7, %v2571_v44  ;;  %v2577_v56 = vadd.s32 %v2571_v44, %v2567_v7  ;;  %v11333_v29 = vmul.u32 %v2588_v45, %v2563_v58 }
 0x4d7   : > { %v11331_v26 = vsub.s32 %v3077_v21, %v3080_v11  ;;  %v2956_v17 = vadd.f32 -0.4999988, %v2955_v37  ;;  %v2573_v57 = vshll.u32 %v11324_v36, 16  ;;  %v2576_v12 = vsel %vm2575_vm10, 1, %v13741_v6 }
 0x4d8   : > { %v2963_v54 = vadd.f32 -0.16666654, %v2962_v30  ;;  %vm2971_vm4 = vcmp.eq.s32.totalorder %v11326_v27, 0  ;;  %vm2974_vm14 = vcmp.eq.s32.totalorder %v11326_v27, 2  ;;  %v2530_v19 = vshrl.u32 %v13643_v25, %v13828_v40 }
 0x4d9   : > { %vm3082_vm3 = vcmp.lt.s32.totalorder %v11331_v26, 0  ;;  %v3083_v61 = vsub.s32 0, %v11331_v26  ;;  %v2578_v10 = vadd.s32 %v2576_v12, %v2570_v55  ;;  %v2957_v21 = vmul.f32 %v2956_v17, %v2952_v51 }
 0x4da   : > { %v2964_v13 = vmul.f32 %v2963_v54, %v2952_v51  ;;  %vm2970_vm0 = vcmp.lt.s32.totalorder %v11326_v27, 2  ;;  %vm13833_vm7 = vcmp.lt.s32.totalorder %v13829_v28, 4  ;;  %vm2579_vm8 = vc.u32 %v2577_v56, %v2573_v57 }
 0x4db   : > { %v2551_v60 = vsel %vm13833_vm7, %v11260_v47, 2102212464  ;;  %vm2967_vm13 = vweird.f32 %v13812_v42  ;;  %v3084_v20 = vsel %vm3082_vm3, %v3083_v61, %v11331_v26  ;;  %v2580_v43 = vsel %vm2579_vm8, 1, %v13741_v6 }
 0x4dc   : > { %v2591_v0 = vmul.u32 %v2587_v3, %v11309_v23  ;;  %v2593_v40 = vshll.u32 %v11333_v29, 16  ;;  %v2958_v63 = vadd.f32 1.0, %v2957_v21  ;;  %v2965_v34 = vadd.f32 1.0, %v2964_v13 }
 0x4dd   : > { %v3085_v51 = vclz %v3084_v20  ;;  %v2582_v41 = vadd.s32 %v2580_v43, %v2578_v10  ;;  %v3073_v59 = vadd.s32 %v11233_v1, %v11230_v39  ;;  %v2550_v47 = vsel %vm2546_vm5, %v2530_v19, %v11245_v49 }
 0x4de   : > { %v2572_v15 = vshrl.u32 %v2568_v4, 16  ;;  %v2589_v62 = vmul.u32 %v2587_v3, %v2563_v58  ;;  %v2966_v11 = vmul.f32 %v2965_v34, %v11294_v22  ;;  %v2975_v7 = vxor.u32 2147483648, %v2958_v63 }
 0x4df   : > { %vm2981_vm12 = vcmp.lt.s32.totalorder %v13823_v14, 0  ;;  %v7180_v44 = vadd.s32 4294967294, %v3085_v51  ;;  %v2552_v37 = vsel %vm2548_vm15, %v11253_v16, %v2551_v60  ;;  %v2595_v55 = vshll.u32 %v2591_v0, 16  ;;  %v13836_v60 = vld [vmem:[#allocation16_spill] sm:$0xff] }
 0x4e0   : > { %v2583_v30 = vadd.s32 %v2582_v41, %v2572_v15  ;;  %vm2597_vm9 = vc.u32 %v2589_v62, %v2593_v40  ;;  %v2599_v39 = vadd.s32 %v2593_v40, %v2589_v62  ;;  %v2972_v1 = vxor.u32 2147483648, %v2966_v11 }
 0x4e1   : > { %vm7181_vm2 = vcmp.lt.s32.totalorder %v7180_v44, 0  ;;  %v3103_v49 = vsub.s32 4, %v11316_v35  ;;  %v2574_v58 = vshrl.u32 %v11324_v36, 16  ;;  %v2592_v22 = vmul.u32 %v2588_v45, %v11309_v23 }
 0x4e2   : > { %v3088_v4 = vsel %vm7181_vm2, 0, %v7180_v44  ;;  %v2598_v3 = vsel %vm2597_vm9, 1, %v13741_v6  ;;  %vm2601_vm1 = vc.u32 %v2599_v39, %v2595_v55  ;;  %v2973_v56 = vsel %vm2971_vm4, %v2958_v63, %v2972_v1 }
 0x4e3   : > { %v2976_v16 = vsel %vm2974_vm14, %v2975_v7, %v2966_v11  ;;  %v3089_v17 = vsub.s32 32, %v3088_v4  ;;  %v3093_v54 = vsub.s32 4294967266, %v3088_v4  ;;  %v11372_v12 = vadd.s32 %v2583_v30, %v2574_v58  ;;  %v13837_v58 = vld [vmem:[#allocation28_spill] sm:$0xff] }
 0x4e4   : > { %v2977_v57 = vsel %vm2970_vm0, %v2973_v56, %v2976_v16  ;;  %v2600_v36 = vadd.s32 %v2598_v3, %v2592_v22  ;;  %v2602_v61 = vsel %vm2601_vm1, 1, %v13741_v6  ;;  %v3090_v45 = vshll.u32 %v11331_v26, %v3088_v4 }
 0x4e5   : > { %v2978_v23 = vsel %vm2967_vm13, nan, %v2977_v57  ;;  %v3091_v19 = vshrl.u32 %v3073_v59, %v3089_v17  ;;  %v3094_v10 = vadd.s32 127, %v3093_v54  ;;  %vm11380_vm15 = vcmp.le.f32.partialorder %v2979_v18, 0.7853982 }
 0x4e6   : > { %5058 = vmatpush.msra.mxu2 %v2978_v23  ;;  %v2594_v27 = vshrl.u32 %v11333_v29, 16  ;;  %v2604_v13 = vadd.s32 %v2602_v61, %v2600_v36  ;;  %v2669_v20 = vand.u32 2147483647, %v13836_v60  ;;  %v2553_v42 = vsel %vm2547_vm6, %v2550_v47, %v2552_v37 }
 0x4e7   : > { %v3092_v43 = vor.u32 %v3091_v19, %v3090_v45  ;;  %v3095_v40 = vshll.u32 %v3094_v10, 23  ;;  %v11388_v26 = vadd.s32 %v2599_v39, %v2595_v55  ;;  %v3104_v63 = vsel %vm2981_vm12, %v3103_v49, %v11316_v35 }
 0x4e8   : > { %v2596_v18 = vshrl.u32 %v2591_v0, 16  ;;  %v2605_v34 = vadd.s32 %v2604_v13, %v2594_v27  ;;  %v2676_v51 = vand.u32 8388607, %v2669_v20  ;;  %v2686_v41 = vshll.u32 %v13643_v25, %v11026_v8 }
 0x4e9   : > { %v3096_v29 = vor.u32 4788187, %v3095_v40  ;;  %vm2609_vm5 = vc.u32 %v11372_v12, %v11388_v26  ;;  %v2687_v28 = vshrl.u32 %v13641_v33, %v11134_v53  ;;  %v2689_v35 = vshll.u32 %v13641_v33, %v11026_v8 }
 0x4ea   : > { %v2606_v59 = vadd.s32 %v2605_v34, %v2596_v18  ;;  %v2677_v47 = vor.u32 8388608, %v2676_v51  ;;  %v2690_v0 = vshrl.u32 %v13739_v5, %v11134_v53  ;;  %v3099_v62 = vcvt.s32.f32 %v3092_v43 }
 0x4eb   : > { %v3097_v15 = vand.u32 2147483647, %v3096_v29  ;;  %v2692_v11 = vshll.u32 %v13739_v5, %v11026_v8  ;;  %v2693_v7 = vshrl.u32 %v13710_v2, %v11134_v53  ;;  %v3106_v44 = vsel %vm11380_vm15, 0, %v3104_v63 }
 0x4ec   : > { %v2610_v37 = vadd.s32 1, %v2606_v59  ;;  %v2688_v30 = vor.u32 %v2687_v28, %v2686_v41  ;;  %v2691_v55 = vor.u32 %v2690_v0, %v2689_v35  ;;  %v2607_v1 = vmul.u32 %v11280_v46, %v2553_v42 }
 0x4ed   : > { %v3100_v39 = vmul.f32 %v3099_v62, %v3097_v15  ;;  %v2694_v49 = vor.u32 %v2693_v7, %v2692_v11  ;;  %vm2703_vm6 = vcmp.lt.s32.totalorder %v11011_v52, 3  ;;  %v11415_v4 = vshll.u32 %v13710_v2, %v13837_v58 }
 0x4ee   : > { %v2611_v8 = vsel %vm2609_vm5, %v2610_v37, %v2606_v59  ;;  %v2715_v22 = vsel %vm2703_vm6, %v11289_v38, %v11321_v24  ;;  %v11424_v3 = vshll.u32 %v2677_v47, 8  ;;  %v3123_v46 = vadd.s32 3, %v3106_v44 }
 0x4ef   : > { %v3101_v56 = vxor.u32 2147483648, %v3100_v39  ;;  %v2612_v16 = vadd.s32 %v2611_v8, %v2607_v1  ;;  %vm2701_vm10 = vcmp.lt.s32.totalorder %v11011_v52, 1  ;;  %vm2702_vm4 = vcmp.lt.s32.totalorder %v11011_v52, 2 }
 0x4f0   : > { %v2709_v17 = vsel %vm2701_vm10, %v2688_v30, %v2691_v55  ;;  %v2711_v54 = vsel %vm2703_vm6, %v2694_v49, %v11314_v48  ;;  %v2713_v57 = vsel %vm2701_vm10, %v2691_v55, %v2694_v49  ;;  %v2718_v61 = vand.u32 65535, %v11424_v3 }
 0x4f1   : > { %v3102_v38 = vsel %vm2981_vm12, %v3101_v56, %v3100_v39  ;;  %v2613_v24 = vadd.s32 536870912, %v2612_v16  ;;  %v2716_v36 = vsel %vm2702_vm4, %v2713_v57, %v2715_v22  ;;  %v11444_v45 = vshrl.u32 %v11424_v3, 16 }
 0x4f2   : > { %v3105_v23 = vsel %vm11380_vm15, %v13823_v14, %v3102_v38  ;;  %v2720_v48 = vand.u32 65535, %v2716_v36  ;;  %v2721_v19 = vshrl.u32 %v2716_v36, 16  ;;  %v11448_v10 = vshll.u32 %v13708_v32, %v13837_v58 }
 0x4f3   : > { %v3107_v27 = vmul.f32 %v3105_v23, %v3105_v23  ;;  %v11450_v13 = vshrl.u32 %v2613_v24, 30  ;;  %v2712_v43 = vsel %vm2702_vm4, %v2709_v17, %v2711_v54  ;;  %v2685_v40 = vshrl.u32 %v13643_v25, %v11134_v53 }
 0x4f4   : > { %v2706_v21 = vsel %vm2704_vm11, %v2694_v49, 2102212464  ;;  %v2723_v42 = vmul.u32 %v2721_v19, %v2718_v61  ;;  %v11459_v63 = vmul.u32 %v2720_v48, %v11444_v45  ;;  %v11461_v51 = vand.u32 3, %v3123_v46  ;;  %v13838_v46 = vld [vmem:[#allocation34_spill] sm:$0xff] }
 0x4f5   : > { %v3108_v18 = vmul.f32 -0.001358992, %v3107_v27  ;;  %v3115_v34 = vmul.f32 -0.00019511016, %v3107_v27  ;;  %v2615_v29 = vshll.u32 %v11450_v13, 30  ;;  %v2705_v41 = vsel %vm2701_vm10, %v2685_v40, %v2688_v30 }
 0x4f6   : > { %v2722_v28 = vmul.u32 %v2720_v48, %v2718_v61  ;;  %v2726_v59 = vshll.u32 %v2723_v42, 16  ;;  %v2743_v47 = vshrl.u32 %v2712_v43, 16  ;;  %v2707_v15 = vsel %vm2703_vm6, %v2691_v55, %v2706_v21 }
 0x4f7   : > { %v3109_v53 = vadd.f32 0.041655596, %v3108_v18  ;;  %v3116_v35 = vadd.f32 0.008332121, %v3115_v34  ;;  %v11466_v0 = vsub.s32 %v2612_v16, %v2615_v29  ;;  %v2725_v62 = vmul.u32 %v2721_v19, %v11444_v45 }
 0x4f8   : > { %v2728_v11 = vshll.u32 %v11459_v63, 16  ;;  %vm2730_vm11 = vc.u32 %v2722_v28, %v2726_v59  ;;  %v2732_v7 = vadd.s32 %v2726_v59, %v2722_v28  ;;  %v2742_v1 = vand.u32 65535, %v2712_v43 }
 0x4f9   : > { %v3110_v44 = vmul.f32 %v3109_v53, %v3107_v27  ;;  %v3117_v37 = vmul.f32 %v3116_v35, %v3107_v27  ;;  %vm2617_vm14 = vcmp.lt.s32.totalorder %v11466_v0, 0  ;;  %v2618_v30 = vsub.s32 0, %v11466_v0 }
 0x4fa   : > { %v2731_v39 = vsel %vm2730_vm11, 1, %v13741_v6  ;;  %vm2734_vm3 = vc.u32 %v2732_v7, %v2728_v11  ;;  %v11475_v49 = vmul.u32 %v2743_v47, %v2718_v61  ;;  %v11480_v16 = vshrl.u32 %v13708_v32, %v13838_v46 }
 0x4fb   : > { %v3111_v8 = vadd.f32 -0.4999988, %v3110_v44  ;;  %v3118_v55 = vadd.f32 -0.16666654, %v3117_v37  ;;  %v2619_v22 = vsel %vm2617_vm14, %v2618_v30, %v11466_v0  ;;  %v2733_v56 = vadd.s32 %v2731_v39, %v2725_v62 }
 0x4fc   : > { %v11484_v17 = vshrl.u32 %v13642_v9, %v13838_v46  ;;  %v2620_v54 = vclz %v2619_v22  ;;  %v2735_v57 = vsel %vm2734_vm3, 1, %v13741_v6  ;;  %vm3125_vm0 = vcmp.lt.s32.totalorder %v11461_v51, 2 }
 0x4fd   : > { %v3112_v38 = vmul.f32 %v3111_v8, %v3107_v27  ;;  %v3119_v24 = vmul.f32 %v3118_v55, %v3107_v27  ;;  %vm3126_vm7 = vcmp.eq.s32.totalorder %v11461_v51, 0  ;;  %vm3129_vm8 = vcmp.eq.s32.totalorder %v11461_v51, 2 }
 0x4fe   : > { %vm3122_vm13 = vweird.f32 %v13823_v14  ;;  %v2608_v36 = vadd.s32 %v11388_v26, %v11372_v12  ;;  %v7171_v48 = vadd.s32 4294967294, %v2620_v54  ;;  %v11495_v19 = vsel %vm2702_vm4, %v2705_v41, %v2707_v15 }
 0x4ff   : > { %v2737_v43 = vadd.s32 %v2735_v57, %v2733_v56  ;;  %v3113_v40 = vadd.f32 1.0, %v3112_v38  ;;  %v3120_v21 = vadd.f32 1.0, %v3119_v24  ;;  %v2746_v27 = vmul.u32 %v2742_v1, %v11444_v45 }
 0x500   : > { %v2748_v18 = vshll.u32 %v11475_v49, 16  ;;  %vm7172_vm12 = vcmp.lt.s32.totalorder %v7171_v48, 0  ;;  %v2727_v34 = vshrl.u32 %v2723_v42, 16  ;;  %v2729_v29 = vshrl.u32 %v11459_v63, 16 }
 0x501   : > { %v2744_v28 = vmul.u32 %v2742_v1, %v2718_v61  ;;  %v3121_v59 = vmul.f32 %v3120_v21, %v3105_v23  ;;  %v3130_v53 = vxor.u32 2147483648, %v3113_v40  ;;  %v2623_v12 = vsel %vm7172_vm12, 0, %v7171_v48  ;;  %v13843_v21 = vld [vmem:[#allocation13_spill] sm:$0xff] }
 0x502   : > { %v2747_v26 = vmul.u32 %v2743_v47, %v11444_v45  ;;  %vm2516_vm9 = vcmp.lt.s32.totalorder %v13824_v31, 0  ;;  %v2624_v52 = vsub.s32 32, %v2623_v12  ;;  %v2628_v41 = vsub.s32 4294967266, %v2623_v12  ;;  %v13839_v47 = vld [vmem:[#allocation5_spill] sm:$0xff] }
 0x503   : > { %v2738_v35 = vadd.s32 %v2737_v43, %v2727_v34  ;;  %vm2752_vm2 = vc.u32 %v2744_v28, %v2748_v18  ;;  %v3127_v15 = vxor.u32 2147483648, %v3121_v59  ;;  %v2750_v62 = vshll.u32 %v2746_v27, 16  ;;  %v13842_v43 = vld [vmem:[#allocation10_spill] sm:$0xff] }
 0x504   : > { %v2753_v11 = vsel %vm2752_vm2, 1, %v13741_v6  ;;  %v2754_v7 = vadd.s32 %v2748_v18, %v2744_v28  ;;  %v2625_v42 = vshll.u32 %v11466_v0, %v2623_v12  ;;  %v2626_v63 = vshrl.u32 %v2608_v36, %v2624_v52 }
 0x505   : > { %v2629_v61 = vadd.s32 127, %v2628_v41  ;;  %v2755_v23 = vadd.s32 %v2753_v11, %v2747_v26  ;;  %v3128_v44 = vsel %vm3126_vm7, %v3113_v40, %v3127_v15  ;;  %v3131_v45 = vsel %vm3129_vm8, %v3130_v53, %v3121_v59  ;;  %v13845_v11 = vld [vmem:[#allocation27_spill] sm:$0xff] }
 0x506   : > { %vm2756_vm1 = vc.u32 %v2754_v7, %v2750_v62  ;;  %v2204_v37 = vand.u32 2147483647, %v13839_v47  ;;  %v3132_v30 = vsel %vm3125_vm0, %v3128_v44, %v3131_v45  ;;  %vm11513_vm15 = vcmp.le.f32.partialorder %v2514_v50, 0.7853982  ;;  %v13847_v45 = vld [vmem:[#allocation26_spill] sm:$0xff] }
 0x507   : > { %v2627_v0 = vor.u32 %v2626_v63, %v2625_v42  ;;  %v2630_v1 = vshll.u32 %v2629_v61, 23  ;;  %v2757_v8 = vsel %vm2756_vm1, 1, %v13741_v6  ;;  %v3133_v55 = vsel %vm3122_vm13, nan, %v3132_v30 }
 0x508   : > { %v2638_v22 = vsub.s32 4, %v11450_v13  ;;  %v2749_v56 = vshrl.u32 %v11475_v49, 16  ;;  %v2759_v54 = vadd.s32 %v2757_v8, %v2755_v23  ;;  %5090 = vmatpush.msra.mxu3 %v3133_v55  ;;  %v11522_v57 = vadd.s32 %v2738_v35, %v2729_v29 }
 0x509   : > { %v2631_v51 = vor.u32 4788187, %v2630_v1  ;;  %v2751_v50 = vshrl.u32 %v2746_v27, 16  ;;  %v11524_v38 = vadd.s32 %v2754_v7, %v2750_v62  ;;  %v2634_v24 = vcvt.s32.f32 %v2627_v0  ;;  %v13846_v7 = vld [vmem:[#allocation19_spill] sm:$0xff] }
 0x50a   : > { %v2760_v36 = vadd.s32 %v2759_v54, %v2749_v56  ;;  %v2211_v48 = vand.u32 8388607, %v2204_v37  ;;  %v2221_v14 = vshll.u32 %v13643_v25, %v13842_v43  ;;  %v2222_v49 = vshrl.u32 %v13641_v33, %v13843_v21  ;;  %v13848_v54 = vld [vmem:[#allocation31_spill] sm:$0xff] }
 0x50b   : > { %v2632_v40 = vand.u32 2147483647, %v2631_v51  ;;  %v2224_v18 = vshll.u32 %v13641_v33, %v13842_v43  ;;  %v2225_v27 = vshrl.u32 %v13739_v5, %v13843_v21  ;;  %v2639_v34 = vsel %vm2516_vm9, %v2638_v22, %v11450_v13  ;;  %v13844_v13 = vld [vmem:[#allocation17_spill] sm:$0xff] }
 0x50c   : > { %v2761_v29 = vadd.s32 %v2760_v36, %v2751_v50  ;;  %v2227_v28 = vshll.u32 %v13739_v5, %v13842_v43  ;;  %v2228_v59 = vshrl.u32 %v13710_v2, %v13843_v21  ;;  %vm2764_vm5 = vc.u32 %v11522_v57, %v11524_v38 }
 0x50d   : > { %v2635_v53 = vmul.f32 %v2634_v24, %v2632_v40  ;;  %v11545_v12 = vor.u32 %v2222_v49, %v2221_v14  ;;  %v11547_v26 = vor.u32 %v2225_v27, %v2224_v18  ;;  %v2212_v41 = vor.u32 8388608, %v2211_v48 }
 0x50e   : > { %v2765_v52 = vadd.s32 1, %v2761_v29  ;;  %v11549_v35 = vor.u32 %v2228_v59, %v2227_v28  ;;  %vm2238_vm6 = vcmp.lt.s32.totalorder %v13844_v13, 3  ;;  %v2762_v62 = vmul.u32 %v11424_v3, %v11495_v19 }
 0x50f   : > { %v2636_v15 = vxor.u32 2147483648, %v2635_v53  ;;  %vm2236_vm10 = vcmp.lt.s32.totalorder %v13844_v13, 1  ;;  %v2250_v42 = vsel %vm2238_vm6, %v13846_v7, %v13845_v11  ;;  %v11561_v63 = vor.u32 %v11480_v16, %v11415_v4 }
 0x510   : > { %v2641_v61 = vsel %vm11513_vm15, 0, %v2639_v34  ;;  %v2766_v23 = vsel %vm2764_vm5, %v2765_v52, %v2761_v29  ;;  %v2248_v3 = vsel %vm2236_vm10, %v11547_v26, %v11549_v35  ;;  %vm2237_vm4 = vcmp.lt.s32.totalorder %v13844_v13, 2 }
 0x511   : > { %v2637_v19 = vsel %vm2516_vm9, %v2636_v15, %v2635_v53  ;;  %v2767_v44 = vadd.s32 %v2766_v23, %v2762_v62  ;;  %v2244_v4 = vsel %vm2236_vm10, %v11545_v12, %v11547_v26  ;;  %v2246_v30 = vsel %vm2238_vm6, %v11549_v35, %v13847_v45 }
 0x512   : > { %v2640_v16 = vsel %vm11513_vm15, %v13824_v31, %v2637_v19  ;;  %v2251_v0 = vsel %vm2237_vm4, %v2248_v3, %v2250_v42  ;;  %v11585_v1 = vshll.u32 %v2212_v41, 8  ;;  %vm2394_vm11 = vcmp.lt.s32.totalorder %v13848_v54, 4 }
 0x513   : > { %v2642_v8 = vmul.f32 %v2640_v16, %v2640_v16  ;;  %v2768_v55 = vadd.s32 536870912, %v2767_v44  ;;  %v2255_v22 = vand.u32 65535, %v2251_v0  ;;  %v2256_v56 = vshrl.u32 %v2251_v0, 16 }
 0x514   : > { %v2658_v51 = vadd.s32 3, %v2641_v61  ;;  %v2253_v39 = vand.u32 65535, %v11585_v1  ;;  %v2254_v50 = vshrl.u32 %v11585_v1, 16  ;;  %v2247_v43 = vsel %vm2237_vm4, %v2244_v4, %v2246_v30 }
 0x515   : > { %v2643_v24 = vmul.f32 -0.001358992, %v2642_v8  ;;  %v2650_v36 = vmul.f32 -0.00019511016, %v2642_v8  ;;  %v11590_v48 = vshrl.u32 %v2768_v55, 30  ;;  %v2390_v18 = vor.u32 %v11484_v17, %v11448_v10 }
 0x516   : > { %v11597_v14 = vsel %vm2394_vm11, %v11561_v63, 920167782  ;;  %v2258_v40 = vmul.u32 %v2256_v56, %v2253_v39  ;;  %v11599_v49 = vmul.u32 %v2255_v22, %v2254_v50  ;;  %v2659_v28 = vand.u32 3, %v2658_v51 }
 0x517   : > { %v2644_v27 = vadd.f32 0.041655596, %v2643_v24  ;;  %v2651_v34 = vadd.f32 0.008332121, %v2650_v36  ;;  %v2770_v29 = vshll.u32 %v11590_v48, 30  ;;  %v2257_v59 = vmul.u32 %v2255_v22, %v2253_v39 }
 0x518   : > { %v2261_v53 = vshll.u32 %v2258_v40, 16  ;;  %v2278_v52 = vshrl.u32 %v2247_v43, 16  ;;  %v2277_v11 = vand.u32 65535, %v2247_v43  ;;  %v2260_v7 = vmul.u32 %v2256_v56, %v2254_v50 }
 0x519   : > { %v2645_v41 = vmul.f32 %v2644_v27, %v2642_v8  ;;  %v2652_v15 = vmul.f32 %v2651_v34, %v2642_v8  ;;  %v2771_v62 = vsub.s32 %v2767_v44, %v2770_v29  ;;  %v2263_v42 = vshll.u32 %v11599_v49, 16 }
 0x51a   : > { %vm2265_vm14 = vc.u32 %v2257_v59, %v2261_v53  ;;  %v2267_v61 = vadd.s32 %v2261_v53, %v2257_v59  ;;  %v2220_v4 = vshrl.u32 %v13643_v25, %v13843_v21  ;;  %v11608_v30 = vmul.u32 %v2278_v52, %v2253_v39 }
 0x51b   : > { %v2646_v23 = vadd.f32 -0.4999988, %v2645_v41  ;;  %v2653_v3 = vadd.f32 -0.16666654, %v2652_v15  ;;  %vm2772_vm3 = vcmp.lt.s32.totalorder %v2771_v62, 0  ;;  %v2773_v19 = vsub.s32 0, %v2771_v62 }
 0x51c   : > { %v2266_v45 = vsel %vm2265_vm14, 1, %v13741_v6  ;;  %vm2269_vm0 = vc.u32 %v2267_v61, %v2263_v42  ;;  %vm2660_vm7 = vcmp.lt.s32.totalorder %v2659_v28, 2  ;;  %vm2657_vm8 = vweird.f32 %v13824_v31 }
 0x51d   : > { %v2647_v0 = vmul.f32 %v2646_v23, %v2642_v8  ;;  %v2654_v44 = vmul.f32 %v2653_v3, %v2642_v8  ;;  %v2774_v55 = vsel %vm2772_vm3, %v2773_v19, %v2771_v62  ;;  %v2268_v22 = vadd.s32 %v2266_v45, %v2260_v7 }
 0x51e   : > { %vm2661_vm13 = vcmp.eq.s32.totalorder %v2659_v28, 0  ;;  %v2775_v56 = vclz %v2774_v55  ;;  %vm13849_vm12 = vcmp.lt.s32.totalorder %v13844_v13, 4  ;;  %v2270_v21 = vsel %vm2269_vm0, 1, %v13741_v6 }
 0x51f   : > { %v2241_v51 = vsel %vm13849_vm12, %v11549_v35, 2102212464  ;;  %v2648_v24 = vadd.f32 1.0, %v2647_v0  ;;  %v2655_v36 = vadd.f32 1.0, %v2654_v44  ;;  %v2272_v43 = vadd.s32 %v2270_v21, %v2268_v22  ;;  %v13850_v44 = vld [vmem:[#allocation8_spill] sm:$0xff] }
 0x520   : > { %v2281_v27 = vmul.u32 %v2277_v11, %v2254_v50  ;;  %vm2664_vm9 = vcmp.eq.s32.totalorder %v2659_v28, 2  ;;  %v2763_v8 = vadd.s32 %v11524_v38, %v11522_v57  ;;  %v7174_v34 = vadd.s32 4294967294, %v2775_v56 }
 0x521   : > { %v2240_v29 = vsel %vm2236_vm10, %v2220_v4, %v11545_v12  ;;  %v2656_v59 = vmul.f32 %v2655_v36, %v2640_v16  ;;  %v2665_v53 = vxor.u32 2147483648, %v2648_v24  ;;  %v2262_v41 = vshrl.u32 %v2258_v40, 16 }
 0x522   : > { %v2283_v35 = vshll.u32 %v11608_v30, 16  ;;  %vm7175_vm2 = vcmp.lt.s32.totalorder %v7174_v34, 0  ;;  %v2242_v15 = vsel %vm2238_vm6, %v11547_v26, %v2241_v51  ;;  %v2279_v7 = vmul.u32 %v2277_v11, %v2253_v39 }
 0x523   : > { %v2282_v42 = vmul.u32 %v2278_v52, %v2254_v50  ;;  %v2662_v61 = vxor.u32 2147483648, %v2656_v59  ;;  %v2778_v23 = vsel %vm7175_vm2, 0, %v7174_v34  ;;  %v2273_v57 = vadd.s32 %v2272_v43, %v2262_v41 }
 0x524   : > { %v2285_v38 = vshll.u32 %v2281_v27, 16  ;;  %v2666_v3 = vsel %vm2664_vm9, %v2665_v53, %v2656_v59  ;;  %v2779_v19 = vsub.s32 32, %v2778_v23  ;;  %v2783_v12 = vsub.s32 4294967266, %v2778_v23 }
 0x525   : > { %vm2287_vm1 = vc.u32 %v2279_v7, %v2283_v35  ;;  %v2663_v16 = vsel %vm2661_vm13, %v2648_v24, %v2662_v61  ;;  %v2780_v40 = vshll.u32 %v2771_v62, %v2778_v23  ;;  %v2289_v45 = vadd.s32 %v2283_v35, %v2279_v7 }
 0x526   : > { %v2288_v4 = vsel %vm2287_vm1, 1, %v13741_v6  ;;  %v2667_v0 = vsel %vm2660_vm7, %v2663_v16, %v2666_v3  ;;  %v2781_v26 = vshrl.u32 %v2763_v8, %v2779_v19  ;;  %v2784_v39 = vadd.s32 127, %v2783_v12 }
 0x527   : > { %v2290_v50 = vadd.s32 %v2288_v4, %v2282_v42  ;;  %v2404_v52 = vsel %vm2394_vm11, %v2390_v18, 1326507024  ;;  %v2668_v11 = vsel %vm2657_vm8, nan, %v2667_v0  ;;  %vm2291_vm15 = vc.u32 %v2289_v45, %v2285_v38 }
 0x528   : > { %v2359_v62 = vand.u32 2147483647, %v13850_v44  ;;  %5059 = vmatpush.msra.mxu2 %v2668_v11  ;;  %v2782_v55 = vor.u32 %v2781_v26, %v2780_v40  ;;  %v2785_v22 = vshll.u32 %v2784_v39, 23  ;;  %v2264_v28 = vshrl.u32 %v11599_v49, 16 }
 0x529   : > { %v2292_v56 = vsel %vm2291_vm15, 1, %v13741_v6  ;;  %vm2671_vm5 = vcmp.lt.s32.totalorder %v13836_v60, 0  ;;  %v2243_v10 = vsel %vm2237_vm4, %v2240_v29, %v2242_v15  ;;  %v2284_v17 = vshrl.u32 %v11608_v30, 16 }
 0x52a   : > { %v2286_v18 = vshrl.u32 %v2281_v27, 16  ;;  %v2294_v31 = vadd.s32 %v2292_v56, %v2290_v50  ;;  %v2786_v51 = vor.u32 4788187, %v2785_v22  ;;  %v11642_v21 = vadd.s32 %v2273_v57, %v2264_v28 }
 0x52b   : > { %v11644_v24 = vadd.s32 %v2289_v45, %v2285_v38  ;;  %v2366_v36 = vand.u32 8388607, %v2359_v62  ;;  %v2789_v49 = vcvt.s32.f32 %v2782_v55  ;;  %v2376_v8 = vshll.u32 %v13643_v25, %v13837_v58 }
 0x52c   : > { %v2295_v43 = vadd.s32 %v2294_v31, %v2284_v17  ;;  %v2377_v13 = vshrl.u32 %v13641_v33, %v13838_v46  ;;  %v2787_v34 = vand.u32 2147483647, %v2786_v51  ;;  %v2379_v27 = vshll.u32 %v13641_v33, %v13837_v58 }
 0x52d   : > { %v2367_v30 = vor.u32 8388608, %v2366_v36  ;;  %v2380_v29 = vshrl.u32 %v13739_v5, %v13838_v46  ;;  %v2382_v41 = vshll.u32 %v13739_v5, %v13837_v58  ;;  %v2383_v35 = vshrl.u32 %v13710_v2, %v13838_v46 }
 0x52e   : > { %v2296_v59 = vadd.s32 %v2295_v43, %v2286_v18  ;;  %v11656_v53 = vor.u32 %v2377_v13, %v2376_v8  ;;  %v2790_v15 = vmul.f32 %v2789_v49, %v2787_v34  ;;  %v2793_v7 = vsub.s32 4, %v11590_v48 }
 0x52f   : > { %vm2299_vm6 = vc.u32 %v11642_v21, %v11644_v24  ;;  %v11665_v42 = vor.u32 %v2380_v29, %v2379_v27  ;;  %v11667_v23 = vor.u32 %v2383_v35, %v2382_v41  ;;  %vm2391_vm10 = vcmp.lt.s32.totalorder %v13848_v54, 1 }
 0x530   : > { %v2300_v61 = vadd.s32 1, %v2296_v59  ;;  %vm2393_vm4 = vcmp.lt.s32.totalorder %v13848_v54, 3  ;;  %v2791_v57 = vxor.u32 2147483648, %v2790_v15  ;;  %v2297_v58 = vmul.u32 %v11585_v1, %v2243_v10 }
 0x531   : > { %v2399_v38 = vsel %vm2391_vm10, %v11656_v53, %v11665_v42  ;;  %v2405_v3 = vsel %vm2393_vm4, %v11561_v63, %v2404_v52  ;;  %v2401_v12 = vsel %vm2393_vm4, %v11667_v23, %v11597_v14  ;;  %v2403_v1 = vsel %vm2391_vm10, %v11665_v42, %v11667_v23 }
 0x532   : > { %v2301_v19 = vsel %vm2299_vm6, %v2300_v61, %v2296_v59  ;;  %v11687_v16 = vshll.u32 %v2367_v30, 8  ;;  %vm11691_vm14 = vcmp.le.f32.partialorder %v2669_v20, 0.7853982  ;;  %v2792_v63 = vsel %vm2671_vm5, %v2791_v57, %v2790_v15 }
 0x533   : > { %v2302_v4 = vadd.s32 %v2301_v19, %v2297_v58  ;;  %vm2392_vm3 = vcmp.lt.s32.totalorder %v13848_v54, 2  ;;  %v2794_v14 = vsel %vm2671_vm5, %v2793_v7, %v11590_v48  ;;  %v2795_v45 = vsel %vm11691_vm14, %v13836_v60, %v2792_v63 }
 0x534   : > { %v2406_v20 = vsel %vm2392_vm3, %v2403_v1, %v2405_v3  ;;  %v2797_v0 = vmul.f32 %v2795_v45, %v2795_v45  ;;  %v2402_v39 = vsel %vm2392_vm3, %v2399_v38, %v2401_v12  ;;  %v2408_v52 = vand.u32 65535, %v11687_v16 }
 0x535   : > { %v2303_v26 = vadd.s32 536870912, %v2302_v4  ;;  %v2410_v50 = vand.u32 65535, %v2406_v20  ;;  %v2409_v11 = vshrl.u32 %v11687_v16, 16  ;;  %v2411_v55 = vshrl.u32 %v2406_v20, 16 }
 0x536   : > { %v2796_v48 = vsel %vm11691_vm14, 0, %v2794_v14  ;;  %v2798_v22 = vmul.f32 -0.001358992, %v2797_v0  ;;  %v2805_v28 = vmul.f32 -0.00019511016, %v2797_v0  ;;  %v2433_v18 = vshrl.u32 %v2402_v39, 16 }
 0x537   : > { %v11712_v56 = vshrl.u32 %v2303_v26, 30  ;;  %v2413_v10 = vmul.u32 %v2411_v55, %v2408_v52  ;;  %v11714_v17 = vmul.u32 %v2410_v50, %v2409_v11  ;;  %v2813_v49 = vadd.s32 3, %v2796_v48 }
 0x538   : > { %v2799_v31 = vadd.f32 0.041655596, %v2798_v22  ;;  %v2806_v51 = vadd.f32 0.008332121, %v2805_v28  ;;  %v2412_v43 = vmul.u32 %v2410_v50, %v2408_v52  ;;  %v2415_v27 = vmul.u32 %v2411_v55, %v2409_v11 }
 0x539   : > { %v2305_v36 = vshll.u32 %v11712_v56, 30  ;;  %v2416_v8 = vshll.u32 %v2413_v10, 16  ;;  %v2418_v29 = vshll.u32 %v11714_v17, 16  ;;  %v11718_v41 = vmul.u32 %v2433_v18, %v2408_v52 }
 0x53a   : > { %v2800_v13 = vmul.f32 %v2799_v31, %v2797_v0  ;;  %v2807_v34 = vmul.f32 %v2806_v51, %v2797_v0  ;;  %v2814_v61 = vand.u32 3, %v2813_v49  ;;  %v2432_v58 = vand.u32 65535, %v2402_v39 }
 0x53b   : > { %v2306_v30 = vsub.s32 %v2302_v4, %v2305_v36  ;;  %vm2420_vm0 = vc.u32 %v2412_v43, %v2416_v8  ;;  %v2422_v59 = vadd.s32 %v2416_v8, %v2412_v43  ;;  %vm2812_vm13 = vweird.f32 %v13836_v60 }
 0x53c   : > { %v2801_v35 = vadd.f32 -0.4999988, %v2800_v13  ;;  %v2808_v15 = vadd.f32 -0.16666654, %v2807_v34  ;;  %v2421_v57 = vsel %vm2420_vm0, 1, %v13741_v6  ;;  %v2438_v20 = vshll.u32 %v11718_v41, 16 }
 0x53d   : > { %vm2307_vm7 = vcmp.lt.s32.totalorder %v2306_v30, 0  ;;  %v2308_v7 = vsub.s32 0, %v2306_v30  ;;  %vm2424_vm8 = vc.u32 %v2422_v59, %v2418_v29  ;;  %v2423_v12 = vadd.s32 %v2421_v57, %v2415_v27 }
 0x53e   : > { %v2802_v38 = vmul.f32 %v2801_v35, %v2797_v0  ;;  %v2809_v3 = vmul.f32 %v2808_v15, %v2797_v0  ;;  %v2425_v40 = vsel %vm2424_vm8, 1, %v13741_v6  ;;  %vm2815_vm12 = vcmp.lt.s32.totalorder %v2814_v61, 2 }
 0x53f   : > { %v2309_v19 = vsel %vm2307_vm7, %v2308_v7, %v2306_v30  ;;  %v2427_v14 = vadd.s32 %v2425_v40, %v2423_v12  ;;  %v2434_v50 = vmul.u32 %v2432_v58, %v2408_v52  ;;  %v2436_v55 = vmul.u32 %v2432_v58, %v2409_v11 }
 0x540   : > { %v2310_v1 = vclz %v2309_v19  ;;  %v2803_v63 = vadd.f32 1.0, %v2802_v38  ;;  %v2810_v4 = vadd.f32 1.0, %v2809_v3  ;;  %vm2816_vm9 = vcmp.eq.s32.totalorder %v2814_v61, 0 }
 0x541   : > { %v2417_v0 = vshrl.u32 %v2413_v10, 16  ;;  %vm2819_vm2 = vcmp.eq.s32.totalorder %v2814_v61, 2  ;;  %v2298_v22 = vadd.s32 %v11644_v24, %v11642_v21  ;;  %vm2442_vm15 = vc.u32 %v2434_v50, %v2438_v20 }
 0x542   : > { %v7165_v26 = vadd.s32 4294967294, %v2310_v1  ;;  %v2811_v48 = vmul.f32 %v2810_v4, %v2795_v45  ;;  %v2820_v39 = vxor.u32 2147483648, %v2803_v63  ;;  %v2437_v36 = vmul.u32 %v2433_v18, %v2409_v11 }
 0x543   : > { %v2428_v51 = vadd.s32 %v2427_v14, %v2417_v0  ;;  %v2440_v8 = vshll.u32 %v2436_v55, 16  ;;  %v2443_v52 = vsel %vm2442_vm15, 1, %v13741_v6  ;;  %v2444_v34 = vadd.s32 %v2438_v20, %v2434_v50 }
 0x544   : > { %vm7166_vm1 = vcmp.lt.s32.totalorder %v7165_v26, 0  ;;  %v2817_v28 = vxor.u32 2147483648, %v2811_v48  ;;  %v2821_v45 = vsel %vm2819_vm2, %v2820_v39, %v2811_v48  ;;  %v2445_v27 = vadd.s32 %v2443_v52, %v2437_v36 }
 0x545   : > { %v2313_v31 = vsel %vm7166_vm1, 0, %v7165_v26  ;;  %v2375_v11 = vshrl.u32 %v13643_v25, %v13838_v46  ;;  %v2396_v18 = vsel %vm2394_vm11, %v11667_v23, 2102212464  ;;  %vm2446_vm5 = vc.u32 %v2444_v34, %v2440_v8 }
 0x546   : > { %v2314_v49 = vsub.s32 32, %v2313_v31  ;;  %v2318_v43 = vsub.s32 4294967266, %v2313_v31  ;;  %v2818_v13 = vsel %vm2816_vm9, %v2803_v63, %v2817_v28  ;;  %v2315_v29 = vshll.u32 %v2306_v30, %v2313_v31 }
 0x547   : > { %v2822_v10 = vsel %vm2815_vm12, %v2818_v13, %v2821_v45  ;;  %v2419_v7 = vshrl.u32 %v11714_v17, 16  ;;  %v2447_v30 = vsel %vm2446_vm5, 1, %v13741_v6  ;;  %v2439_v61 = vshrl.u32 %v11718_v41, 16 }
 0x548   : > { %v2316_v59 = vshrl.u32 %v2298_v22, %v2314_v49  ;;  %v2319_v21 = vadd.s32 127, %v2318_v43  ;;  %v2823_v24 = vsel %vm2812_vm13, nan, %v2822_v10  ;;  %v2449_v57 = vadd.s32 %v2447_v30, %v2445_v27 }
 0x549   : > { %5091 = vmatpush.msra.mxu3 %v2823_v24  ;;  %v2395_v46 = vsel %vm2391_vm10, %v2375_v11, %v11656_v53  ;;  %v2397_v23 = vsel %vm2393_vm4, %v11665_v42, %v2396_v18  ;;  %v2429_v58 = vadd.s32 %v2428_v51, %v2419_v7  ;;  %v2441_v38 = vshrl.u32 %v2436_v55, 16 }
 0x54a   : > { %v2317_v35 = vor.u32 %v2316_v59, %v2315_v29  ;;  %v2320_v15 = vshll.u32 %v2319_v21, 23  ;;  %v2450_v3 = vadd.s32 %v2449_v57, %v2439_v61  ;;  %v2448_v17 = vadd.s32 %v2444_v34, %v2440_v8 }
 0x54b   : > { %v2398_v1 = vsel %vm2392_vm3, %v2395_v46, %v2397_v23  ;;  %vm2206_vm6 = vcmp.lt.s32.totalorder %v13839_v47, 0  ;;  %v2328_v42 = vsub.s32 4, %v11712_v56  ;;  %vm11751_vm10 = vcmp.le.f32.partialorder %v2204_v37, 0.7853982 }
 0x54c   : > { %v2321_v60 = vor.u32 4788187, %v2320_v15  ;;  %v2324_v12 = vcvt.s32.f32 %v2317_v35  ;;  %v2451_v41 = vadd.s32 %v2450_v3, %v2441_v38  ;;  %vm2454_vm11 = vc.u32 %v2429_v58, %v2448_v17 }
 0x54d   : > { %v2452_v53 = vmul.u32 %v11687_v16, %v2398_v1  ;;  %v2329_v16 = vsel %vm2206_vm6, %v2328_v42, %v11712_v56  ;;  %v2453_v7 = vadd.s32 %v2448_v17, %v2429_v58  ;;  %vm2347_vm7 = vweird.f32 %v13839_v47 }
 0x54e   : > { %v2322_v19 = vand.u32 2147483647, %v2321_v60  ;;  %v2455_v63 = vadd.s32 1, %v2451_v41  ;;  %v2331_v28 = vsel %vm11751_vm10, 0, %v2329_v16  ;;  %vm5029_vm13 = vcmask 588800  }
 0x54f   : > { %v2348_v8 = vadd.s32 3, %v2331_v28  ;;  %vm2361_vm12 = vcmp.lt.s32.totalorder %v13850_v44, 0  ;;  %vm11772_vm9 = vcmp.le.f32.partialorder %v2359_v62, 0.7853982  ;;  %vm2502_vm5 = vweird.f32 %v13850_v44 }
 0x550   : > { %v2325_v40 = vmul.f32 %v2324_v12, %v2322_v19  ;;  %v2456_v14 = vsel %vm2454_vm11, %v2455_v63, %v2451_v41  ;;  %v4999_v41 = vld [vmem:[%s13468_s5] sm:$0xff]  ;;  %v5000_v63 = vld [vmem:[%s13468_s5 + $0x8] sm:$0xff] }
 0x551   : > { %v2457_v26 = vadd.s32 %v2456_v14, %v2452_v53  ;;  %v2349_v21 = vand.u32 3, %v2348_v8 }
 0x552   : > { %v2326_v4 = vxor.u32 2147483648, %v2325_v40 }
 0x553   : > { %v2458_v48 = vadd.s32 536870912, %v2457_v26  ;;  %vm2351_vm3 = vcmp.eq.s32.totalorder %v2349_v21, 0  ;;  %vm2354_vm0 = vcmp.eq.s32.totalorder %v2349_v21, 2  ;;  %vm2350_vm8 = vcmp.lt.s32.totalorder %v2349_v21, 2  ;;  %v11800_v21 = vpop.permute.xlu0 %5021 }
 0x554   : > { %v2327_v54 = vsel %vm2206_vm6, %v2326_v4, %v2325_v40 }
 0x555   : > { %v2330_v50 = vsel %vm11751_vm10, %v13839_v47, %v2327_v54  ;;  %v2459_v22 = vshrl.u32 %v2458_v48, 30  ;;  %v5001_v48 = vld [vmem:[%s13468_s5 + $0x10] sm:$0xff] }
 0x556   : > { %v2332_v55 = vmul.f32 %v2330_v50, %v2330_v50 }
 0x557   : > { %v2460_v51 = vshll.u32 %v2459_v22, 30  ;;  %v2483_v14 = vsub.s32 4, %v2459_v22 }
 0x558   : > { %v2333_v39 = vmul.f32 -0.001358992, %v2332_v55  ;;  %v2340_v0 = vmul.f32 -0.00019511016, %v2332_v55 }
 0x559   : > { %v2461_v43 = vsub.s32 %v2457_v26, %v2460_v51 }
 0x55a   : > { %v2334_v37 = vadd.f32 0.041655596, %v2333_v39  ;;  %v2341_v31 = vadd.f32 0.008332121, %v2340_v0 }
 0x55b   : > { %vm2462_vm4 = vcmp.lt.s32.totalorder %v2461_v43, 0  ;;  %v2463_v45 = vsub.s32 0, %v2461_v43 }
 0x55c   : > { %v2335_v36 = vmul.f32 %v2334_v37, %v2332_v55  ;;  %v2342_v49 = vmul.f32 %v2341_v31, %v2332_v55 }
 0x55d   : > { %v2464_v56 = vsel %vm2462_vm4, %v2463_v45, %v2461_v43 }
 0x55e   : > { %v2336_v52 = vadd.f32 -0.4999988, %v2335_v36  ;;  %v2343_v13 = vadd.f32 -0.16666654, %v2342_v49  ;;  %v2465_v10 = vclz %v2464_v56 }
 0x560   : > { %v2337_v34 = vmul.f32 %v2336_v52, %v2332_v55  ;;  %v2344_v27 = vmul.f32 %v2343_v13, %v2332_v55  ;;  %v7168_v24 = vadd.s32 4294967294, %v2465_v10  ;;  %v2484_v55 = vsel %vm2361_vm12, %v2483_v14, %v2459_v22  ;;  %v5002_v22 = vld [vmem:[%s13468_s5 + $0x18] sm:$0xff] }
 0x561   : > { %v2486_v39 = vsel %vm11772_vm9, 0, %v2484_v55 }
 0x562   : > { %v2338_v29 = vadd.f32 1.0, %v2337_v34  ;;  %v2345_v59 = vadd.f32 1.0, %v2344_v27  ;;  %vm7169_vm14 = vcmp.lt.s32.totalorder %v7168_v24, 0  ;;  %v2503_v51 = vadd.s32 3, %v2486_v39 }
 0x563   : > { %v2468_v15 = vsel %vm7169_vm14, 0, %v7168_v24 }
 0x564   : > { %v2346_v11 = vmul.f32 %v2345_v59, %v2330_v50  ;;  %v2355_v18 = vxor.u32 2147483648, %v2338_v29  ;;  %v2469_v30 = vsub.s32 32, %v2468_v15  ;;  %v2473_v61 = vsub.s32 4294967266, %v2468_v15 }
 0x565   : > { %v2470_v23 = vshll.u32 %v2461_v43, %v2468_v15  ;;  %v2504_v52 = vand.u32 3, %v2503_v51 }
 0x566   : > { %v2352_v35 = vxor.u32 2147483648, %v2346_v11  ;;  %v2356_v60 = vsel %vm2354_vm0, %v2355_v18, %v2346_v11  ;;  %v2471_v38 = vshrl.u32 %v2453_v7, %v2469_v30  ;;  %v2474_v3 = vadd.s32 127, %v2473_v61  ;;  %v11802_v11 = vpop.permute.xlu2 %5026  ;;  %v5007_v18 = vpop.permute.xlu0 %5006 }
 0x567   : > { %vm2506_vm2 = vcmp.eq.s32.totalorder %v2504_v52, 0  ;;  %vm2509_vm1 = vcmp.eq.s32.totalorder %v2504_v52, 2  ;;  %vm2505_vm15 = vcmp.lt.s32.totalorder %v2504_v52, 2 }
 0x568   : > { %v2353_v57 = vsel %vm2351_vm3, %v2338_v29, %v2352_v35  ;;  %v2472_v12 = vor.u32 %v2471_v38, %v2470_v23  ;;  %v2475_v1 = vshll.u32 %v2474_v3, 23  ;;  %v5003_v29 = vld [vmem:[%s13468_s5 + $0x20] sm:$0xf] }
 0x569   : > { %v2357_v46 = vsel %vm2350_vm8, %v2353_v57, %v2356_v60 }
 0x56a   : > { %v2358_v19 = vsel %vm2347_vm7, nan, %v2357_v46  ;;  %v2476_v58 = vor.u32 4788187, %v2475_v1  ;;  %v2479_v17 = vcvt.s32.f32 %v2472_v12 }
 0x56b   : > { %5060 = vmatpush.msra.mxu2 %v2358_v19  ;;  %v11810_v19 = vpop.permute.xlu1 %5016 }
 0x56c   : > { %7218 = vmatmul.msk.f32.vlgmr.msra.gmra.mxu2 %vm5029_vm13, %v4999_v41  ;;  %v2477_v47 = vand.u32 2147483647, %v2476_v58 }
 0x56e   : > { %v2480_v40 = vmul.f32 %v2479_v17, %v2477_v47  ;;  %v5012_v7 = vpop.permute.xlu2 %5011 }
 0x570   : > { %v2481_v4 = vxor.u32 2147483648, %v2480_v40 }
 0x572   : > { %v2482_v42 = vsel %vm2361_vm12, %v2481_v4, %v2480_v40 }
 0x573   : > { %v2485_v20 = vsel %vm11772_vm9, %v13850_v44, %v2482_v42 }
 0x574   : > { %7219 = vmatmul.msk.f32.gmra.mxu2 %vm5029_vm13, %v5000_v63  ;;  %v2487_v54 = vmul.f32 %v2485_v20, %v2485_v20 }
 0x576   : > { %v2488_v26 = vmul.f32 -0.001358992, %v2487_v54  ;;  %v2495_v50 = vmul.f32 -0.00019511016, %v2487_v54 }
 0x578   : > { %v2489_v62 = vadd.f32 0.041655596, %v2488_v26  ;;  %v2496_v16 = vadd.f32 0.008332121, %v2495_v50 }
 0x57a   : > { %v2490_v0 = vmul.f32 %v2489_v62, %v2487_v54  ;;  %v2497_v28 = vmul.f32 %v2496_v16, %v2487_v54 }
 0x57c   : > { %7220 = vmatmul.msk.f32.gmra.mxu2 %vm5029_vm13, %v5001_v48  ;;  %v2491_v37 = vadd.f32 -0.4999988, %v2490_v0  ;;  %v2498_v31 = vadd.f32 -0.16666654, %v2497_v28 }
 0x57e   : > { %v2492_v36 = vmul.f32 %v2491_v37, %v2487_v54  ;;  %v2499_v49 = vmul.f32 %v2498_v31, %v2487_v54 }
 0x580   : > { %v2493_v43 = vadd.f32 1.0, %v2492_v36  ;;  %v2500_v8 = vadd.f32 1.0, %v2499_v49 }
 0x582   : > { %v2501_v13 = vmul.f32 %v2500_v8, %v2485_v20  ;;  %v2510_v45 = vxor.u32 2147483648, %v2493_v43 }
 0x584   : > { %7221 = vmatmul.msk.f32.gmra.mxu2 %vm5029_vm13, %v5002_v22  ;;  %v2507_v34 = vxor.u32 2147483648, %v2501_v13  ;;  %v2511_v56 = vsel %vm2509_vm1, %v2510_v45, %v2501_v13 }
 0x586   : > { %v2508_v27 = vsel %vm2506_vm2, %v2493_v43, %v2507_v34 }
 0x587   : > { %v2512_v10 = vsel %vm2505_vm15, %v2508_v27, %v2511_v56 }
 0x588   : > { %v2513_v59 = vsel %vm2502_vm5, nan, %v2512_v10 }
 0x589   : > { %5092 = vmatpush.msra.mxu3 %v2513_v59 }
 0x58a   : > { %7223 = vmatmul.msk.f32.vlgmr.msra.gmra.mxu3 %vm5029_vm13, %v4999_v41 }
 0x58c   : > { %7222 = vmatmul.msk.f32.gmra.mxu2 %vm5029_vm13, %v5003_v29 }
 0x592   : > { %7224 = vmatmul.msk.f32.gmra.mxu3 %vm5029_vm13, %v5000_v63 }
 0x59a   : > { %7225 = vmatmul.msk.f32.gmra.mxu3 %vm5029_vm13, %v5001_v48 }
 0x5a2   : > { %7226 = vmatmul.msk.f32.gmra.mxu3 %vm5029_vm13, %v5002_v22 }
 0x5aa   : > { %7227 = vmatmul.msk.f32.gmra.mxu3 %vm5029_vm13, %v5003_v29 }
 0x5ef   : > { %v5062_v44 = vpop.f32.mrf.mxu2 }
 0x5f0   : > { %v11804_v35 = vadd.f32 %v5062_v44, %v5007_v18 }
 0x5f2   : > { %13857 = vst [vmem:[#allocation77_spill] sm:$0xff] %v11804_v35  ;;  %v5112_v30 = vand.u32 2139095040, %v11804_v35 }
 0x5f4   : > { %v5113_v57 = vshrl.u32 %v5112_v30, 23 }
 0x5f6   : > { %v7228_v38 = vadd.s32 4294967169, %v5113_v57 }
 0x5f7   : > { %v5065_v24 = vpop.f32.mrf.mxu2 }
 0x5f8   : > { %v11807_v61 = vadd.f32 %v5065_v24, %v5012_v7  ;;  %v5119_v12 = vadd.s32 1, %v7228_v38 }
 0x5fa   : > { %13858 = vst [vmem:[#allocation36_spill] sm:$0xff] %v11807_v61  ;;  %v5422_v46 = vand.u32 2139095040, %v11807_v61  ;;  %vm5120_vm11 = vcmp.gt.s32.totalorder %v5119_v12, 0 }
 0x5fb   : > { %v5121_v4 = vsel %vm5120_vm11, %v5119_v12, 0 }
 0x5fc   : > { %v5423_v3 = vshrl.u32 %v5422_v46, 23  ;;  %v11821_v14 = vand.u32 31, %v5121_v4  ;;  %v11836_v51 = vshrl.u32 %v5121_v4, 5 }
 0x5fe   : > { %v7234_v1 = vadd.s32 4294967169, %v5423_v3  ;;  %13860 = vst [vmem:[#allocation74_spill] sm:$0xff] %v11821_v14  ;;  %v11828_v62 = vsub.s32 32, %v11821_v14  ;;  %v5135_v36 = vshll.u32 %v13710_v2, %v11821_v14  ;;  %v5138_v43 = vshll.u32 %v13708_v32, %v11821_v14 }
 0x5ff   : > { %v5068_v15 = vpop.f32.mrf.mxu2  ;;  %13863 = vst [vmem:[#allocation62_spill] sm:$0xff] %v11836_v51  ;;  %vm5144_vm14 = vcmp.lt.s32.totalorder %v11836_v51, 4 }
 0x600   : > { %v11813_v41 = vadd.f32 %v5068_v15, %v11810_v19  ;;  %v5429_v17 = vadd.s32 1, %v7234_v1  ;;  %13861 = vst [vmem:[#allocation76_spill] sm:$0xff] %v11828_v62  ;;  %v5136_v37 = vshrl.u32 %v13708_v32, %v11828_v62  ;;  %v5139_v31 = vshrl.u32 %v13642_v9, %v11828_v62 }
 0x602   : > { %v5732_v40 = vand.u32 2139095040, %v11813_v41  ;;  %vm5430_vm6 = vcmp.gt.s32.totalorder %v5429_v17, 0  ;;  %v11850_v45 = vor.u32 %v5136_v37, %v5135_v36  ;;  %v5140_v34 = vor.u32 %v5139_v31, %v5138_v43 }
 0x603   : > { %v5431_v26 = vsel %vm5430_vm6, %v5429_v17, 0 }
 0x604   : > { %v5733_v42 = vshrl.u32 %v5732_v40, 23  ;;  %v11830_v16 = vand.u32 31, %v5431_v26  ;;  %13866 = vst [vmem:[#allocation70_spill] sm:$0xff] %v11850_v45  ;;  %v11852_v27 = vshrl.u32 %v5431_v26, 5  ;;  %v11869_v46 = vsel %vm5144_vm14, %v11850_v45, 920167782 }
 0x605   : > { %13868 = vst [vmem:[#allocation20_spill] sm:$0xff] %v11869_v46 }
 0x606   : > { %v7240_v55 = vadd.s32 4294967169, %v5733_v42  ;;  %13862 = vst [vmem:[#allocation38_spill] sm:$0xff] %v11830_v16  ;;  %v11841_v49 = vsub.s32 32, %v11830_v16  ;;  %v5448_v30 = vshll.u32 %v13708_v32, %v11830_v16  ;;  %vm5454_vm3 = vcmp.lt.s32.totalorder %v11852_v27, 4 }
 0x607   : > { %v5071_v23 = vpop.f32.mrf.mxu2  ;;  %13867 = vst [vmem:[#allocation71_spill] sm:$0xff] %v11852_v27 }
 0x608   : > { %v5739_v0 = vadd.s32 1, %v7240_v55  ;;  %13864 = vst [vmem:[#allocation75_spill] sm:$0xff] %v11841_v49  ;;  %v11844_v22 = vadd.f32 %v5071_v23, %v11800_v21  ;;  %v5446_v10 = vshrl.u32 %v13708_v32, %v11841_v49  ;;  %v5449_v29 = vshrl.u32 %v13642_v9, %v11841_v49 }
 0x609   : > { %v11873_v23 = vsel %vm5144_vm14, %v5140_v34, 1326507024 }
 0x60a   : > { %vm5740_vm10 = vcmp.gt.s32.totalorder %v5739_v0, 0  ;;  %v6042_v59 = vand.u32 2139095040, %v11844_v22  ;;  %13869 = vst [vmem:[#allocation58_spill] sm:$0xff] %v11873_v23  ;;  %v5450_v3 = vor.u32 %v5449_v29, %v5448_v30 }
 0x60b   : > { %v5741_v15 = vsel %vm5740_vm10, %v5739_v0, 0 }
 0x60c   : > { %v11878_v12 = vand.u32 31, %v5741_v15  ;;  %v6043_v1 = vshrl.u32 %v6042_v59, 23 }
 0x60d   : > { %v5094_v60 = vpop.f32.mrf.mxu3 }
 0x60e   : > { %v11819_v53 = vadd.f32 %v5094_v60, %v5007_v18  ;;  %13871 = vst [vmem:[#allocation40_spill] sm:$0xff] %v11878_v12 }
 0x60f   : > { %v5074_v47 = vpop.f32.mrf.mxu2 }
 0x610   : > { %v11817_v63 = vadd.f32 %v5074_v47, %v11802_v11  ;;  %13859 = vst [vmem:[#allocation67_spill] sm:$0xff] %v11819_v53  ;;  %v5267_v54 = vand.u32 2139095040, %v11819_v53 }
 0x612   : > { %v6352_v20 = vand.u32 2139095040, %v11817_v63  ;;  %v5268_v39 = vshrl.u32 %v5267_v54, 23  ;;  %v13587_v57 = vand.u32 2147483647, %v11817_v63 }
 0x614   : > { %v6353_v48 = vshrl.u32 %v6352_v20, 23  ;;  %v7231_v8 = vadd.s32 4294967169, %v5268_v39  ;;  %v6356_v40 = vand.u32 8388607, %v13587_v57  ;;  %v7246_v39 = vadd.s32 4294967169, %v6043_v1 }
 0x615   : > { %v5097_v58 = vpop.f32.mrf.mxu3 }
 0x616   : > { %v7252_v28 = vadd.s32 4294967169, %v6353_v48  ;;  %v11848_v52 = vadd.f32 %v5097_v58, %v5012_v7  ;;  %v5274_v24 = vadd.s32 1, %v7231_v8  ;;  %v5445_v7 = vshll.u32 %v13710_v2, %v11830_v16 }
 0x617   : > { %v11899_v48 = vsub.s32 32, %v11878_v12  ;;  %v6357_v29 = vor.u32 8388608, %v6356_v40 }
 0x618   : > { %13865 = vst [vmem:[#allocation73_spill] sm:$0xff] %v11848_v52  ;;  %v6359_v13 = vadd.s32 1, %v7252_v28  ;;  %v5577_v18 = vand.u32 2139095040, %v11848_v52  ;;  %v11875_v38 = vor.u32 %v5446_v10, %v5445_v7  ;;  %vm5275_vm0 = vcmp.gt.s32.totalorder %v5274_v24, 0 }
 0x619   : > { %13873 = vst [vmem:[#allocation11_spill] sm:$0xff] %v11899_v48  ;;  %v11935_v7 = vsel %vm5454_vm3, %v5450_v3, 1326507024  ;;  %v11942_v1 = vsel %vm5275_vm0, %v5274_v24, 0 }
 0x61a   : > { %vm6360_vm4 = vcmp.gt.s32.totalorder %v6359_v13, 0  ;;  %13870 = vst [vmem:[#allocation51_spill] sm:$0xff] %v11875_v38  ;;  %v5578_v58 = vshrl.u32 %v5577_v18, 23  ;;  %v11931_v18 = vsel %vm5454_vm3, %v11875_v38, 920167782 }
 0x61b   : > { %v6361_v44 = vsel %vm6360_vm4, %v6359_v13, 0  ;;  %13875 = vst [vmem:[#allocation44_spill] sm:$0xff] %v11931_v18  ;;  %v13893_v38 = vand.u32 2147483647, %v11817_v63 }
 0x61c   : > { %v6363_v60 = vand.u32 31, %v6361_v44  ;;  %v11887_v4 = vshrl.u32 %v6361_v44, 5  ;;  %v7237_v13 = vadd.s32 4294967169, %v5578_v58  ;;  %13876 = vst [vmem:[#allocation54_spill] sm:$0xff] %v11935_v7 }
 0x61d   : > { %v11825_v50 = vpop.f32.mrf.mxu3  ;;  %13877 = vst [vmem:[#allocation68_spill] sm:$0xff] %v11942_v1 }
 0x61e   : > { %v11883_v17 = vsub.s32 32, %v6363_v60  ;;  %v6369_v42 = vshll.u32 %v13641_v33, %v6363_v60  ;;  %v6372_v20 = vshll.u32 %v13739_v5, %v6363_v60  ;;  %v6378_v0 = vshll.u32 %v13708_v32, %v6363_v60 }
 0x61f   : > { %v11912_v34 = vadd.f32 %v11825_v50, %v11810_v19  ;;  %v6366_v59 = vshll.u32 %v13643_v25, %v6363_v60  ;;  %vm6381_vm7 = vcmp.lt.s32.totalorder %v11887_v4, 1  ;;  %vm6384_vm8 = vcmp.lt.s32.totalorder %v11887_v4, 4 }
 0x620   : > { %v6370_v54 = vshrl.u32 %v13739_v5, %v11883_v17  ;;  %v6373_v26 = vshrl.u32 %v13710_v2, %v11883_v17  ;;  %v6376_v55 = vshrl.u32 %v13708_v32, %v11883_v17  ;;  %v6379_v28 = vshrl.u32 %v13642_v9, %v11883_v17 }
 0x621   : > { %v6367_v37 = vshrl.u32 %v13641_v33, %v11883_v17  ;;  %13874 = vst [vmem:[#allocation39_spill] sm:$0xff] %v11912_v34  ;;  %vm6383_vm13 = vcmp.lt.s32.totalorder %v11887_v4, 3  ;;  %vm6382_vm12 = vcmp.lt.s32.totalorder %v11887_v4, 2  ;;  %v5584_v40 = vadd.s32 1, %v7237_v13 }
 0x622   : > { %v11906_v31 = vor.u32 %v6370_v54, %v6369_v42  ;;  %v11908_v36 = vor.u32 %v6373_v26, %v6372_v20  ;;  %v6380_v10 = vor.u32 %v6379_v28, %v6378_v0  ;;  %v6049_v42 = vadd.s32 1, %v7246_v39 }
 0x623   : > { %v11937_v30 = vor.u32 %v6367_v37, %v6366_v59  ;;  %v11947_v20 = vshll.u32 %v6357_v29, 8  ;;  %v11951_v54 = vshrl.u32 %v5741_v15, 5  ;;  %v5756_v26 = vshrl.u32 %v13708_v32, %v11899_v48 }
 0x624   : > { %v6393_v44 = vsel %vm6381_vm7, %v11906_v31, %v11908_v36  ;;  %v6394_v19 = vsel %vm6384_vm8, %v6380_v10, 1326507024  ;;  %v5887_v24 = vand.u32 2139095040, %v11912_v34  ;;  %v11967_v28 = vand.u32 31, %v11942_v1 }
 0x625   : > { %v5103_v56 = vpop.f32.mrf.mxu3  ;;  %13878 = vst [vmem:[#allocation72_spill] sm:$0xff] %v11951_v54  ;;  %v6389_v39 = vsel %vm6381_vm7, %v11937_v30, %v11906_v31  ;;  %v5755_v37 = vshll.u32 %v13710_v2, %v11878_v12  ;;  %vm5585_vm9 = vcmp.gt.s32.totalorder %v5584_v40, 0  ;;  %vm6050_vm2 = vcmp.gt.s32.totalorder %v6049_v42, 0 }
 0x626   : > { %v11881_v47 = vadd.f32 %v5103_v56, %v11800_v21  ;;  %v6375_v21 = vshll.u32 %v13710_v2, %v6363_v60  ;;  %13879 = vst [vmem:[#allocation64_spill] sm:$0xff] %v11967_v28  ;;  %v6398_v13 = vand.u32 65535, %v11947_v20  ;;  %v5888_v29 = vshrl.u32 %v5887_v24, 23 }
 0x627   : > { %v11974_v10 = vor.u32 %v5756_v26, %v5755_v37  ;;  %vm5764_vm1 = vcmp.lt.s32.totalorder %v11951_v54, 4  ;;  %v11983_v57 = vsel %vm5585_vm9, %v5584_v40, 0  ;;  %v6051_v53 = vsel %vm6050_vm2, %v6049_v42, 0 }
 0x628   : > { %13872 = vst [vmem:[#allocation66_spill] sm:$0xff] %v11881_v47  ;;  %v6377_v43 = vor.u32 %v6376_v55, %v6375_v21  ;;  %v6197_v56 = vand.u32 2139095040, %v11881_v47  ;;  %v5759_v55 = vshrl.u32 %v13642_v9, %v11899_v48  ;;  %v11991_v46 = vand.u32 31, %v11983_v57 }
 0x629   : > { %13880 = vst [vmem:[#allocation55_spill] sm:$0xff] %v11974_v10  ;;  %v11997_v42 = vshrl.u32 %v6051_v53, 5  ;;  %vm12130_vm9 = vcmp.le.f32.partialorder %v13893_v38, 0.7853982 }
 0x62a   : > { %v6395_v60 = vsel %vm6383_vm13, %v6377_v43, %v6394_v19  ;;  %v6198_v58 = vshrl.u32 %v6197_v56, 23  ;;  %13883 = vst [vmem:[#allocation65_spill] sm:$0xff] %v11991_v46 }
 0x62b   : > { %v6396_v3 = vsel %vm6382_vm12, %v6393_v44, %v6395_v60  ;;  %v6399_v60 = vshrl.u32 %v11947_v20, 16 }
 0x62c   : > { %v6401_v0 = vshrl.u32 %v6396_v3, 16  ;;  %v6400_v56 = vand.u32 65535, %v6396_v3 }
 0x62d   : > { %v5106_v8 = vpop.f32.mrf.mxu3 }
 0x62e   : > { %v11926_v50 = vadd.f32 %v5106_v8, %v11802_v11  ;;  %v6390_v11 = vsel %vm6384_vm8, %v6377_v43, 920167782  ;;  %v5758_v43 = vshll.u32 %v13708_v32, %v11878_v12  ;;  %v7249_v8 = vadd.s32 4294967169, %v6198_v58 }
 0x62f   : > { %v6391_v15 = vsel %vm6383_vm13, %v11908_v36, %v6390_v11  ;;  %v6403_v11 = vmul.u32 %v6401_v0, %v6398_v13  ;;  %v11981_v58 = vsub.s32 32, %v11967_v28  ;;  %v6404_v26 = vmul.u32 %v6400_v56, %v6399_v60 }
 0x630   : > { %v6507_v21 = vand.u32 2139095040, %v11926_v50  ;;  %v6392_v44 = vsel %vm6382_vm12, %v6389_v39, %v6391_v15  ;;  %v5760_v19 = vor.u32 %v5759_v55, %v5758_v43  ;;  %v6204_v3 = vadd.s32 1, %v7249_v8 }
 0x631   : > { %13881 = vst [vmem:[#allocation69_spill] sm:$0xff] %v11981_v58  ;;  %v6406_v37 = vshll.u32 %v6403_v11, 16  ;;  %v6422_v24 = vand.u32 65535, %v6392_v44  ;;  %v11988_v55 = vsel %vm5764_vm1, %v11974_v10, 920167782  ;;  %v7243_v39 = vadd.s32 4294967169, %v5888_v29 }
 0x632   : > { %v6508_v59 = vshrl.u32 %v6507_v21, 23  ;;  %v6423_v21 = vshrl.u32 %v6392_v44, 16  ;;  %13882 = vst [vmem:[#allocation63_spill] sm:$0xff] %v11988_v55  ;;  %v6402_v43 = vmul.u32 %v6400_v56, %v6398_v13  ;;  %v11995_v40 = vsel %vm5764_vm1, %v5760_v19, 1326507024 }
 0x633   : > { %13884 = vst [vmem:[#allocation23_spill] sm:$0xff] %v11995_v40  ;;  %v11999_v8 = vand.u32 31, %v6051_v53  ;;  %v6405_v44 = vmul.u32 %v6401_v0, %v6399_v60  ;;  %v6408_v45 = vshll.u32 %v6404_v26, 16  ;;  %vm6205_vm5 = vcmp.gt.s32.totalorder %v6204_v3, 0 }
 0x634   : > { %v7255_v15 = vadd.s32 4294967169, %v6508_v59  ;;  %vm6410_vm15 = vc.u32 %v6402_v43, %v6406_v37  ;;  %v6412_v23 = vadd.s32 %v6406_v37, %v6402_v43  ;;  %v6425_v59 = vmul.u32 %v6423_v21, %v6398_v13 }
 0x635   : > { %v6411_v29 = vsel %vm6410_vm15, 1, %v13741_v6  ;;  %v6426_v56 = vmul.u32 %v6422_v24, %v6399_v60  ;;  %v5894_v51 = vadd.s32 1, %v7243_v39  ;;  %v12003_v19 = vsub.s32 32, %v11999_v8 }
 0x636   : > { %v6514_v14 = vadd.s32 1, %v7255_v15  ;;  %v6413_v62 = vadd.s32 %v6411_v29, %v6405_v44  ;;  %vm6414_vm11 = vc.u32 %v6412_v23, %v6408_v45  ;;  %v6424_v53 = vmul.u32 %v6422_v24, %v6398_v13 }
 0x637   : > { %v6415_v35 = vsel %vm6414_vm11, 1, %v13741_v6  ;;  %v6428_v1 = vshll.u32 %v6425_v59, 16  ;;  %v12007_v0 = vsub.s32 32, %v11991_v46  ;;  %v6206_v37 = vsel %vm6205_vm5, %v6204_v3, 0 }
 0x638   : > { %v6407_v43 = vshrl.u32 %v6403_v11, 16  ;;  %v6417_v58 = vadd.s32 %v6415_v35, %v6413_v62  ;;  %v6427_v52 = vmul.u32 %v6423_v21, %v6399_v60  ;;  %v6430_v28 = vshll.u32 %v6426_v56, 16 }
 0x639   : > { %13885 = vst [vmem:[#allocation57_spill] sm:$0xff] %v12007_v0  ;;  %vm6432_vm6 = vc.u32 %v6424_v53, %v6428_v1  ;;  %v6434_v39 = vadd.s32 %v6428_v1, %v6424_v53  ;;  %vm5895_vm10 = vcmp.gt.s32.totalorder %v5894_v51, 0  ;;  %vm6515_vm4 = vcmp.gt.s32.totalorder %v6514_v14, 0 }
 0x63a   : > { %v6418_v45 = vadd.s32 %v6417_v58, %v6407_v43  ;;  %v6433_v23 = vsel %vm6432_vm6, 1, %v13741_v6  ;;  %v6066_v15 = vshrl.u32 %v13708_v32, %v12003_v19  ;;  %v6386_v13 = vsel %vm6384_vm8, %v11908_v36, 2102212464 }
 0x63b   : > { %v6435_v24 = vadd.s32 %v6433_v23, %v6427_v52  ;;  %vm6436_vm0 = vc.u32 %v6434_v39, %v6430_v28  ;;  %v12015_v11 = vand.u32 31, %v6206_v37  ;;  %v6365_v35 = vshrl.u32 %v13643_v25, %v11883_v17 }
 0x63c   : > { %v6409_v62 = vshrl.u32 %v6404_v26, 16  ;;  %v6437_v1 = vsel %vm6436_vm0, 1, %v13741_v6  ;;  %v13605_v60 = vand.u32 2147483647, %v11926_v50  ;;  %v6516_v58 = vsel %vm6515_vm4, %v6514_v14, 0 }
 0x63d   : > { %v6429_v3 = vshrl.u32 %v6425_v59, 16  ;;  %v6439_v21 = vadd.s32 %v6437_v1, %v6435_v24  ;;  %v5896_v44 = vsel %vm5895_vm10, %v5894_v51, 0  ;;  %v6385_v52 = vsel %vm6381_vm7, %v6365_v35, %v11937_v30 }
 0x63e   : > { %v6387_v36 = vsel %vm6383_vm13, %v11906_v31, %v6386_v13  ;;  %v12028_v29 = vadd.s32 %v6418_v45, %v6409_v62  ;;  %v6065_v17 = vshll.u32 %v13710_v2, %v11999_v8  ;;  %v6069_v14 = vshrl.u32 %v13642_v9, %v12003_v19 }
 0x63f   : > { %v6431_v26 = vshrl.u32 %v6426_v56, 16  ;;  %v6440_v59 = vadd.s32 %v6439_v21, %v6429_v3  ;;  %v6068_v51 = vshll.u32 %v13708_v32, %v11999_v8  ;;  %v12037_v53 = vsub.s32 32, %v12015_v11 }
 0x640   : > { %v6518_v30 = vand.u32 31, %v6516_v58  ;;  %v12039_v43 = vadd.s32 %v6434_v39, %v6430_v28  ;;  %v12041_v31 = vand.u32 31, %v5896_v44  ;;  %v6511_v45 = vand.u32 8388607, %v13605_v60 }
 0x641   : > { %v6388_v23 = vsel %vm6382_vm12, %v6385_v52, %v6387_v36  ;;  %v6441_v13 = vadd.s32 %v6440_v59, %v6431_v26  ;;  %v12048_v56 = vshrl.u32 %v11983_v57, 5  ;;  %v12050_v24 = vor.u32 %v6066_v15, %v6065_v17 }
 0x642   : > { %vm6074_vm7 = vcmp.lt.s32.totalorder %v11997_v42, 4  ;;  %vm6444_vm8 = vc.u32 %v12028_v29, %v12039_v43  ;;  %v12057_v28 = vshll.u32 %v13710_v2, %v11991_v46  ;;  %v12061_v39 = vshll.u32 %v13708_v32, %v11991_v46 }
 0x643   : > { %13886 = vst [vmem:[#allocation59_spill] sm:$0xff] %v12048_v56  ;;  %v6070_v4 = vor.u32 %v6069_v14, %v6068_v51  ;;  %v6445_v35 = vadd.s32 1, %v6441_v13  ;;  %v12065_v57 = vshrl.u32 %v13708_v32, %v12007_v0  ;;  %v6221_v15 = vshrl.u32 %v13708_v32, %v12037_v53 }
 0x644   : > { %13887 = vst [vmem:[#allocation60_spill] sm:$0xff] %v12057_v28  ;;  %v12069_v62 = vsub.s32 32, %v6518_v30  ;;  %v6442_v1 = vmul.u32 %v11947_v20, %v6388_v23  ;;  %v12072_v3 = vshrl.u32 %v5896_v44, 5  ;;  %v12075_v21 = vsub.s32 32, %v12041_v31 }
 0x645   : > { %13888 = vst [vmem:[#allocation9_spill] sm:$0xff] %v12061_v39  ;;  %v6512_v52 = vor.u32 8388608, %v6511_v45  ;;  %v6446_v36 = vsel %vm6444_vm8, %v6445_v35, %v6441_v13  ;;  %v12079_v17 = vshll.u32 %v13710_v2, %v12041_v31  ;;  %v12084_v14 = vsel %vm6074_vm7, %v12050_v24, 920167782 }
 0x646   : > { %13889 = vst [vmem:[#allocation33_spill] sm:$0xff] %v12065_v57  ;;  %v6220_v26 = vshll.u32 %v13710_v2, %v12015_v11  ;;  %v6447_v20 = vadd.s32 %v6446_v36, %v6442_v1  ;;  %v12090_v44 = vsel %vm6074_vm7, %v6070_v4, 1326507024  ;;  %v12092_v59 = vshrl.u32 %v6206_v37, 5 }
 0x647   : > { %13890 = vst [vmem:[#allocation37_spill] sm:$0xff] %v12072_v3  ;;  %v12096_v51 = vshll.u32 %v13708_v32, %v12015_v11  ;;  %v12103_v13 = vshrl.u32 %v13642_v9, %v12037_v53  ;;  %v6531_v35 = vshrl.u32 %v13708_v32, %v12069_v62  ;;  %vm6351_vm13 = vcmp.lt.s32.totalorder %v11817_v63, 0 }
 0x648   : > { %13891 = vst [vmem:[#allocation42_spill] sm:$0xff] %v12079_v17  ;;  %v12099_v23 = vor.u32 %v6221_v15, %v6220_v26  ;;  %v6448_v1 = vadd.s32 536870912, %v6447_v20  ;;  %v6522_v37 = vshrl.u32 %v13641_v33, %v12069_v62  ;;  %v6525_v4 = vshrl.u32 %v13739_v5, %v12069_v62 }
 0x649   : > { %v6528_v15 = vshrl.u32 %v13710_v2, %v12069_v62  ;;  %v12114_v36 = vshll.u32 %v6512_v52, 8  ;;  %v12116_v26 = vshrl.u32 %v6516_v58, 5  ;;  %v6530_v60 = vshll.u32 %v13710_v2, %v6518_v30 }
 0x64a   : > { %v6534_v45 = vshrl.u32 %v13642_v9, %v12069_v62  ;;  %v6449_v46 = vshrl.u32 %v6448_v1, 30  ;;  %v6521_v56 = vshll.u32 %v13643_v25, %v6518_v30  ;;  %v6524_v39 = vshll.u32 %v13641_v33, %v6518_v30 }
 0x64b   : > { %v6527_v18 = vshll.u32 %v13739_v5, %v6518_v30  ;;  %v13892_v57 = vand.u32 2147483647, %v11844_v22  ;;  %vm6229_vm12 = vcmp.lt.s32.totalorder %v12092_v59, 4  ;;  %v6532_v52 = vor.u32 %v6531_v35, %v6530_v60 }
 0x64c   : > { %v6533_v58 = vshll.u32 %v13708_v32, %v6518_v30  ;;  %v6450_v1 = vshll.u32 %v6449_v46, 30  ;;  %v12136_v49 = vor.u32 %v6522_v37, %v6521_v56  ;;  %v12138_v16 = vor.u32 %v6525_v4, %v6524_v39 }
 0x64d   : > { %v6046_v28 = vand.u32 8388607, %v13892_v57  ;;  %v12140_v57 = vor.u32 %v6528_v15, %v6527_v18  ;;  %v6473_v35 = vsub.s32 4, %v6449_v46  ;;  %v13622_v30 = vand.u32 2147483647, %v11881_v47 }
 0x64e   : > { %v6535_v61 = vor.u32 %v6534_v45, %v6533_v58  ;;  %v6451_v60 = vsub.s32 %v6447_v20, %v6450_v1  ;;  %v12146_v38 = vsel %vm6229_vm12, %v12099_v23, 920167782  ;;  %vm6539_vm2 = vcmp.lt.s32.totalorder %v12116_v26, 4 }
 0x64f   : > { %v12150_v27 = vand.u32 65535, %v12114_v36  ;;  %v6047_v56 = vor.u32 8388608, %v6046_v28  ;;  %vm6536_vm15 = vcmp.lt.s32.totalorder %v12116_v26, 1  ;;  %v6545_v18 = vsel %vm6539_vm2, %v6532_v52, 920167782 }
 0x650   : > { %vm6452_vm5 = vcmp.lt.s32.totalorder %v6451_v60, 0  ;;  %v6453_v39 = vsub.s32 0, %v6451_v60  ;;  %vm6538_vm11 = vcmp.lt.s32.totalorder %v12116_v26, 3  ;;  %v6544_v20 = vsel %vm6536_vm15, %v12136_v49, %v12138_v16 }
 0x651   : > { %v6548_v45 = vsel %vm6536_vm15, %v12138_v16, %v12140_v57  ;;  %v12165_v28 = vshrl.u32 %v12114_v36, 16  ;;  %v6549_v37 = vsel %vm6539_vm2, %v6535_v61, 1326507024  ;;  %v6474_v15 = vsel %vm6351_vm13, %v6473_v35, %v6449_v46 }
 0x652   : > { %v6454_v4 = vsel %vm6452_vm5, %v6453_v39, %v6451_v60  ;;  %v12173_v58 = vand.u32 8388607, %v13622_v30  ;;  %v6546_v1 = vsel %vm6538_vm11, %v12140_v57, %v6545_v18  ;;  %v6056_v34 = vshll.u32 %v13643_v25, %v11999_v8 }
 0x653   : > { %v6455_v0 = vclz %v6454_v4  ;;  %v12180_v17 = vshll.u32 %v6047_v56, 8  ;;  %v6057_v61 = vshrl.u32 %v13641_v33, %v12003_v19  ;;  %v6059_v46 = vshll.u32 %v13641_v33, %v11999_v8 }
 0x654   : > { %v6060_v35 = vshrl.u32 %v13739_v5, %v12003_v19  ;;  %v6063_v39 = vshrl.u32 %v13710_v2, %v12003_v19  ;;  %v6550_v18 = vsel %vm6538_vm11, %v6532_v52, %v6549_v37  ;;  %v6476_v56 = vsel %vm12130_vm9, 0, %v6474_v15 }
 0x655   : > { %v7253_v4 = vadd.s32 4294967294, %v6455_v0  ;;  %v6062_v30 = vshll.u32 %v13739_v5, %v11999_v8  ;;  %v6443_v3 = vadd.s32 %v12039_v43, %v12028_v29  ;;  %v6058_v47 = vor.u32 %v6057_v61, %v6056_v34 }
 0x656   : > { %v12198_v55 = vor.u32 %v6060_v35, %v6059_v46  ;;  %v12202_v54 = vand.u32 65535, %v12180_v17  ;;  %v12205_v0 = vshrl.u32 %v12180_v17, 16  ;;  %v6493_v37 = vadd.s32 3, %v6476_v56 }
 0x657   : > { %vm7254_vm6 = vcmp.lt.s32.totalorder %v7253_v4, 0  ;;  %v6064_v40 = vor.u32 %v6063_v39, %v6062_v30  ;;  %vm6071_vm10 = vcmp.lt.s32.totalorder %v11997_v42, 1  ;;  %vm6072_vm4 = vcmp.lt.s32.totalorder %v11997_v42, 2 }
 0x658   : > { %v6458_v52 = vsel %vm7254_vm6, 0, %v7253_v4  ;;  %v6055_v29 = vshrl.u32 %v13643_v25, %v12003_v19  ;;  %vm6073_vm0 = vcmp.lt.s32.totalorder %v11997_v42, 3  ;;  %v6079_v43 = vsel %vm6071_vm10, %v6058_v47, %v12198_v55 }
 0x659   : > { %v6459_v8 = vsub.s32 32, %v6458_v52  ;;  %v6463_v34 = vsub.s32 4294967266, %v6458_v52  ;;  %v12217_v30 = vshll.u32 %v13643_v25, %v12015_v11  ;;  %v12221_v15 = vshrl.u32 %v13641_v33, %v12037_v53 }
 0x65a   : > { %v12225_v61 = vshll.u32 %v13641_v33, %v12015_v11  ;;  %v6460_v46 = vshll.u32 %v6451_v60, %v6458_v52  ;;  %v6081_v39 = vsel %vm6073_vm0, %v6064_v40, %v12084_v14  ;;  %v12230_v4 = vand.u32 3, %v6493_v37 }
 0x65b   : > { %v6461_v19 = vshrl.u32 %v6443_v3, %v6459_v8  ;;  %v6464_v35 = vadd.s32 127, %v6463_v34  ;;  %v12234_v56 = vsel %vm6071_vm10, %v6055_v29, %v6058_v47  ;;  %v12238_v10 = vsel %vm6074_vm7, %v6064_v40, 2102212464 }
 0x65c   : > { %v12242_v33 = vshrl.u32 %v13739_v5, %v12037_v53  ;;  %v6520_v52 = vshrl.u32 %v13643_v25, %v12069_v62  ;;  %vm6537_vm8 = vcmp.lt.s32.totalorder %v12116_v26, 2  ;;  %v6541_v47 = vsel %vm6539_vm2, %v12140_v57, 2102212464 }
 0x65d   : > { %v6462_v3 = vor.u32 %v6461_v19, %v6460_v46  ;;  %v6465_v60 = vshll.u32 %v6464_v35, 23  ;;  %v6547_v14 = vsel %vm6537_vm8, %v6544_v20, %v6546_v1  ;;  %v6551_v37 = vsel %vm6537_vm8, %v6548_v45, %v6550_v18 }
 0x65e   : > { %v12256_v8 = vsel %vm6072_vm4, %v6079_v43, %v6081_v39  ;;  %v6540_v62 = vsel %vm6536_vm15, %v6520_v52, %v12136_v49  ;;  %v6542_v29 = vsel %vm6538_vm11, %v12138_v16, %v6541_v47  ;;  %v6555_v57 = vand.u32 65535, %v6551_v37 }
 0x65f   : > { %v6466_v34 = vor.u32 4788187, %v6465_v60  ;;  %v6556_v46 = vshrl.u32 %v6551_v37, 16  ;;  %v6577_v19 = vand.u32 65535, %v6547_v14  ;;  %v6578_v20 = vshrl.u32 %v6547_v14, 16 }
 0x660   : > { %v6083_v45 = vsel %vm6071_vm10, %v12198_v55, %v6064_v40  ;;  %v6469_v18 = vcvt.s32.f32 %v6462_v3  ;;  %v6559_v43 = vmul.u32 %v6555_v57, %v12165_v28  ;;  %v6085_v49 = vsel %vm6073_vm0, %v12050_v24, %v12090_v44 }
 0x661   : > { %v6467_v1 = vand.u32 2147483647, %v6466_v34  ;;  %v12274_v16 = vsel %vm6537_vm8, %v6540_v62, %v6542_v29  ;;  %v6558_v35 = vmul.u32 %v6556_v46, %v12150_v27  ;;  %v6580_v39 = vmul.u32 %v6578_v20, %v12150_v27 }
 0x662   : > { %v6557_v3 = vmul.u32 %v6555_v57, %v12150_v27  ;;  %v6560_v52 = vmul.u32 %v6556_v46, %v12165_v28  ;;  %v6581_v47 = vmul.u32 %v6577_v19, %v12165_v28  ;;  %v6563_v37 = vshll.u32 %v6559_v43, 16 }
 0x663   : > { %v6470_v40 = vmul.f32 %v6469_v18, %v6467_v1  ;;  %v6561_v14 = vshll.u32 %v6558_v35, 16  ;;  %v6579_v24 = vmul.u32 %v6577_v19, %v12150_v27  ;;  %v6583_v44 = vshll.u32 %v6580_v39, 16 }
 0x664   : > { %v6564_v34 = vshrl.u32 %v6559_v43, 16  ;;  %v6582_v62 = vmul.u32 %v6578_v20, %v12165_v28  ;;  %v6585_v29 = vshll.u32 %v6581_v47, 16  ;;  %v6086_v27 = vsel %vm6072_vm4, %v6083_v45, %v6085_v49 }
 0x665   : > { %v6471_v26 = vxor.u32 2147483648, %v6470_v40  ;;  %vm6565_vm7 = vc.u32 %v6557_v3, %v6561_v14  ;;  %v6567_v12 = vadd.s32 %v6561_v14, %v6557_v3  ;;  %vm6587_vm2 = vc.u32 %v6579_v24, %v6583_v44 }
 0x666   : > { %v6589_v1 = vadd.s32 %v6583_v44, %v6579_v24  ;;  %v6566_v46 = vsel %vm6565_vm7, 1, %v13741_v6  ;;  %v6588_v18 = vsel %vm6587_vm2, 1, %v13741_v6  ;;  %v6562_v3 = vshrl.u32 %v6558_v35, 16 }
 0x667   : > { %v6472_v57 = vsel %vm6351_vm13, %v6471_v26, %v6470_v40  ;;  %v6568_v28 = vadd.s32 %v6566_v46, %v6560_v52  ;;  %vm6569_vm15 = vc.u32 %v6567_v12, %v6563_v37  ;;  %v6590_v20 = vadd.s32 %v6588_v18, %v6582_v62 }
 0x668   : > { %v6475_v19 = vsel %vm12130_vm9, %v11817_v63, %v6472_v57  ;;  %v6570_v14 = vsel %vm6569_vm15, 1, %v13741_v6  ;;  %vm6591_vm5 = vc.u32 %v6589_v1, %v6585_v29  ;;  %v6090_v44 = vand.u32 65535, %v6086_v27 }
 0x669   : > { %v6477_v43 = vmul.f32 %v6475_v19, %v6475_v19  ;;  %v6572_v40 = vadd.s32 %v6570_v14, %v6568_v28  ;;  %v6592_v24 = vsel %vm6591_vm5, 1, %v13741_v6  ;;  %v6091_v26 = vshrl.u32 %v6086_v27, 16 }
 0x66a   : > { %v6584_v45 = vshrl.u32 %v6580_v39, 16  ;;  %v6594_v49 = vadd.s32 %v6592_v24, %v6590_v20  ;;  %v6586_v7 = vshrl.u32 %v6581_v47, 16  ;;  %v12297_v12 = vmul.u32 %v6090_v44, %v12205_v0 }
 0x66b   : > { %v6478_v60 = vmul.f32 -0.001358992, %v6477_v43  ;;  %v6485_v48 = vmul.f32 -0.00019511016, %v6477_v43  ;;  %v6573_v9 = vadd.s32 %v6572_v40, %v6562_v3  ;;  %v6093_v52 = vmul.u32 %v6091_v26, %v12202_v54 }
 0x66c   : > { %v12299_v62 = vadd.s32 %v6589_v1, %v6585_v29  ;;  %v6595_v57 = vadd.s32 %v6594_v49, %v6584_v45  ;;  %v6092_v18 = vmul.u32 %v6090_v44, %v12202_v54  ;;  %v6113_v39 = vshrl.u32 %v12256_v8, 16 }
 0x66d   : > { %v6479_v35 = vadd.f32 0.041655596, %v6478_v60  ;;  %v6486_v37 = vadd.f32 0.008332121, %v6485_v48  ;;  %v12301_v46 = vadd.s32 %v6573_v9, %v6564_v34  ;;  %v6096_v27 = vshll.u32 %v6093_v52, 16 }
 0x66e   : > { %v6596_v47 = vadd.s32 %v6595_v57, %v6586_v7  ;;  %v6095_v3 = vmul.u32 %v6091_v26, %v12205_v0  ;;  %v6098_v48 = vshll.u32 %v12297_v12, 16  ;;  %v6597_v14 = vmul.u32 %v12114_v36, %v12274_v16 }
 0x66f   : > { %v6480_v28 = vmul.f32 %v6479_v35, %v6477_v43  ;;  %v6487_v20 = vmul.f32 %v6486_v37, %v6477_v43  ;;  %vm6599_vm13 = vc.u32 %v12301_v46, %v12299_v62  ;;  %vm6100_vm9 = vc.u32 %v6092_v18, %v6096_v27 }
 0x670   : > { %v6102_v60 = vadd.s32 %v6096_v27, %v6092_v18  ;;  %v6600_v34 = vadd.s32 1, %v6596_v47  ;;  %v6101_v1 = vsel %vm6100_vm9, 1, %v13741_v6  ;;  %v6115_v24 = vmul.u32 %v6113_v39, %v12202_v54 }
 0x671   : > { %v6481_v29 = vadd.f32 -0.4999988, %v6480_v28  ;;  %v6488_v9 = vadd.f32 -0.16666654, %v6487_v20  ;;  %v6103_v40 = vadd.s32 %v6101_v1, %v6095_v3  ;;  %vm6492_vm6 = vweird.f32 %v11817_v63 }
 0x672   : > { %vm6104_vm11 = vc.u32 %v6102_v60, %v6098_v48  ;;  %v6601_v45 = vsel %vm6599_vm13, %v6600_v34, %v6596_v47  ;;  %v6077_v35 = vsel %vm6073_vm0, %v12198_v55, %v12238_v10  ;;  %v13896_v36 = vand.u32 65535, %v12256_v8 }
 0x673   : > { %v6482_v44 = vmul.f32 %v6481_v29, %v6477_v43  ;;  %v6489_v26 = vmul.f32 %v6488_v9, %v6477_v43  ;;  %v6105_v49 = vsel %vm6104_vm11, 1, %v13741_v6  ;;  %v6602_v7 = vadd.s32 %v6601_v45, %v6597_v14 }
 0x674   : > { %v6107_v37 = vadd.s32 %v6105_v49, %v6103_v40  ;;  %v6116_v16 = vmul.u32 %v13896_v36, %v12205_v0  ;;  %v13897_v43 = vmov %v13896_v36  ;;  %v6118_v28 = vshll.u32 %v6115_v24, 16 }
 0x675   : > { %v6483_v57 = vadd.f32 1.0, %v6482_v44  ;;  %v6490_v18 = vadd.f32 1.0, %v6489_v26  ;;  %v6114_v27 = vmul.u32 %v13897_v43, %v12202_v54  ;;  %v6603_v20 = vadd.s32 536870912, %v6602_v7 }
 0x676   : > { %v6097_v47 = vshrl.u32 %v6093_v52, 16  ;;  %v6117_v3 = vmul.u32 %v6113_v39, %v12205_v0  ;;  %v6120_v48 = vshll.u32 %v6116_v16, 16  ;;  %vm6495_vm0 = vcmp.lt.s32.totalorder %v12230_v4, 2 }
 0x677   : > { %v6491_v60 = vmul.f32 %v6490_v18, %v6475_v19  ;;  %v6500_v29 = vxor.u32 2147483648, %v6483_v57  ;;  %vm6122_vm10 = vc.u32 %v6114_v27, %v6118_v28  ;;  %v6124_v10 = vadd.s32 %v6118_v28, %v6114_v27 }
 0x678   : > { %v6604_v55 = vshrl.u32 %v6603_v20, 30  ;;  %v6108_v9 = vadd.s32 %v6107_v37, %v6097_v47  ;;  %v6123_v34 = vsel %vm6122_vm10, 1, %v13741_v6  ;;  %vm6496_vm8 = vcmp.eq.s32.totalorder %v12230_v4, 0 }
 0x679   : > { %v6497_v8 = vxor.u32 2147483648, %v6491_v60  ;;  %v6125_v54 = vadd.s32 %v6123_v34, %v6117_v3  ;;  %vm6126_vm7 = vc.u32 %v6124_v10, %v6120_v48  ;;  %vm6499_vm2 = vcmp.eq.s32.totalorder %v12230_v4, 2 }
 0x67a   : > { %v6605_v52 = vshll.u32 %v6604_v55, 30  ;;  %v6099_v0 = vshrl.u32 %v12297_v12, 16  ;;  %v6127_v19 = vsel %vm6126_vm7, 1, %v13741_v6  ;;  %v6501_v1 = vsel %vm6499_vm2, %v6500_v29, %v6491_v60 }
 0x67b   : > { %v6498_v39 = vsel %vm6496_vm8, %v6483_v57, %v6497_v8  ;;  %v6119_v14 = vshrl.u32 %v6115_v24, 16  ;;  %v6129_v40 = vadd.s32 %v6127_v19, %v6125_v54  ;;  %v6121_v49 = vshrl.u32 %v6116_v16, 16 }
 0x67c   : > { %v6502_v44 = vsel %vm6495_vm0, %v6498_v39, %v6501_v1  ;;  %v6606_v26 = vsub.s32 %v6602_v7, %v6605_v52  ;;  %v12334_v45 = vadd.s32 %v6108_v9, %v6099_v0  ;;  %v12338_v36 = vadd.s32 %v6124_v10, %v6120_v48 }
 0x67d   : > { %v6503_v37 = vsel %vm6492_vm6, nan, %v6502_v44  ;;  %v6130_v18 = vadd.s32 %v6129_v40, %v6119_v14  ;;  %v12342_v12 = vor.u32 %v12242_v33, %v12225_v61  ;;  %vm13898_vm15 = vcmask 1043456  }
 0x67e   : > { %7258 = vmatpush.msk.msrb.mxu2 %vm13898_vm15, %v6503_v37  ;;  %vm6607_vm5 = vcmp.lt.s32.totalorder %v6606_v26, 0  ;;  %v6608_v24 = vsub.s32 0, %v6606_v26  ;;  %v6217_v4 = vshll.u32 %v13739_v5, %v12015_v11  ;;  %v6218_v7 = vshrl.u32 %v13710_v2, %v12037_v53 }
 0x67f   : > { %v13899_v63 = vor.u32 %v12103_v13, %v12096_v51  ;;  %v6078_v33 = vsel %vm6072_vm4, %v12234_v56, %v6077_v35  ;;  %v6131_v61 = vadd.s32 %v6130_v18, %v6121_v49  ;;  %v12359_v57 = vor.u32 %v12221_v15, %v12217_v30 }
 0x680   : > { %v6609_v43 = vsel %vm6607_vm5, %v6608_v24, %v6606_v26  ;;  %v6628_v11 = vsub.s32 4, %v6604_v55  ;;  %vm6134_vm13 = vc.u32 %v12334_v45, %v12338_v36  ;;  %v12363_v27 = vor.u32 %v6218_v7, %v6217_v4 }
 0x681   : > { %v6239_v16 = vsel %vm6229_vm12, %v13899_v63, 1326507024  ;;  %v6610_v51 = vclz %v6609_v43  ;;  %v6135_v13 = vadd.s32 1, %v6131_v61  ;;  %vm6226_vm9 = vcmp.lt.s32.totalorder %v12092_v59, 1 }
 0x682   : > { %vm6228_vm11 = vcmp.lt.s32.totalorder %v12092_v59, 3  ;;  %v6132_v42 = vmul.u32 %v12180_v17, %v6078_v33  ;;  %v6238_v30 = vsel %vm6226_vm9, %v12342_v12, %v12363_v27  ;;  %v13900_v56 = vor.u32 8388608, %v12173_v58 }
 0x683   : > { %v6240_v15 = vsel %vm6228_vm11, %v12099_v23, %v6239_v16  ;;  %vm6506_vm4 = vcmp.lt.s32.totalorder %v11926_v50, 0  ;;  %v13901_v28 = vand.u32 2147483647, %v11926_v50  ;;  %v7256_v17 = vadd.s32 4294967294, %v6610_v51 }
 0x684   : > { %v12377_v35 = vshll.u32 %v13900_v56, 8  ;;  %v6136_v47 = vsel %vm6134_vm13, %v6135_v13, %v6131_v61  ;;  %v6598_v3 = vadd.s32 %v12299_v62, %v12301_v46  ;;  %v6629_v23 = vsel %vm6506_vm4, %v6628_v11, %v6604_v55 }
 0x685   : > { %vm12382_vm6 = vcmp.le.f32.partialorder %v13901_v28, 0.7853982  ;;  %v6137_v48 = vadd.s32 %v6136_v47, %v6132_v42  ;;  %vm6227_vm10 = vcmp.lt.s32.totalorder %v12092_v59, 2  ;;  %vm7257_vm0 = vcmp.lt.s32.totalorder %v7256_v17, 0 }
 0x686   : > { %v6234_v58 = vsel %vm6226_vm9, %v12359_v57, %v12342_v12  ;;  %v6236_v60 = vsel %vm6228_vm11, %v12363_v27, %v12146_v38  ;;  %v6241_v62 = vsel %vm6227_vm10, %v6238_v30, %v6240_v15  ;;  %v6613_v46 = vsel %vm7257_vm0, 0, %v7256_v17 }
 0x687   : > { %v6138_v29 = vadd.s32 536870912, %v6137_v48  ;;  %v6243_v10 = vand.u32 65535, %v12377_v35  ;;  %v6245_v55 = vand.u32 65535, %v6241_v62  ;;  %v6614_v9 = vsub.s32 32, %v6613_v46 }
 0x688   : > { %v6618_v34 = vsub.s32 4294967266, %v6613_v46  ;;  %v6244_v8 = vshrl.u32 %v12377_v35, 16  ;;  %v6246_v54 = vshrl.u32 %v6241_v62, 16  ;;  %v6615_v52 = vshll.u32 %v6606_v26, %v6613_v46 }
 0x689   : > { %v6631_v0 = vsel %vm12382_vm6, 0, %v6629_v23  ;;  %v12405_v19 = vshrl.u32 %v6138_v29, 30  ;;  %v6237_v38 = vsel %vm6227_vm10, %v6234_v58, %v6236_v60  ;;  %v6616_v39 = vshrl.u32 %v6598_v3, %v6614_v9 }
 0x68a   : > { %v6619_v1 = vadd.s32 127, %v6618_v34  ;;  %v6248_v14 = vmul.u32 %v6246_v54, %v6243_v10  ;;  %v12409_v40 = vmul.u32 %v6245_v55, %v6244_v8  ;;  %v12413_v44 = vshrl.u32 %v13708_v32, %v12075_v21 }
 0x68b   : > { %v12417_v26 = vshll.u32 %v13708_v32, %v12041_v31  ;;  %v6140_v49 = vshll.u32 %v12405_v19, 30  ;;  %v6210_v37 = vshrl.u32 %v13643_v25, %v12037_v53  ;;  %v6617_v18 = vor.u32 %v6616_v39, %v6615_v52 }
 0x68c   : > { %v6620_v24 = vshll.u32 %v6619_v1, 23  ;;  %v6247_v4 = vmul.u32 %v6245_v55, %v6243_v10  ;;  %v6251_v7 = vshll.u32 %v6248_v14, 16  ;;  %v6648_v63 = vadd.s32 3, %v6631_v0 }
 0x68d   : > { %v12422_v16 = vsub.s32 %v6137_v48, %v6140_v49  ;;  %v6267_v33 = vand.u32 65535, %v6237_v38  ;;  %v6268_v61 = vshrl.u32 %v6237_v38, 16  ;;  %v6250_v11 = vmul.u32 %v6246_v54, %v6244_v8 }
 0x68e   : > { %v6621_v43 = vor.u32 4788187, %v6620_v24  ;;  %v6253_v51 = vshll.u32 %v12409_v40, 16  ;;  %vm6255_vm8 = vc.u32 %v6247_v4, %v6251_v7  ;;  %v6624_v13 = vcvt.s32.f32 %v6617_v18 }
 0x68f   : > { %vm6142_vm7 = vcmp.lt.s32.totalorder %v12422_v16, 0  ;;  %v6143_v42 = vsub.s32 0, %v12422_v16  ;;  %v6256_v53 = vsel %vm6255_vm8, 1, %v13741_v6  ;;  %v6257_v15 = vadd.s32 %v6251_v7, %v6247_v4 }
 0x690   : > { %v6622_v30 = vand.u32 2147483647, %v6621_v43  ;;  %v6258_v56 = vadd.s32 %v6256_v53, %v6250_v11  ;;  %v6270_v28 = vmul.u32 %v6268_v61, %v6243_v10  ;;  %v6133_v17 = vadd.s32 %v12338_v36, %v12334_v45 }
 0x691   : > { %v6144_v47 = vsel %vm6142_vm7, %v6143_v42, %v12422_v16  ;;  %v6230_v3 = vsel %vm6226_vm9, %v6210_v37, %v12359_v57  ;;  %v6271_v23 = vmul.u32 %v6267_v33, %v6244_v8  ;;  %vm6259_vm2 = vc.u32 %v6257_v15, %v6253_v51 }
 0x692   : > { %v6625_v48 = vmul.f32 %v6624_v13, %v6622_v30  ;;  %v6145_v58 = vclz %v6144_v47  ;;  %v6273_v60 = vshll.u32 %v6270_v28, 16  ;;  %v12434_v62 = vand.u32 3, %v6648_v63 }
 0x693   : > { %v6231_v46 = vsel %vm6229_vm12, %v12363_v27, 2102212464  ;;  %v6260_v29 = vsel %vm6259_vm2, 1, %v13741_v6  ;;  %v6269_v45 = vmul.u32 %v6267_v33, %v6243_v10  ;;  %vm6041_vm15 = vcmp.lt.s32.totalorder %v11844_v22, 0 }
 0x694   : > { %v6626_v36 = vxor.u32 2147483648, %v6625_v48  ;;  %v7247_v55 = vadd.s32 4294967294, %v6145_v58  ;;  %v6252_v9 = vshrl.u32 %v6248_v14, 16  ;;  %v6262_v57 = vadd.s32 %v6260_v29, %v6258_v56 }
 0x695   : > { %v6272_v34 = vmul.u32 %v6268_v61, %v6244_v8  ;;  %v6275_v54 = vshll.u32 %v6271_v23, 16  ;;  %vm6277_vm5 = vc.u32 %v6269_v45, %v6273_v60  ;;  %v6279_v52 = vadd.s32 %v6273_v60, %v6269_v45 }
 0x696   : > { %v6627_v0 = vsel %vm6506_vm4, %v6626_v36, %v6625_v48  ;;  %vm7248_vm13 = vcmp.lt.s32.totalorder %v7247_v55, 0  ;;  %v6263_v38 = vadd.s32 %v6262_v57, %v6252_v9  ;;  %v6278_v27 = vsel %vm6277_vm5, 1, %v13741_v6  ;;  %v13908_v57 = vld [vmem:[#allocation11_spill] sm:$0xff] }
 0x697   : > { %v12447_v10 = vsel %vm12382_vm6, %v11926_v50, %v6627_v0  ;;  %v6148_v39 = vsel %vm7248_vm13, 0, %v7247_v55  ;;  %v6280_v1 = vadd.s32 %v6278_v27, %v6272_v34  ;;  %vm6281_vm12 = vc.u32 %v6279_v52, %v6275_v54 }
 0x698   : > { %v6632_v8 = vmul.f32 %v12447_v10, %v12447_v10  ;;  %v6149_v14 = vsub.s32 32, %v6148_v39  ;;  %v6153_v49 = vsub.s32 4294967266, %v6148_v39  ;;  %v6232_v37 = vsel %vm6228_vm11, %v12342_v12, %v6231_v46 }
 0x699   : > { %v6150_v18 = vshll.u32 %v12422_v16, %v6148_v39  ;;  %v6163_v24 = vsub.s32 4, %v12405_v19  ;;  %v6254_v20 = vshrl.u32 %v12409_v40, 16  ;;  %v6282_v4 = vsel %vm6281_vm12, 1, %v13741_v6  ;;  %v13909_v39 = vld [vmem:[#allocation40_spill] sm:$0xff] }
 0x69a   : > { %v6633_v7 = vmul.f32 -0.001358992, %v6632_v8  ;;  %v6640_v63 = vmul.f32 -0.00019511016, %v6632_v8  ;;  %v6151_v33 = vshrl.u32 %v6133_v17, %v6149_v14  ;;  %v6154_v61 = vadd.s32 127, %v6153_v49 }
 0x69b   : > { %v6233_v43 = vsel %vm6227_vm10, %v6230_v3, %v6232_v37  ;;  %v12460_v11 = vadd.s32 %v6263_v38, %v6254_v20  ;;  %v6274_v51 = vshrl.u32 %v6270_v28, 16  ;;  %v6284_v13 = vadd.s32 %v6282_v4, %v6280_v1 }
 0x69c   : > { %v6634_v12 = vadd.f32 0.041655596, %v6633_v7  ;;  %v6641_v42 = vadd.f32 0.008332121, %v6640_v63  ;;  %v6152_v16 = vor.u32 %v6151_v33, %v6150_v18  ;;  %v6155_v53 = vshll.u32 %v6154_v61, 23 }
 0x69d   : > { %v6164_v40 = vsel %vm6041_vm15, %v6163_v24, %v12405_v19  ;;  %v6276_v30 = vshrl.u32 %v6271_v23, 16  ;;  %v12465_v15 = vadd.s32 %v6279_v52, %v6275_v54  ;;  %v6285_v56 = vadd.s32 %v6284_v13, %v6274_v51 }
 0x69e   : > { %v6635_v17 = vmul.f32 %v6634_v12, %v6632_v8  ;;  %v6642_v47 = vmul.f32 %v6641_v42, %v6632_v8  ;;  %v6156_v59 = vor.u32 4788187, %v6155_v53  ;;  %v5729_v3 = vand.u32 2147483647, %v11813_v41 }
 0x69f   : > { %v13904_v28 = vmov 1326507024   ;;  %v13905_v58 = vand.u32 2147483647, %v11844_v22  ;;  %v6286_v19 = vadd.s32 %v6285_v56, %v6276_v30  ;;  %vm6289_vm11 = vc.u32 %v12460_v11, %v12465_v15 }
 0x6a0   : > { %v12470_v48 = vshrl.u32 %v13904_v28, %v12075_v21  ;;  %v6636_v23 = vadd.f32 -0.4999988, %v6635_v17  ;;  %v6643_v46 = vadd.f32 -0.16666654, %v6642_v47  ;;  %vm6654_vm4 = vcmp.eq.s32.totalorder %v12434_v62, 2  ;;  %v13912_v47 = vld [vmem:[#allocation23_spill] sm:$0xff] }
 0x6a1   : > { %vm12474_vm9 = vcmp.le.f32.partialorder %v13905_v58, 0.7853982  ;;  %v6157_v29 = vand.u32 2147483647, %v6156_v59  ;;  %v6159_v45 = vcvt.s32.f32 %v6152_v16  ;;  %vm6651_vm6 = vcmp.eq.s32.totalorder %v12434_v62, 0  ;;  %v13911_v16 = vld [vmem:[#allocation72_spill] sm:$0xff] }
 0x6a2   : > { %v6166_v36 = vsel %vm12474_vm9, 0, %v6164_v40  ;;  %v6287_v55 = vmul.u32 %v12377_v35, %v6233_v43  ;;  %v6290_v9 = vadd.s32 1, %v6286_v19  ;;  %v5750_v34 = vshrl.u32 %v13739_v5, %v13908_v57  ;;  %v13913_v59 = vld [vmem:[#allocation55_spill] sm:$0xff] }
 0x6a3   : > { %v6637_v54 = vmul.f32 %v6636_v23, %v6632_v8  ;;  %v6644_v52 = vmul.f32 %v6643_v46, %v6632_v8  ;;  %vm6650_vm10 = vcmp.lt.s32.totalorder %v12434_v62, 2  ;;  %v6160_v0 = vmul.f32 %v6159_v45, %v6157_v29 }
 0x6a4   : > { %v5736_v38 = vand.u32 8388607, %v5729_v3  ;;  %v6291_v27 = vsel %vm6289_vm11, %v6290_v9, %v6286_v19  ;;  %v13910_v1 = vmov 2475754826   ;;  %v5752_v35 = vshll.u32 %v13739_v5, %v13909_v39 }
 0x6a5   : > { %v5749_v14 = vshll.u32 %v13910_v1, %v13909_v39  ;;  %v5753_v49 = vshrl.u32 %v13710_v2, %v13908_v57  ;;  %v6638_v8 = vadd.f32 1.0, %v6637_v54  ;;  %v6645_v37 = vadd.f32 1.0, %v6644_v52  ;;  %v13915_v52 = vld [vmem:[#allocation63_spill] sm:$0xff] }
 0x6a6   : > { %v6161_v18 = vxor.u32 2147483648, %v6160_v0  ;;  %v6292_v24 = vadd.s32 %v6291_v27, %v6287_v55  ;;  %v6183_v20 = vadd.s32 3, %v6166_v36  ;;  %v5747_v4 = vshrl.u32 %v13910_v1, %v13908_v57 }
 0x6a7   : > { %v12501_v7 = vor.u32 %v5750_v34, %v5749_v14  ;;  %v5754_v63 = vor.u32 %v5753_v49, %v5752_v35  ;;  %v6646_v33 = vmul.f32 %v6645_v37, %v12447_v10  ;;  %v6655_v61 = vxor.u32 2147483648, %v6638_v8  ;;  %v13916_v14 = vld [vmem:[#allocation66_spill] sm:$0xff] }
 0x6a8   : > { %v6162_v43 = vsel %vm6041_vm15, %v6161_v18, %v6160_v0  ;;  %v6293_v51 = vadd.s32 536870912, %v6292_v24  ;;  %v5737_v12 = vor.u32 8388608, %v5736_v38  ;;  %v5746_v42 = vshll.u32 %v13643_v25, %v13909_v39 }
 0x6a9   : > { %v12509_v13 = vsel %vm12474_vm9, %v11844_v22, %v6162_v43  ;;  %vm5761_vm0 = vcmp.lt.s32.totalorder %v13911_v16, 1  ;;  %v6652_v53 = vxor.u32 2147483648, %v6646_v33  ;;  %vm5763_vm8 = vcmp.lt.s32.totalorder %v13911_v16, 3 }
 0x6aa   : > { %v6167_v10 = vmul.f32 %v12509_v13, %v12509_v13  ;;  %v6294_v40 = vshrl.u32 %v6293_v51, 30  ;;  %v6656_v30 = vsel %vm6654_vm4, %v6655_v61, %v6646_v33  ;;  %v5748_v56 = vor.u32 %v5747_v4, %v5746_v42 }
 0x6ab   : > { %v5773_v17 = vsel %vm5761_vm0, %v12501_v7, %v5754_v63  ;;  %v5775_v58 = vsel %vm5763_vm8, %v13913_v59, %v13912_v47  ;;  %v6653_v60 = vsel %vm6651_vm6, %v6638_v8, %v6652_v53  ;;  %vm6647_vm7 = vweird.f32 %v11926_v50 }
 0x6ac   : > { %v6168_v19 = vmul.f32 -0.001358992, %v6167_v10  ;;  %v6175_v23 = vmul.f32 -0.00019511016, %v6167_v10  ;;  %v6295_v46 = vshll.u32 %v6294_v40, 30  ;;  %v6657_v29 = vsel %vm6650_vm10, %v6653_v60, %v6656_v30 }
 0x6ad   : > { %v12531_v45 = vand.u32 3, %v6183_v20  ;;  %vm5762_vm2 = vcmp.lt.s32.totalorder %v13911_v16, 2  ;;  %v6658_v36 = vsel %vm6647_vm7, nan, %v6657_v29  ;;  %vm13914_vm15 = vcmask 1043456  }
 0x6ae   : > { %v6169_v55 = vadd.f32 0.041655596, %v6168_v19  ;;  %v6176_v9 = vadd.f32 0.008332121, %v6175_v23  ;;  %v12534_v34 = vsub.s32 %v6292_v24, %v6295_v46  ;;  %7260 = vmatpush.msk.msrb.mxu3 %vm13914_vm15, %v6658_v36  ;;  %v5769_v54 = vsel %vm5761_vm0, %v5748_v56, %v12501_v7 }
 0x6af   : > { %v5771_v50 = vsel %vm5763_vm8, %v5754_v63, %v13915_v52  ;;  %v5776_v62 = vsel %vm5762_vm2, %v5773_v17, %v5775_v58  ;;  %v12545_v0 = vshll.u32 %v5737_v12, 8  ;;  %vm6196_vm13 = vcmp.lt.s32.totalorder %v13916_v14, 0 }
 0x6b0   : > { %v6170_v38 = vmul.f32 %v6169_v55, %v6167_v10  ;;  %v6177_v27 = vmul.f32 %v6176_v9, %v6167_v10  ;;  %vm6297_vm5 = vcmp.lt.s32.totalorder %v12534_v34, 0  ;;  %v6298_v39 = vsub.s32 0, %v12534_v34 }
 0x6b1   : > { %v6318_v35 = vsub.s32 4, %v6294_v40  ;;  %v5745_v49 = vshrl.u32 %v13643_v25, %v13908_v57  ;;  %v5780_v8 = vand.u32 65535, %v5776_v62  ;;  %vm6189_vm12 = vcmp.eq.s32.totalorder %v12531_v45, 2 }
 0x6b2   : > { %v6171_v37 = vadd.f32 -0.4999988, %v6170_v38  ;;  %v6178_v18 = vadd.f32 -0.16666654, %v6177_v27  ;;  %v6299_v24 = vsel %vm6297_vm5, %v6298_v39, %v12534_v34  ;;  %v5772_v20 = vsel %vm5762_vm2, %v5769_v54, %v5771_v50 }
 0x6b3   : > { %vm6186_vm9 = vcmp.eq.s32.totalorder %v12531_v45, 0  ;;  %v6300_v4 = vclz %v6299_v24  ;;  %v5778_v33 = vand.u32 65535, %v12545_v0  ;;  %v5779_v61 = vshrl.u32 %v12545_v0, 16 }
 0x6b4   : > { %v5781_v43 = vshrl.u32 %v5776_v62, 16  ;;  %v6172_v51 = vmul.f32 %v6171_v37, %v6167_v10  ;;  %v6179_v57 = vmul.f32 %v6178_v18, %v6167_v10  ;;  %vm6185_vm11 = vcmp.lt.s32.totalorder %v12531_v45, 2 }
 0x6b5   : > { %v6288_v12 = vadd.s32 %v12465_v15, %v12460_v11  ;;  %v12564_v42 = vsel %vm5761_vm0, %v5745_v49, %v5748_v56  ;;  %vm6182_vm4 = vweird.f32 %v11844_v22  ;;  %v7250_v53 = vadd.s32 4294967294, %v6300_v4 }
 0x6b6   : > { %v5766_v30 = vsel %vm5764_vm1, %v5754_v63, 2102212464  ;;  %v5783_v17 = vmul.u32 %v5781_v43, %v5778_v33  ;;  %v12569_v47 = vmul.u32 %v5780_v8, %v5779_v61  ;;  %v6173_v59 = vadd.f32 1.0, %v6172_v51 }
 0x6b7   : > { %v6180_v10 = vadd.f32 1.0, %v6179_v57  ;;  %v13917_v58 = vand.u32 2147483647, %v13916_v14  ;;  %v6319_v11 = vsel %vm6196_vm13, %v6318_v35, %v6294_v40  ;;  %v5802_v15 = vand.u32 65535, %v5772_v20 }
 0x6b8   : > { %vm7251_vm10 = vcmp.lt.s32.totalorder %v7250_v53, 0  ;;  %v5782_v56 = vmul.u32 %v5780_v8, %v5778_v33  ;;  %v5786_v19 = vshll.u32 %v5783_v17, 16  ;;  %v5803_v23 = vshrl.u32 %v5772_v20, 16 }
 0x6b9   : > { %vm12573_vm6 = vcmp.le.f32.partialorder %v13917_v58, 0.7853982  ;;  %v6181_v63 = vmul.f32 %v6180_v10, %v12509_v13  ;;  %v6190_v46 = vxor.u32 2147483648, %v6173_v59  ;;  %v6303_v29 = vsel %vm7251_vm10, 0, %v7250_v53 }
 0x6ba   : > { %v5785_v36 = vmul.u32 %v5781_v43, %v5779_v61  ;;  %v6304_v55 = vsub.s32 32, %v6303_v29  ;;  %v6308_v9 = vsub.s32 4294967266, %v6303_v29  ;;  %v5788_v54 = vshll.u32 %v12569_v47, 16 }
 0x6bb   : > { %vm5790_vm1 = vc.u32 %v5782_v56, %v5786_v19  ;;  %v6187_v52 = vxor.u32 2147483648, %v6181_v63  ;;  %v6305_v50 = vshll.u32 %v12534_v34, %v6303_v29  ;;  %v5792_v62 = vadd.s32 %v5786_v19, %v5782_v56 }
 0x6bc   : > { %v5791_v40 = vsel %vm5790_vm1, 1, %v13741_v6  ;;  %v6191_v38 = vsel %vm6189_vm12, %v6190_v46, %v6181_v63  ;;  %v6306_v27 = vshrl.u32 %v6288_v12, %v6304_v55  ;;  %v6309_v39 = vadd.s32 127, %v6308_v9  ;;  %v13921_v63 = vld [vmem:[#allocation42_spill] sm:$0xff] }
 0x6bd   : > { %v5793_v13 = vadd.s32 %v5791_v40, %v5785_v36  ;;  %v6188_v35 = vsel %vm6186_vm9, %v6173_v59, %v6187_v52  ;;  %vm5794_vm0 = vc.u32 %v5792_v62, %v5788_v54  ;;  %v5805_v49 = vmul.u32 %v5803_v23, %v5778_v33  ;;  %v13920_v59 = vld [vmem:[#allocation37_spill] sm:$0xff] }
 0x6be   : > { %v5806_v8 = vmul.u32 %v5802_v15, %v5779_v61  ;;  %v6192_v37 = vsel %vm6185_vm11, %v6188_v35, %v6191_v38  ;;  %v6307_v18 = vor.u32 %v6306_v27, %v6305_v50  ;;  %v6310_v34 = vshll.u32 %v6309_v39, 23 }
 0x6bf   : > { %v5795_v24 = vsel %vm5794_vm0, 1, %v13741_v6  ;;  %v6193_v20 = vsel %vm6182_vm4, nan, %v6192_v37  ;;  %v5804_v43 = vmul.u32 %v5802_v15, %v5778_v33  ;;  %v5808_v51 = vshll.u32 %v5805_v49, 16 }
 0x6c0   : > { %v5797_v4 = vadd.s32 %v5795_v24, %v5793_v13  ;;  %6687 = vmatpush.msrb.mxu2 %v6193_v20  ;;  %v6311_v57 = vor.u32 4788187, %v6310_v34  ;;  %v6321_v12 = vsel %vm12573_vm6, 0, %v6319_v11  ;;  %v5767_v45 = vsel %vm5763_vm8, %v12501_v7, %v5766_v30 }
 0x6c1   : > { %v5787_v53 = vshrl.u32 %v5783_v17, 16  ;;  %vm5919_vm7 = vcmp.lt.s32.totalorder %v13920_v59, 4  ;;  %v5807_v10 = vmul.u32 %v5803_v23, %v5779_v61  ;;  %v5810_v58 = vshll.u32 %v5806_v8, 16  ;;  %v13922_v17 = vld [vmem:[#allocation39_spill] sm:$0xff] }
 0x6c2   : > { %vm5812_vm15 = vc.u32 %v5804_v43, %v5808_v51  ;;  %v5814_v22 = vadd.s32 %v5808_v51, %v5804_v43  ;;  %v6312_v56 = vand.u32 2147483647, %v6311_v57  ;;  %v6314_v19 = vcvt.s32.f32 %v6307_v18 }
 0x6c3   : > { %v5798_v33 = vadd.s32 %v5797_v4, %v5787_v53  ;;  %v5813_v15 = vsel %vm5812_vm15, 1, %v13741_v6  ;;  %v5912_v46 = vor.u32 %v12413_v44, %v13921_v63  ;;  %v5915_v11 = vor.u32 %v12470_v48, %v12417_v26 }
 0x6c4   : > { %v5815_v29 = vadd.s32 %v5813_v15, %v5807_v10  ;;  %vm5816_vm8 = vc.u32 %v5814_v22, %v5810_v58  ;;  %v6315_v7 = vmul.f32 %v6314_v19, %v6312_v56  ;;  %v5789_v30 = vshrl.u32 %v12569_v47, 16 }
 0x6c5   : > { %v5817_v61 = vsel %vm5816_vm8, 1, %v13741_v6  ;;  %v5884_v23 = vand.u32 2147483647, %v13922_v17  ;;  %v6338_v36 = vadd.s32 3, %v6321_v12  ;;  %v5768_v55 = vsel %vm5762_vm2, %v12564_v42, %v5767_v45 }
 0x6c6   : > { %v5809_v9 = vshrl.u32 %v5805_v49, 16  ;;  %v5819_v54 = vadd.s32 %v5817_v61, %v5815_v29  ;;  %v6316_v44 = vxor.u32 2147483648, %v6315_v7  ;;  %v12609_v52 = vadd.s32 %v5798_v33, %v5789_v30 }
 0x6c7   : > { %v5811_v26 = vshrl.u32 %v5806_v8, 16  ;;  %v5891_v48 = vand.u32 8388607, %v5884_v23  ;;  %v5902_v47 = vshrl.u32 %v13910_v1, %v12075_v21  ;;  %v5904_v40 = vshll.u32 %v13910_v1, %v12041_v31 }
 0x6c8   : > { %v5820_v50 = vadd.s32 %v5819_v54, %v5809_v9  ;;  %v5905_v16 = vshrl.u32 %v13739_v5, %v12075_v21  ;;  %v6317_v42 = vsel %vm6196_vm13, %v6316_v44, %v6315_v7  ;;  %v12621_v62 = vadd.s32 %v5814_v22, %v5810_v58  ;;  %v13923_v9 = vld [vmem:[#allocation57_spill] sm:$0xff] }
 0x6c9   : > { %v5907_v38 = vshll.u32 %v13739_v5, %v12041_v31  ;;  %v5908_v27 = vshrl.u32 %v13710_v2, %v12075_v21  ;;  %v12630_v39 = vsel %vm12573_vm6, %v13916_v14, %v6317_v42  ;;  %v5901_v35 = vshll.u32 %v13643_v25, %v12041_v31 }
 0x6ca   : > { %v5821_v13 = vadd.s32 %v5820_v50, %v5811_v26  ;;  %v12634_v49 = vor.u32 %v5905_v16, %v5904_v40  ;;  %v5925_v8 = vsel %vm5919_vm7, %v5912_v46, 920167782  ;;  %v6322_v37 = vmul.f32 %v12630_v39, %v12630_v39 }
 0x6cb   : > { %vm5824_vm2 = vc.u32 %v12609_v52, %v12621_v62  ;;  %v5909_v18 = vor.u32 %v5908_v27, %v5907_v38  ;;  %v5929_v60 = vsel %vm5919_vm7, %v5915_v11, 1326507024  ;;  %v5892_v24 = vor.u32 8388608, %v5891_v48 }
 0x6cc   : > { %v5825_v34 = vadd.s32 1, %v5821_v13  ;;  %v12644_v20 = vor.u32 %v5902_v47, %v5901_v35  ;;  %v6323_v31 = vmul.f32 -0.001358992, %v6322_v37  ;;  %v6330_v4 = vmul.f32 -0.00019511016, %v6322_v37 }
 0x6cd   : > { %v5822_v43 = vmul.u32 %v12545_v0, %v5768_v55  ;;  %vm5916_vm5 = vcmp.lt.s32.totalorder %v13920_v59, 1  ;;  %v12648_v51 = vand.u32 3, %v6338_v36  ;;  %vm5917_vm13 = vcmp.lt.s32.totalorder %v13920_v59, 2 }
 0x6ce   : > { %v5826_v57 = vsel %vm5824_vm2, %v5825_v34, %v5821_v13  ;;  %v5928_v12 = vsel %vm5916_vm5, %v12634_v49, %v5909_v18  ;;  %v6324_v45 = vadd.f32 0.041655596, %v6323_v31  ;;  %v6331_v53 = vadd.f32 0.008332121, %v6330_v4 }
 0x6cf   : > { %v5827_v10 = vadd.s32 %v5826_v57, %v5822_v43  ;;  %vm5918_vm12 = vcmp.lt.s32.totalorder %v13920_v59, 3  ;;  %v5924_v0 = vsel %vm5916_vm5, %v12644_v20, %v12634_v49  ;;  %v12663_v56 = vshll.u32 %v5892_v24, 8 }
 0x6d0   : > { %v5926_v58 = vsel %vm5918_vm12, %v5909_v18, %v5925_v8  ;;  %v5930_v22 = vsel %vm5918_vm12, %v5912_v46, %v5929_v60  ;;  %v6325_v19 = vmul.f32 %v6324_v45, %v6322_v37  ;;  %v6332_v33 = vmul.f32 %v6331_v53, %v6322_v37 }
 0x6d1   : > { %v5828_v15 = vadd.s32 536870912, %v5827_v10  ;;  %v5931_v63 = vsel %vm5917_vm13, %v5928_v12, %v5930_v22  ;;  %v5933_v11 = vand.u32 65535, %v12663_v56  ;;  %v12669_v29 = vshrl.u32 %v12663_v56, 16 }
 0x6d2   : > { %v5935_v7 = vand.u32 65535, %v5931_v63  ;;  %v5936_v30 = vshrl.u32 %v5931_v63, 16  ;;  %v6326_v61 = vadd.f32 -0.4999988, %v6325_v19  ;;  %v6333_v36 = vadd.f32 -0.16666654, %v6332_v33 }
 0x6d3   : > { %v5829_v55 = vshrl.u32 %v5828_v15, 30  ;;  %v5927_v46 = vsel %vm5917_vm13, %v5924_v0, %v5926_v58  ;;  %v12675_v54 = vshrl.u32 %v13904_v28, %v13923_v9  ;;  %vm6341_vm9 = vcmp.eq.s32.totalorder %v12648_v51, 0 }
 0x6d4   : > { %v5938_v44 = vmul.u32 %v5936_v30, %v5933_v11  ;;  %v12679_v26 = vmul.u32 %v5935_v7, %v12669_v29  ;;  %v6327_v48 = vmul.f32 %v6326_v61, %v6322_v37  ;;  %v6334_v50 = vmul.f32 %v6333_v36, %v6322_v37 }
 0x6d5   : > { %vm6340_vm11 = vcmp.lt.s32.totalorder %v12648_v51, 2  ;;  %v5830_v47 = vshll.u32 %v5829_v55, 30  ;;  %v5900_v40 = vshrl.u32 %v13643_v25, %v12075_v21  ;;  %vm6337_vm4 = vweird.f32 %v13916_v14 }
 0x6d6   : > { %v5921_v16 = vsel %vm5919_vm7, %v5909_v18, 2102212464  ;;  %v5937_v42 = vmul.u32 %v5935_v7, %v5933_v11  ;;  %v5941_v38 = vshll.u32 %v5938_v44, 16  ;;  %v5958_v27 = vshrl.u32 %v5927_v46, 16 }
 0x6d7   : > { %v6328_v13 = vadd.f32 1.0, %v6327_v48  ;;  %v6335_v35 = vadd.f32 1.0, %v6334_v50  ;;  %vm5731_vm6 = vcmp.lt.s32.totalorder %v11813_v41, 0  ;;  %v5831_v8 = vsub.s32 %v5827_v10, %v5830_v47 }
 0x6d8   : > { %v5957_v37 = vand.u32 65535, %v5927_v46  ;;  %v5940_v60 = vmul.u32 %v5936_v30, %v12669_v29  ;;  %v5943_v34 = vshll.u32 %v12679_v26, 16  ;;  %vm5945_vm10 = vc.u32 %v5937_v42, %v5941_v38 }
 0x6d9   : > { %v5947_v21 = vadd.s32 %v5941_v38, %v5937_v42  ;;  %v6336_v24 = vmul.f32 %v6335_v35, %v12630_v39  ;;  %v6345_v31 = vxor.u32 2147483648, %v6328_v13  ;;  %vm5832_vm1 = vcmp.lt.s32.totalorder %v5831_v8, 0  ;;  %v13926_v42 = vld [vmem:[#allocation36_spill] sm:$0xff] }
 0x6da   : > { %v5833_v18 = vsub.s32 0, %v5831_v8  ;;  %vm6344_vm0 = vcmp.eq.s32.totalorder %v12648_v51, 2  ;;  %v5946_v4 = vsel %vm5945_vm10, 1, %v13741_v6  ;;  %v5960_v43 = vmul.u32 %v5958_v27, %v5933_v11 }
 0x6db   : > { %vm5949_vm7 = vc.u32 %v5947_v21, %v5943_v34  ;;  %v6342_v57 = vxor.u32 2147483648, %v6336_v24  ;;  %v5920_v45 = vsel %vm5916_vm5, %v5900_v40, %v12644_v20  ;;  %v5948_v53 = vadd.s32 %v5946_v4, %v5940_v60  ;;  %v13927_v4 = vld [vmem:[#allocation38_spill] sm:$0xff] }
 0x6dc   : > { %v5834_v12 = vsel %vm5832_vm1, %v5833_v18, %v5831_v8  ;;  %vm12698_vm15 = vcmp.le.f32.partialorder %v5729_v3, 0.7853982  ;;  %v5853_v0 = vsub.s32 4, %v5829_v55  ;;  %v5922_v58 = vsel %vm5918_vm12, %v12634_v49, %v5921_v16 }
 0x6dd   : > { %v5835_v10 = vclz %v5834_v12  ;;  %v5950_v22 = vsel %vm5949_vm7, 1, %v13741_v6  ;;  %v6343_v19 = vsel %vm6341_vm9, %v6328_v13, %v6342_v57  ;;  %v6346_v33 = vsel %vm6344_vm0, %v6345_v31, %v6336_v24  ;;  %v13928_v57 = vld [vmem:[#allocation75_spill] sm:$0xff] }
 0x6de   : > { %v5961_v20 = vmul.u32 %v5957_v37, %v12669_v29  ;;  %v5963_v15 = vshll.u32 %v5960_v43, 16  ;;  %v6347_v3 = vsel %vm6340_vm11, %v6343_v19, %v6346_v33  ;;  %v5952_v7 = vadd.s32 %v5950_v22, %v5948_v53 }
 0x6df   : > { %v7241_v63 = vadd.s32 4294967294, %v5835_v10  ;;  %v5959_v30 = vmul.u32 %v5957_v37, %v5933_v11  ;;  %v6348_v61 = vsel %vm6337_vm4, nan, %v6347_v3  ;;  %v5823_v49 = vadd.s32 %v12621_v62, %v12609_v52 }
 0x6e0   : > { %v5923_v36 = vsel %vm5917_vm13, %v5920_v45, %v5922_v58  ;;  %v5942_v46 = vshrl.u32 %v5938_v44, 16  ;;  %6707 = vmatpush.msrb.mxu3 %v6348_v61  ;;  %v5854_v48 = vsel %vm5731_vm6, %v5853_v0, %v5829_v55  ;;  %v5962_v51 = vmul.u32 %v5958_v27, %v12669_v29 }
 0x6e1   : > { %vm7242_vm8 = vcmp.lt.s32.totalorder %v7241_v63, 0  ;;  %vm5967_vm2 = vc.u32 %v5959_v30, %v5963_v15  ;;  %v5965_v11 = vshll.u32 %v5961_v20, 16  ;;  %v5969_v47 = vadd.s32 %v5963_v15, %v5959_v30 }
 0x6e2   : > { %v5838_v50 = vsel %vm7242_vm8, 0, %v7241_v63  ;;  %v5968_v14 = vsel %vm5967_vm2, 1, %v13741_v6  ;;  %v5953_v52 = vadd.s32 %v5952_v7, %v5942_v46  ;;  %v5944_v59 = vshrl.u32 %v12679_v26, 16  ;;  %v13929_v7 = vld [vmem:[#allocation71_spill] sm:$0xff] }
 0x6e3   : > { %v5839_v40 = vsub.s32 32, %v5838_v50  ;;  %v5843_v16 = vsub.s32 4294967266, %v5838_v50  ;;  %v5970_v62 = vadd.s32 %v5968_v14, %v5962_v51  ;;  %vm5971_vm5 = vc.u32 %v5969_v47, %v5965_v11  ;;  %v13932_v51 = vld [vmem:[#allocation60_spill] sm:$0xff] }
 0x6e4   : > { %v5977_v44 = vmul.u32 %v12663_v56, %v5923_v36  ;;  %v5419_v38 = vand.u32 2147483647, %v13926_v42  ;;  %v5840_v55 = vshll.u32 %v5831_v8, %v5838_v50  ;;  %v5972_v27 = vsel %vm5971_vm5, 1, %v13741_v6  ;;  %v13931_v36 = vld [vmem:[#allocation51_spill] sm:$0xff]  ;;  %v13933_v50 = vld [vmem:[#allocation33_spill] sm:$0xff] }
 0x6e5   : > { %v5841_v13 = vshrl.u32 %v5823_v49, %v5839_v40  ;;  %v5844_v29 = vadd.s32 127, %v5843_v16  ;;  %v5856_v35 = vsel %vm12698_vm15, 0, %v5854_v48  ;;  %v5964_v37 = vshrl.u32 %v5960_v43, 16  ;;  %v13930_v49 = vld [vmem:[#allocation54_spill] sm:$0xff] }
 0x6e6   : > { %v5966_v60 = vshrl.u32 %v5961_v20, 16  ;;  %v5974_v34 = vadd.s32 %v5972_v27, %v5970_v62  ;;  %v5954_v31 = vadd.s32 %v5953_v52, %v5944_v59  ;;  %v5426_v26 = vand.u32 8388607, %v5419_v38  ;;  %v13935_v52 = vld [vmem:[#allocation9_spill] sm:$0xff] }
 0x6e7   : > { %v5842_v21 = vor.u32 %v5841_v13, %v5840_v55  ;;  %v5845_v24 = vshll.u32 %v5844_v29, 23  ;;  %v5973_v56 = vadd.s32 %v5969_v47, %v5965_v11  ;;  %v5436_v8 = vshll.u32 %v13643_v25, %v13927_v4  ;;  %v13934_v47 = vld [vmem:[#allocation44_spill] sm:$0xff] }
 0x6e8   : > { %v5975_v18 = vadd.s32 %v5974_v34, %v5964_v37  ;;  %v5437_v12 = vshrl.u32 %v13910_v1, %v13928_v57  ;;  %v5427_v53 = vor.u32 8388608, %v5426_v26  ;;  %v5439_v43 = vshll.u32 %v13910_v1, %v13927_v4 }
 0x6e9   : > { %v5846_v45 = vor.u32 4788187, %v5845_v24  ;;  %v5440_v10 = vshrl.u32 %v13739_v5, %v13928_v57  ;;  %v5442_v22 = vshll.u32 %v13739_v5, %v13927_v4  ;;  %v5443_v19 = vshrl.u32 %v13710_v2, %v13928_v57  ;;  %v13936_v24 = vld [vmem:[#allocation64_spill] sm:$0xff]  ;;  %v13937_v4 = vld [vmem:[#allocation59_spill] sm:$0xff] }
 0x6ea   : > { %v5976_v0 = vadd.s32 %v5975_v18, %v5966_v60  ;;  %v12737_v58 = vor.u32 %v5437_v12, %v5436_v8  ;;  %v5849_v20 = vcvt.s32.f32 %v5842_v21  ;;  %vm5979_vm13 = vc.u32 %v5954_v31, %v5973_v56 }
 0x6eb   : > { %v5847_v33 = vand.u32 2147483647, %v5846_v45  ;;  %v12743_v15 = vor.u32 %v5440_v10, %v5439_v43  ;;  %v5444_v63 = vor.u32 %v5443_v19, %v5442_v22  ;;  %vm5451_vm12 = vcmp.lt.s32.totalorder %v13929_v7, 1 }
 0x6ec   : > { %v5980_v3 = vadd.s32 1, %v5976_v0  ;;  %vm5453_vm9 = vcmp.lt.s32.totalorder %v13929_v7, 3  ;;  %v12755_v48 = vshll.u32 %v5427_v53, 8  ;;  %v12759_v11 = vor.u32 %v13933_v50, %v13932_v51 }
 0x6ed   : > { %v5850_v30 = vmul.f32 %v5849_v20, %v5847_v33  ;;  %v5459_v61 = vsel %vm5451_vm12, %v12737_v58, %v12743_v15  ;;  %v5465_v46 = vsel %vm5453_vm9, %v13931_v36, %v13930_v49  ;;  %v5461_v40 = vsel %vm5453_vm9, %v5444_v63, %v13934_v47 }
 0x6ee   : > { %v5981_v14 = vsel %vm5979_vm13, %v5980_v3, %v5976_v0  ;;  %v5463_v16 = vsel %vm5451_vm12, %v12743_v15, %v5444_v63  ;;  %v5605_v62 = vor.u32 %v12675_v54, %v13935_v52  ;;  %vm5452_vm11 = vcmp.lt.s32.totalorder %v13929_v7, 2 }
 0x6ef   : > { %v5851_v59 = vxor.u32 2147483648, %v5850_v30  ;;  %v5982_v55 = vadd.s32 %v5981_v14, %v5977_v44  ;;  %v5873_v13 = vadd.s32 3, %v5856_v35  ;;  %v12772_v29 = vsel %vm5452_vm11, %v5459_v61, %v5461_v40 }
 0x6f0   : > { %v5466_v27 = vsel %vm5452_vm11, %v5463_v16, %v5465_v46  ;;  %v5468_v37 = vand.u32 65535, %v12755_v48  ;;  %v12781_v44 = vshll.u32 %v13710_v2, %v13936_v24  ;;  %v12785_v35 = vshll.u32 %v13708_v32, %v13936_v24 }
 0x6f1   : > { %v5852_v60 = vsel %vm5731_vm6, %v5851_v59, %v5850_v30  ;;  %v5983_v34 = vadd.s32 536870912, %v5982_v55  ;;  %v5470_v21 = vand.u32 65535, %v5466_v27  ;;  %v5471_v54 = vshrl.u32 %v5466_v27, 16 }
 0x6f2   : > { %v5855_v26 = vsel %vm12698_vm15, %v11813_v41, %v5852_v60  ;;  %v5469_v18 = vshrl.u32 %v12755_v48, 16  ;;  %vm5609_vm4 = vcmp.lt.s32.totalorder %v13937_v4, 4  ;;  %v5493_v39 = vshrl.u32 %v12772_v29, 16 }
 0x6f3   : > { %v5857_v8 = vmul.f32 %v5855_v26, %v5855_v26  ;;  %v12792_v12 = vshrl.u32 %v5983_v34, 30  ;;  %v5473_v45 = vmul.u32 %v5471_v54, %v5468_v37  ;;  %v12797_v53 = vsel %vm5609_vm4, %v12759_v11, 920167782 }
 0x6f4   : > { %v12801_v43 = vsel %vm5609_vm4, %v5605_v62, 1326507024  ;;  %v12803_v10 = vmul.u32 %v5470_v21, %v5469_v18  ;;  %v12806_v19 = vand.u32 3, %v5873_v13  ;;  %v5978_v20 = vadd.s32 %v5973_v56, %v5954_v31 }
 0x6f5   : > { %v5858_v0 = vmul.f32 -0.001358992, %v5857_v8  ;;  %v5865_v22 = vmul.f32 -0.00019511016, %v5857_v8  ;;  %v5985_v33 = vshll.u32 %v12792_v12, 30  ;;  %v5472_v3 = vmul.u32 %v5470_v21, %v5468_v37 }
 0x6f6   : > { %v5476_v30 = vshll.u32 %v5473_v45, 16  ;;  %v5492_v61 = vand.u32 65535, %v12772_v29  ;;  %v5475_v51 = vmul.u32 %v5471_v54, %v5469_v18  ;;  %v5478_v50 = vshll.u32 %v12803_v10, 16 }
 0x6f7   : > { %v5859_v49 = vadd.f32 0.041655596, %v5858_v0  ;;  %v5866_v36 = vadd.f32 0.008332121, %v5865_v22  ;;  %v12810_v46 = vsub.s32 %v5982_v55, %v5985_v33  ;;  %v12813_v47 = vmul.u32 %v5493_v39, %v5468_v37 }
 0x6f8   : > { %vm5480_vm6 = vc.u32 %v5472_v3, %v5476_v30  ;;  %v5482_v14 = vadd.s32 %v5476_v30, %v5472_v3  ;;  %v5435_v56 = vshrl.u32 %v13643_v25, %v13928_v57  ;;  %v5456_v52 = vsel %vm5454_vm3, %v5444_v63, 2102212464 }
 0x6f9   : > { %v5860_v40 = vmul.f32 %v5859_v49, %v5857_v8  ;;  %v5867_v16 = vmul.f32 %v5866_v36, %v5857_v8  ;;  %vm5987_vm10 = vcmp.lt.s32.totalorder %v12810_v46, 0  ;;  %v5988_v31 = vsub.s32 0, %v12810_v46 }
 0x6fa   : > { %v5481_v62 = vsel %vm5480_vm6, 1, %v13741_v6  ;;  %vm5484_vm1 = vc.u32 %v5482_v14, %v5478_v50  ;;  %vm5876_vm0 = vcmp.eq.s32.totalorder %v12806_v19, 0  ;;  %vm5879_vm7 = vcmp.eq.s32.totalorder %v12806_v19, 2 }
 0x6fb   : > { %v5861_v59 = vadd.f32 -0.4999988, %v5860_v40  ;;  %v5868_v55 = vadd.f32 -0.16666654, %v5867_v16  ;;  %v5989_v13 = vsel %vm5987_vm10, %v5988_v31, %v12810_v46  ;;  %v5483_v29 = vadd.s32 %v5481_v62, %v5475_v51 }
 0x6fc   : > { %v5990_v27 = vclz %v5989_v13  ;;  %v5477_v60 = vshrl.u32 %v5473_v45, 16  ;;  %v5485_v34 = vsel %vm5484_vm1, 1, %v13741_v6  ;;  %v5498_v57 = vshll.u32 %v12813_v47, 16  ;;  %v13938_v13 = vld [vmem:[#allocation73_spill] sm:$0xff] }
 0x6fd   : > { %v5862_v21 = vmul.f32 %v5861_v59, %v5857_v8  ;;  %v5869_v63 = vmul.f32 %v5868_v55, %v5857_v8  ;;  %vm5875_vm3 = vcmp.lt.s32.totalorder %v12806_v19, 2  ;;  %v5487_v54 = vadd.s32 %v5485_v34, %v5483_v29 }
 0x6fe   : > { %v5496_v0 = vmul.u32 %v5492_v61, %v5469_v18  ;;  %vm5872_vm15 = vweird.f32 %v11813_v41  ;;  %v7244_v22 = vadd.s32 4294967294, %v5990_v27  ;;  %v5455_v33 = vsel %vm5451_vm12, %v5435_v56, %v12737_v58 }
 0x6ff   : > { %v5457_v45 = vsel %vm5453_vm9, %v12743_v15, %v5456_v52  ;;  %v5494_v3 = vmul.u32 %v5492_v61, %v5468_v37  ;;  %v5863_v30 = vadd.f32 1.0, %v5862_v21  ;;  %v5870_v49 = vadd.f32 1.0, %v5869_v63 }
 0x700   : > { %v5479_v8 = vshrl.u32 %v12803_v10, 16  ;;  %v5488_v36 = vadd.s32 %v5487_v54, %v5477_v60  ;;  %vm7245_vm8 = vcmp.lt.s32.totalorder %v7244_v22, 0  ;;  %v5497_v51 = vmul.u32 %v5493_v39, %v5469_v18 }
 0x701   : > { %vm5502_vm2 = vc.u32 %v5494_v3, %v5498_v57  ;;  %v5504_v50 = vadd.s32 %v5498_v57, %v5494_v3  ;;  %v5871_v14 = vmul.f32 %v5870_v49, %v5855_v26  ;;  %v5880_v40 = vxor.u32 2147483648, %v5863_v30  ;;  %v13939_v49 = vld [vmem:[#allocation65_spill] sm:$0xff] }
 0x702   : > { %v5993_v16 = vsel %vm7245_vm8, 0, %v7244_v22  ;;  %v5500_v31 = vshll.u32 %v5496_v0, 16  ;;  %v5499_v56 = vshrl.u32 %v12813_v47, 16  ;;  %v5503_v15 = vsel %vm5502_vm2, 1, %v13741_v6 }
 0x703   : > { %v5994_v62 = vsub.s32 32, %v5993_v16  ;;  %v5998_v58 = vsub.s32 4294967266, %v5993_v16  ;;  %v5877_v37 = vxor.u32 2147483648, %v5871_v14  ;;  %v12838_v61 = vadd.s32 %v5488_v36, %v5479_v8 }
 0x704   : > { %v5505_v52 = vadd.s32 %v5503_v15, %v5497_v51  ;;  %vm5506_vm5 = vc.u32 %v5504_v50, %v5500_v31  ;;  %v5995_v10 = vshll.u32 %v12810_v46, %v5993_v16  ;;  %v5881_v55 = vsel %vm5879_vm7, %v5880_v40, %v5871_v14 }
 0x705   : > { %v5996_v18 = vshrl.u32 %v5978_v20, %v5994_v62  ;;  %v5999_v39 = vadd.s32 127, %v5998_v58  ;;  %v5507_v26 = vsel %vm5506_vm5, 1, %v13741_v6  ;;  %v5878_v59 = vsel %vm5876_vm0, %v5863_v30, %v5877_v37 }
 0x706   : > { %v5509_v47 = vadd.s32 %v5507_v26, %v5505_v52  ;;  %v5574_v29 = vand.u32 2147483647, %v13938_v13  ;;  %v5882_v27 = vsel %vm5875_vm3, %v5878_v59, %v5881_v55  ;;  %vm5886_vm13 = vcmp.lt.s32.totalorder %v13922_v17, 0 }
 0x707   : > { %v5997_v60 = vor.u32 %v5996_v18, %v5995_v10  ;;  %v6000_v46 = vshll.u32 %v5999_v39, 23  ;;  %v5883_v20 = vsel %vm5872_vm15, nan, %v5882_v27  ;;  %v5501_v34 = vshrl.u32 %v5496_v0, 16 }
 0x708   : > { %v12852_v57 = vadd.s32 %v5504_v50, %v5500_v31  ;;  %v5510_v21 = vadd.s32 %v5509_v47, %v5499_v56  ;;  %6688 = vmatpush.msrb.mxu2 %v5883_v20  ;;  %v6008_v54 = vsub.s32 4, %v12792_v12  ;;  %v5458_v22 = vsel %vm5452_vm11, %v5455_v33, %v5457_v45 }
 0x709   : > { %v6001_v63 = vor.u32 4788187, %v6000_v46  ;;  %v5581_v19 = vand.u32 8388607, %v5574_v29  ;;  %v6004_v3 = vcvt.s32.f32 %v5997_v60  ;;  %v5592_v41 = vshrl.u32 %v13910_v1, %v13923_v9 }
 0x70a   : > { %v5511_v30 = vadd.s32 %v5510_v21, %v5501_v34  ;;  %vm5514_vm12 = vc.u32 %v12838_v61, %v12852_v57  ;;  %v5591_v8 = vshll.u32 %v13643_v25, %v13939_v49  ;;  %v5594_v36 = vshll.u32 %v13910_v1, %v13939_v49 }
 0x70b   : > { %v6002_v0 = vand.u32 2147483647, %v6001_v63  ;;  %v5595_v7 = vshrl.u32 %v13739_v5, %v13923_v9  ;;  %v5582_v45 = vor.u32 8388608, %v5581_v19  ;;  %v5597_v51 = vshll.u32 %v13739_v5, %v13939_v49 }
 0x70c   : > { %v5515_v33 = vadd.s32 1, %v5511_v30  ;;  %v5598_v50 = vshrl.u32 %v13710_v2, %v13923_v9  ;;  %v6009_v40 = vsel %vm5886_vm13, %v6008_v54, %v12792_v12  ;;  %v5512_v16 = vmul.u32 %v12755_v48, %v5458_v22  ;;  %v13940_v12 = vld [vmem:[#allocation69_spill] sm:$0xff] }
 0x70d   : > { %v6005_v14 = vmul.f32 %v6004_v3, %v6002_v0  ;;  %v12877_v31 = vor.u32 %v5595_v7, %v5594_v36  ;;  %v12879_v58 = vor.u32 %v5592_v41, %v5591_v8  ;;  %vm5608_vm9 = vcmp.lt.s32.totalorder %v13937_v4, 3  ;;  %v13941_v3 = vld [vmem:[#allocation68_spill] sm:$0xff] }
 0x70e   : > { %v5516_v62 = vsel %vm5514_vm12, %v5515_v33, %v5511_v30  ;;  %v5599_v56 = vor.u32 %v5598_v50, %v5597_v51  ;;  %vm5606_vm11 = vcmp.lt.s32.totalorder %v13937_v4, 1  ;;  %v5620_v52 = vsel %vm5608_vm9, %v12759_v11, %v12801_v43 }
 0x70f   : > { %v6006_v15 = vxor.u32 2147483648, %v6005_v14  ;;  %v5517_v37 = vadd.s32 %v5516_v62, %v5512_v16  ;;  %v5291_v48 = vshrl.u32 %v13708_v32, %v13940_v12  ;;  %vm5885_vm6 = vcmp.le.f32.partialorder %v5884_v23, 0.7853982 }
 0x710   : > { %v5618_v10 = vsel %vm5606_vm11, %v12877_v31, %v5599_v56  ;;  %v12894_v18 = vshll.u32 %v5582_v45, 8  ;;  %v6011_v26 = vsel %vm5885_vm6, 0, %v6009_v40  ;;  %vm5607_vm10 = vcmp.lt.s32.totalorder %v13937_v4, 2  ;;  %v13944_v4 = vld [vmem:[#allocation74_spill] sm:$0xff] }
 0x711   : > { %v6007_v39 = vsel %vm5886_vm13, %v6006_v15, %v6005_v14  ;;  %v5518_v59 = vadd.s32 536870912, %v5517_v37  ;;  %v5614_v23 = vsel %vm5606_vm11, %v12879_v58, %v12877_v31  ;;  %v5616_v43 = vsel %vm5608_vm9, %v5599_v56, %v12797_v53 }
 0x712   : > { %v12900_v11 = vsel %vm5885_vm6, %v13922_v17, %v6007_v39  ;;  %v5621_v55 = vsel %vm5607_vm10, %v5618_v10, %v5620_v52  ;;  %v12913_v47 = vshrl.u32 %v13904_v28, %v13940_v12  ;;  %v6028_v20 = vadd.s32 3, %v6011_v26 }
 0x713   : > { %v6012_v27 = vmul.f32 %v12900_v11, %v12900_v11  ;;  %v12917_v60 = vshrl.u32 %v5518_v59, 30  ;;  %v5625_v46 = vand.u32 65535, %v5621_v55  ;;  %v5623_v34 = vand.u32 65535, %v12894_v18 }
 0x714   : > { %v12921_v21 = vshrl.u32 %v12894_v18, 16  ;;  %v5626_v53 = vshrl.u32 %v5621_v55, 16  ;;  %v5617_v19 = vsel %vm5607_vm10, %v5614_v23, %v5616_v43  ;;  %v12927_v30 = vshrl.u32 %v13941_v3, 5 }
 0x715   : > { %v6013_v63 = vmul.f32 -0.001358992, %v6012_v27  ;;  %v6020_v54 = vmul.f32 -0.00019511016, %v6012_v27  ;;  %v5520_v22 = vshll.u32 %v12917_v60, 30  ;;  %v12930_v41 = vor.u32 %v5291_v48, %v12781_v44 }
 0x716   : > { %v5628_v0 = vmul.u32 %v5626_v53, %v5623_v34  ;;  %v12933_v49 = vmul.u32 %v5625_v46, %v12921_v21  ;;  %v5295_v8 = vor.u32 %v12913_v47, %v12785_v35  ;;  %v6029_v45 = vand.u32 3, %v6028_v20 }
 0x717   : > { %v6014_v36 = vadd.f32 0.041655596, %v6013_v63  ;;  %v6021_v7 = vadd.f32 0.008332121, %v6020_v54  ;;  %v12937_v33 = vsub.s32 %v5517_v37, %v5520_v22  ;;  %v5627_v51 = vmul.u32 %v5625_v46, %v5623_v34 }
 0x718   : > { %v5631_v50 = vshll.u32 %v5628_v0, 16  ;;  %v5648_v14 = vshrl.u32 %v5617_v19, 16  ;;  %v5630_v62 = vmul.u32 %v5626_v53, %v12921_v21  ;;  %v5633_v15 = vshll.u32 %v12933_v49, 16 }
 0x719   : > { %v6015_v40 = vmul.f32 %v6014_v36, %v6012_v27  ;;  %v6022_v16 = vmul.f32 %v6021_v7, %v6012_v27  ;;  %vm5522_vm1 = vcmp.lt.s32.totalorder %v12937_v33, 0  ;;  %v5523_v44 = vsub.s32 0, %v12937_v33 }
 0x71a   : > { %vm5635_vm0 = vc.u32 %v5627_v51, %v5631_v50  ;;  %v5637_v52 = vadd.s32 %v5631_v50, %v5627_v51  ;;  %vm6031_vm7 = vcmp.eq.s32.totalorder %v6029_v45, 0  ;;  %v5647_v23 = vand.u32 65535, %v5617_v19 }
 0x71b   : > { %v6016_v48 = vadd.f32 -0.4999988, %v6015_v40  ;;  %v6023_v10 = vadd.f32 -0.16666654, %v6022_v16  ;;  %v5524_v37 = vsel %vm5522_vm1, %v5523_v44, %v12937_v33  ;;  %v5636_v39 = vsel %vm5635_vm0, 1, %v13741_v6 }
 0x71c   : > { %v5525_v26 = vclz %v5524_v37  ;;  %v5638_v59 = vadd.s32 %v5636_v39, %v5630_v62  ;;  %vm5639_vm3 = vc.u32 %v5637_v52, %v5633_v15  ;;  %vm6030_vm15 = vcmp.lt.s32.totalorder %v6029_v45, 2  ;;  %v13942_v39 = vld [vmem:[#allocation77_spill] sm:$0xff] }
 0x71d   : > { %v6017_v43 = vmul.f32 %v6016_v48, %v6012_v27  ;;  %v6024_v55 = vmul.f32 %v6023_v10, %v6012_v27  ;;  %v5611_v46 = vsel %vm5609_vm4, %v5599_v56, 2102212464  ;;  %v5640_v20 = vsel %vm5639_vm3, 1, %v13741_v6 }
 0x71e   : > { %vm6027_vm8 = vweird.f32 %v13922_v17  ;;  %vm6034_vm2 = vcmp.eq.s32.totalorder %v6029_v45, 2  ;;  %v5513_v53 = vadd.s32 %v12852_v57, %v12838_v61  ;;  %v7235_v63 = vadd.s32 4294967294, %v5525_v26 }
 0x71f   : > { %v5590_v54 = vshrl.u32 %v13643_v25, %v13923_v9  ;;  %v6018_v22 = vadd.f32 1.0, %v6017_v43  ;;  %v6025_v19 = vadd.f32 1.0, %v6024_v55  ;;  %v5642_v3 = vadd.s32 %v5640_v20, %v5638_v59 }
 0x720   : > { %v5650_v27 = vmul.u32 %v5648_v14, %v5623_v34  ;;  %vm7236_vm5 = vcmp.lt.s32.totalorder %v7235_v63, 0  ;;  %v5612_v36 = vsel %vm5608_vm9, %v12877_v31, %v5611_v46  ;;  %v5651_v7 = vmul.u32 %v5647_v23, %v12921_v21 }
 0x721   : > { %v5610_v56 = vsel %vm5606_vm11, %v5590_v54, %v12879_v58  ;;  %v6026_v61 = vmul.f32 %v6025_v19, %v12900_v11  ;;  %v6035_v57 = vxor.u32 2147483648, %v6018_v22  ;;  %v5528_v51 = vsel %vm7236_vm5, 0, %v7235_v63 }
 0x722   : > { %v5632_v9 = vshrl.u32 %v5628_v0, 16  ;;  %v5529_v50 = vsub.s32 32, %v5528_v51  ;;  %v5533_v40 = vsub.s32 4294967266, %v5528_v51  ;;  %v5649_v16 = vmul.u32 %v5647_v23, %v5623_v34 }
 0x723   : > { %v5653_v44 = vshll.u32 %v5650_v27, 16  ;;  %v6032_v62 = vxor.u32 2147483648, %v6026_v61  ;;  %v5530_v15 = vshll.u32 %v12937_v33, %v5528_v51  ;;  %v5652_v58 = vmul.u32 %v5648_v14, %v12921_v21 }
 0x724   : > { %v5643_v52 = vadd.s32 %v5642_v3, %v5632_v9  ;;  %v6036_v48 = vsel %vm6034_vm2, %v6035_v57, %v6026_v61  ;;  %vm5421_vm4 = vcmp.lt.s32.totalorder %v13926_v42, 0  ;;  %v5531_v31 = vshrl.u32 %v5513_v53, %v5529_v50  ;;  %v13943_v57 = vld [vmem:[#allocation76_spill] sm:$0xff] }
 0x725   : > { %v5534_v10 = vadd.s32 127, %v5533_v40  ;;  %v5655_v11 = vshll.u32 %v5651_v7, 16  ;;  %v6033_v37 = vsel %vm6031_vm7, %v6018_v22, %v6032_v62  ;;  %vm5657_vm13 = vc.u32 %v5649_v16, %v5653_v44 }
 0x726   : > { %v5659_v0 = vadd.s32 %v5653_v44, %v5649_v16  ;;  %v5109_v34 = vand.u32 2147483647, %v13942_v39  ;;  %v6037_v26 = vsel %vm6030_vm15, %v6033_v37, %v6036_v48  ;;  %v5532_v59 = vor.u32 %v5531_v31, %v5530_v15 }
 0x727   : > { %v5535_v33 = vshll.u32 %v5534_v10, 23  ;;  %v5658_v23 = vsel %vm5657_vm13, 1, %v13741_v6  ;;  %v6038_v21 = vsel %vm6027_vm8, nan, %v6037_v26  ;;  %v5634_v14 = vshrl.u32 %v12933_v49, 16  ;;  %v13946_v10 = vld [vmem:[#allocation58_spill] sm:$0xff] }
 0x728   : > { %v5660_v43 = vadd.s32 %v5658_v23, %v5652_v58  ;;  %vm5661_vm12 = vc.u32 %v5659_v0, %v5655_v11  ;;  %6708 = vmatpush.msrb.mxu3 %v6038_v21  ;;  %v5543_v46 = vsub.s32 4, %v12917_v60  ;;  %v5613_v20 = vsel %vm5607_vm10, %v5610_v56, %v5612_v36  ;;  %v13945_v58 = vld [vmem:[#allocation62_spill] sm:$0xff] }
 0x729   : > { %v5536_v55 = vor.u32 4788187, %v5535_v33  ;;  %v5662_v45 = vsel %vm5661_vm12, 1, %v13741_v6  ;;  %v12976_v53 = vadd.s32 %v5643_v52, %v5634_v14  ;;  %v5654_v63 = vshrl.u32 %v5650_v27, 16 }
 0x72a   : > { %v5656_v54 = vshrl.u32 %v5651_v7, 16  ;;  %v5664_v22 = vadd.s32 %v5662_v45, %v5660_v43  ;;  %v5539_v19 = vcvt.s32.f32 %v5532_v59  ;;  %v12978_v3 = vadd.s32 %v5659_v0, %v5655_v11  ;;  %v13947_v11 = vld [vmem:[#allocation70_spill] sm:$0xff] }
 0x72b   : > { %v5537_v17 = vand.u32 2147483647, %v5536_v55  ;;  %v5116_v49 = vand.u32 8388607, %v5109_v34  ;;  %v5127_v51 = vshrl.u32 %v13910_v1, %v13943_v57  ;;  %v5129_v56 = vshll.u32 %v13910_v1, %v13944_v4  ;;  %v13950_v55 = vld [vmem:[#allocation20_spill] sm:$0xff] }
 0x72c   : > { %v5665_v61 = vadd.s32 %v5664_v22, %v5654_v63  ;;  %v5130_v36 = vshrl.u32 %v13739_v5, %v13943_v57  ;;  %vm5299_vm9 = vcmp.lt.s32.totalorder %v12927_v30, 4  ;;  %v5126_v7 = vshll.u32 %v13643_v25, %v13944_v4 }
 0x72d   : > { %v5540_v27 = vmul.f32 %v5539_v19, %v5537_v17  ;;  %v5132_v9 = vshll.u32 %v13739_v5, %v13944_v4  ;;  %v5133_v50 = vshrl.u32 %v13710_v2, %v13943_v57  ;;  %v5544_v40 = vsel %vm5421_vm4, %v5543_v46, %v12917_v60 }
 0x72e   : > { %v5666_v16 = vadd.s32 %v5665_v61, %v5656_v54  ;;  %vm5669_vm11 = vc.u32 %v12976_v53, %v12978_v3  ;;  %v5131_v44 = vor.u32 %v5130_v36, %v5129_v56  ;;  %v5128_v15 = vor.u32 %v5127_v51, %v5126_v7 }
 0x72f   : > { %v5541_v62 = vxor.u32 2147483648, %v5540_v27  ;;  %v5134_v52 = vor.u32 %v5133_v50, %v5132_v9  ;;  %vm5143_vm6 = vcmp.lt.s32.totalorder %v13945_v58, 3  ;;  %v5117_v31 = vor.u32 8388608, %v5116_v49 }
 0x730   : > { %v5670_v48 = vadd.s32 1, %v5666_v16  ;;  %vm5141_vm10 = vcmp.lt.s32.totalorder %v13945_v58, 1  ;;  %v5155_v37 = vsel %vm5143_vm6, %v13947_v11, %v13946_v10  ;;  %vm13008_vm1 = vcmp.le.f32.partialorder %v5419_v38, 0.7853982 }
 0x731   : > { %v5542_v0 = vsel %vm5421_vm4, %v5541_v62, %v5540_v27  ;;  %v5667_v26 = vmul.u32 %v12894_v18, %v5613_v20  ;;  %v5153_v59 = vsel %vm5141_vm10, %v5131_v44, %v5134_v52  ;;  %v5546_v23 = vsel %vm13008_vm1, 0, %v5544_v40 }
 0x732   : > { %v13020_v33 = vsel %vm13008_vm1, %v13926_v42, %v5542_v0  ;;  %v5671_v38 = vsel %vm5669_vm11, %v5670_v48, %v5666_v16  ;;  %vm5142_vm0 = vcmp.lt.s32.totalorder %v13945_v58, 2  ;;  %v5149_v14 = vsel %vm5141_vm10, %v5128_v15, %v5131_v44 }
 0x733   : > { %v5547_v18 = vmul.f32 %v13020_v33, %v13020_v33  ;;  %v5672_v21 = vadd.s32 %v5671_v38, %v5667_v26  ;;  %v5156_v43 = vsel %vm5142_vm0, %v5153_v59, %v5155_v37  ;;  %v5151_v46 = vsel %vm5143_vm6, %v5134_v52, %v13950_v55 }
 0x734   : > { %v13037_v20 = vshll.u32 %v5117_v31, 8  ;;  %v5160_v45 = vand.u32 65535, %v5156_v43  ;;  %v5161_v63 = vshrl.u32 %v5156_v43, 16  ;;  %v5563_v17 = vadd.s32 3, %v5546_v23 }
 0x735   : > { %v5548_v54 = vmul.f32 -0.001358992, %v5547_v18  ;;  %v5555_v22 = vmul.f32 -0.00019511016, %v5547_v18  ;;  %v5673_v19 = vadd.s32 536870912, %v5672_v21  ;;  %v5152_v7 = vsel %vm5142_vm0, %v5149_v14, %v5151_v46 }
 0x736   : > { %v13042_v49 = vsel %vm5299_vm9, %v12930_v41, 920167782  ;;  %v13049_v61 = vsel %vm5299_vm9, %v5295_v8, 1326507024  ;;  %v5158_v51 = vand.u32 65535, %v13037_v20  ;;  %v5159_v4 = vshrl.u32 %v13037_v20, 16 }
 0x737   : > { %v5549_v56 = vadd.f32 0.041655596, %v5548_v54  ;;  %v5556_v36 = vadd.f32 0.008332121, %v5555_v22  ;;  %v13053_v27 = vshrl.u32 %v5673_v19, 30  ;;  %v5125_v9 = vshrl.u32 %v13643_v25, %v13943_v57 }
 0x738   : > { %v5146_v35 = vsel %vm5144_vm14, %v5134_v52, 2102212464  ;;  %v5163_v47 = vmul.u32 %v5161_v63, %v5158_v51  ;;  %v13061_v8 = vmul.u32 %v5160_v45, %v5159_v4  ;;  %v5564_v16 = vand.u32 3, %v5563_v17 }
 0x739   : > { %v5550_v50 = vmul.f32 %v5549_v56, %v5547_v18  ;;  %v5557_v40 = vmul.f32 %v5556_v36, %v5547_v18  ;;  %v5675_v62 = vshll.u32 %v13053_v27, 30  ;;  %v5145_v48 = vsel %vm5141_vm10, %v5125_v9, %v5128_v15 }
 0x73a   : > { %v5162_v31 = vmul.u32 %v5160_v45, %v5158_v51  ;;  %v5166_v10 = vshll.u32 %v5163_v47, 16  ;;  %v5183_v11 = vshrl.u32 %v5152_v7, 16  ;;  %v5147_v52 = vsel %vm5143_vm6, %v5131_v44, %v5146_v35 }
 0x73b   : > { %v5551_v37 = vadd.f32 -0.4999988, %v5550_v50  ;;  %v5558_v60 = vadd.f32 -0.16666654, %v5557_v40  ;;  %v13066_v57 = vsub.s32 %v5672_v21, %v5675_v62  ;;  %v5165_v0 = vmul.u32 %v5161_v63, %v5159_v4 }
 0x73c   : > { %v5168_v26 = vshll.u32 %v13061_v8, 16  ;;  %vm5170_vm14 = vc.u32 %v5162_v31, %v5166_v10  ;;  %v5172_v59 = vadd.s32 %v5166_v10, %v5162_v31  ;;  %vm5565_vm7 = vcmp.lt.s32.totalorder %v5564_v16, 2 }
 0x73d   : > { %v5552_v23 = vmul.f32 %v5551_v37, %v5547_v18  ;;  %v5559_v38 = vmul.f32 %v5558_v60, %v5547_v18  ;;  %vm5677_vm3 = vcmp.lt.s32.totalorder %v13066_v57, 0  ;;  %v5678_v15 = vsub.s32 0, %v13066_v57 }
 0x73e   : > { %vm5562_vm15 = vweird.f32 %v13926_v42  ;;  %v5171_v21 = vsel %vm5170_vm14, 1, %v13741_v6  ;;  %vm5174_vm8 = vc.u32 %v5172_v59, %v5168_v26  ;;  %v5182_v14 = vand.u32 65535, %v5152_v7  ;;  %v13951_v26 = vld [vmem:[#allocation67_spill] sm:$0xff] }
 0x73f   : > { %v5185_v43 = vmul.u32 %v5183_v11, %v5158_v51  ;;  %v5553_v44 = vadd.f32 1.0, %v5552_v23  ;;  %v5560_v55 = vadd.f32 1.0, %v5559_v38  ;;  %v5679_v46 = vsel %vm5677_vm3, %v5678_v15, %v13066_v57 }
 0x740   : > { %v5173_v45 = vadd.s32 %v5171_v21, %v5165_v0  ;;  %vm5566_vm2 = vcmp.eq.s32.totalorder %v5564_v16, 0  ;;  %vm5569_vm5 = vcmp.eq.s32.totalorder %v5564_v16, 2  ;;  %vm5576_vm4 = vcmp.lt.s32.totalorder %v13938_v13, 0 }
 0x741   : > { %v5680_v18 = vclz %v5679_v46  ;;  %v5175_v63 = vsel %vm5174_vm8, 1, %v13741_v6  ;;  %v5561_v54 = vmul.f32 %v5560_v55, %v13020_v33  ;;  %v5570_v22 = vxor.u32 2147483648, %v5553_v44 }
 0x742   : > { %v5668_v17 = vadd.s32 %v12978_v3, %v12976_v53  ;;  %v5177_v19 = vadd.s32 %v5175_v63, %v5173_v45  ;;  %v5698_v36 = vsub.s32 4, %v13053_v27  ;;  %v13084_v7 = vsel %vm5142_vm0, %v5145_v48, %v5147_v52 }
 0x743   : > { %v7238_v56 = vadd.s32 4294967294, %v5680_v18  ;;  %v5186_v9 = vmul.u32 %v5182_v14, %v5159_v4  ;;  %v5567_v35 = vxor.u32 2147483648, %v5561_v54  ;;  %v5167_v50 = vshrl.u32 %v5163_v47, 16 }
 0x744   : > { %v5184_v40 = vmul.u32 %v5182_v14, %v5158_v51  ;;  %v5188_v62 = vshll.u32 %v5185_v43, 16  ;;  %v5571_v31 = vsel %vm5569_vm5, %v5570_v22, %v5561_v54  ;;  %v5169_v33 = vshrl.u32 %v13061_v8, 16 }
 0x745   : > { %vm7239_vm13 = vcmp.lt.s32.totalorder %v7238_v56, 0  ;;  %v5187_v10 = vmul.u32 %v5183_v11, %v5159_v4  ;;  %v5568_v53 = vsel %vm5566_vm2, %v5553_v44, %v5567_v35  ;;  %v5178_v37 = vadd.s32 %v5177_v19, %v5167_v50 }
 0x746   : > { %v5683_v3 = vsel %vm7239_vm13, 0, %v7238_v56  ;;  %vm5192_vm12 = vc.u32 %v5184_v40, %v5188_v62  ;;  %v5572_v58 = vsel %vm5565_vm7, %v5568_v53, %v5571_v31  ;;  %v5190_v52 = vshll.u32 %v5186_v9, 16 }
 0x747   : > { %v5684_v48 = vsub.s32 32, %v5683_v3  ;;  %v5688_v60 = vsub.s32 4294967266, %v5683_v3  ;;  %v5573_v51 = vsel %vm5562_vm15, nan, %v5572_v58  ;;  %v5193_v47 = vsel %vm5192_vm12, 1, %v13741_v6 }
 0x748   : > { %v5194_v0 = vadd.s32 %v5188_v62, %v5184_v40  ;;  %v5264_v59 = vand.u32 2147483647, %v13951_v26  ;;  %6689 = vmatpush.msrb.mxu2 %v5573_v51  ;;  %v5685_v4 = vshll.u32 %v13066_v57, %v5683_v3  ;;  %v5195_v23 = vadd.s32 %v5193_v47, %v5187_v10 }
 0x749   : > { %v5686_v8 = vshrl.u32 %v5668_v17, %v5684_v48  ;;  %v5689_v11 = vadd.s32 127, %v5688_v60  ;;  %v5699_v16 = vsel %vm5576_vm4, %v5698_v36, %v13053_v27  ;;  %v5189_v38 = vshrl.u32 %v5185_v43, 16 }
 0x74a   : > { %vm5196_vm11 = vc.u32 %v5194_v0, %v5190_v52  ;;  %v5271_v42 = vand.u32 8388607, %v5264_v59  ;;  %vm13102_vm6 = vcmp.le.f32.partialorder %v5574_v29, 0.7853982  ;;  %v13106_v14 = vadd.s32 %v5178_v37, %v5169_v33 }
 0x74b   : > { %v5687_v21 = vor.u32 %v5686_v8, %v5685_v4  ;;  %v5690_v57 = vshll.u32 %v5689_v11, 23  ;;  %v5197_v44 = vsel %vm5196_vm11, 1, %v13741_v6  ;;  %v5191_v55 = vshrl.u32 %v5186_v9, 16 }
 0x74c   : > { %v13109_v46 = vadd.s32 %v5194_v0, %v5190_v52  ;;  %v5199_v27 = vadd.s32 %v5197_v44, %v5195_v23  ;;  %v5281_v43 = vshll.u32 %v13643_v25, %v13936_v24  ;;  %v5272_v18 = vor.u32 8388608, %v5271_v42 }
 0x74d   : > { %v5691_v45 = vor.u32 4788187, %v5690_v57  ;;  %v5282_v29 = vshrl.u32 %v13910_v1, %v13940_v12  ;;  %v5284_v63 = vshll.u32 %v13910_v1, %v13936_v24  ;;  %v5285_v22 = vshrl.u32 %v13739_v5, %v13940_v12 }
 0x74e   : > { %v5200_v54 = vadd.s32 %v5199_v27, %v5189_v38  ;;  %v5287_v17 = vshll.u32 %v13739_v5, %v13936_v24  ;;  %v5288_v19 = vshrl.u32 %v13710_v2, %v13940_v12  ;;  %v5694_v36 = vcvt.s32.f32 %v5687_v21 }
 0x74f   : > { %v5692_v56 = vand.u32 2147483647, %v5691_v45  ;;  %vm5204_vm10 = vc.u32 %v13106_v14, %v13109_v46  ;;  %v13125_v9 = vor.u32 %v5282_v29, %v5281_v43  ;;  %v13127_v50 = vor.u32 %v5285_v22, %v5284_v63 }
 0x750   : > { %v5201_v35 = vadd.s32 %v5200_v54, %v5191_v55  ;;  %v13129_v40 = vor.u32 %v5288_v19, %v5287_v17  ;;  %vm5298_vm1 = vcmp.lt.s32.totalorder %v12927_v30, 3  ;;  %vm5296_vm0 = vcmp.lt.s32.totalorder %v12927_v30, 1 }
 0x751   : > { %v5695_v62 = vmul.f32 %v5694_v36, %v5692_v56  ;;  %v5310_v24 = vsel %vm5298_vm1, %v12930_v41, %v13049_v61  ;;  %v13137_v31 = vshll.u32 %v5272_v18, 8  ;;  %vm5297_vm14 = vcmp.lt.s32.totalorder %v12927_v30, 2 }
 0x752   : > { %v5205_v33 = vadd.s32 1, %v5201_v35  ;;  %v5304_v10 = vsel %vm5296_vm0, %v13125_v9, %v13127_v50  ;;  %v5306_v53 = vsel %vm5298_vm1, %v13129_v40, %v13042_v49  ;;  %v5202_v37 = vmul.u32 %v13037_v20, %v13084_v7 }
 0x753   : > { %v5696_v3 = vxor.u32 2147483648, %v5695_v62  ;;  %v5307_v41 = vsel %vm5297_vm14, %v5304_v10, %v5306_v53  ;;  %v5308_v61 = vsel %vm5296_vm0, %v13127_v50, %v13129_v40  ;;  %v5701_v58 = vsel %vm13102_vm6, 0, %v5699_v16 }
 0x754   : > { %v5206_v48 = vsel %vm5204_vm10, %v5205_v33, %v5201_v35  ;;  %v5311_v49 = vsel %vm5297_vm14, %v5308_v61, %v5310_v24  ;;  %v5313_v60 = vand.u32 65535, %v13137_v31  ;;  %v5314_v47 = vshrl.u32 %v13137_v31, 16 }
 0x755   : > { %v5697_v20 = vsel %vm5576_vm4, %v5696_v3, %v5695_v62  ;;  %v5207_v7 = vadd.s32 %v5206_v48, %v5202_v37  ;;  %v5315_v52 = vand.u32 65535, %v5311_v49  ;;  %v5316_v0 = vshrl.u32 %v5311_v49, 16 }
 0x756   : > { %v5700_v51 = vsel %vm13102_vm6, %v13938_v13, %v5697_v20  ;;  %v5338_v4 = vshrl.u32 %v5307_v41, 16  ;;  %v5718_v11 = vadd.s32 3, %v5701_v58  ;;  %v5337_v54 = vand.u32 65535, %v5307_v41 }
 0x757   : > { %v5702_v8 = vmul.f32 %v5700_v51, %v5700_v51  ;;  %v5208_v23 = vadd.s32 536870912, %v5207_v7  ;;  %v5318_v16 = vmul.u32 %v5316_v0, %v5313_v60  ;;  %v13170_v38 = vmul.u32 %v5315_v52, %v5314_v47 }
 0x758   : > { %v5317_v44 = vmul.u32 %v5315_v52, %v5313_v60  ;;  %v13174_v27 = vmul.u32 %v5338_v4, %v5313_v60  ;;  %v13176_v45 = vand.u32 3, %v5718_v11  ;;  %v5320_v56 = vmul.u32 %v5316_v0, %v5314_v47 }
 0x759   : > { %v5703_v42 = vmul.f32 -0.001358992, %v5702_v8  ;;  %v5710_v21 = vmul.f32 -0.00019511016, %v5702_v8  ;;  %v13172_v57 = vshrl.u32 %v5208_v23, 30  ;;  %v5321_v55 = vshll.u32 %v5318_v16, 16 }
 0x75a   : > { %v5323_v29 = vshll.u32 %v13170_v38, 16  ;;  %v5343_v35 = vshll.u32 %v13174_v27, 16  ;;  %vm5721_vm8 = vcmp.eq.s32.totalorder %v13176_v45, 0  ;;  %vm5724_vm2 = vcmp.eq.s32.totalorder %v13176_v45, 2 }
 0x75b   : > { %v5704_v15 = vadd.f32 0.041655596, %v5703_v42  ;;  %v5711_v43 = vadd.f32 0.008332121, %v5710_v21  ;;  %v5210_v18 = vshll.u32 %v13172_v57, 30  ;;  %vm5325_vm7 = vc.u32 %v5317_v44, %v5321_v55 }
 0x75c   : > { %v5327_v63 = vadd.s32 %v5321_v55, %v5317_v44  ;;  %v5326_v36 = vsel %vm5325_vm7, 1, %v13741_v6  ;;  %v5339_v3 = vmul.u32 %v5337_v54, %v5313_v60  ;;  %v5341_v37 = vmul.u32 %v5337_v54, %v5314_v47 }
 0x75d   : > { %v5705_v22 = vmul.f32 %v5704_v15, %v5702_v8  ;;  %v5712_v17 = vmul.f32 %v5711_v43, %v5702_v8  ;;  %v5211_v19 = vsub.s32 %v5207_v7, %v5210_v18  ;;  %v5328_v10 = vadd.s32 %v5326_v36, %v5320_v56 }
 0x75e   : > { %vm5329_vm3 = vc.u32 %v5327_v63, %v5323_v29  ;;  %vm5720_vm5 = vcmp.lt.s32.totalorder %v13176_v45, 2  ;;  %v5322_v48 = vshrl.u32 %v5318_v16, 16  ;;  %vm5717_vm4 = vweird.f32 %v13938_v13 }
 0x75f   : > { %v5706_v62 = vadd.f32 -0.4999988, %v5705_v22  ;;  %v5713_v24 = vadd.f32 -0.16666654, %v5712_v17  ;;  %vm5212_vm15 = vcmp.lt.s32.totalorder %v5211_v19, 0  ;;  %v5213_v33 = vsub.s32 0, %v5211_v19 }
 0x760   : > { %v5330_v53 = vsel %vm5329_vm3, 1, %v13741_v6  ;;  %v5342_v7 = vmul.u32 %v5338_v4, %v5314_v47  ;;  %vm5347_vm13 = vc.u32 %v5339_v3, %v5343_v35  ;;  %v5349_v23 = vadd.s32 %v5343_v35, %v5339_v3 }
 0x761   : > { %v5707_v41 = vmul.f32 %v5706_v62, %v5702_v8  ;;  %v5714_v61 = vmul.f32 %v5713_v24, %v5702_v8  ;;  %v5214_v58 = vsel %vm5212_vm15, %v5213_v33, %v5211_v19  ;;  %v5332_v20 = vadd.s32 %v5330_v53, %v5328_v10 }
 0x762   : > { %v5215_v49 = vclz %v5214_v58  ;;  %v5348_v11 = vsel %vm5347_vm13, 1, %v13741_v6  ;;  %v5280_v60 = vshrl.u32 %v13643_v25, %v13940_v12  ;;  %v5301_v8 = vsel %vm5299_vm9, %v13129_v40, 2102212464 }
 0x763   : > { %v5708_v52 = vadd.f32 1.0, %v5707_v41  ;;  %v5715_v0 = vadd.f32 1.0, %v5714_v61  ;;  %v5345_v16 = vshll.u32 %v5341_v37, 16  ;;  %v5333_v55 = vadd.s32 %v5332_v20, %v5322_v48 }
 0x764   : > { %v7229_v42 = vadd.s32 4294967294, %v5215_v49  ;;  %v5350_v15 = vadd.s32 %v5348_v11, %v5342_v7  ;;  %v5203_v47 = vadd.s32 %v13109_v46, %v13106_v14  ;;  %v5300_v4 = vsel %vm5296_vm0, %v5280_v60, %v13125_v9 }
 0x765   : > { %v5716_v21 = vmul.f32 %v5715_v0, %v5700_v51  ;;  %v5725_v44 = vxor.u32 2147483648, %v5708_v52  ;;  %vm5351_vm11 = vc.u32 %v5349_v23, %v5345_v16  ;;  %v5302_v40 = vsel %vm5298_vm1, %v13127_v50, %v5301_v8 }
 0x766   : > { %vm7230_vm12 = vcmp.lt.s32.totalorder %v7229_v42, 0  ;;  %v5324_v51 = vshrl.u32 %v13170_v38, 16  ;;  %v5344_v63 = vshrl.u32 %v13174_v27, 16  ;;  %v5352_v14 = vsel %vm5351_vm11, 1, %v13741_v6 }
 0x767   : > { %v5722_v43 = vxor.u32 2147483648, %v5716_v21  ;;  %v5218_v12 = vsel %vm7230_vm12, 0, %v7229_v42  ;;  %v5726_v9 = vsel %vm5724_vm2, %v5725_v44, %v5716_v21  ;;  %v5354_v22 = vadd.s32 %v5352_v14, %v5350_v15 }
 0x768   : > { %v5219_v18 = vsub.s32 32, %v5218_v12  ;;  %v5223_v29 = vsub.s32 4294967266, %v5218_v12  ;;  %v5334_v54 = vadd.s32 %v5333_v55, %v5324_v51  ;;  %v5220_v50 = vshll.u32 %v5211_v19, %v5218_v12 }
 0x769   : > { %v5723_v46 = vsel %vm5721_vm8, %v5708_v52, %v5722_v43  ;;  %v5346_v27 = vshrl.u32 %v5341_v37, 16  ;;  %v5355_v35 = vadd.s32 %v5354_v22, %v5344_v63  ;;  %v5353_v33 = vadd.s32 %v5349_v23, %v5345_v16 }
 0x76a   : > { %v5727_v17 = vsel %vm5720_vm5, %v5723_v46, %v5726_v9  ;;  %v5221_v56 = vshrl.u32 %v5203_v47, %v5219_v18  ;;  %v5224_v38 = vadd.s32 127, %v5223_v29  ;;  %v5303_v10 = vsel %vm5297_vm14, %v5300_v4, %v5302_v40 }
 0x76b   : > { %v5728_v36 = vsel %vm5717_vm4, nan, %v5727_v17  ;;  %v5356_v53 = vadd.s32 %v5355_v35, %v5346_v27  ;;  %vm5359_vm9 = vc.u32 %v5334_v54, %v5353_v33  ;;  %v5357_v61 = vmul.u32 %v13137_v31, %v5303_v10 }
 0x76c   : > { %6709 = vmatpush.msrb.mxu3 %v5728_v36  ;;  %v5222_v62 = vor.u32 %v5221_v56, %v5220_v50  ;;  %v5225_v24 = vshll.u32 %v5224_v38, 23  ;;  %vm5111_vm6 = vcmp.lt.s32.totalorder %v13942_v39, 0  ;;  %vm13218_vm10 = vcmp.le.f32.partialorder %v5109_v34, 0.7853982 }
 0x76d   : > { %v5360_v45 = vadd.s32 1, %v5356_v53  ;;  %v5233_v52 = vsub.s32 4, %v13172_v57  ;;  %v5358_v9 = vadd.s32 %v5353_v33, %v5334_v54  ;;  %vm5252_vm15 = vweird.f32 %v13942_v39  ;;  %v6660_v54 = vld [vmem:[%s13470_s7] sm:$0x7] }
 0x76e   : > { %v5226_v3 = vor.u32 4788187, %v5225_v24  ;;  %v5229_v19 = vcvt.s32.f32 %v5222_v62  ;;  %vm13956_vm8 = vcmask 293888   ;;  %vm5266_vm2 = vcmp.lt.s32.totalorder %v13951_v26, 0 }
 0x76f   : > { %v5361_v58 = vsel %vm5359_vm9, %v5360_v45, %v5356_v53  ;;  %v5234_v34 = vsel %vm5111_vm6, %v5233_v52, %v13172_v57  ;;  %vm5265_vm5 = vcmp.le.f32.partialorder %v5264_v59, 0.7853982  ;;  %vm5407_vm11 = vweird.f32 %v13951_v26  ;;  %vm13957_vm9 = vmmov %vm13956_vm8 }
 0x770   : > { %v5227_v41 = vand.u32 2147483647, %v5226_v3  ;;  %v5362_v48 = vadd.s32 %v5361_v58, %v5357_v61  ;;  %v5236_v44 = vsel %vm13218_vm10, 0, %v5234_v34 }
 0x771   : > { %v5253_v40 = vadd.s32 3, %v5236_v44 }
 0x772   : > { %v5230_v13 = vmul.f32 %v5229_v19, %v5227_v41  ;;  %v5363_v49 = vadd.s32 536870912, %v5362_v48 }
 0x773   : > { %v5254_v46 = vand.u32 3, %v5253_v40  ;;  %v13245_v40 = vpop.permute.xlu1 %6663 }
 0x774   : > { %v5231_v37 = vxor.u32 2147483648, %v5230_v13  ;;  %v13222_v7 = vshrl.u32 %v5363_v49, 30 }
 0x775   : > { %vm5256_vm14 = vcmp.eq.s32.totalorder %v5254_v46, 0  ;;  %vm5259_vm7 = vcmp.eq.s32.totalorder %v5254_v46, 2  ;;  %vm5255_vm3 = vcmp.lt.s32.totalorder %v5254_v46, 2 }
 0x776   : > { %v5232_v20 = vsel %vm5111_vm6, %v5231_v37, %v5230_v13  ;;  %v5365_v11 = vshll.u32 %v13222_v7, 30  ;;  %v5388_v13 = vsub.s32 4, %v13222_v7 }
 0x777   : > { %v5235_v31 = vsel %vm13218_vm10, %v13942_v39, %v5232_v20 }
 0x778   : > { %v5237_v0 = vmul.f32 %v5235_v31, %v5235_v31  ;;  %v5366_v60 = vsub.s32 %v5362_v48, %v5365_v11  ;;  %v5389_v20 = vsel %vm5266_vm2, %v5388_v13, %v13222_v7 }
 0x77a   : > { %v5238_v23 = vmul.f32 -0.001358992, %v5237_v0  ;;  %v5245_v42 = vmul.f32 -0.00019511016, %v5237_v0  ;;  %vm5367_vm1 = vcmp.lt.s32.totalorder %v5366_v60, 0  ;;  %v5368_v21 = vsub.s32 0, %v5366_v60 }
 0x77c   : > { %v5239_v8 = vadd.f32 0.041655596, %v5238_v23  ;;  %v5246_v16 = vadd.f32 0.008332121, %v5245_v42  ;;  %v5369_v47 = vsel %vm5367_vm1, %v5368_v21, %v5366_v60 }
 0x77d   : > { %v5370_v4 = vclz %v5369_v47 }
 0x77e   : > { %v5240_v55 = vmul.f32 %v5239_v8, %v5237_v0  ;;  %v5247_v15 = vmul.f32 %v5246_v16, %v5237_v0 }
 0x77f   : > { %v7232_v51 = vadd.s32 4294967294, %v5370_v4 }
 0x780   : > { %v5241_v43 = vadd.f32 -0.4999988, %v5240_v55  ;;  %v5248_v12 = vadd.f32 -0.16666654, %v5247_v15 }
 0x781   : > { %vm7233_vm0 = vcmp.lt.s32.totalorder %v7232_v51, 0 }
 0x782   : > { %v5242_v18 = vmul.f32 %v5241_v43, %v5237_v0  ;;  %v5249_v29 = vmul.f32 %v5248_v12, %v5237_v0  ;;  %v5373_v14 = vsel %vm7233_vm0, 0, %v7232_v51  ;;  %v5391_v0 = vsel %vm5265_vm5, 0, %v5389_v20 }
 0x783   : > { %v5374_v22 = vsub.s32 32, %v5373_v14  ;;  %v5378_v17 = vsub.s32 4294967266, %v5373_v14  ;;  %v5375_v38 = vshll.u32 %v5366_v60, %v5373_v14  ;;  %v5408_v34 = vadd.s32 3, %v5391_v0 }
 0x784   : > { %v5243_v63 = vadd.f32 1.0, %v5242_v18  ;;  %v5250_v57 = vadd.f32 1.0, %v5249_v29 }
 0x785   : > { %v5376_v36 = vshrl.u32 %v5358_v9, %v5374_v22  ;;  %v5379_v27 = vadd.s32 127, %v5378_v17  ;;  %v5409_v44 = vand.u32 3, %v5408_v34 }
 0x786   : > { %v5251_v50 = vmul.f32 %v5250_v57, %v5235_v31  ;;  %v5260_v56 = vxor.u32 2147483648, %v5243_v63 }
 0x787   : > { %v5377_v62 = vor.u32 %v5376_v36, %v5375_v38  ;;  %v5380_v24 = vshll.u32 %v5379_v27, 23  ;;  %vm5411_vm4 = vcmp.eq.s32.totalorder %v5409_v44, 0  ;;  %vm5414_vm13 = vcmp.eq.s32.totalorder %v5409_v44, 2 }
 0x788   : > { %v5257_v35 = vxor.u32 2147483648, %v5251_v50  ;;  %v5261_v53 = vsel %vm5259_vm7, %v5260_v56, %v5251_v50  ;;  %vm5410_vm12 = vcmp.lt.s32.totalorder %v5409_v44, 2 }
 0x789   : > { %v5381_v45 = vor.u32 4788187, %v5380_v24  ;;  %v5384_v19 = vcvt.s32.f32 %v5377_v62 }
 0x78a   : > { %v5258_v10 = vsel %vm5256_vm14, %v5243_v63, %v5257_v35 }
 0x78b   : > { %v5262_v3 = vsel %vm5255_vm3, %v5258_v10, %v5261_v53  ;;  %v5382_v41 = vand.u32 2147483647, %v5381_v45 }
 0x78c   : > { %v5263_v33 = vsel %vm5252_vm15, nan, %v5262_v3 }
 0x78d   : > { %6690 = vmatpush.msrb.mxu2 %v5263_v33  ;;  %v5385_v61 = vmul.f32 %v5384_v19, %v5382_v41 }
 0x78e   : > { %7259 = vmatmul.msk.f32.vlgmr.msrb.gmra.mxu2 %vm13956_vm8, %v6660_v54 }
 0x78f   : > { %v5386_v58 = vxor.u32 2147483648, %v5385_v61 }
 0x791   : > { %v5387_v39 = vsel %vm5266_vm2, %v5386_v58, %v5385_v61 }
 0x792   : > { %v5390_v48 = vsel %vm5265_vm5, %v13951_v26, %v5387_v39 }
 0x793   : > { %v5392_v37 = vmul.f32 %v5390_v48, %v5390_v48 }
 0x795   : > { %v5393_v49 = vmul.f32 -0.001358992, %v5392_v37  ;;  %v5400_v30 = vmul.f32 -0.00019511016, %v5392_v37 }
 0x797   : > { %v5394_v52 = vadd.f32 0.041655596, %v5393_v49  ;;  %v5401_v31 = vadd.f32 0.008332121, %v5400_v30 }
 0x799   : > { %v5395_v11 = vmul.f32 %v5394_v52, %v5392_v37  ;;  %v5402_v23 = vmul.f32 %v5401_v31, %v5392_v37 }
 0x79b   : > { %v5396_v42 = vadd.f32 -0.4999988, %v5395_v11  ;;  %v5403_v60 = vadd.f32 -0.16666654, %v5402_v23 }
 0x79d   : > { %v5397_v8 = vmul.f32 %v5396_v42, %v5392_v37  ;;  %v5404_v59 = vmul.f32 %v5403_v60, %v5392_v37 }
 0x79f   : > { %v5398_v16 = vadd.f32 1.0, %v5397_v8  ;;  %v5405_v21 = vadd.f32 1.0, %v5404_v59 }
 0x7a1   : > { %v5406_v55 = vmul.f32 %v5405_v21, %v5390_v48  ;;  %v5415_v15 = vxor.u32 2147483648, %v5398_v16 }
 0x7a3   : > { %v5412_v47 = vxor.u32 2147483648, %v5406_v55  ;;  %v5416_v4 = vsel %vm5414_vm13, %v5415_v15, %v5406_v55 }
 0x7a5   : > { %v5413_v7 = vsel %vm5411_vm4, %v5398_v16, %v5412_v47 }
 0x7a6   : > { %v5417_v43 = vsel %vm5410_vm12, %v5413_v7, %v5416_v4 }
 0x7a7   : > { %v5418_v12 = vsel %vm5407_vm11, nan, %v5417_v43 }
 0x7a8   : > { %6710 = vmatpush.msrb.mxu3 %v5418_v12 }
 0x7a9   : > { %7261 = vmatmul.msk.f32.vlgmr.msrb.gmra.mxu3 %vm13957_vm9, %v6660_v54 }
 0x811   : > { %v6692_v51 = vpop.f32.mrf.mxu2 }
 0x812   : > { %v13248_v18 = vadd.f32 %v6692_v51, %v13245_v40 }
 0x814   : > { %v6718_v29 = vand.u32 2139095040, %v13248_v18  ;;  %v6715_v14 = vand.u32 2147483647, %v13248_v18 }
 0x816   : > { %v6719_v63 = vshrl.u32 %v6718_v29, 23  ;;  %v6722_v26 = vand.u32 8388607, %v6715_v14 }
 0x818   : > { %v7262_v57 = vadd.s32 4294967169, %v6719_v63  ;;  %v6723_v50 = vor.u32 8388608, %v6722_v26 }
 0x81a   : > { %v6725_v46 = vadd.s32 1, %v7262_v57  ;;  %v13267_v58 = vshll.u32 %v6723_v50, 8 }
 0x81c   : > { %vm6726_vm6 = vcmp.gt.s32.totalorder %v6725_v46, 0  ;;  %v6764_v31 = vand.u32 65535, %v13267_v58  ;;  %v6765_v0 = vshrl.u32 %v13267_v58, 16 }
 0x81d   : > { %v6727_v9 = vsel %vm6726_vm6, %v6725_v46, 0 }
 0x81e   : > { %v6729_v22 = vand.u32 31, %v6727_v9  ;;  %v13254_v56 = vshrl.u32 %v6727_v9, 5 }
 0x820   : > { %v6730_v17 = vsub.s32 32, %v6729_v22  ;;  %v6732_v38 = vshll.u32 %v13643_v25, %v6729_v22  ;;  %v6735_v36 = vshll.u32 %v13910_v1, %v6729_v22  ;;  %v6738_v62 = vshll.u32 %v13739_v5, %v6729_v22 }
 0x821   : > { %v6741_v10 = vshll.u32 %v13710_v2, %v6729_v22  ;;  %v6744_v3 = vshll.u32 %v13708_v32, %v6729_v22  ;;  %vm6747_vm10 = vcmp.lt.s32.totalorder %v13254_v56, 1  ;;  %vm6750_vm1 = vcmp.lt.s32.totalorder %v13254_v56, 4 }
 0x822   : > { %v6733_v27 = vshrl.u32 %v13910_v1, %v6730_v17  ;;  %v6736_v35 = vshrl.u32 %v13739_v5, %v6730_v17  ;;  %v6739_v24 = vshrl.u32 %v13710_v2, %v6730_v17  ;;  %v6742_v53 = vshrl.u32 %v13708_v32, %v6730_v17 }
 0x823   : > { %v6745_v45 = vshrl.u32 %v13904_v28, %v6730_v17  ;;  %vm6749_vm0 = vcmp.lt.s32.totalorder %v13254_v56, 3  ;;  %vm6748_vm14 = vcmp.lt.s32.totalorder %v13254_v56, 2  ;;  %v6731_v22 = vshrl.u32 %v13643_v25, %v6730_v17 }
 0x824   : > { %v6734_v54 = vor.u32 %v6733_v27, %v6732_v38  ;;  %v6737_v33 = vor.u32 %v6736_v35, %v6735_v36  ;;  %v6740_v41 = vor.u32 %v6739_v24, %v6738_v62  ;;  %v6743_v19 = vor.u32 %v6742_v53, %v6741_v10 }
 0x825   : > { %v6746_v61 = vor.u32 %v6745_v45, %v6744_v3 }
 0x826   : > { %v6755_v39 = vsel %vm6747_vm10, %v6734_v54, %v6737_v33  ;;  %v6759_v13 = vsel %vm6747_vm10, %v6737_v33, %v6740_v41  ;;  %v6756_v48 = vsel %vm6750_vm1, %v6743_v19, 920167782  ;;  %v6752_v46 = vsel %vm6750_vm1, %v6740_v41, 2102212464 }
 0x827   : > { %v6760_v37 = vsel %vm6750_vm1, %v6746_v61, 1326507024  ;;  %v6757_v49 = vsel %vm6749_vm0, %v6740_v41, %v6756_v48  ;;  %v6751_v62 = vsel %vm6747_vm10, %v6731_v22, %v6734_v54  ;;  %v6753_v24 = vsel %vm6749_vm0, %v6737_v33, %v6752_v46 }
 0x828   : > { %v6761_v30 = vsel %vm6749_vm0, %v6743_v19, %v6760_v37  ;;  %v6758_v20 = vsel %vm6748_vm14, %v6755_v39, %v6757_v49  ;;  %v6754_v17 = vsel %vm6748_vm14, %v6751_v62, %v6753_v24 }
 0x829   : > { %v6762_v52 = vsel %vm6748_vm14, %v6759_v13, %v6761_v30  ;;  %v6788_v42 = vand.u32 65535, %v6758_v20  ;;  %v6789_v60 = vshrl.u32 %v6758_v20, 16  ;;  %v6808_v54 = vmul.u32 %v13267_v58, %v6754_v17 }
 0x82a   : > { %v6766_v11 = vand.u32 65535, %v6762_v52  ;;  %v6767_v23 = vshrl.u32 %v6762_v52, 16 }
 0x82b   : > { %v6791_v59 = vmul.u32 %v6789_v60, %v6764_v31  ;;  %v6792_v16 = vmul.u32 %v6788_v42, %v6765_v0  ;;  %v6790_v15 = vmul.u32 %v6788_v42, %v6764_v31  ;;  %v6793_v43 = vmul.u32 %v6789_v60, %v6765_v0 }
 0x82c   : > { %v6769_v34 = vmul.u32 %v6767_v23, %v6764_v31  ;;  %v6770_v8 = vmul.u32 %v6766_v11, %v6765_v0  ;;  %v6768_v21 = vmul.u32 %v6766_v11, %v6764_v31  ;;  %v6771_v55 = vmul.u32 %v6767_v23, %v6765_v0  ;;  %v6712_v20 = vpop.f32.mrf.mxu3 }
 0x82d   : > { %v6794_v47 = vshll.u32 %v6791_v59, 16  ;;  %v6796_v51 = vshll.u32 %v6792_v16, 16  ;;  %v6795_v27 = vshrl.u32 %v6791_v59, 16  ;;  %v6797_v3 = vshrl.u32 %v6792_v16, 16 }
 0x82e   : > { %v6772_v44 = vshll.u32 %v6769_v34, 16  ;;  %v6774_v7 = vshll.u32 %v6770_v8, 16  ;;  %v6773_v50 = vshrl.u32 %v6769_v34, 16  ;;  %v6775_v10 = vshrl.u32 %v6770_v8, 16 }
 0x82f   : > { %vm6798_vm3 = vc.u32 %v6790_v15, %v6794_v47  ;;  %v6800_v29 = vadd.s32 %v6794_v47, %v6790_v15  ;;  %v13317_v52 = vadd.f32 %v6712_v20, %v13245_v40 }
 0x830   : > { %vm6776_vm7 = vc.u32 %v6768_v21, %v6772_v44  ;;  %v6778_v4 = vadd.s32 %v6772_v44, %v6768_v21  ;;  %v6799_v57 = vsel %vm6798_vm3, 1, %v13741_v6  ;;  %vm6717_vm3 = vcmp.lt.s32.totalorder %v13248_v18, 0 }
 0x831   : > { %v6777_v12 = vsel %vm6776_vm7, 1, %v13741_v6  ;;  %v6801_v9 = vadd.s32 %v6799_v57, %v6793_v43  ;;  %vm6802_vm8 = vc.u32 %v6800_v29, %v6796_v51  ;;  %v13303_v19 = vadd.s32 %v6800_v29, %v6796_v51 }
 0x832   : > { %v6779_v63 = vadd.s32 %v6777_v12, %v6771_v55  ;;  %vm6780_vm15 = vc.u32 %v6778_v4, %v6774_v7  ;;  %v6803_v36 = vsel %vm6802_vm8, 1, %v13741_v6  ;;  %v6873_v31 = vand.u32 2139095040, %v13317_v52 }
 0x833   : > { %v6781_v26 = vsel %vm6780_vm15, 1, %v13741_v6  ;;  %v6805_v35 = vadd.s32 %v6803_v36, %v6801_v9  ;;  %v6870_v11 = vand.u32 2147483647, %v13317_v52  ;;  %vm13396_vm8 = vcmp.le.f32.partialorder %v6715_v14, 0.7853982 }
 0x834   : > { %v6783_v38 = vadd.s32 %v6781_v26, %v6779_v63  ;;  %v6874_v0 = vshrl.u32 %v6873_v31, 23 }
 0x835   : > { %v6806_v45 = vadd.s32 %v6805_v35, %v6795_v27  ;;  %v6877_v34 = vand.u32 8388607, %v6870_v11 }
 0x836   : > { %v6784_v53 = vadd.s32 %v6783_v38, %v6773_v50  ;;  %v7265_v23 = vadd.s32 4294967169, %v6874_v0 }
 0x837   : > { %v6807_v61 = vadd.s32 %v6806_v45, %v6797_v3  ;;  %v6878_v16 = vor.u32 8388608, %v6877_v34 }
 0x838   : > { %v13301_v41 = vadd.s32 %v6784_v53, %v6775_v10  ;;  %v6880_v60 = vadd.s32 1, %v7265_v23 }
 0x839   : > { %v6811_v39 = vadd.s32 1, %v6807_v61  ;;  %v13346_v26 = vshll.u32 %v6878_v16, 8 }
 0x83a   : > { %vm6810_vm2 = vc.u32 %v13301_v41, %v13303_v19  ;;  %vm6881_vm4 = vcmp.gt.s32.totalorder %v6880_v60, 0 }
 0x83b   : > { %v6812_v13 = vsel %vm6810_vm2, %v6811_v39, %v6807_v61  ;;  %v6882_v59 = vsel %vm6881_vm4, %v6880_v60, 0  ;;  %v6919_v62 = vand.u32 65535, %v13346_v26  ;;  %v6920_v10 = vshrl.u32 %v13346_v26, 16 }
 0x83c   : > { %v6813_v33 = vadd.s32 %v6812_v13, %v6808_v54  ;;  %v6884_v40 = vand.u32 31, %v6882_v59  ;;  %v13327_v44 = vshrl.u32 %v6882_v59, 5  ;;  %vm13407_vm4 = vcmp.le.f32.partialorder %v6870_v11, 0.7853982 }
 0x83e   : > { %v6814_v48 = vadd.s32 536870912, %v6813_v33  ;;  %v13325_v21 = vsub.s32 32, %v6884_v40  ;;  %v6887_v55 = vshll.u32 %v13643_v25, %v6884_v40  ;;  %v6890_v15 = vshll.u32 %v13910_v1, %v6884_v40 }
 0x83f   : > { %v6893_v4 = vshll.u32 %v13739_v5, %v6884_v40  ;;  %v6896_v43 = vshll.u32 %v13710_v2, %v6884_v40  ;;  %v6899_v29 = vshll.u32 %v13708_v32, %v6884_v40  ;;  %vm6902_vm12 = vcmp.lt.s32.totalorder %v13327_v44, 1 }
 0x840   : > { %v13310_v37 = vshrl.u32 %v6814_v48, 30  ;;  %v6888_v47 = vshrl.u32 %v13910_v1, %v13325_v21  ;;  %v6891_v7 = vshrl.u32 %v13739_v5, %v13325_v21  ;;  %v6894_v12 = vshrl.u32 %v13710_v2, %v13325_v21 }
 0x841   : > { %v6897_v51 = vshrl.u32 %v13708_v32, %v13325_v21  ;;  %v6900_v63 = vshrl.u32 %v13904_v28, %v13325_v21  ;;  %vm6905_vm11 = vcmp.lt.s32.totalorder %v13327_v44, 4  ;;  %vm6904_vm9 = vcmp.lt.s32.totalorder %v13327_v44, 3 }
 0x842   : > { %v6816_v49 = vshll.u32 %v13310_v37, 30  ;;  %v6889_v1 = vor.u32 %v6888_v47, %v6887_v55  ;;  %v6892_v46 = vor.u32 %v6891_v7, %v6890_v15  ;;  %v6895_v5 = vor.u32 %v6894_v12, %v6893_v4 }
 0x843   : > { %v6898_v9 = vor.u32 %v6897_v51, %v6896_v43  ;;  %v6901_v22 = vor.u32 %v6900_v63, %v6899_v29  ;;  %vm6903_vm6 = vcmp.lt.s32.totalorder %v13327_v44, 2  ;;  %v6809_v48 = vadd.s32 %v13303_v19, %v13301_v41 }
 0x844   : > { %v13313_v30 = vsub.s32 %v6813_v33, %v6816_v49  ;;  %v6910_v2 = vsel %vm6902_vm12, %v6889_v1, %v6892_v46  ;;  %v6914_v50 = vsel %vm6902_vm12, %v6892_v46, %v6895_v5  ;;  %v6907_v41 = vsel %vm6905_vm11, %v6895_v5, 2102212464 }
 0x845   : > { %v6911_v28 = vsel %vm6905_vm11, %v6898_v9, 920167782  ;;  %v6915_v36 = vsel %vm6905_vm11, %v6901_v22, 1326507024  ;;  %v6886_v55 = vshrl.u32 %v13643_v25, %v13325_v21  ;;  %v6908_v29 = vsel %vm6904_vm9, %v6892_v46, %v6907_v41 }
 0x846   : > { %v6819_v56 = vsub.s32 0, %v13313_v30  ;;  %vm6818_vm5 = vcmp.lt.s32.totalorder %v13313_v30, 0  ;;  %v6912_v38 = vsel %vm6904_vm9, %v6895_v5, %v6911_v28  ;;  %v6916_v35 = vsel %vm6904_vm9, %v6898_v9, %v6915_v36 }
 0x847   : > { %v6913_v27 = vsel %vm6903_vm6, %v6910_v2, %v6912_v38  ;;  %v6917_v24 = vsel %vm6903_vm6, %v6914_v50, %v6916_v35  ;;  %v6906_v51 = vsel %vm6902_vm12, %v6886_v55, %v6889_v1 }
 0x848   : > { %v6820_v58 = vsel %vm6818_vm5, %v6819_v56, %v13313_v30  ;;  %v6943_v53 = vand.u32 65535, %v6913_v27  ;;  %v6944_v3 = vshrl.u32 %v6913_v27, 16  ;;  %v6921_v17 = vand.u32 65535, %v6917_v24 }
 0x849   : > { %v6821_v42 = vclz %v6820_v58  ;;  %v6922_v61 = vshrl.u32 %v6917_v24, 16  ;;  %vm6872_vm5 = vcmp.lt.s32.totalorder %v13317_v52, 0 }
 0x84a   : > { %v6946_v39 = vmul.u32 %v6944_v3, %v6919_v62  ;;  %v6947_v54 = vmul.u32 %v6943_v53, %v6920_v10  ;;  %v6925_v33 = vmul.u32 %v6921_v17, %v6920_v10  ;;  %v6945_v20 = vmul.u32 %v6943_v53, %v6919_v62 }
 0x84b   : > { %v7263_v8 = vadd.s32 4294967294, %v6821_v42  ;;  %v6924_v13 = vmul.u32 %v6922_v61, %v6919_v62  ;;  %v6923_v58 = vmul.u32 %v6921_v17, %v6919_v62  ;;  %v6948_v23 = vmul.u32 %v6944_v3, %v6920_v10 }
 0x84c   : > { %v6949_v56 = vshll.u32 %v6946_v39, 16  ;;  %v6926_v42 = vmul.u32 %v6922_v61, %v6920_v10  ;;  %v6951_v60 = vshll.u32 %v6947_v54, 16  ;;  %v6950_v43 = vshrl.u32 %v6946_v39, 16 }
 0x84d   : > { %vm7264_vm13 = vcmp.lt.s32.totalorder %v7263_v8, 0  ;;  %v6927_v0 = vshll.u32 %v6924_v13, 16  ;;  %v6928_v63 = vshrl.u32 %v6924_v13, 16  ;;  %v6952_v9 = vshrl.u32 %v6947_v54, 16 }
 0x84e   : > { %v13344_v57 = vsel %vm7264_vm13, 0, %v7263_v8  ;;  %vm6953_vm10 = vc.u32 %v6945_v20, %v6949_v56  ;;  %v6955_v34 = vadd.s32 %v6949_v56, %v6945_v20  ;;  %v6929_v8 = vshll.u32 %v6925_v33, 16 }
 0x84f   : > { %v6829_v32 = vsub.s32 4294967266, %v13344_v57  ;;  %v6825_v49 = vsub.s32 32, %v13344_v57  ;;  %vm6931_vm1 = vc.u32 %v6923_v58, %v6927_v0  ;;  %v6933_v59 = vadd.s32 %v6927_v0, %v6923_v58 }
 0x850   : > { %v6954_v40 = vsel %vm6953_vm10, 1, %v13741_v6  ;;  %v6932_v19 = vsel %vm6931_vm1, 1, %v13741_v6  ;;  %vm6957_vm0 = vc.u32 %v6955_v34, %v6951_v60  ;;  %v6826_v25 = vshll.u32 %v13313_v30, %v13344_v57 }
 0x851   : > { %v6830_v45 = vadd.s32 127, %v6829_v32  ;;  %v6956_v16 = vadd.s32 %v6954_v40, %v6948_v23  ;;  %v6934_v15 = vadd.s32 %v6932_v19, %v6926_v42  ;;  %vm6935_vm14 = vc.u32 %v6933_v59, %v6929_v8 }
 0x852   : > { %v6958_v47 = vsel %vm6957_vm0, 1, %v13741_v6  ;;  %v6827_v7 = vshrl.u32 %v6809_v48, %v6825_v49  ;;  %v6936_v4 = vsel %vm6935_vm14, 1, %v13741_v6  ;;  %v6930_v2 = vshrl.u32 %v6925_v33, 16 }
 0x853   : > { %v6831_v31 = vshll.u32 %v6830_v45, 23  ;;  %v6960_v12 = vadd.s32 %v6958_v47, %v6956_v16  ;;  %v6938_v5 = vadd.s32 %v6936_v4, %v6934_v15  ;;  %v6909_v6 = vsel %vm6903_vm6, %v6906_v51, %v6908_v29 }
 0x854   : > { %v6828_v28 = vor.u32 %v6827_v7, %v6826_v25  ;;  %v6959_v1 = vadd.s32 %v6955_v34, %v6951_v60  ;;  %v6963_v46 = vmul.u32 %v13346_v26, %v6909_v6  ;;  %v6839_v47 = vsub.s32 4, %v13310_v37 }
 0x855   : > { %v6832_v21 = vor.u32 4788187, %v6831_v31  ;;  %v6961_v22 = vadd.s32 %v6960_v12, %v6950_v43  ;;  %v6939_v32 = vadd.s32 %v6938_v5, %v6928_v63  ;;  %vm7013_vm1 = vweird.f32 %v13317_v52 }
 0x856   : > { %v6835_v35 = vcvt.s32.f32 %v6828_v28  ;;  %v6840_v5 = vsel %vm6717_vm3, %v6839_v47, %v13310_v37  ;;  %vm6858_vm0 = vweird.f32 %v13248_v18  ;;  %vm13962_vm14 = vcmask 1043456  }
 0x857   : > { %v6962_v50 = vadd.s32 %v6961_v22, %v6952_v9  ;;  %v6940_v38 = vadd.s32 %v6939_v32, %v6930_v2  ;;  %v6833_v36 = vand.u32 2147483647, %v6832_v21  ;;  %v6842_v32 = vsel %vm13396_vm8, 0, %v6840_v5 }
 0x858   : > { %v6859_v37 = vadd.s32 3, %v6842_v32 }
 0x859   : > { %v6966_v27 = vadd.s32 1, %v6962_v50  ;;  %vm6965_vm7 = vc.u32 %v6940_v38, %v6959_v1  ;;  %v6836_v57 = vmul.f32 %v6835_v35, %v6833_v36  ;;  %v6964_v20 = vadd.s32 %v6959_v1, %v6940_v38 }
 0x85b   : > { %v6967_v62 = vsel %vm6965_vm7, %v6966_v27, %v6962_v50  ;;  %v6837_v53 = vxor.u32 2147483648, %v6836_v57 }
 0x85c   : > { %v6968_v30 = vadd.s32 %v6967_v62, %v6963_v46 }
 0x85d   : > { %v6838_v45 = vsel %vm6717_vm3, %v6837_v53, %v6836_v57 }
 0x85e   : > { %v6969_v24 = vadd.s32 536870912, %v6968_v30  ;;  %v6841_v61 = vsel %vm13396_vm8, %v13248_v18, %v6838_v45 }
 0x85f   : > { %v6843_v13 = vmul.f32 %v6841_v61, %v6841_v61 }
 0x860   : > { %v6970_v10 = vshrl.u32 %v6969_v24, 30  ;;  %v6860_v24 = vand.u32 3, %v6859_v37 }
 0x861   : > { %v6851_v49 = vmul.f32 -0.00019511016, %v6843_v13  ;;  %v6844_v8 = vmul.f32 -0.001358992, %v6843_v13 }
 0x862   : > { %v6971_v3 = vshll.u32 %v6970_v10, 30  ;;  %v6994_v12 = vsub.s32 4, %v6970_v10  ;;  %vm6862_vm13 = vcmp.eq.s32.totalorder %v6860_v24, 0  ;;  %vm6861_vm12 = vcmp.lt.s32.totalorder %v6860_v24, 2 }
 0x863   : > { %v6852_v23 = vadd.f32 0.008332121, %v6851_v49  ;;  %v6845_v16 = vadd.f32 0.041655596, %v6844_v8  ;;  %vm6865_vm11 = vcmp.eq.s32.totalorder %v6860_v24, 2 }
 0x864   : > { %v6972_v44 = vsub.s32 %v6968_v30, %v6971_v3  ;;  %v6995_v11 = vsel %vm6872_vm5, %v6994_v12, %v6970_v10 }
 0x865   : > { %v6853_v59 = vmul.f32 %v6852_v23, %v6843_v13  ;;  %v6846_v43 = vmul.f32 %v6845_v16, %v6843_v13  ;;  %v6997_v6 = vsel %vm13407_vm4, 0, %v6995_v11 }
 0x866   : > { %vm6973_vm15 = vcmp.lt.s32.totalorder %v6972_v44, 0  ;;  %v6974_v17 = vsub.s32 0, %v6972_v44  ;;  %v7014_v35 = vadd.s32 3, %v6997_v6 }
 0x867   : > { %v6854_v55 = vadd.f32 -0.16666654, %v6853_v59  ;;  %v6847_v21 = vadd.f32 -0.4999988, %v6846_v43 }
 0x868   : > { %v6975_v39 = vsel %vm6973_vm15, %v6974_v17, %v6972_v44 }
 0x869   : > { %v6976_v54 = vclz %v6975_v39  ;;  %v6855_v29 = vmul.f32 %v6854_v55, %v6843_v13  ;;  %v6848_v38 = vmul.f32 %v6847_v21, %v6843_v13 }
 0x86b   : > { %v7266_v33 = vadd.s32 4294967294, %v6976_v54  ;;  %v6856_v22 = vadd.f32 1.0, %v6855_v29  ;;  %v6849_v30 = vadd.f32 1.0, %v6848_v38 }
 0x86d   : > { %vm7267_vm2 = vcmp.lt.s32.totalorder %v7266_v33, 0  ;;  %v6857_v36 = vmul.f32 %v6856_v22, %v6841_v61  ;;  %v6866_v17 = vxor.u32 2147483648, %v6849_v30 }
 0x86e   : > { %v6979_v48 = vsel %vm7267_vm2, 0, %v7266_v33 }
 0x86f   : > { %v6980_v56 = vsub.s32 32, %v6979_v48  ;;  %v6984_v31 = vsub.s32 4294967266, %v6979_v48  ;;  %v6981_v58 = vshll.u32 %v6972_v44, %v6979_v48  ;;  %v6863_v53 = vxor.u32 2147483648, %v6857_v36 }
 0x870   : > { %v7015_v44 = vand.u32 3, %v7014_v35  ;;  %v6867_v54 = vsel %vm6865_vm11, %v6866_v17, %v6857_v36 }
 0x871   : > { %v6982_v0 = vshrl.u32 %v6964_v20, %v6980_v56  ;;  %v6985_v14 = vadd.s32 127, %v6984_v31  ;;  %v6864_v39 = vsel %vm6862_vm13, %v6849_v30, %v6863_v53 }
 0x872   : > { %vm7017_vm9 = vcmp.eq.s32.totalorder %v7015_v44, 0  ;;  %vm7020_vm6 = vcmp.eq.s32.totalorder %v7015_v44, 2  ;;  %vm7016_vm10 = vcmp.lt.s32.totalorder %v7015_v44, 2  ;;  %v6868_v48 = vsel %vm6861_vm12, %v6864_v39, %v6867_v54 }
 0x873   : > { %v6983_v42 = vor.u32 %v6982_v0, %v6981_v58  ;;  %v6986_v60 = vshll.u32 %v6985_v14, 23  ;;  %v6869_v31 = vsel %vm6858_vm0, nan, %v6868_v48 }
 0x875   : > { %v6987_v34 = vor.u32 4788187, %v6986_v60  ;;  %v6990_v41 = vcvt.s32.f32 %v6983_v42 }
 0x877   : > { %v6988_v40 = vand.u32 2147483647, %v6987_v34 }
 0x879   : > { %v6991_v19 = vmul.f32 %v6990_v41, %v6988_v40 }
 0x87b   : > { %v6992_v15 = vxor.u32 2147483648, %v6991_v19 }
 0x87d   : > { %v6993_v4 = vsel %vm6872_vm5, %v6992_v15, %v6991_v19 }
 0x87e   : > { %v6996_v51 = vsel %vm13407_vm4, %v13317_v52, %v6993_v4 }
 0x87f   : > { %v6998_v63 = vmul.f32 %v6996_v51, %v6996_v51 }
 0x881   : > { %v7006_v25 = vmul.f32 -0.00019511016, %v6998_v63  ;;  %v6999_v9 = vmul.f32 -0.001358992, %v6998_v63 }
 0x883   : > { %v7007_v2 = vadd.f32 0.008332121, %v7006_v25  ;;  %v7000_v28 = vadd.f32 0.041655596, %v6999_v9 }
 0x885   : > { %v7008_v50 = vmul.f32 %v7007_v2, %v6998_v63  ;;  %v7001_v1 = vmul.f32 %v7000_v28, %v6998_v63 }
 0x887   : > { %v7009_v27 = vadd.f32 -0.16666654, %v7008_v50  ;;  %v7002_v46 = vadd.f32 -0.4999988, %v7001_v1 }
 0x889   : > { %v7010_v62 = vmul.f32 %v7009_v27, %v6998_v63  ;;  %v7003_v57 = vmul.f32 %v7002_v46, %v6998_v63 }
 0x88b   : > { %v7011_v10 = vadd.f32 1.0, %v7010_v62  ;;  %v7004_v3 = vadd.f32 1.0, %v7003_v57 }
 0x88d   : > { %v7012_v45 = vmul.f32 %v7011_v10, %v6996_v51  ;;  %v7021_v26 = vxor.u32 2147483648, %v7004_v3 }
 0x88f   : > { %v7018_v61 = vxor.u32 2147483648, %v7012_v45  ;;  %v7022_v33 = vsel %vm7020_vm6, %v7021_v26, %v7012_v45 }
 0x891   : > { %v7019_v13 = vsel %vm7017_vm9, %v7004_v3, %v7018_v61 }
 0x892   : > { %v7023_v49 = vsel %vm7016_vm10, %v7019_v13, %v7022_v33 }
 0x893   : > { %v7024_v20 = vsel %vm7013_vm1, nan, %v7023_v49 }
 0x894   : > { %v7027_v56 = vrot.slane %v7024_v20, 4 }
 0x896   : > { %v7028_v58 = vsel %vm13962_vm14, %v6869_v31, %v7027_v56 }
 0x897   : > { %7030 = vst [vmem:[%s326_s13] sm:$0x77] %v7028_v58 }
 0x898   : > { %7356 = shalt.err (!%p7353_p3)
}
 0x899   : > { %7274 = dma.vmem_to_hbm [thread:$0]  (%p7489_p5), %s7046_s28, 128, %s7048_s29, %s7032_s14  }
 0x89a PF: > { %p7280_p4 = scmp.ge.s32.totalorder %s7391_s12, 2  ;;  %s7059_s22 = sand.u32 1, %s7379_s30  }
 0x89b   : > { %s7060_s27 = scalar_lea.sflag [#allocation3], %s7059_s22 }
 0x89c   : > { %p7277_p7 = pnand %p7280_p4, %p7493_p6 }
 0x89e   : > { %p7278_p8 = pneg %p7277_p7 }
 0x8a0   : > { %7374 = dma.done.wait (%p7278_p8), %s7060_s27, 128  }
 0x8a1   : > { %7376 = vsyncadd (%p7278_p8), %s7060_s27, 4294967168  ;;  %p19_p9 = scmp.ge.s32.totalorder %s7476_s15, 4   ;;  %s13963_s30 = smov %s7383_s10 }
 0x8a2   : > { %s13964_s10 = smov %s7387_s11  ;;  %s13965_s11 = smov %s7487_s18 }
 0x8a3   : > { %s13966_s12 = smov %s7476_s15  ;;  %21 = sbr.rel (!%p19_p9) target bundleno = 3 (0x3), region = 91 }
 0x8a8   :  { %7066 = vsyncpa [#allocation3], 1 }
 0x8a9   :  { %7068 = vsyncpa [#allocation3 + $0x1], 1 }

</bundles_post_ra>
